<compile_context>
chip_gen: v6e
topology: v6e:2x2x1
jax: 0.10.0
libtpu: 0.0.40
codegen_flags: <defaults>
</compile_context>

<pallas_src>
import functools
import numpy as np

import jax
import jax.numpy as jnp
from jax import lax
from jax.experimental import pallas as pl
from jax.experimental.pallas import tpu as pltpu


_PADL = 8  # sublane-aligned left offset of the interior inside the padded VMEM slabs


# ----------------------------------------------------------------------------
# Fused Pallas kernel (one batch element per grid step)
# ----------------------------------------------------------------------------

def _fused_cnn_kernel(x_ref, w1_ref, s1_ref, t1_ref, w2_ref, b2_ref,
                      w3_ref, b3_ref, wl_ref, bl_ref, o_ref,
                      pad2_ref, pad3_ref, *, H, W):
    f32, bf16 = jnp.float32, jnp.bfloat16
    H2, W2 = H // 2, W // 2
    H3, W3 = H2 // 2, W2 // 2
    C1, C2, C3 = 64, 128, 256

    # ---- Layer 1: Conv(1->64, 3x3, pad 1) + folded BatchNorm + ReLU (VPU path) ----
    # x_ref is the zero-padded (H+2, W+2, 1) input slab for this batch element.
    acc1 = jnp.zeros((H * W, C1), dtype=f32)
    for t, (ky, kx) in enumerate([(a, b) for a in range(3) for b in range(3)]):
        patch = x_ref[ky:ky + H, kx:kx + W, :].reshape(H * W, 1)      # (HW, 1)
        acc1 = acc1 + patch * w1_ref[t:t + 1, :]                       # (HW, 64)
    y1 = jnp.maximum(acc1 * s1_ref[...] + t1_ref[...], 0.0)           # (HW, 64) f32

    # ---- Layer 2: Conv(64->128) + MaxPool(2) + ReLU  (single im2col bf16 matmul) ----
    pad2_ref[...] = jnp.zeros_like(pad2_ref)
    pad2_ref[1:H + 1, _PADL:_PADL + W, :] = y1.reshape(H, W, C1)       # aligned store
    taps2 = [pad2_ref[ky:ky + H, _PADL - 1 + kx:_PADL - 1 + kx + W, :]
             .reshape(H * W, C1).astype(bf16)
             for ky in range(3) for kx in range(3)]
    p2 = jnp.concatenate(taps2, axis=-1)                               # (HW, 576) bf16
    y2 = jnp.dot(p2, w2_ref[...], preferred_element_type=f32) + b2_ref[...]
    y2 = jnp.maximum(y2, 0.0)                                          # (HW, 128) f32
    y2 = jnp.max(y2.reshape(H * W2, 2, C2), axis=1)                    # pool over W
    y2 = jnp.max(y2.reshape(H2, 2, W2, C2), axis=1)                    # (H2, W2, 128)

    # ---- Layer 3: Conv(128->256) + MaxPool(2) + ReLU (single im2col bf16 matmul) ----
    pad3_ref[...] = jnp.zeros_like(pad3_ref)
    pad3_ref[1:H2 + 1, _PADL:_PADL + W2, :] = y2                       # aligned store
    taps3 = [pad3_ref[ky:ky + H2, _PADL - 1 + kx:_PADL - 1 + kx + W2, :]
             .reshape(H2 * W2, C2).astype(bf16)
             for ky in range(3) for kx in range(3)]
    p3 = jnp.concatenate(taps3, axis=-1)                               # (H2*W2, 1152) bf16
    y3 = jnp.dot(p3, w3_ref[...], preferred_element_type=f32) + b3_ref[...]
    y3 = jnp.maximum(y3, 0.0)                                          # (H2*W2, 256) f32
    y3 = jnp.max(y3.reshape(H2 * W3, 2, C3), axis=1)                   # pool over W
    y3 = jnp.max(y3.reshape(H3, 2, W3, C3), axis=1)                    # (H3, W3, 256)

    # ---- Flatten in HWC order (lin_w rows were pre-permuted to match) + Linear ----
    a3 = y3.reshape(H3 * W3, C3)                                       # (16, 256)
    feats = jnp.concatenate([a3[r:r + 1, :] for r in range(H3 * W3)],
                            axis=-1).astype(bf16)                      # (1, H3*W3*256)
    out = jnp.dot(feats, wl_ref[...], preferred_element_type=f32) + bl_ref[...]
    o_ref[...] = out.astype(o_ref.dtype)                               # (1, 128) lane-dense


# ----------------------------------------------------------------------------
# Forward wrapper (single pallas_call; logits padded to 128 then sliced)
# ----------------------------------------------------------------------------

@functools.partial(jax.jit, static_argnames=("n_out",))
def cnn_classifier_forward(x_nchw, fp, *, n_out):
    N, Cin, H, W = x_nchw.shape
    assert Cin == 1 and H % 4 == 0 and W % 4 == 0 and n_out <= 128
    H2, W2 = H // 2, W // 2
    F = 256 * (H // 4) * (W // 4)

    # Pad the (tiny) network input once; all inter-layer padding happens in VMEM.
    x_pad = jnp.pad(x_nchw.reshape(N, H, W, 1).astype(jnp.float32),
                    ((0, 0), (1, 1), (1, 1), (0, 0)))

    kern = functools.partial(_fused_cnn_kernel, H=H, W=W)
    out = pl.pallas_call(
        kern,
        out_shape=jax.ShapeDtypeStruct((N, 1, 128), jnp.float32),
        grid=(N,),
        in_specs=[
            pl.BlockSpec((None, H + 2, W + 2, 1), lambda n: (n, 0, 0, 0)),  # x
            pl.BlockSpec((9, 64), lambda n: (0, 0)),                        # w1
            pl.BlockSpec((1, 64), lambda n: (0, 0)),                        # BN scale
            pl.BlockSpec((1, 64), lambda n: (0, 0)),                        # BN shift
            pl.BlockSpec((9 * 64, 128), lambda n: (0, 0)),                  # w2 (bf16)
            pl.BlockSpec((1, 128), lambda n: (0, 0)),                       # b2
            pl.BlockSpec((9 * 128, 256), lambda n: (0, 0)),                 # w3 (bf16)
            pl.BlockSpec((1, 256), lambda n: (0, 0)),                       # b3
            pl.BlockSpec((F, 128), lambda n: (0, 0)),                       # wl (bf16)
            pl.BlockSpec((1, 128), lambda n: (0, 0)),                       # bl
        ],
        out_specs=pl.BlockSpec((None, 1, 128), lambda n: (n, 0, 0)),
        scratch_shapes=[
            pltpu.VMEM((H + 2, W + 2 * _PADL, 64), jnp.float32),    # padded layer-2 input
            pltpu.VMEM((H2 + 2, W2 + 2 * _PADL, 128), jnp.float32),  # padded layer-3 input
        ],
        compiler_params=pltpu.CompilerParams(
            dimension_semantics=("parallel",)),
    )(x_pad, fp['w1'], fp['s1'], fp['t1'], fp['w2'], fp['b2'],
      fp['w3'], fp['b3'], fp['wl'], fp['bl'])
    return out[:, 0, :n_out]


# ----------------------------------------------------------------------------
# One-time host-side parameter preparation (layout permutation, BN folding, bf16)
# ----------------------------------------------------------------------------

def prepare_params(params, H, W, n_out, eps=1e-5):
    f32, bf16 = jnp.float32, jnp.bfloat16

    def conv_mat(w_oihw, dtype):
        cout, cin = w_oihw.shape[0], w_oihw.shape[1]
        # OIHW -> rows ordered (ky, kx, cin) to match the im2col tap/column order.
        return jnp.transpose(w_oihw, (2, 3, 1, 0)).reshape(9 * cin, cout).astype(dtype)

    bn_scale = params['bn_gamma'] / jnp.sqrt(params['bn_var'] + eps)
    s1 = bn_scale.astype(f32)[None, :]
    t1 = ((params['conv1_b'] - params['bn_mean']) * bn_scale
          + params['bn_beta']).astype(f32)[None, :]

    H3, W3 = H // 4, W // 4
    F = 256 * H3 * W3
    # Torch flattens (C, H, W); the kernel flattens (H, W, C) -> permute rows once,
    # and pad the output dim to a lane-dense 128.
    wl = params['lin_w'].reshape(n_out, 256, H3, W3)
    wl = jnp.transpose(wl, (2, 3, 1, 0)).reshape(F, n_out)
    wl = jnp.zeros((F, 128), f32).at[:, :n_out].set(wl).astype(bf16)
    bl = jnp.zeros((1, 128), f32).at[0, :n_out].set(params['lin_b'])

    return {
        'w1': conv_mat(params['conv1_w'], f32),        # (9, 64)   layer-1 stays on VPU/f32
        's1': s1, 't1': t1,                            # (1, 64) folded BatchNorm
        'w2': conv_mat(params['conv2_w'], bf16),       # (576, 128)
        'b2': params['conv2_b'].astype(f32)[None, :],  # (1, 128)
        'w3': conv_mat(params['conv3_w'], bf16),       # (1152, 256)
        'b3': params['conv3_b'].astype(f32)[None, :],  # (1, 256)
        'wl': wl, 'bl': bl,                            # (F, 128), (1, 128)
    }


# ----------------------------------------------------------------------------
# Deterministic synthetic parameters (PyTorch-native layouts, shapes from __init__)
# ----------------------------------------------------------------------------

def init_params(key, H, W, n_out):
    keys = jax.random.split(key, 12)

    def nrm(k, shape, scale=0.05):
        return scale * jax.random.normal(k, shape, dtype=jnp.float32)

    F = 256 * (H // 4) * (W // 4)
    return {
        'conv1_w': nrm(keys[0], (64, 1, 3, 3)),
        'conv2_w': nrm(keys[1], (128, 64, 3, 3)),
        'conv3_w': nrm(keys[2], (256, 128, 3, 3)),
        'conv1_b': nrm(keys[3], (64,)),
        'conv2_b': nrm(keys[4], (128,)),
        'conv3_b': nrm(keys[5], (256,)),
        'bn_gamma': 1.0 + nrm(keys[6], (64,), 0.1),
        'bn_beta': nrm(keys[7], (64,), 0.1),
        'bn_mean': nrm(keys[8], (64,), 0.1),
        'bn_var': 1.0 + jnp.abs(nrm(keys[9], (64,), 0.1)),
        'lin_w': nrm(keys[10], (n_out, F)),
        'lin_b': nrm(keys[11], (n_out,)),
    }


# ----------------------------------------------------------------------------
# Pure-JAX (f32) reference in PyTorch layout for a sanity check
# ----------------------------------------------------------------------------

def ref_forward(x_nchw, params):
    eps = 1e-5
    dn = ('NCHW', 'OIHW', 'NCHW')
    x = x_nchw.astype(jnp.float32)

    def conv(a, w, b):
        y = lax.conv_general_dilated(a, w, (1, 1), ((1, 1), (1, 1)),
                                     dimension_numbers=dn,
                                     precision=lax.Precision.HIGHEST)
        return y + b[None, :, None, None]

    def pool(a):
        return lax.reduce_window(a, -jnp.inf, lax.max,
                                 (1, 1, 2, 2), (1, 1, 2, 2), 'VALID')

    y = conv(x, params['conv1_w'], params['conv1_b'])
    y = (params['bn_gamma'][None, :, None, None]
         * (y - params['bn_mean'][None, :, None, None])
         / jnp.sqrt(params['bn_var'][None, :, None, None] + eps)
         + params['bn_beta'][None, :, None, None])
    y = jnp.maximum(y, 0.0)
    y = jnp.maximum(pool(conv(y, params['conv2_w'], params['conv2_b'])), 0.0)
    y = jnp.maximum(pool(conv(y, params['conv3_w'], params['conv3_b'])), 0.0)
    feats = y.reshape(x.shape[0], -1)          # torch's x.view(N, -1): (N, C*H*W)
    return feats @ params['lin_w'].T + params['lin_b']


# ----------------------------------------------------------------------------

if __name__ == "__main__":
    N, Cin, H, W = 2, 1, 16, 16       # n_input_data_dim1 = n_input_data_dim2 = 16
    n_out = 4

    key = jax.random.PRNGKey(0)
    kx, kp = jax.random.split(key)
    x = jax.random.normal(kx, (N, Cin, H, W), dtype=jnp.float32)
    params = init_params(kp, H, W, n_out)
    fp = prepare_params(params, H, W, n_out)   # one-time layout / bf16 conversion

    out = cnn_classifier_forward(x, fp, n_out=n_out)
    out = jax.block_until_ready(out)

    ref = jax.block_until_ready(ref_forward(x, params))
    np.testing.assert_allclose(np.asarray(out), np.asarray(ref),
                               rtol=2e-2, atol=2e-2)

    print("KERNEL_OK")
</pallas_src>

<mosaic_0001>
module attributes {stable_mosaic.version = 11 : i64} {
  func.func @_fused_cnn_kernel(%arg0: i32, %arg1: memref<1x18x18x1xf32, #tpu.memory_space<vmem>>, %arg2: memref<9x64xf32, #tpu.memory_space<vmem>>, %arg3: memref<1x64xf32, #tpu.memory_space<vmem>>, %arg4: memref<1x64xf32, #tpu.memory_space<vmem>>, %arg5: memref<576x128xbf16, #tpu.memory_space<vmem>>, %arg6: memref<1x128xf32, #tpu.memory_space<vmem>>, %arg7: memref<1152x256xbf16, #tpu.memory_space<vmem>>, %arg8: memref<1x256xf32, #tpu.memory_space<vmem>>, %arg9: memref<4096x128xbf16, #tpu.memory_space<vmem>>, %arg10: memref<1x128xf32, #tpu.memory_space<vmem>>, %arg11: memref<1x1x128xf32, #tpu.memory_space<vmem>>, %arg12: memref<18x32x64xf32, #tpu.memory_space<vmem>>, %arg13: memref<10x24x128xf32, #tpu.memory_space<vmem>>) attributes {dimension_semantics = [#tpu.dimension_semantics<parallel>], iteration_bounds = array<i64: 2>, scalar_prefetch = 0 : i64, scratch_operands = 2 : i64, tpu.core_type = #tpu.core_type<tc>, window_params = [{transform_indices = @transform_0, window_bounds = array<i64: 1, 18, 18, 1>}, {pipeline_mode = #tpu.pipeline_mode<synchronous>, transform_indices = @transform_1, window_bounds = array<i64: 9, 64>}, {pipeline_mode = #tpu.pipeline_mode<synchronous>, transform_indices = @transform_2, window_bounds = array<i64: 1, 64>}, {pipeline_mode = #tpu.pipeline_mode<synchronous>, transform_indices = @transform_3, window_bounds = array<i64: 1, 64>}, {pipeline_mode = #tpu.pipeline_mode<synchronous>, transform_indices = @transform_4, window_bounds = array<i64: 576, 128>}, {pipeline_mode = #tpu.pipeline_mode<synchronous>, transform_indices = @transform_5, window_bounds = array<i64: 1, 128>}, {pipeline_mode = #tpu.pipeline_mode<synchronous>, transform_indices = @transform_6, window_bounds = array<i64: 1152, 256>}, {pipeline_mode = #tpu.pipeline_mode<synchronous>, transform_indices = @transform_7, window_bounds = array<i64: 1, 256>}, {pipeline_mode = #tpu.pipeline_mode<synchronous>, transform_indices = @transform_8, window_bounds = array<i64: 4096, 128>}, {pipeline_mode = #tpu.pipeline_mode<synchronous>, transform_indices = @transform_9, window_bounds = array<i64: 1, 128>}, {transform_indices = @transform_10, window_bounds = array<i64: 1, 1, 128>}]} {
    %cst = arith.constant 0.000000e+00 : f32
    %0 = vector.broadcast %cst : f32 to vector<256x64xf32>
    %c0 = arith.constant 0 : index
    %c0_0 = arith.constant 0 : index
    %c0_1 = arith.constant 0 : index
    %c0_2 = arith.constant 0 : index
    %1 = vector.load %arg1[%c0, %c0_0, %c0_1, %c0_2] : memref<1x18x18x1xf32, #tpu.memory_space<vmem>>, vector<1x16x16x1xf32>
    %2 = vector.shape_cast %1 : vector<1x16x16x1xf32> to vector<16x16x1xf32>
    %3 = vector.shape_cast %2 : vector<16x16x1xf32> to vector<256x1xf32>
    %c0_3 = arith.constant 0 : index
    %c0_4 = arith.constant 0 : index
    %4 = vector.load %arg2[%c0_3, %c0_4] : memref<9x64xf32, #tpu.memory_space<vmem>>, vector<1x64xf32>
    %5 = vector.broadcast %3 : vector<256x1xf32> to vector<256x64xf32>
    %6 = vector.broadcast %4 : vector<1x64xf32> to vector<256x64xf32>
    %7 = arith.mulf %5, %6 : vector<256x64xf32>
    %8 = arith.addf %0, %7 : vector<256x64xf32>
    %c0_5 = arith.constant 0 : index
    %c0_6 = arith.constant 0 : index
    %c1 = arith.constant 1 : index
    %c0_7 = arith.constant 0 : index
    %9 = vector.load %arg1[%c0_5, %c0_6, %c1, %c0_7] : memref<1x18x18x1xf32, #tpu.memory_space<vmem>>, vector<1x16x16x1xf32>
    %10 = vector.shape_cast %9 : vector<1x16x16x1xf32> to vector<16x16x1xf32>
    %11 = vector.shape_cast %10 : vector<16x16x1xf32> to vector<256x1xf32>
    %c1_8 = arith.constant 1 : index
    %c0_9 = arith.constant 0 : index
    %12 = vector.load %arg2[%c1_8, %c0_9] : memref<9x64xf32, #tpu.memory_space<vmem>>, vector<1x64xf32>
    %13 = vector.broadcast %11 : vector<256x1xf32> to vector<256x64xf32>
    %14 = vector.broadcast %12 : vector<1x64xf32> to vector<256x64xf32>
    %15 = arith.mulf %13, %14 : vector<256x64xf32>
    %16 = arith.addf %8, %15 : vector<256x64xf32>
    %c0_10 = arith.constant 0 : index
    %c0_11 = arith.constant 0 : index
    %c2 = arith.constant 2 : index
    %c0_12 = arith.constant 0 : index
    %17 = vector.load %arg1[%c0_10, %c0_11, %c2, %c0_12] : memref<1x18x18x1xf32, #tpu.memory_space<vmem>>, vector<1x16x16x1xf32>
    %18 = vector.shape_cast %17 : vector<1x16x16x1xf32> to vector<16x16x1xf32>
    %19 = vector.shape_cast %18 : vector<16x16x1xf32> to vector<256x1xf32>
    %c2_13 = arith.constant 2 : index
    %c0_14 = arith.constant 0 : index
    %20 = vector.load %arg2[%c2_13, %c0_14] : memref<9x64xf32, #tpu.memory_space<vmem>>, vector<1x64xf32>
    %21 = vector.broadcast %19 : vector<256x1xf32> to vector<256x64xf32>
    %22 = vector.broadcast %20 : vector<1x64xf32> to vector<256x64xf32>
    %23 = arith.mulf %21, %22 : vector<256x64xf32>
    %24 = arith.addf %16, %23 : vector<256x64xf32>
    %c0_15 = arith.constant 0 : index
    %c1_16 = arith.constant 1 : index
    %c0_17 = arith.constant 0 : index
    %c0_18 = arith.constant 0 : index
    %25 = vector.load %arg1[%c0_15, %c1_16, %c0_17, %c0_18] : memref<1x18x18x1xf32, #tpu.memory_space<vmem>>, vector<1x16x16x1xf32>
    %26 = vector.shape_cast %25 : vector<1x16x16x1xf32> to vector<16x16x1xf32>
    %27 = vector.shape_cast %26 : vector<16x16x1xf32> to vector<256x1xf32>
    %c3 = arith.constant 3 : index
    %c0_19 = arith.constant 0 : index
    %28 = vector.load %arg2[%c3, %c0_19] : memref<9x64xf32, #tpu.memory_space<vmem>>, vector<1x64xf32>
    %29 = vector.broadcast %27 : vector<256x1xf32> to vector<256x64xf32>
    %30 = vector.broadcast %28 : vector<1x64xf32> to vector<256x64xf32>
    %31 = arith.mulf %29, %30 : vector<256x64xf32>
    %32 = arith.addf %24, %31 : vector<256x64xf32>
    %c0_20 = arith.constant 0 : index
    %c1_21 = arith.constant 1 : index
    %c1_22 = arith.constant 1 : index
    %c0_23 = arith.constant 0 : index
    %33 = vector.load %arg1[%c0_20, %c1_21, %c1_22, %c0_23] : memref<1x18x18x1xf32, #tpu.memory_space<vmem>>, vector<1x16x16x1xf32>
    %34 = vector.shape_cast %33 : vector<1x16x16x1xf32> to vector<16x16x1xf32>
    %35 = vector.shape_cast %34 : vector<16x16x1xf32> to vector<256x1xf32>
    %c4 = arith.constant 4 : index
    %c0_24 = arith.constant 0 : index
    %36 = vector.load %arg2[%c4, %c0_24] : memref<9x64xf32, #tpu.memory_space<vmem>>, vector<1x64xf32>
    %37 = vector.broadcast %35 : vector<256x1xf32> to vector<256x64xf32>
    %38 = vector.broadcast %36 : vector<1x64xf32> to vector<256x64xf32>
    %39 = arith.mulf %37, %38 : vector<256x64xf32>
    %40 = arith.addf %32, %39 : vector<256x64xf32>
    %c0_25 = arith.constant 0 : index
    %c1_26 = arith.constant 1 : index
    %c2_27 = arith.constant 2 : index
    %c0_28 = arith.constant 0 : index
    %41 = vector.load %arg1[%c0_25, %c1_26, %c2_27, %c0_28] : memref<1x18x18x1xf32, #tpu.memory_space<vmem>>, vector<1x16x16x1xf32>
    %42 = vector.shape_cast %41 : vector<1x16x16x1xf32> to vector<16x16x1xf32>
    %43 = vector.shape_cast %42 : vector<16x16x1xf32> to vector<256x1xf32>
    %c5 = arith.constant 5 : index
    %c0_29 = arith.constant 0 : index
    %44 = vector.load %arg2[%c5, %c0_29] : memref<9x64xf32, #tpu.memory_space<vmem>>, vector<1x64xf32>
    %45 = vector.broadcast %43 : vector<256x1xf32> to vector<256x64xf32>
    %46 = vector.broadcast %44 : vector<1x64xf32> to vector<256x64xf32>
    %47 = arith.mulf %45, %46 : vector<256x64xf32>
    %48 = arith.addf %40, %47 : vector<256x64xf32>
    %c0_30 = arith.constant 0 : index
    %c2_31 = arith.constant 2 : index
    %c0_32 = arith.constant 0 : index
    %c0_33 = arith.constant 0 : index
    %49 = vector.load %arg1[%c0_30, %c2_31, %c0_32, %c0_33] : memref<1x18x18x1xf32, #tpu.memory_space<vmem>>, vector<1x16x16x1xf32>
    %50 = vector.shape_cast %49 : vector<1x16x16x1xf32> to vector<16x16x1xf32>
    %51 = vector.shape_cast %50 : vector<16x16x1xf32> to vector<256x1xf32>
    %c6 = arith.constant 6 : index
    %c0_34 = arith.constant 0 : index
    %52 = vector.load %arg2[%c6, %c0_34] : memref<9x64xf32, #tpu.memory_space<vmem>>, vector<1x64xf32>
    %53 = vector.broadcast %51 : vector<256x1xf32> to vector<256x64xf32>
    %54 = vector.broadcast %52 : vector<1x64xf32> to vector<256x64xf32>
    %55 = arith.mulf %53, %54 : vector<256x64xf32>
    %56 = arith.addf %48, %55 : vector<256x64xf32>
    %c0_35 = arith.constant 0 : index
    %c2_36 = arith.constant 2 : index
    %c1_37 = arith.constant 1 : index
    %c0_38 = arith.constant 0 : index
    %57 = vector.load %arg1[%c0_35, %c2_36, %c1_37, %c0_38] : memref<1x18x18x1xf32, #tpu.memory_space<vmem>>, vector<1x16x16x1xf32>
    %58 = vector.shape_cast %57 : vector<1x16x16x1xf32> to vector<16x16x1xf32>
    %59 = vector.shape_cast %58 : vector<16x16x1xf32> to vector<256x1xf32>
    %c7 = arith.constant 7 : index
    %c0_39 = arith.constant 0 : index
    %60 = vector.load %arg2[%c7, %c0_39] : memref<9x64xf32, #tpu.memory_space<vmem>>, vector<1x64xf32>
    %61 = vector.broadcast %59 : vector<256x1xf32> to vector<256x64xf32>
    %62 = vector.broadcast %60 : vector<1x64xf32> to vector<256x64xf32>
    %63 = arith.mulf %61, %62 : vector<256x64xf32>
    %64 = arith.addf %56, %63 : vector<256x64xf32>
    %c0_40 = arith.constant 0 : index
    %c2_41 = arith.constant 2 : index
    %c2_42 = arith.constant 2 : index
    %c0_43 = arith.constant 0 : index
    %65 = vector.load %arg1[%c0_40, %c2_41, %c2_42, %c0_43] : memref<1x18x18x1xf32, #tpu.memory_space<vmem>>, vector<1x16x16x1xf32>
    %66 = vector.shape_cast %65 : vector<1x16x16x1xf32> to vector<16x16x1xf32>
    %67 = vector.shape_cast %66 : vector<16x16x1xf32> to vector<256x1xf32>
    %c8 = arith.constant 8 : index
    %c0_44 = arith.constant 0 : index
    %68 = vector.load %arg2[%c8, %c0_44] : memref<9x64xf32, #tpu.memory_space<vmem>>, vector<1x64xf32>
    %69 = vector.broadcast %67 : vector<256x1xf32> to vector<256x64xf32>
    %70 = vector.broadcast %68 : vector<1x64xf32> to vector<256x64xf32>
    %71 = arith.mulf %69, %70 : vector<256x64xf32>
    %72 = arith.addf %64, %71 : vector<256x64xf32>
    %c0_45 = arith.constant 0 : index
    %c0_46 = arith.constant 0 : index
    %73 = vector.load %arg3[%c0_45, %c0_46] : memref<1x64xf32, #tpu.memory_space<vmem>>, vector<1x64xf32>
    %74 = vector.broadcast %73 : vector<1x64xf32> to vector<256x64xf32>
    %75 = arith.mulf %72, %74 : vector<256x64xf32>
    %c0_47 = arith.constant 0 : index
    %c0_48 = arith.constant 0 : index
    %76 = vector.load %arg4[%c0_47, %c0_48] : memref<1x64xf32, #tpu.memory_space<vmem>>, vector<1x64xf32>
    %77 = vector.broadcast %76 : vector<1x64xf32> to vector<256x64xf32>
    %78 = arith.addf %75, %77 : vector<256x64xf32>
    %cst_49 = arith.constant 0.000000e+00 : f32
    %79 = vector.broadcast %cst_49 : f32 to vector<256x64xf32>
    %80 = arith.maximumf %78, %79 : vector<256x64xf32>
    %cst_50 = arith.constant 0.000000e+00 : f32
    %81 = vector.broadcast %cst_50 : f32 to vector<18x32x64xf32>
    %c0_51 = arith.constant 0 : index
    %c0_52 = arith.constant 0 : index
    %c0_53 = arith.constant 0 : index
    %82 = vector.load %arg12[%c0_51, %c0_52, %c0_53] : memref<18x32x64xf32, #tpu.memory_space<vmem>>, vector<18x32x64xf32>
    tpu.vector_store %arg12[%c0_51, %c0_52, %c0_53], %81 {strides = array<i32>} : memref<18x32x64xf32, #tpu.memory_space<vmem>>, vector<18x32x64xf32>,
    %83 = vector.shape_cast %80 : vector<256x64xf32> to vector<16x16x64xf32>
    %c1_54 = arith.constant 1 : index
    %c8_55 = arith.constant 8 : index
    %c0_56 = arith.constant 0 : index
    %84 = vector.load %arg12[%c1_54, %c8_55, %c0_56] : memref<18x32x64xf32, #tpu.memory_space<vmem>>, vector<16x16x64xf32>
    tpu.vector_store %arg12[%c1_54, %c8_55, %c0_56], %83 {strides = array<i32>} : memref<18x32x64xf32, #tpu.memory_space<vmem>>, vector<16x16x64xf32>,
    %c0_57 = arith.constant 0 : index
    %c7_58 = arith.constant 7 : index
    %c0_59 = arith.constant 0 : index
    %85 = vector.load %arg12[%c0_57, %c7_58, %c0_59] : memref<18x32x64xf32, #tpu.memory_space<vmem>>, vector<16x16x64xf32>
    %86 = vector.shape_cast %85 : vector<16x16x64xf32> to vector<256x64xf32>
    %87 = arith.truncf %86 : vector<256x64xf32> to vector<256x64xbf16>
    %c0_60 = arith.constant 0 : index
    %c8_61 = arith.constant 8 : index
    %c0_62 = arith.constant 0 : index
    %88 = vector.load %arg12[%c0_60, %c8_61, %c0_62] : memref<18x32x64xf32, #tpu.memory_space<vmem>>, vector<16x16x64xf32>
    %89 = vector.shape_cast %88 : vector<16x16x64xf32> to vector<256x64xf32>
    %90 = arith.truncf %89 : vector<256x64xf32> to vector<256x64xbf16>
    %c0_63 = arith.constant 0 : index
    %c9 = arith.constant 9 : index
    %c0_64 = arith.constant 0 : index
    %91 = vector.load %arg12[%c0_63, %c9, %c0_64] : memref<18x32x64xf32, #tpu.memory_space<vmem>>, vector<16x16x64xf32>
    %92 = vector.shape_cast %91 : vector<16x16x64xf32> to vector<256x64xf32>
    %93 = arith.truncf %92 : vector<256x64xf32> to vector<256x64xbf16>
    %c1_65 = arith.constant 1 : index
    %c7_66 = arith.constant 7 : index
    %c0_67 = arith.constant 0 : index
    %94 = vector.load %arg12[%c1_65, %c7_66, %c0_67] : memref<18x32x64xf32, #tpu.memory_space<vmem>>, vector<16x16x64xf32>
    %95 = vector.shape_cast %94 : vector<16x16x64xf32> to vector<256x64xf32>
    %96 = arith.truncf %95 : vector<256x64xf32> to vector<256x64xbf16>
    %c1_68 = arith.constant 1 : index
    %c8_69 = arith.constant 8 : index
    %c0_70 = arith.constant 0 : index
    %97 = vector.load %arg12[%c1_68, %c8_69, %c0_70] : memref<18x32x64xf32, #tpu.memory_space<vmem>>, vector<16x16x64xf32>
    %98 = vector.shape_cast %97 : vector<16x16x64xf32> to vector<256x64xf32>
    %99 = arith.truncf %98 : vector<256x64xf32> to vector<256x64xbf16>
    %c1_71 = arith.constant 1 : index
    %c9_72 = arith.constant 9 : index
    %c0_73 = arith.constant 0 : index
    %100 = vector.load %arg12[%c1_71, %c9_72, %c0_73] : memref<18x32x64xf32, #tpu.memory_space<vmem>>, vector<16x16x64xf32>
    %101 = vector.shape_cast %100 : vector<16x16x64xf32> to vector<256x64xf32>
    %102 = arith.truncf %101 : vector<256x64xf32> to vector<256x64xbf16>
    %c2_74 = arith.constant 2 : index
    %c7_75 = arith.constant 7 : index
    %c0_76 = arith.constant 0 : index
    %103 = vector.load %arg12[%c2_74, %c7_75, %c0_76] : memref<18x32x64xf32, #tpu.memory_space<vmem>>, vector<16x16x64xf32>
    %104 = vector.shape_cast %103 : vector<16x16x64xf32> to vector<256x64xf32>
    %105 = arith.truncf %104 : vector<256x64xf32> to vector<256x64xbf16>
    %c2_77 = arith.constant 2 : index
    %c8_78 = arith.constant 8 : index
    %c0_79 = arith.constant 0 : index
    %106 = vector.load %arg12[%c2_77, %c8_78, %c0_79] : memref<18x32x64xf32, #tpu.memory_space<vmem>>, vector<16x16x64xf32>
    %107 = vector.shape_cast %106 : vector<16x16x64xf32> to vector<256x64xf32>
    %108 = arith.truncf %107 : vector<256x64xf32> to vector<256x64xbf16>
    %c2_80 = arith.constant 2 : index
    %c9_81 = arith.constant 9 : index
    %c0_82 = arith.constant 0 : index
    %109 = vector.load %arg12[%c2_80, %c9_81, %c0_82] : memref<18x32x64xf32, #tpu.memory_space<vmem>>, vector<16x16x64xf32>
    %110 = vector.shape_cast %109 : vector<16x16x64xf32> to vector<256x64xf32>
    %111 = arith.truncf %110 : vector<256x64xf32> to vector<256x64xbf16>
    %112 = tpu.concatenate %87, %90, %93, %96, %99, %102, %105, %108, %111 in 1 : vector<256x64xbf16>, vector<256x64xbf16>, vector<256x64xbf16>, vector<256x64xbf16>, vector<256x64xbf16>, vector<256x64xbf16>, vector<256x64xbf16>, vector<256x64xbf16>, vector<256x64xbf16> -> vector<256x576xbf16>
    %c0_83 = arith.constant 0 : index
    %c0_84 = arith.constant 0 : index
    %113 = vector.load %arg5[%c0_83, %c0_84] : memref<576x128xbf16, #tpu.memory_space<vmem>>, vector<576x128xbf16>
    %cst_85 = arith.constant dense<0.000000e+00> : vector<256x128xf32>
    %114 = tpu.matmul %112, %113, %cst_85 {dimension_numbers = #tpu.dot_dimension_numbers<[1], [0], [0], [1], [0, 0, 1, 1], [], []>} : vector<256x576xbf16>, vector<576x128xbf16>, vector<256x128xf32> -> vector<256x128xf32>
    %c0_86 = arith.constant 0 : index
    %c0_87 = arith.constant 0 : index
    %115 = vector.load %arg6[%c0_86, %c0_87] : memref<1x128xf32, #tpu.memory_space<vmem>>, vector<1x128xf32>
    %116 = vector.broadcast %115 : vector<1x128xf32> to vector<256x128xf32>
    %117 = arith.addf %114, %116 : vector<256x128xf32>
    %cst_88 = arith.constant 0.000000e+00 : f32
    %118 = vector.broadcast %cst_88 : f32 to vector<256x128xf32>
    %119 = arith.maximumf %117, %118 : vector<256x128xf32>
    %120 = vector.shape_cast %119 : vector<256x128xf32> to vector<128x2x128xf32>
    %cst_89 = arith.constant dense<0xFF800000> : vector<128x128xf32>
    %121 = vector.multi_reduction <maximumf>, %120, %cst_89 [1] : vector<128x2x128xf32> to vector<128x128xf32>
    %122 = vector.shape_cast %121 : vector<128x128xf32> to vector<8x2x8x128xf32>
    %cst_90 = arith.constant dense<0xFF800000> : vector<8x8x128xf32>
    %123 = vector.multi_reduction <maximumf>, %122, %cst_90 [1] : vector<8x2x8x128xf32> to vector<8x8x128xf32>
    %cst_91 = arith.constant 0.000000e+00 : f32
    %124 = vector.broadcast %cst_91 : f32 to vector<10x24x128xf32>
    %c0_92 = arith.constant 0 : index
    %c0_93 = arith.constant 0 : index
    %c0_94 = arith.constant 0 : index
    %125 = vector.load %arg13[%c0_92, %c0_93, %c0_94] : memref<10x24x128xf32, #tpu.memory_space<vmem>>, vector<10x24x128xf32>
    tpu.vector_store %arg13[%c0_92, %c0_93, %c0_94], %124 {strides = array<i32>} : memref<10x24x128xf32, #tpu.memory_space<vmem>>, vector<10x24x128xf32>,
    %c1_95 = arith.constant 1 : index
    %c8_96 = arith.constant 8 : index
    %c0_97 = arith.constant 0 : index
    %126 = vector.load %arg13[%c1_95, %c8_96, %c0_97] : memref<10x24x128xf32, #tpu.memory_space<vmem>>, vector<8x8x128xf32>
    tpu.vector_store %arg13[%c1_95, %c8_96, %c0_97], %123 {strides = array<i32>} : memref<10x24x128xf32, #tpu.memory_space<vmem>>, vector<8x8x128xf32>,
    %c0_98 = arith.constant 0 : index
    %c7_99 = arith.constant 7 : index
    %c0_100 = arith.constant 0 : index
    %127 = vector.load %arg13[%c0_98, %c7_99, %c0_100] : memref<10x24x128xf32, #tpu.memory_space<vmem>>, vector<8x8x128xf32>
    %128 = vector.shape_cast %127 : vector<8x8x128xf32> to vector<64x128xf32>
    %129 = arith.truncf %128 : vector<64x128xf32> to vector<64x128xbf16>
    %c0_101 = arith.constant 0 : index
    %c8_102 = arith.constant 8 : index
    %c0_103 = arith.constant 0 : index
    %130 = vector.load %arg13[%c0_101, %c8_102, %c0_103] : memref<10x24x128xf32, #tpu.memory_space<vmem>>, vector<8x8x128xf32>
    %131 = vector.shape_cast %130 : vector<8x8x128xf32> to vector<64x128xf32>
    %132 = arith.truncf %131 : vector<64x128xf32> to vector<64x128xbf16>
    %c0_104 = arith.constant 0 : index
    %c9_105 = arith.constant 9 : index
    %c0_106 = arith.constant 0 : index
    %133 = vector.load %arg13[%c0_104, %c9_105, %c0_106] : memref<10x24x128xf32, #tpu.memory_space<vmem>>, vector<8x8x128xf32>
    %134 = vector.shape_cast %133 : vector<8x8x128xf32> to vector<64x128xf32>
    %135 = arith.truncf %134 : vector<64x128xf32> to vector<64x128xbf16>
    %c1_107 = arith.constant 1 : index
    %c7_108 = arith.constant 7 : index
    %c0_109 = arith.constant 0 : index
    %136 = vector.load %arg13[%c1_107, %c7_108, %c0_109] : memref<10x24x128xf32, #tpu.memory_space<vmem>>, vector<8x8x128xf32>
    %137 = vector.shape_cast %136 : vector<8x8x128xf32> to vector<64x128xf32>
    %138 = arith.truncf %137 : vector<64x128xf32> to vector<64x128xbf16>
    %c1_110 = arith.constant 1 : index
    %c8_111 = arith.constant 8 : index
    %c0_112 = arith.constant 0 : index
    %139 = vector.load %arg13[%c1_110, %c8_111, %c0_112] : memref<10x24x128xf32, #tpu.memory_space<vmem>>, vector<8x8x128xf32>
    %140 = vector.shape_cast %139 : vector<8x8x128xf32> to vector<64x128xf32>
    %141 = arith.truncf %140 : vector<64x128xf32> to vector<64x128xbf16>
    %c1_113 = arith.constant 1 : index
    %c9_114 = arith.constant 9 : index
    %c0_115 = arith.constant 0 : index
    %142 = vector.load %arg13[%c1_113, %c9_114, %c0_115] : memref<10x24x128xf32, #tpu.memory_space<vmem>>, vector<8x8x128xf32>
    %143 = vector.shape_cast %142 : vector<8x8x128xf32> to vector<64x128xf32>
    %144 = arith.truncf %143 : vector<64x128xf32> to vector<64x128xbf16>
    %c2_116 = arith.constant 2 : index
    %c7_117 = arith.constant 7 : index
    %c0_118 = arith.constant 0 : index
    %145 = vector.load %arg13[%c2_116, %c7_117, %c0_118] : memref<10x24x128xf32, #tpu.memory_space<vmem>>, vector<8x8x128xf32>
    %146 = vector.shape_cast %145 : vector<8x8x128xf32> to vector<64x128xf32>
    %147 = arith.truncf %146 : vector<64x128xf32> to vector<64x128xbf16>
    %c2_119 = arith.constant 2 : index
    %c8_120 = arith.constant 8 : index
    %c0_121 = arith.constant 0 : index
    %148 = vector.load %arg13[%c2_119, %c8_120, %c0_121] : memref<10x24x128xf32, #tpu.memory_space<vmem>>, vector<8x8x128xf32>
    %149 = vector.shape_cast %148 : vector<8x8x128xf32> to vector<64x128xf32>
    %150 = arith.truncf %149 : vector<64x128xf32> to vector<64x128xbf16>
    %c2_122 = arith.constant 2 : index
    %c9_123 = arith.constant 9 : index
    %c0_124 = arith.constant 0 : index
    %151 = vector.load %arg13[%c2_122, %c9_123, %c0_124] : memref<10x24x128xf32, #tpu.memory_space<vmem>>, vector<8x8x128xf32>
    %152 = vector.shape_cast %151 : vector<8x8x128xf32> to vector<64x128xf32>
    %153 = arith.truncf %152 : vector<64x128xf32> to vector<64x128xbf16>
    %154 = tpu.concatenate %129, %132, %135, %138, %141, %144, %147, %150, %153 in 1 : vector<64x128xbf16>, vector<64x128xbf16>, vector<64x128xbf16>, vector<64x128xbf16>, vector<64x128xbf16>, vector<64x128xbf16>, vector<64x128xbf16>, vector<64x128xbf16>, vector<64x128xbf16> -> vector<64x1152xbf16>
    %c0_125 = arith.constant 0 : index
    %c0_126 = arith.constant 0 : index
    %155 = vector.load %arg7[%c0_125, %c0_126] : memref<1152x256xbf16, #tpu.memory_space<vmem>>, vector<1152x256xbf16>
    %cst_127 = arith.constant dense<0.000000e+00> : vector<64x256xf32>
    %156 = tpu.matmul %154, %155, %cst_127 {dimension_numbers = #tpu.dot_dimension_numbers<[1], [0], [0], [1], [0, 0, 1, 1], [], []>} : vector<64x1152xbf16>, vector<1152x256xbf16>, vector<64x256xf32> -> vector<64x256xf32>
    %c0_128 = arith.constant 0 : index
    %c0_129 = arith.constant 0 : index
    %157 = vector.load %arg8[%c0_128, %c0_129] : memref<1x256xf32, #tpu.memory_space<vmem>>, vector<1x256xf32>
    %158 = vector.broadcast %157 : vector<1x256xf32> to vector<64x256xf32>
    %159 = arith.addf %156, %158 : vector<64x256xf32>
    %cst_130 = arith.constant 0.000000e+00 : f32
    %160 = vector.broadcast %cst_130 : f32 to vector<64x256xf32>
    %161 = arith.maximumf %159, %160 : vector<64x256xf32>
    %162 = vector.shape_cast %161 : vector<64x256xf32> to vector<32x2x256xf32>
    %cst_131 = arith.constant dense<0xFF800000> : vector<32x256xf32>
    %163 = vector.multi_reduction <maximumf>, %162, %cst_131 [1] : vector<32x2x256xf32> to vector<32x256xf32>
    %164 = vector.shape_cast %163 : vector<32x256xf32> to vector<4x2x4x256xf32>
    %cst_132 = arith.constant dense<0xFF800000> : vector<4x4x256xf32>
    %165 = vector.multi_reduction <maximumf>, %164, %cst_132 [1] : vector<4x2x4x256xf32> to vector<4x4x256xf32>
    %166 = vector.shape_cast %165 : vector<4x4x256xf32> to vector<16x256xf32>
    %167 = vector.extract_strided_slice %166 {offsets = [0, 0], sizes = [1, 256], strides = [1, 1]} : vector<16x256xf32> to vector<1x256xf32>
    %168 = vector.extract_strided_slice %166 {offsets = [1, 0], sizes = [1, 256], strides = [1, 1]} : vector<16x256xf32> to vector<1x256xf32>
    %169 = vector.extract_strided_slice %166 {offsets = [2, 0], sizes = [1, 256], strides = [1, 1]} : vector<16x256xf32> to vector<1x256xf32>
    %170 = vector.extract_strided_slice %166 {offsets = [3, 0], sizes = [1, 256], strides = [1, 1]} : vector<16x256xf32> to vector<1x256xf32>
    %171 = vector.extract_strided_slice %166 {offsets = [4, 0], sizes = [1, 256], strides = [1, 1]} : vector<16x256xf32> to vector<1x256xf32>
    %172 = vector.extract_strided_slice %166 {offsets = [5, 0], sizes = [1, 256], strides = [1, 1]} : vector<16x256xf32> to vector<1x256xf32>
    %173 = vector.extract_strided_slice %166 {offsets = [6, 0], sizes = [1, 256], strides = [1, 1]} : vector<16x256xf32> to vector<1x256xf32>
    %174 = vector.extract_strided_slice %166 {offsets = [7, 0], sizes = [1, 256], strides = [1, 1]} : vector<16x256xf32> to vector<1x256xf32>
    %175 = vector.extract_strided_slice %166 {offsets = [8, 0], sizes = [1, 256], strides = [1, 1]} : vector<16x256xf32> to vector<1x256xf32>
    %176 = vector.extract_strided_slice %166 {offsets = [9, 0], sizes = [1, 256], strides = [1, 1]} : vector<16x256xf32> to vector<1x256xf32>
    %177 = vector.extract_strided_slice %166 {offsets = [10, 0], sizes = [1, 256], strides = [1, 1]} : vector<16x256xf32> to vector<1x256xf32>
    %178 = vector.extract_strided_slice %166 {offsets = [11, 0], sizes = [1, 256], strides = [1, 1]} : vector<16x256xf32> to vector<1x256xf32>
    %179 = vector.extract_strided_slice %166 {offsets = [12, 0], sizes = [1, 256], strides = [1, 1]} : vector<16x256xf32> to vector<1x256xf32>
    %180 = vector.extract_strided_slice %166 {offsets = [13, 0], sizes = [1, 256], strides = [1, 1]} : vector<16x256xf32> to vector<1x256xf32>
    %181 = vector.extract_strided_slice %166 {offsets = [14, 0], sizes = [1, 256], strides = [1, 1]} : vector<16x256xf32> to vector<1x256xf32>
    %182 = vector.extract_strided_slice %166 {offsets = [15, 0], sizes = [1, 256], strides = [1, 1]} : vector<16x256xf32> to vector<1x256xf32>
    %183 = tpu.concatenate %167, %168, %169, %170, %171, %172, %173, %174, %175, %176, %177, %178, %179, %180, %181, %182 in 1 : vector<1x256xf32>, vector<1x256xf32>, vector<1x256xf32>, vector<1x256xf32>, vector<1x256xf32>, vector<1x256xf32>, vector<1x256xf32>, vector<1x256xf32>, vector<1x256xf32>, vector<1x256xf32>, vector<1x256xf32>, vector<1x256xf32>, vector<1x256xf32>, vector<1x256xf32>, vector<1x256xf32>, vector<1x256xf32> -> vector<1x4096xf32>
    %184 = arith.truncf %183 : vector<1x4096xf32> to vector<1x4096xbf16>
    %c0_133 = arith.constant 0 : index
    %c0_134 = arith.constant 0 : index
    %185 = vector.load %arg9[%c0_133, %c0_134] : memref<4096x128xbf16, #tpu.memory_space<vmem>>, vector<4096x128xbf16>
    %cst_135 = arith.constant dense<0.000000e+00> : vector<1x128xf32>
    %186 = tpu.matmul %184, %185, %cst_135 {dimension_numbers = #tpu.dot_dimension_numbers<[1], [0], [0], [1], [0, 0, 1, 1], [], []>} : vector<1x4096xbf16>, vector<4096x128xbf16>, vector<1x128xf32> -> vector<1x128xf32>
    %c0_136 = arith.constant 0 : index
    %c0_137 = arith.constant 0 : index
    %187 = vector.load %arg10[%c0_136, %c0_137] : memref<1x128xf32, #tpu.memory_space<vmem>>, vector<1x128xf32>
    %188 = arith.addf %186, %187 : vector<1x128xf32>
    %c0_138 = arith.constant 0 : index
    %c0_139 = arith.constant 0 : index
    %c0_140 = arith.constant 0 : index
    %189 = vector.load %arg11[%c0_138, %c0_139, %c0_140] : memref<1x1x128xf32, #tpu.memory_space<vmem>>, vector<1x1x128xf32>
    %190 = vector.shape_cast %189 : vector<1x1x128xf32> to vector<1x128xf32>
    %191 = vector.shape_cast %188 : vector<1x128xf32> to vector<1x1x128xf32>
    tpu.vector_store %arg11[%c0_138, %c0_139, %c0_140], %191 {strides = array<i32>} : memref<1x1x128xf32, #tpu.memory_space<vmem>>, vector<1x1x128xf32>,
    return
  }
  func.func @transform_0(%arg0: i32) -> (i32, i32, i32, i32) {
    %c0_i32 = arith.constant 0 : i32
    %c0_i32_0 = arith.constant 0 : i32
    %c0_i32_1 = arith.constant 0 : i32
    %c0_i32_2 = arith.constant 0 : i32
    return %arg0, %c0_i32, %c0_i32_0, %c0_i32_1 : i32, i32, i32, i32
  }
  func.func @transform_1(%arg0: i32) -> (i32, i32) {
    %c0_i32 = arith.constant 0 : i32
    %c0_i32_0 = arith.constant 0 : i32
    %c0_i32_1 = arith.constant 0 : i32
    return %c0_i32, %c0_i32_0 : i32, i32
  }
  func.func @transform_2(%arg0: i32) -> (i32, i32) {
    %c0_i32 = arith.constant 0 : i32
    %c0_i32_0 = arith.constant 0 : i32
    %c0_i32_1 = arith.constant 0 : i32
    return %c0_i32, %c0_i32_0 : i32, i32
  }
  func.func @transform_3(%arg0: i32) -> (i32, i32) {
    %c0_i32 = arith.constant 0 : i32
    %c0_i32_0 = arith.constant 0 : i32
    %c0_i32_1 = arith.constant 0 : i32
    return %c0_i32, %c0_i32_0 : i32, i32
  }
  func.func @transform_4(%arg0: i32) -> (i32, i32) {
    %c0_i32 = arith.constant 0 : i32
    %c0_i32_0 = arith.constant 0 : i32
    %c0_i32_1 = arith.constant 0 : i32
    return %c0_i32, %c0_i32_0 : i32, i32
  }
  func.func @transform_5(%arg0: i32) -> (i32, i32) {
    %c0_i32 = arith.constant 0 : i32
    %c0_i32_0 = arith.constant 0 : i32
    %c0_i32_1 = arith.constant 0 : i32
    return %c0_i32, %c0_i32_0 : i32, i32
  }
  func.func @transform_6(%arg0: i32) -> (i32, i32) {
    %c0_i32 = arith.constant 0 : i32
    %c0_i32_0 = arith.constant 0 : i32
    %c0_i32_1 = arith.constant 0 : i32
    return %c0_i32, %c0_i32_0 : i32, i32
  }
  func.func @transform_7(%arg0: i32) -> (i32, i32) {
    %c0_i32 = arith.constant 0 : i32
    %c0_i32_0 = arith.constant 0 : i32
    %c0_i32_1 = arith.constant 0 : i32
    return %c0_i32, %c0_i32_0 : i32, i32
  }
  func.func @transform_8(%arg0: i32) -> (i32, i32) {
    %c0_i32 = arith.constant 0 : i32
    %c0_i32_0 = arith.constant 0 : i32
    %c0_i32_1 = arith.constant 0 : i32
    return %c0_i32, %c0_i32_0 : i32, i32
  }
  func.func @transform_9(%arg0: i32) -> (i32, i32) {
    %c0_i32 = arith.constant 0 : i32
    %c0_i32_0 = arith.constant 0 : i32
    %c0_i32_1 = arith.constant 0 : i32
    return %c0_i32, %c0_i32_0 : i32, i32
  }
  func.func @transform_10(%arg0: i32) -> (i32, i32, i32) {
    %c0_i32 = arith.constant 0 : i32
    %c0_i32_0 = arith.constant 0 : i32
    %c0_i32_1 = arith.constant 0 : i32
    return %arg0, %c0_i32, %c0_i32_0 : i32, i32, i32
  }
}

</mosaic_0001>

<bundles_post_ra>
// kernel: cnn_classifier_forward.1
= control target key start
LH: loop header
LB: loop body
LE: loop exit
PB: predicated region body
PF: predicated region fallthrough
CT: control target
= control target key end

     0   :  { %15 = vsyncpa [#allocation5], 0  ;;  %s17770_s0 = inlined_call_operand.vmem [shape: f32[2,18,18,1], index: 0, kind: input, shape index: {}]   ;;  %s17771_s1 = inlined_call_operand.vmem [shape: f32[9,64], index: 1, kind: input, shape index: {}]   ;;  %s17772_s2 = inlined_call_operand.vmem [shape: f32[1,64], index: 2, kind: input, shape index: {}]   ;;  %s17773_s3 = inlined_call_operand.vmem [shape: f32[1,64], index: 3, kind: input, shape index: {}]   ;;  %s17774_s4 = inlined_call_operand.vmem [shape: bf16[576,128], index: 4, kind: input, shape index: {}]   ;;  %s17775_s5 = inlined_call_operand.vmem [shape: f32[1,128], index: 5, kind: input, shape index: {}]   ;;  %s17776_s6 = inlined_call_operand.vmem [shape: bf16[1152,256], index: 6, kind: input, shape index: {}]   ;;  %s17777_s7 = inlined_call_operand.vmem [shape: f32[1,256], index: 7, kind: input, shape index: {}]   ;;  %s17778_s8 = inlined_call_operand.hbm [shape: bf16[4096,128], index: 8, kind: input, shape index: {}]   ;;  %s17779_s9 = inlined_call_operand.vmem [shape: f32[1,128], index: 9, kind: input, shape index: {}]   ;;  %s17780_s10 = inlined_call_operand.hbm [shape: f32[2,1,128], index: 10, kind: output, shape index: {}]  }
   0x1   :  { %16 = vsyncpa [#allocation6], 0 }
   0x2   :  { %18 = vsyncpa [#allocation6 + $0x1], 0  ;;  %s13707_s13 = smov 0   ;;  %s13709_s14 = smov 0  }
   0x3   :  { %s13711_s15 = smov 0   ;;  %s13713_s16 = smov 0  }
   0x4 LB: > { %s13728_s17 = sadd.s32 4294967295, %s13642_s16   ;;  %s11646_s18 = sadd.s32 4294967294, %s13642_s16   ;;  %s13642_s16 = sphi %s13713_s16, %s17925_s16   ;;  %s13638_s15 = sphi %s13711_s15, %s17924_s15   ;;  %s13634_s14 = sphi %s13709_s14, %s17923_s14   ;;  %s13630_s13 = sphi %s13707_s13, %s17922_s13  }
   0x5   : > { %s13732_s19 = sadd.s32 1, %s13642_s16   ;;  %s246_s20 = sadd.s32 1, %s13638_s15 }
   0x6   : > { %s243_s21 = ssub.s32 %s13642_s16, %s13732_s19  ;;  %p256_p0 = scmp.ne.s32.totalorder %s13638_s15, %s13634_s14 }
   0x7   : > { %p244_p1 = scmp.eq.s32.totalorder %s243_s21, 0  ;;  %p257_p2 = scmp.eq.s32.totalorder %s13728_s17, 1 }
   0x8   : > { %p262_p3 = scmp.ne.s32.totalorder %s13634_s14, %s13630_s13  ;;  %p263_p4 = scmp.eq.s32.totalorder %s11646_s18, 1 }
   0x9   : > { %s13743_s22 = scalar_select %p244_p1, %s13638_s15, %s246_s20  }
   0xa   : > { %p13745_p5 = por %p257_p2, %p256_p0  ;;  %p13749_p6 = por %p263_p4, %p262_p3 }
   0xb   : > { %p11647_p7 = scmp.ge.s32.totalorder %s13642_s16, 1  ;;  %p270_p8 = scmp.lt.s32.totalorder %s13642_s16, 3 }
   0xc   : > { %s17817_s24 = scalar_select %p13749_p6, 1, 0 }
   0xd   : > { %p12963_p9 = scmp.eq.s32.totalorder %s13728_s17, 0  ;;  %p13756_p10 = pnand %p11647_p7, %p270_p8 }
   0xe   : > { %s13644_s26 = smov [#allocation4]  }
   0xf   : > { %s303_s27 = sshll.u32 %s13644_s26, 4  ;;  %p12955_p11 = pneg %p13756_p10  ;;  %s304_s27 = int_to_ptr.vmem [resolvable:$true] %s303_s27 }
  0x10   : > { %s13563_s28 = scalar_lea.vmem %s304_s27, 32768  ;;  %p13571_p3 = scmp.lt.s32.totalorder %s304_s27, %s304_s27 }
  0x11   : > { %p12956_p12 = pnand %p12963_p9, %p12955_p11  ;;  %p13564_p0 = scmp.ne.s32.totalorder %s304_s27, %s13563_s28 }
  0x12   : > { %p13572_p4 = scmp.lt.s32.totalorder %s13563_s28, %s13563_s28 }
  0x13   : > { %p13554_p13 = pneg %p12956_p12 }
  0x14   : > { %p13573_p6 = por %p13572_p4, %p13571_p3 }
  0x15   : > { %p13566_p1 = pnand %p13564_p0, %p13554_p13 }
  0x17   : > { %p13567_p2 = pneg %p13566_p1 }
  0x19   : > { %p13574_p7 = pnand %p13573_p6, %p13567_p2 }
  0x1b   : > { %13577 = shalt.err (!%p13574_p7)
}
  0x1c   : > { %s13645_s29 = smov 64   ;;  %s13646_s30 = smov 4  }
  0x1d   : > { %12958 = dma.hbm_to_vmem [thread:$0]  (!%p12956_p12), %s17778_s8, 32768, %s304_s27, [#allocation5], %s13645_s29, %s13645_s29, %s13646_s30  }
  0x1e   : > { %330 = sbr.rel (%p13756_p10) target bundleno = 2203 (0x89b), region = 60 }
  0x23   : > { %13621 = dma.done.wait (%p12963_p9), [#allocation5], 32768  }
  0x24   : > { %13623 = vsyncadd (%p12963_p9), [#allocation5], 4294934528  ;;  %p367_p8 = scmp.lt.s32.totalorder %s13728_s17, 1  ;;  %v17781_v0 = vmov 0   ;;  %vm2834_vm0 = vcmask 523264   ;;  %v13648_v19 = vmov 0.0  }
  0x25   : > { %13006 = vset.pattern.permute.xlu1 %v17781_v0  ;;  %13005 = vset.pattern.permute.xlu0 %v17781_v0  ;;  %2841 = vst.msk [vmem:[#allocation2 + $0x30] sm:$0xff] %vm2834_vm0, %v13648_v19  ;;  %2835 = vst.msk [vmem:[#allocation2] sm:$0xff] %vm2834_vm0, %v13648_v19  ;;  %v14023_v52 = vld [vmem:[%s17771_s1 + $0x1] ss:$0 sm:$0xff]  ;;  %v14036_v57 = vld [vmem:[%s17771_s1] ss:$0 sm:$0xff] }
  0x26   : > { %s368_s18 = scalar_select %p367_p8, %s13728_s17, 1  ;;  %2836 = vst.msk [vmem:[#allocation2 + $0x8] sm:$0xff] %vm2834_vm0, %v13648_v19  ;;  %2837 = vst.msk [vmem:[#allocation2 + $0x10] sm:$0xff] %vm2834_vm0, %v13648_v19  ;;  %v14041_v58 = vld [vmem:[%s17771_s1 + $0x2] ss:$0 sm:$0xff]  ;;  %vm5383_vm1 = vcmask 1041408  }
  0x27   : > { %2838 = vst.msk [vmem:[#allocation2 + $0x18] sm:$0xff] %vm2834_vm0, %v13648_v19  ;;  %2839 = vst.msk [vmem:[#allocation2 + $0x20] sm:$0xff] %vm2834_vm0, %v13648_v19  ;;  %v14048_v63 = vld [vmem:[%s17771_s1 + $0x3] ss:$0 sm:$0xff]  ;;  %s13649_s11 = smov 64   ;;  %vm6438_vm2 = vcmask 1041409  }
  0x28   : > { %s12948_s20 = smul.u32 432, %s368_s18  ;;  %2840 = vst.msk [vmem:[#allocation2 + $0x28] sm:$0xff] %vm2834_vm0, %v13648_v19  ;;  %2842 = vst.msk [vmem:[#allocation2 + $0x38] sm:$0xff] %vm2834_vm0, %v13648_v19  ;;  %v13108_v0 = vld [vmem:[%s17776_s6 + $0xa4] ss:$8 sps:$4 sm:$0xff]   ;;  %vm6440_vm3 = vcmask 1042434  }
  0x29   : > { %2843 = vst.msk [vmem:[#allocation2 + $0x40] sm:$0xff] %vm2834_vm0, %v13648_v19  ;;  %2844 = vst.msk [vmem:[#allocation2 + $0x48] sm:$0xff] %vm2834_vm0, %v13648_v19  ;;  %vm6442_vm4 = vcmask 1043459   ;;  %vm6444_vm5 = vcmask 1044484   ;;  %vm6446_vm6 = vcmask 1045509   ;;  %vm6448_vm7 = vcmask 1046534  }
  0x2a   : > { %s13780_s25 = scalar_lea.vmem %s17770_s0, %s12948_s20  ;;  %2845 = vst.msk [vmem:[#allocation2 + $0x50] sm:$0xff] %vm2834_vm0, %v13648_v19  ;;  %2846 = vst.msk [vmem:[#allocation2 + $0x58] sm:$0xff] %vm2834_vm0, %v13648_v19  ;;  %vm6450_vm8 = vcmask 1047559   ;;  %s365_s30 = sand.u32 1, %s13634_s14  }
  0x2b   : > { %v375_v1 = vld [vmem:[%s13780_s25 + $0x18] sm:$0xff]  ;;  %v373_v2 = vld [vmem:[%s13780_s25] sm:$0xff]  ;;  %v374_v4 = vld [vmem:[%s13780_s25 + $0x8] sm:$0xff]  ;;  %2847 = vst.msk [vmem:[#allocation2 + $0x60] sm:$0xff] %vm2834_vm0, %v13648_v19  ;;  %s11567_s26 = scalar_lea.sflag [#allocation6], %s365_s30 }
  0x2c   : > { %418 = vperm.xlu1 %13006, %v375_v1   ;;  %408 = vperm.xlu0 %13005, %v373_v2   ;;  %v634_v3 = vld [vmem:[%s13780_s25 + $0x1] sm:$0xff]  ;;  %v635_v6 = vld [vmem:[%s13780_s25 + $0x9] sm:$0xff]  ;;  %v11689_v8 = vld [vmem:[%s13780_s25 + $0x19] sm:$0xff]  ;;  %2848 = vst.msk [vmem:[#allocation2 + $0x68] sm:$0xff] %vm2834_vm0, %v13648_v19 }
  0x2d   : > { %v895_v5 = vld [vmem:[%s13780_s25 + $0x2] sm:$0xff]  ;;  %v896_v7 = vld [vmem:[%s13780_s25 + $0xa] sm:$0xff]  ;;  %v11722_v12 = vld [vmem:[%s13780_s25 + $0x1a] sm:$0xff]  ;;  %2849 = vst.msk [vmem:[#allocation2 + $0x70] sm:$0xff] %vm2834_vm0, %v13648_v19 }
  0x2e   : > { %v11657_v9 = vld [vmem:[%s13780_s25 + $0x20] sm:$0xff]  ;;  %v13795_v13 = vld [vmem:[%s13780_s25 + $0x38] sm:$0xff]  ;;  %v13798_v14 = vld [vmem:[%s13780_s25 + $0x30] sm:$0xff]  ;;  %2850 = vst.msk [vmem:[#allocation2 + $0x78] sm:$0xff] %vm2834_vm0, %v13648_v19 }
  0x2f   : > { %v11690_v10 = vld [vmem:[%s13780_s25 + $0x21] sm:$0xff]  ;;  %v13803_v15 = vld [vmem:[%s13780_s25 + $0x39] sm:$0xff]  ;;  %v13806_v16 = vld [vmem:[%s13780_s25 + $0x31] sm:$0xff]  ;;  %2851 = vst.msk [vmem:[#allocation2 + $0x80] sm:$0xff] %vm2834_vm0, %v13648_v19 }
  0x30   : > { %669 = vperm.xlu1 %13006, %v634_v3   ;;  %413 = vperm.xlu0 %13005, %v374_v4   ;;  %v11723_v11 = vld [vmem:[%s13780_s25 + $0x22] sm:$0xff]  ;;  %v13813_v17 = vld [vmem:[%s13780_s25 + $0x3a] sm:$0xff]  ;;  %v13816_v18 = vld [vmem:[%s13780_s25 + $0x32] sm:$0xff]  ;;  %2852 = vst.msk [vmem:[#allocation2 + $0x88] sm:$0xff] %vm2834_vm0, %v13648_v19 }
  0x31   : > { %2853 = vst.msk [vmem:[#allocation2 + $0x90] sm:$0xff] %vm2834_vm0, %v13648_v19  ;;  %2854 = vst.msk [vmem:[#allocation2 + $0x98] sm:$0xff] %vm2834_vm0, %v13648_v19  ;;  %v11758_v20 = vld [vmem:[%s13780_s25 + $0x50] sm:$0xff]  ;;  %v11757_v21 = vld [vmem:[%s13780_s25 + $0x48] sm:$0xff] }
  0x32   : > { %2855 = vst.msk [vmem:[#allocation2 + $0xa0] sm:$0xff] %vm2834_vm0, %v13648_v19  ;;  %2856 = vst.msk [vmem:[#allocation2 + $0xa8] sm:$0xff] %vm2834_vm0, %v13648_v19  ;;  %v11791_v22 = vld [vmem:[%s13780_s25 + $0x51] sm:$0xff]  ;;  %v11790_v23 = vld [vmem:[%s13780_s25 + $0x49] sm:$0xff] }
  0x33   : > { %2857 = vst.msk [vmem:[#allocation2 + $0xb0] sm:$0xff] %vm2834_vm0, %v13648_v19  ;;  %2858 = vst.msk [vmem:[#allocation2 + $0xb8] sm:$0xff] %vm2834_vm0, %v13648_v19  ;;  %v11824_v24 = vld [vmem:[%s13780_s25 + $0x52] sm:$0xff]  ;;  %v11823_v25 = vld [vmem:[%s13780_s25 + $0x4a] sm:$0xff] }
  0x34   : > { %930 = vperm.xlu1 %13006, %v895_v5   ;;  %674 = vperm.xlu0 %13005, %v635_v6   ;;  %2859 = vst.msk [vmem:[#allocation2 + $0xc0] sm:$0xff] %vm2834_vm0, %v13648_v19  ;;  %2860 = vst.msk [vmem:[#allocation2 + $0xc8] sm:$0xff] %vm2834_vm0, %v13648_v19  ;;  %v11760_v26 = vld [vmem:[%s13780_s25 + $0x68] sm:$0xff]  ;;  %v11759_v27 = vld [vmem:[%s13780_s25 + $0x60] sm:$0xff] }
  0x35   : > { %2861 = vst.msk [vmem:[#allocation2 + $0xd0] sm:$0xff] %vm2834_vm0, %v13648_v19  ;;  %2862 = vst.msk [vmem:[#allocation2 + $0xd8] sm:$0xff] %vm2834_vm0, %v13648_v19  ;;  %v11793_v28 = vld [vmem:[%s13780_s25 + $0x69] sm:$0xff]  ;;  %v11792_v29 = vld [vmem:[%s13780_s25 + $0x61] sm:$0xff] }
  0x36   : > { %2863 = vst.msk [vmem:[#allocation2 + $0xe0] sm:$0xff] %vm2834_vm0, %v13648_v19  ;;  %2864 = vst.msk [vmem:[#allocation2 + $0xe8] sm:$0xff] %vm2834_vm0, %v13648_v19  ;;  %v11826_v30 = vld [vmem:[%s13780_s25 + $0x6a] sm:$0xff]  ;;  %v11825_v31 = vld [vmem:[%s13780_s25 + $0x62] sm:$0xff] }
  0x37   : > { %2865 = vst.msk [vmem:[#allocation2 + $0xf0] sm:$0xff] %vm2834_vm0, %v13648_v19  ;;  %2866 = vst.msk [vmem:[#allocation2 + $0xf8] sm:$0xff] %vm2834_vm0, %v13648_v19  ;;  %v11762_v42 = vld [vmem:[%s13780_s25 + $0x80] sm:$0xff]  ;;  %v11761_v43 = vld [vmem:[%s13780_s25 + $0x78] sm:$0xff] }
  0x38   : > { %1192 = vperm.xlu1 %13006, %v375_v1   ;;  %935 = vperm.xlu0 %13005, %v896_v7   ;;  %2867 = vst.msk [vmem:[#allocation2 + $0x100] sm:$0xff] %vm2834_vm0, %v13648_v19  ;;  %2868 = vst.msk [vmem:[#allocation2 + $0x108] sm:$0xff] %vm2834_vm0, %v13648_v19  ;;  %v11795_v48 = vld [vmem:[%s13780_s25 + $0x81] sm:$0xff]  ;;  %v11794_v49 = vld [vmem:[%s13780_s25 + $0x79] sm:$0xff] }
  0x39   : > { %2869 = vst.msk [vmem:[#allocation2 + $0x110] sm:$0xff] %vm2834_vm0, %v13648_v19  ;;  %2870 = vst.msk [vmem:[#allocation2 + $0x118] sm:$0xff] %vm2834_vm0, %v13648_v19  ;;  %v14030_v55 = vld [vmem:[%s13780_s25 + $0x82] sm:$0xff]  ;;  %v11827_v56 = vld [vmem:[%s13780_s25 + $0x7a] sm:$0xff] }
  0x3a   : > { %2871 = vst.msk [vmem:[#allocation2 + $0x120] sm:$0xff] %vm2834_vm0, %v13648_v19  ;;  %2872 = vst.msk [vmem:[#allocation2 + $0x128] sm:$0xff] %vm2834_vm0, %v13648_v19  ;;  %v14056_v3 = vld [vmem:[%s17771_s1 + $0x4] ss:$0 sm:$0xff]  ;;  %v14063_v6 = vld [vmem:[%s17771_s1 + $0x5] ss:$0 sm:$0xff] }
  0x3b   : > { %2873 = vst.msk [vmem:[#allocation2 + $0x130] sm:$0xff] %vm2834_vm0, %v13648_v19  ;;  %2874 = vst.msk [vmem:[#allocation2 + $0x138] sm:$0xff] %vm2834_vm0, %v13648_v19 }
  0x3c   : > { %1453 = vperm.xlu1 %13006, %v11689_v8   ;;  %1197 = vperm.xlu0 %13005, %v11657_v9   ;;  %2875 = vst.msk [vmem:[#allocation2 + $0x140] sm:$0xff] %vm2834_vm0, %v13648_v19  ;;  %2876 = vst.msk [vmem:[#allocation2 + $0x148] sm:$0xff] %vm2834_vm0, %v13648_v19 }
  0x3d   : > { %2877 = vst.msk [vmem:[#allocation2 + $0x150] sm:$0xff] %vm2834_vm0, %v13648_v19  ;;  %2878 = vst.msk [vmem:[#allocation2 + $0x158] sm:$0xff] %vm2834_vm0, %v13648_v19 }
  0x3e   : > { %2879 = vst.msk [vmem:[#allocation2 + $0x160] sm:$0xff] %vm2834_vm0, %v13648_v19  ;;  %2880 = vst.msk [vmem:[#allocation2 + $0x168] sm:$0xff] %vm2834_vm0, %v13648_v19 }
  0x3f   : > { %2881 = vst.msk [vmem:[#allocation2 + $0x170] sm:$0xff] %vm2834_vm0, %v13648_v19  ;;  %2882 = vst.msk [vmem:[#allocation2 + $0x178] sm:$0xff] %vm2834_vm0, %v13648_v19 }
  0x40   : > { %423 = vperm.xlu1 %13006, %v11657_v9   ;;  %1458 = vperm.xlu0 %13005, %v11690_v10   ;;  %2883 = vst.msk [vmem:[#allocation2 + $0x180] sm:$0xff] %vm2834_vm0, %v13648_v19  ;;  %2884 = vst.msk [vmem:[#allocation2 + $0x188] sm:$0xff] %vm2834_vm0, %v13648_v19 }
  0x41   : > { %2885 = vst.msk [vmem:[#allocation2 + $0x190] sm:$0xff] %vm2834_vm0, %v13648_v19  ;;  %2886 = vst.msk [vmem:[#allocation2 + $0x198] sm:$0xff] %vm2834_vm0, %v13648_v19 }
  0x42   : > { %2887 = vst.msk [vmem:[#allocation2 + $0x1a0] sm:$0xff] %vm2834_vm0, %v13648_v19  ;;  %2888 = vst.msk [vmem:[#allocation2 + $0x1a8] sm:$0xff] %vm2834_vm0, %v13648_v19 }
  0x43   : > { %2889 = vst.msk [vmem:[#allocation2 + $0x1b0] sm:$0xff] %vm2834_vm0, %v13648_v19  ;;  %2890 = vst.msk [vmem:[#allocation2 + $0x1b8] sm:$0xff] %vm2834_vm0, %v13648_v19 }
  0x44   : > { %684 = vperm.xlu1 %13006, %v11690_v10   ;;  %679 = vperm.xlu0 %13005, %v11689_v8   ;;  %2891 = vst.msk [vmem:[#allocation2 + $0x1c0] sm:$0xff] %vm2834_vm0, %v13648_v19  ;;  %2892 = vst.msk [vmem:[#allocation2 + $0x1c8] sm:$0xff] %vm2834_vm0, %v13648_v19 }
  0x45   : > { %2893 = vst.msk [vmem:[#allocation2 + $0x1d0] sm:$0xff] %vm2834_vm0, %v13648_v19  ;;  %2894 = vst.msk [vmem:[#allocation2 + $0x1d8] sm:$0xff] %vm2834_vm0, %v13648_v19 }
  0x46   : > { %2895 = vst.msk [vmem:[#allocation2 + $0x1e0] sm:$0xff] %vm2834_vm0, %v13648_v19  ;;  %2896 = vst.msk [vmem:[#allocation2 + $0x1e8] sm:$0xff] %vm2834_vm0, %v13648_v19 }
  0x47   : > { %2897 = vst.msk [vmem:[#allocation2 + $0x1f0] sm:$0xff] %vm2834_vm0, %v13648_v19  ;;  %2898 = vst.msk [vmem:[#allocation2 + $0x1f8] sm:$0xff] %vm2834_vm0, %v13648_v19 }
  0x48   : > { %1719 = vperm.xlu1 %13006, %v11723_v11   ;;  %1714 = vperm.xlu0 %13005, %v11722_v12   ;;  %2899 = vst.msk [vmem:[#allocation2 + $0x200] sm:$0xff] %vm2834_vm0, %v13648_v19  ;;  %2900 = vst.msk [vmem:[#allocation2 + $0x208] sm:$0xff] %vm2834_vm0, %v13648_v19 }
  0x49   : > { %2901 = vst.msk [vmem:[#allocation2 + $0x210] sm:$0xff] %vm2834_vm0, %v13648_v19  ;;  %2902 = vst.msk [vmem:[#allocation2 + $0x218] sm:$0xff] %vm2834_vm0, %v13648_v19 }
  0x4a   : > { %2903 = vst.msk [vmem:[#allocation2 + $0x220] sm:$0xff] %vm2834_vm0, %v13648_v19  ;;  %2904 = vst.msk [vmem:[#allocation2 + $0x228] sm:$0xff] %vm2834_vm0, %v13648_v19 }
  0x4b   : > { %2905 = vst.msk [vmem:[#allocation2 + $0x230] sm:$0xff] %vm2834_vm0, %v13648_v19  ;;  %2906 = vst.msk [vmem:[#allocation2 + $0x238] sm:$0xff] %vm2834_vm0, %v13648_v19 }
  0x4c   : > { %945 = vperm.xlu1 %13006, %v11723_v11   ;;  %940 = vperm.xlu0 %13005, %v11722_v12   ;;  %6344 = vst [vmem:[#allocation3] sm:$0xff] %v13648_v19  ;;  %6345 = vst [vmem:[#allocation3 + $0x8] sm:$0xff] %v13648_v19 }
  0x4d   : > { %6346 = vst [vmem:[#allocation3 + $0x10] sm:$0xff] %v13648_v19  ;;  %6347 = vst [vmem:[#allocation3 + $0x18] sm:$0xff] %v13648_v19 }
  0x4e   : > { %6349 = vst [vmem:[#allocation3 + $0x28] sm:$0xff] %v13648_v19  ;;  %6350 = vst [vmem:[#allocation3 + $0x30] sm:$0xff] %v13648_v19 }
  0x4f   : > { %6352 = vst [vmem:[#allocation3 + $0x40] sm:$0xff] %v13648_v19  ;;  %6353 = vst [vmem:[#allocation3 + $0x48] sm:$0xff] %v13648_v19 }
  0x50   : > { %1981 = vperm.xlu1 %13006, %v13795_v13   ;;  %1976 = vperm.xlu0 %13005, %v13798_v14   ;;  %6355 = vst [vmem:[#allocation3 + $0x58] sm:$0xff] %v13648_v19  ;;  %6356 = vst [vmem:[#allocation3 + $0x60] sm:$0xff] %v13648_v19 }
  0x51   : > { %6358 = vst [vmem:[#allocation3 + $0x70] sm:$0xff] %v13648_v19  ;;  %6359 = vst [vmem:[#allocation3 + $0x78] sm:$0xff] %v13648_v19 }
  0x52   : > { %6361 = vst [vmem:[#allocation3 + $0x88] sm:$0xff] %v13648_v19  ;;  %6362 = vst [vmem:[#allocation3 + $0x90] sm:$0xff] %v13648_v19 }
  0x53   : > { %6364 = vst [vmem:[#allocation3 + $0xa0] sm:$0xff] %v13648_v19  ;;  %6365 = vst [vmem:[#allocation3 + $0xa8] sm:$0xff] %v13648_v19 }
  0x54   : > { %1207 = vperm.xlu1 %13006, %v13795_v13   ;;  %1202 = vperm.xlu0 %13005, %v13798_v14   ;;  %6367 = vst [vmem:[#allocation3 + $0xb8] sm:$0xff] %v13648_v19  ;;  %6368 = vst [vmem:[#allocation3 + $0xc0] sm:$0xff] %v13648_v19 }
  0x55   : > { %6370 = vst [vmem:[#allocation3 + $0xd0] sm:$0xff] %v13648_v19  ;;  %6371 = vst [vmem:[#allocation3 + $0xd8] sm:$0xff] %v13648_v19 }
  0x56   : > { %6372 = vst [vmem:[#allocation3 + $0xe0] sm:$0xff] %v13648_v19  ;;  %6373 = vst [vmem:[#allocation3 + $0xe8] sm:$0xff] %v13648_v19 }
  0x58   : > { %2242 = vperm.xlu1 %13006, %v13803_v15   ;;  %2237 = vperm.xlu0 %13005, %v13806_v16  }
  0x5c   : > { %1468 = vperm.xlu1 %13006, %v13803_v15   ;;  %1463 = vperm.xlu0 %13005, %v13806_v16  }
  0x60   : > { %2503 = vperm.xlu1 %13006, %v13813_v17   ;;  %2498 = vperm.xlu0 %13005, %v13816_v18  }
  0x64   : > { %433 = vperm.xlu1 %13006, %v13795_v13   ;;  %428 = vperm.xlu0 %13005, %v13798_v14   ;;  %v14074_v13 = vld [vmem:[%s17771_s1 + $0x6] ss:$0 sm:$0xff] }
  0x68   : > { %694 = vperm.xlu1 %13006, %v13803_v15   ;;  %689 = vperm.xlu0 %13005, %v13806_v16  }
  0x6c   : > { %1729 = vperm.xlu1 %13006, %v13813_v17   ;;  %1724 = vperm.xlu0 %13005, %v13816_v18  }
  0x70   : > { %955 = vperm.xlu1 %13006, %v13813_v17   ;;  %950 = vperm.xlu0 %13005, %v13816_v18  }
  0x74   : > { %1991 = vperm.xlu1 %13006, %v11758_v20   ;;  %1986 = vperm.xlu0 %13005, %v11757_v21  }
  0x78   : > { %1217 = vperm.xlu1 %13006, %v11758_v20   ;;  %1212 = vperm.xlu0 %13005, %v11757_v21  }
  0x7c   : > { %2252 = vperm.xlu1 %13006, %v11791_v22   ;;  %2247 = vperm.xlu0 %13005, %v11790_v23  }
  0x80   : > { %1478 = vperm.xlu1 %13006, %v11791_v22   ;;  %1473 = vperm.xlu0 %13005, %v11790_v23  }
  0x84   : > { %2513 = vperm.xlu1 %13006, %v11824_v24   ;;  %2508 = vperm.xlu0 %13005, %v11823_v25  }
  0x88   : > { %443 = vperm.xlu1 %13006, %v11758_v20   ;;  %438 = vperm.xlu0 %13005, %v11757_v21  }
  0x8c   : > { %704 = vperm.xlu1 %13006, %v11791_v22   ;;  %699 = vperm.xlu0 %13005, %v11790_v23  }
  0x90   : > { %1739 = vperm.xlu1 %13006, %v11824_v24   ;;  %1734 = vperm.xlu0 %13005, %v11823_v25  }
  0x94   : > { %965 = vperm.xlu1 %13006, %v11824_v24   ;;  %960 = vperm.xlu0 %13005, %v11823_v25   ;;  %v14083_v24 = vld [vmem:[%s17771_s1 + $0x7] ss:$0 sm:$0xff] }
  0x98   : > { %2001 = vperm.xlu1 %13006, %v11760_v26   ;;  %1996 = vperm.xlu0 %13005, %v11759_v27  }
  0x9c   : > { %1227 = vperm.xlu1 %13006, %v11760_v26   ;;  %1222 = vperm.xlu0 %13005, %v11759_v27  }
  0xa0   : > { %2262 = vperm.xlu1 %13006, %v11793_v28   ;;  %2257 = vperm.xlu0 %13005, %v11792_v29  }
  0xa4   : > { %1488 = vperm.xlu1 %13006, %v11793_v28   ;;  %1483 = vperm.xlu0 %13005, %v11792_v29  }
  0xa7   : > { %v14008_v32 = vpop.permute.xlu1 %418  ;;  %v409_v33 = vpop.permute.xlu0 %408 }
  0xa8   : > { %2523 = vperm.xlu1 %13006, %v11826_v30   ;;  %2518 = vperm.xlu0 %13005, %v11825_v31   ;;  %v570_v4 = vmul.f32 %v14036_v57, %v409_v33 }
  0xab   : > { %v670_v34 = vpop.permute.xlu1 %669  ;;  %v414_v35 = vpop.permute.xlu0 %413 }
  0xac   : > { %453 = vperm.xlu1 %13006, %v11760_v26   ;;  %448 = vperm.xlu0 %13005, %v11759_v27   ;;  %v831_v62 = vmul.f32 %v14023_v52, %v670_v34  ;;  %v571_v1 = vmul.f32 %v14036_v57, %v414_v35  ;;  %v14095_v34 = vld [vmem:[%s17771_s1 + $0x8] ss:$0 sm:$0xff] }
  0xae   : > { %v863_v11 = vadd.f32 %v831_v62, %v570_v4 }
  0xaf   : > { %v931_v36 = vpop.permute.xlu1 %930  ;;  %v675_v37 = vpop.permute.xlu0 %674 }
  0xb0   : > { %714 = vperm.xlu1 %13006, %v11793_v28   ;;  %709 = vperm.xlu0 %13005, %v11792_v29   ;;  %v832_v59 = vmul.f32 %v14023_v52, %v675_v37  ;;  %v1092_v5 = vmul.f32 %v14041_v58, %v931_v36 }
  0xb2   : > { %v864_v7 = vadd.f32 %v832_v59, %v571_v1  ;;  %v1124_v16 = vadd.f32 %v1092_v5, %v863_v11 }
  0xb3   : > { %v1193_v38 = vpop.permute.xlu1 %1192  ;;  %v936_v39 = vpop.permute.xlu0 %935 }
  0xb4   : > { %1749 = vperm.xlu1 %13006, %v11826_v30   ;;  %1744 = vperm.xlu0 %13005, %v11825_v31   ;;  %v1093_v2 = vmul.f32 %v14041_v58, %v936_v39  ;;  %v1354_v12 = vmul.f32 %v14048_v63, %v1193_v38 }
  0xb6   : > { %v1125_v14 = vadd.f32 %v1093_v2, %v864_v7  ;;  %v1386_v22 = vadd.f32 %v1354_v12, %v1124_v16  ;;  %v11797_v7 = vld [vmem:[%s13780_s25 + $0x99] sm:$0xff]  ;;  %v11796_v12 = vld [vmem:[%s13780_s25 + $0x91] sm:$0xff] }
  0xb7   : > { %v1454_v40 = vpop.permute.xlu1 %1453  ;;  %v1198_v41 = vpop.permute.xlu0 %1197 }
  0xb8   : > { %975 = vperm.xlu1 %13006, %v11826_v30   ;;  %970 = vperm.xlu0 %13005, %v11825_v31   ;;  %v1355_v8 = vmul.f32 %v14048_v63, %v1198_v41  ;;  %v1615_v17 = vmul.f32 %v14056_v3, %v1454_v40  ;;  %v14102_v40 = vld [vmem:[%s17772_s2] ss:$0 sm:$0xff] }
  0xba   : > { %v1387_v18 = vadd.f32 %v1355_v8, %v1125_v14  ;;  %v1647_v27 = vadd.f32 %v1615_v17, %v1386_v22 }
  0xbb   : > { %v14012_v44 = vpop.permute.xlu1 %423  ;;  %v1459_v45 = vpop.permute.xlu0 %1458 }
  0xbc   : > { %2011 = vperm.xlu1 %13006, %v11762_v42   ;;  %2006 = vperm.xlu0 %13005, %v11761_v43   ;;  %v1616_v15 = vmul.f32 %v14056_v3, %v1459_v45 }
  0xbe   : > { %v1648_v25 = vadd.f32 %v1616_v15, %v1387_v18  ;;  %v11830_v18 = vld [vmem:[%s13780_s25 + $0x9a] sm:$0xff] }
  0xbf   : > { %v14014_v46 = vpop.permute.xlu1 %684  ;;  %v14016_v47 = vpop.permute.xlu0 %679 }
  0xc0   : > { %1237 = vperm.xlu1 %13006, %v11762_v42   ;;  %1232 = vperm.xlu0 %13005, %v11761_v43   ;;  %v834_v22 = vmul.f32 %v14023_v52, %v14014_v46 }
  0xc3   : > { %v1720_v50 = vpop.permute.xlu1 %1719  ;;  %v1715_v51 = vpop.permute.xlu0 %1714 }
  0xc4   : > { %2272 = vperm.xlu1 %13006, %v11795_v48   ;;  %2267 = vperm.xlu0 %13005, %v11794_v49   ;;  %v1877_v19 = vmul.f32 %v14063_v6, %v1720_v50  ;;  %v1876_v23 = vmul.f32 %v14063_v6, %v1715_v51  ;;  %v11763_v50 = vld [vmem:[%s13780_s25 + $0x90] sm:$0xff]  ;;  %v14112_v51 = vld [vmem:[%s17773_s3] ss:$0 sm:$0xff] }
  0xc6   : > { %v1909_v29 = vadd.f32 %v1877_v19, %v1648_v25  ;;  %v1908_v35 = vadd.f32 %v1876_v23, %v1647_v27  ;;  %v11829_v19 = vld [vmem:[%s13780_s25 + $0x92] sm:$0xff]  ;;  %v833_v23 = vmul.f32 %v14023_v52, %v14016_v47  ;;  %v572_v25 = vmul.f32 %v14036_v57, %v14008_v32 }
  0xc7   : > { %v14025_v53 = vpop.permute.xlu1 %945  ;;  %v14027_v54 = vpop.permute.xlu0 %940 }
  0xc8   : > { %1498 = vperm.xlu1 %13006, %v11795_v48   ;;  %1493 = vperm.xlu0 %13005, %v11794_v49   ;;  %v1095_v27 = vmul.f32 %v14041_v58, %v14025_v53  ;;  %v865_v47 = vadd.f32 %v833_v23, %v572_v25 }
  0xcb   : > { %v1982_v60 = vpop.permute.xlu1 %1981  ;;  %v1977_v61 = vpop.permute.xlu0 %1976 }
  0xcc   : > { %2533 = vperm.xlu1 %13006, %v14030_v55   ;;  %2528 = vperm.xlu0 %13005, %v11827_v56   ;;  %v2139_v26 = vmul.f32 %v14074_v13, %v1982_v60  ;;  %v2138_v28 = vmul.f32 %v14074_v13, %v1977_v61 }
  0xce   : > { %v2171_v37 = vadd.f32 %v2139_v26, %v1909_v29  ;;  %v2170_v38 = vadd.f32 %v2138_v28, %v1908_v35  ;;  %v573_v26 = vmul.f32 %v14036_v57, %v14012_v44  ;;  %v1094_v28 = vmul.f32 %v14041_v58, %v14027_v54 }
  0xcf   : > { %v14066_v9 = vpop.permute.xlu1 %1207  ;;  %v14068_v10 = vpop.permute.xlu0 %1202 }
  0xd0   : > { %463 = vperm.xlu1 %13006, %v11762_v42   ;;  %458 = vperm.xlu0 %13005, %v11761_v43   ;;  %v1357_v35 = vmul.f32 %v14048_v63, %v14066_v9  ;;  %v1356_v32 = vmul.f32 %v14048_v63, %v14068_v10 }
  0xd3   : > { %v2243_v20 = vpop.permute.xlu1 %2242  ;;  %v2238_v21 = vpop.permute.xlu0 %2237 }
  0xd4   : > { %724 = vperm.xlu1 %13006, %v11795_v48   ;;  %719 = vperm.xlu0 %13005, %v11794_v49   ;;  %v2400_v30 = vmul.f32 %v14083_v24, %v2243_v20  ;;  %v2399_v36 = vmul.f32 %v14083_v24, %v2238_v21  ;;  %v11764_v49 = vld [vmem:[%s13780_s25 + $0x98] sm:$0xff] }
  0xd6   : > { %v2432_v39 = vadd.f32 %v2400_v30, %v2171_v37  ;;  %v2431_v43 = vadd.f32 %v2399_v36, %v2170_v38  ;;  %v866_v30 = vadd.f32 %v834_v22, %v573_v26  ;;  %v1126_v36 = vadd.f32 %v1094_v28, %v865_v47 }
  0xd7   : > { %v14088_v31 = vpop.permute.xlu1 %1468  ;;  %v14090_v33 = vpop.permute.xlu0 %1463 }
  0xd8   : > { %1759 = vperm.xlu1 %13006, %v14030_v55   ;;  %1754 = vperm.xlu0 %13005, %v11827_v56   ;;  %v1127_v44 = vadd.f32 %v1095_v27, %v866_v30  ;;  %v1618_v53 = vmul.f32 %v14056_v3, %v14088_v31  ;;  %v1617_v54 = vmul.f32 %v14056_v3, %v14090_v33  ;;  %v11799_v30 = vld [vmem:[%s13780_s25 + $0xb1] sm:$0xff] }
  0xdb   : > { %v2504_v41 = vpop.permute.xlu1 %2503  ;;  %v2499_v42 = vpop.permute.xlu0 %2498 }
  0xdc   : > { %v2661_v45 = vmul.f32 %v14095_v34, %v2504_v41  ;;  %v2660_v48 = vmul.f32 %v14095_v34, %v2499_v42  ;;  %985 = vperm.xlu1 %13006, %v14030_v55   ;;  %980 = vperm.xlu0 %13005, %v11827_v56   ;;  %v1388_v41 = vadd.f32 %v1356_v32, %v1126_v36  ;;  %v11798_v32 = vld [vmem:[%s13780_s25 + $0xa9] sm:$0xff] }
  0xde   : > { %v2693_v59 = vadd.f32 %v2661_v45, %v2432_v39  ;;  %v2692_v60 = vadd.f32 %v2660_v48, %v2431_v43  ;;  %v1389_v39 = vadd.f32 %v1357_v35, %v1127_v44  ;;  %v1649_v43 = vadd.f32 %v1617_v54, %v1388_v41 }
  0xdf   : > { %v14114_v61 = vpop.permute.xlu1 %433  ;;  %v14116_v62 = vpop.permute.xlu0 %428 }
  0xe0   : > { %v2732_v1 = vmul.f32 %v14102_v40, %v2693_v59  ;;  %v2731_v55 = vmul.f32 %v14102_v40, %v2692_v60  ;;  %2021 = vperm.xlu1 %13006, %v11764_v49   ;;  %2016 = vperm.xlu0 %13005, %v11763_v50   ;;  %v1650_v10 = vadd.f32 %v1618_v53, %v1389_v39 }
  0xe2   : > { %v2771_v56 = vadd.f32 %v14112_v51, %v2732_v1  ;;  %v2770_v2 = vadd.f32 %v14112_v51, %v2731_v55 }
  0xe3   : > { %v14122_v4 = vpop.permute.xlu1 %694  ;;  %v14124_v5 = vpop.permute.xlu0 %689 }
  0xe4   : > { %v2803_v8 = vmax.f32 %v2771_v56, 0.0  ;;  %v2802_v11 = vmax.f32 %v2770_v2, 0.0  ;;  %1247 = vperm.xlu1 %13006, %v11764_v49   ;;  %1242 = vperm.xlu0 %13005, %v11763_v50  }
  0xe6   : > { %2909 = vst.msk [vmem:[#allocation2 + $0x30] sm:$0xff] %vm2834_vm0, %v2803_v8  ;;  %2908 = vst.msk [vmem:[#allocation2 + $0x28] sm:$0xff] %vm2834_vm0, %v2802_v11 }
  0xe7   : > { %v1730_v14 = vpop.permute.xlu1 %1729  ;;  %v1725_v15 = vpop.permute.xlu0 %1724 }
  0xe8   : > { %2282 = vperm.xlu1 %13006, %v11797_v7   ;;  %2277 = vperm.xlu0 %13005, %v11796_v12   ;;  %v1879_v42 = vmul.f32 %v14063_v6, %v1730_v14  ;;  %v1878_v9 = vmul.f32 %v14063_v6, %v1725_v15  ;;  %v11766_v14 = vld [vmem:[%s13780_s25 + $0xb0] sm:$0xff]  ;;  %v11765_v15 = vld [vmem:[%s13780_s25 + $0xa8] sm:$0xff] }
  0xea   : > { %v1911_v33 = vadd.f32 %v1879_v42, %v1650_v10  ;;  %v836_v42 = vmul.f32 %v14023_v52, %v14122_v4  ;;  %v575_v10 = vmul.f32 %v14036_v57, %v14114_v61 }
  0xeb   : > { %v14130_v16 = vpop.permute.xlu1 %955  ;;  %v14132_v17 = vpop.permute.xlu0 %950 }
  0xec   : > { %1508 = vperm.xlu1 %13006, %v11797_v7   ;;  %1503 = vperm.xlu0 %13005, %v11796_v12  }
  0xef   : > { %v1992_v20 = vpop.permute.xlu1 %1991  ;;  %v1987_v21 = vpop.permute.xlu0 %1986 }
  0xf0   : > { %2543 = vperm.xlu1 %13006, %v11830_v18   ;;  %2538 = vperm.xlu0 %13005, %v11829_v19   ;;  %v2141_v45 = vmul.f32 %v14074_v13, %v1992_v20  ;;  %v2140_v48 = vmul.f32 %v14074_v13, %v1987_v21 }
  0xf2   : > { %v2173_v1 = vadd.f32 %v2141_v45, %v1911_v33  ;;  %v1097_v45 = vmul.f32 %v14041_v58, %v14130_v16 }
  0xf3   : > { %v14148_v29 = vpop.permute.xlu1 %1217  ;;  %v14150_v46 = vpop.permute.xlu0 %1212 }
  0xf4   : > { %473 = vperm.xlu1 %13006, %v11764_v49   ;;  %468 = vperm.xlu0 %13005, %v11763_v50   ;;  %v1910_v50 = vadd.f32 %v1878_v9, %v1649_v43  ;;  %v835_v9 = vmul.f32 %v14023_v52, %v14124_v5  ;;  %v574_v43 = vmul.f32 %v14036_v57, %v14116_v62 }
  0xf5   : > { %v1359_v5 = vmul.f32 %v14048_v63, %v14148_v29  ;;  %v1358_v61 = vmul.f32 %v14048_v63, %v14150_v46 }
  0xf6   : > { %v2172_v55 = vadd.f32 %v2140_v48, %v1910_v50  ;;  %v1096_v48 = vmul.f32 %v14041_v58, %v14132_v17  ;;  %v868_v50 = vadd.f32 %v836_v42, %v575_v10  ;;  %v867_v52 = vadd.f32 %v835_v9, %v574_v43  ;;  %v11800_v42 = vld [vmem:[%s13780_s25 + $0xc1] sm:$0xff]  ;;  %v11834_v43 = vld [vmem:[%s13780_s25 + $0xca] sm:$0xff] }
  0xf7   : > { %v2253_v37 = vpop.permute.xlu1 %2252  ;;  %v2248_v38 = vpop.permute.xlu0 %2247 }
  0xf8   : > { %734 = vperm.xlu1 %13006, %v11797_v7   ;;  %729 = vperm.xlu0 %13005, %v11796_v12   ;;  %v2402_v59 = vmul.f32 %v14083_v24, %v2253_v37  ;;  %v2401_v60 = vmul.f32 %v14083_v24, %v2248_v38  ;;  %v11832_v37 = vld [vmem:[%s13780_s25 + $0xb2] sm:$0xff]  ;;  %v11831_v38 = vld [vmem:[%s13780_s25 + $0xaa] sm:$0xff]  ;;  %v1129_v57 = vadd.f32 %v1097_v45, %v868_v50  ;;  %v11833_v45 = vld [vmem:[%s13780_s25 + $0xc2] sm:$0xff] }
  0xf9   : > { %v1128_v62 = vadd.f32 %v1096_v48, %v867_v52  ;;  %v14259_v52 = vld [vmem:[%s17771_s1 + $0x1] ss:$0 sm:$0xff] }
  0xfa   : > { %v2434_v7 = vadd.f32 %v2402_v59, %v2173_v1  ;;  %v2433_v8 = vadd.f32 %v2401_v60, %v2172_v55  ;;  %v1391_v60 = vadd.f32 %v1359_v5, %v1129_v57  ;;  %v14268_v57 = vld [vmem:[%s17771_s1] ss:$0 sm:$0xff] }
  0xfb   : > { %v14164_v31 = vpop.permute.xlu1 %1478  ;;  %v14166_v49 = vpop.permute.xlu0 %1473  ;;  %v1390_v1 = vadd.f32 %v1358_v61, %v1128_v62 }
  0xfc   : > { %1769 = vperm.xlu1 %13006, %v11830_v18   ;;  %1764 = vperm.xlu0 %13005, %v11829_v19   ;;  %v1620_v16 = vmul.f32 %v14056_v3, %v14164_v31  ;;  %v1619_v58 = vmul.f32 %v14056_v3, %v14166_v49 }
  0xfe   : > { %v1652_v63 = vadd.f32 %v1620_v16, %v1391_v60  ;;  %v1651_v46 = vadd.f32 %v1619_v58, %v1390_v1 }
  0xff   : > { %v2514_v56 = vpop.permute.xlu1 %2513  ;;  %v2509_v2 = vpop.permute.xlu0 %2508 }
 0x100   : > { %v2663_v11 = vmul.f32 %v14095_v34, %v2514_v56  ;;  %v2662_v12 = vmul.f32 %v14095_v34, %v2509_v2  ;;  %995 = vperm.xlu1 %13006, %v11830_v18   ;;  %990 = vperm.xlu0 %13005, %v11829_v19  }
 0x102   : > { %v2695_v20 = vadd.f32 %v2663_v11, %v2434_v7  ;;  %v2694_v21 = vadd.f32 %v2662_v12, %v2433_v8 }
 0x103   : > { %v14174_v22 = vpop.permute.xlu1 %443  ;;  %v14176_v23 = vpop.permute.xlu0 %438 }
 0x104   : > { %v2734_v25 = vmul.f32 %v14102_v40, %v2695_v20  ;;  %v2733_v26 = vmul.f32 %v14102_v40, %v2694_v21  ;;  %2031 = vperm.xlu1 %13006, %v11766_v14   ;;  %2026 = vperm.xlu0 %13005, %v11765_v15   ;;  %v577_v62 = vmul.f32 %v14268_v57, %v14174_v22 }
 0x105   : > { %v576_v16 = vmul.f32 %v14268_v57, %v14176_v23  ;;  %v14290_v23 = vld [vmem:[%s17771_s1 + $0x3] ss:$0 sm:$0xff] }
 0x106   : > { %v2773_v27 = vadd.f32 %v14112_v51, %v2734_v25  ;;  %v2772_v18 = vadd.f32 %v14112_v51, %v2733_v26  ;;  %v11768_v26 = vld [vmem:[%s13780_s25 + $0xc8] sm:$0xff] }
 0x107   : > { %v14182_v28 = vpop.permute.xlu1 %704  ;;  %v14184_v19 = vpop.permute.xlu0 %699 }
 0x108   : > { %v2805_v47 = vmax.f32 %v2773_v27, 0.0  ;;  %v2804_v35 = vmax.f32 %v2772_v18, 0.0  ;;  %1257 = vperm.xlu1 %13006, %v11766_v14   ;;  %1252 = vperm.xlu0 %13005, %v11765_v15   ;;  %v11767_v27 = vld [vmem:[%s13780_s25 + $0xc0] sm:$0xff]  ;;  %v838_v5 = vmul.f32 %v14259_v52, %v14182_v28  ;;  %v837_v61 = vmul.f32 %v14259_v52, %v14184_v19 }
 0x109   : > { %v14277_v28 = vld [vmem:[%s17771_s1 + $0x2] ss:$0 sm:$0xff] }
 0x10a   : > { %2911 = vst.msk [vmem:[#allocation2 + $0x50] sm:$0xff] %vm2834_vm0, %v2805_v47  ;;  %2910 = vst.msk [vmem:[#allocation2 + $0x48] sm:$0xff] %vm2834_vm0, %v2804_v35  ;;  %v870_v60 = vadd.f32 %v838_v5, %v577_v62  ;;  %v869_v22 = vadd.f32 %v837_v61, %v576_v16  ;;  %v14346_v5 = vld [vmem:[%s17772_s2] ss:$0 sm:$0xff] }
 0x10b   : > { %v1740_v44 = vpop.permute.xlu1 %1739  ;;  %v1735_v36 = vpop.permute.xlu0 %1734 }
 0x10c   : > { %2292 = vperm.xlu1 %13006, %v11799_v30   ;;  %2287 = vperm.xlu0 %13005, %v11798_v32   ;;  %v1881_v55 = vmul.f32 %v14063_v6, %v1740_v44  ;;  %v1880_v29 = vmul.f32 %v14063_v6, %v1735_v36 }
 0x10e   : > { %v1913_v3 = vadd.f32 %v1881_v55, %v1652_v63  ;;  %v1912_v49 = vadd.f32 %v1880_v29, %v1651_v46  ;;  %v14299_v29 = vld [vmem:[%s17771_s1 + $0x4] ss:$0 sm:$0xff] }
 0x10f   : > { %v14190_v53 = vpop.permute.xlu1 %965  ;;  %v14192_v54 = vpop.permute.xlu0 %960 }
 0x110   : > { %1518 = vperm.xlu1 %13006, %v11799_v30   ;;  %1513 = vperm.xlu0 %13005, %v11798_v32   ;;  %v1099_v19 = vmul.f32 %v14277_v28, %v14190_v53  ;;  %v1098_v58 = vmul.f32 %v14277_v28, %v14192_v54 }
 0x112   : > { %v1131_v54 = vadd.f32 %v1099_v19, %v870_v60  ;;  %v1130_v55 = vadd.f32 %v1098_v58, %v869_v22 }
 0x113   : > { %v2002_v39 = vpop.permute.xlu1 %2001  ;;  %v1997_v41 = vpop.permute.xlu0 %1996 }
 0x114   : > { %2553 = vperm.xlu1 %13006, %v11832_v37   ;;  %2548 = vperm.xlu0 %13005, %v11831_v38   ;;  %v2143_v56 = vmul.f32 %v14074_v13, %v2002_v39  ;;  %v2142_v2 = vmul.f32 %v14074_v13, %v1997_v41 }
 0x116   : > { %v2175_v11 = vadd.f32 %v2143_v56, %v1913_v3  ;;  %v2174_v12 = vadd.f32 %v2142_v2, %v1912_v49 }
 0x117   : > { %v14208_v33 = vpop.permute.xlu1 %1227  ;;  %v14210_v4 = vpop.permute.xlu0 %1222 }
 0x118   : > { %483 = vperm.xlu1 %13006, %v11766_v14   ;;  %478 = vperm.xlu0 %13005, %v11765_v15   ;;  %v1361_v1 = vmul.f32 %v14290_v23, %v14208_v33  ;;  %v1360_v53 = vmul.f32 %v14290_v23, %v14210_v4  ;;  %v14308_v4 = vld [vmem:[%s17771_s1 + $0x5] ss:$0 sm:$0xff] }
 0x11a   : > { %v1393_v2 = vadd.f32 %v1361_v1, %v1131_v54  ;;  %v1392_v3 = vadd.f32 %v1360_v53, %v1130_v55  ;;  %v11803_v1 = vld [vmem:[%s13780_s25 + $0xe1] sm:$0xff]  ;;  %v11802_v53 = vld [vmem:[%s13780_s25 + $0xd9] sm:$0xff] }
 0x11b   : > { %v2263_v17 = vpop.permute.xlu1 %2262  ;;  %v2258_v59 = vpop.permute.xlu0 %2257 }
 0x11c   : > { %744 = vperm.xlu1 %13006, %v11799_v30   ;;  %739 = vperm.xlu0 %13005, %v11798_v32   ;;  %v2404_v8 = vmul.f32 %v14083_v24, %v2263_v17  ;;  %v2403_v6 = vmul.f32 %v14083_v24, %v2258_v59 }
 0x11e   : > { %v2436_v20 = vadd.f32 %v2404_v8, %v2175_v11  ;;  %v2435_v13 = vadd.f32 %v2403_v6, %v2174_v12 }
 0x11f   : > { %v14224_v31 = vpop.permute.xlu1 %1488  ;;  %v14226_v7 = vpop.permute.xlu0 %1483 }
 0x120   : > { %1779 = vperm.xlu1 %13006, %v11832_v37   ;;  %1774 = vperm.xlu0 %13005, %v11831_v38   ;;  %v1622_v63 = vmul.f32 %v14299_v29, %v14224_v31  ;;  %v1621_v46 = vmul.f32 %v14299_v29, %v14226_v7  ;;  %v14315_v7 = vld [vmem:[%s17771_s1 + $0x6] ss:$0 sm:$0xff] }
 0x122   : > { %v1654_v6 = vadd.f32 %v1622_v63, %v1393_v2  ;;  %v1653_v31 = vadd.f32 %v1621_v46, %v1392_v3 }
 0x123   : > { %v2524_v14 = vpop.permute.xlu1 %2523  ;;  %v2519_v15 = vpop.permute.xlu0 %2518 }
 0x124   : > { %v2665_v21 = vmul.f32 %v14095_v34, %v2524_v14  ;;  %v2664_v25 = vmul.f32 %v14095_v34, %v2519_v15  ;;  %1005 = vperm.xlu1 %13006, %v11832_v37   ;;  %1000 = vperm.xlu0 %13005, %v11831_v38   ;;  %v11801_v38 = vld [vmem:[%s13780_s25 + $0xc9] sm:$0xff] }
 0x126   : > { %v2697_v18 = vadd.f32 %v2665_v21, %v2436_v20  ;;  %v2696_v24 = vadd.f32 %v2664_v25, %v2435_v13  ;;  %v14326_v21 = vld [vmem:[%s17771_s1 + $0x7] ss:$0 sm:$0xff] }
 0x127   : > { %v14234_v30 = vpop.permute.xlu1 %453  ;;  %v14236_v47 = vpop.permute.xlu0 %448 }
 0x128   : > { %v2736_v35 = vmul.f32 %v14102_v40, %v2697_v18  ;;  %v2735_v32 = vmul.f32 %v14102_v40, %v2696_v24  ;;  %2041 = vperm.xlu1 %13006, %v11768_v26   ;;  %2036 = vperm.xlu0 %13005, %v11767_v27  }
 0x12a   : > { %v2775_v34 = vadd.f32 %v14112_v51, %v2736_v35  ;;  %v2774_v44 = vadd.f32 %v14112_v51, %v2735_v32 }
 0x12b   : > { %v14242_v36 = vpop.permute.xlu1 %714  ;;  %v14244_v37 = vpop.permute.xlu0 %709 }
 0x12c   : > { %v2807_v39 = vmax.f32 %v2775_v34, 0.0  ;;  %v2806_v41 = vmax.f32 %v2774_v44, 0.0  ;;  %1267 = vperm.xlu1 %13006, %v11768_v26   ;;  %1262 = vperm.xlu0 %13005, %v11767_v27   ;;  %v14333_v44 = vld [vmem:[%s17771_s1 + $0x8] ss:$0 sm:$0xff]  ;;  %v840_v3 = vmul.f32 %v14259_v52, %v14242_v36 }
 0x12e   : > { %2913 = vst.msk [vmem:[#allocation2 + $0x70] sm:$0xff] %vm2834_vm0, %v2807_v39  ;;  %2912 = vst.msk [vmem:[#allocation2 + $0x68] sm:$0xff] %vm2834_vm0, %v2806_v41  ;;  %v11770_v41 = vld [vmem:[%s13780_s25 + $0xe0] sm:$0xff] }
 0x12f   : > { %v1750_v40 = vpop.permute.xlu1 %1749  ;;  %v1745_v9 = vpop.permute.xlu0 %1744 }
 0x130   : > { %2302 = vperm.xlu1 %13006, %v11801_v38   ;;  %2297 = vperm.xlu0 %13005, %v11800_v42   ;;  %v1883_v49 = vmul.f32 %v14308_v4, %v1750_v40  ;;  %v1882_v8 = vmul.f32 %v14308_v4, %v1745_v9  ;;  %v11769_v9 = vld [vmem:[%s13780_s25 + $0xd8] sm:$0xff] }
 0x132   : > { %v1915_v20 = vadd.f32 %v1883_v49, %v1654_v6  ;;  %v1914_v13 = vadd.f32 %v1882_v8, %v1653_v31  ;;  %v839_v8 = vmul.f32 %v14259_v52, %v14244_v37  ;;  %v579_v6 = vmul.f32 %v14268_v57, %v14234_v30 }
 0x133   : > { %v14250_v51 = vpop.permute.xlu1 %975  ;;  %v14252_v10 = vpop.permute.xlu0 %970 }
 0x134   : > { %1528 = vperm.xlu1 %13006, %v11801_v38   ;;  %1523 = vperm.xlu0 %13005, %v11800_v42   ;;  %v1101_v31 = vmul.f32 %v14277_v28, %v14250_v51  ;;  %v872_v36 = vadd.f32 %v840_v3, %v579_v6 }
 0x136   : > { %v1133_v51 = vadd.f32 %v1101_v31, %v872_v36 }
 0x137   : > { %v2012_v48 = vpop.permute.xlu1 %2011  ;;  %v2007_v50 = vpop.permute.xlu0 %2006 }
 0x138   : > { %2563 = vperm.xlu1 %13006, %v11834_v43   ;;  %2558 = vperm.xlu0 %13005, %v11833_v45   ;;  %v2145_v11 = vmul.f32 %v14315_v7, %v2012_v48  ;;  %v2144_v12 = vmul.f32 %v14315_v7, %v2007_v50 }
 0x13a   : > { %v2176_v18 = vadd.f32 %v2144_v12, %v1914_v13  ;;  %v1100_v12 = vmul.f32 %v14277_v28, %v14252_v10 }
 0x13b   : > { %v14283_v17 = vpop.permute.xlu1 %1237  ;;  %v14285_v59 = vpop.permute.xlu0 %1232 }
 0x13c   : > { %493 = vperm.xlu1 %13006, %v11768_v26   ;;  %488 = vperm.xlu0 %13005, %v11767_v27   ;;  %v2177_v27 = vadd.f32 %v2145_v11, %v1915_v20  ;;  %v578_v11 = vmul.f32 %v14268_v57, %v14236_v47  ;;  %v1363_v13 = vmul.f32 %v14290_v23, %v14283_v17 }
 0x13d   : > { %v1362_v30 = vmul.f32 %v14290_v23, %v14285_v59 }
 0x13f   : > { %v2273_v56 = vpop.permute.xlu1 %2272  ;;  %v2268_v33 = vpop.permute.xlu0 %2267 }
 0x140   : > { %754 = vperm.xlu1 %13006, %v11801_v38   ;;  %749 = vperm.xlu0 %13005, %v11800_v42   ;;  %v2406_v25 = vmul.f32 %v14326_v21, %v2273_v56  ;;  %v2405_v26 = vmul.f32 %v14326_v21, %v2268_v33  ;;  %v11836_v56 = vld [vmem:[%s13780_s25 + $0xe2] sm:$0xff]  ;;  %v11835_v33 = vld [vmem:[%s13780_s25 + $0xda] sm:$0xff] }
 0x142   : > { %v2438_v32 = vadd.f32 %v2406_v25, %v2177_v27  ;;  %v2437_v34 = vadd.f32 %v2405_v26, %v2176_v18  ;;  %v871_v25 = vadd.f32 %v839_v8, %v578_v11  ;;  %v1395_v18 = vadd.f32 %v1363_v13, %v1133_v51 }
 0x143   : > { %v14319_v14 = vpop.permute.xlu1 %1498  ;;  %v14321_v15 = vpop.permute.xlu0 %1493 }
 0x144   : > { %1789 = vperm.xlu1 %13006, %v11834_v43   ;;  %1784 = vperm.xlu0 %13005, %v11833_v45   ;;  %v1624_v47 = vmul.f32 %v14299_v29, %v14319_v14  ;;  %v1132_v26 = vadd.f32 %v1100_v12, %v871_v25  ;;  %v1623_v10 = vmul.f32 %v14299_v29, %v14321_v15  ;;  %v11805_v25 = vld [vmem:[%s13780_s25 + $0xf9] sm:$0xff] }
 0x146   : > { %v1656_v59 = vadd.f32 %v1624_v47, %v1395_v18  ;;  %v11837_v18 = vld [vmem:[%s13780_s25 + $0xf2] sm:$0xff] }
 0x147   : > { %v2534_v24 = vpop.permute.xlu1 %2533  ;;  %v2529_v35 = vpop.permute.xlu0 %2528 }
 0x148   : > { %v2667_v38 = vmul.f32 %v14333_v44, %v2534_v24  ;;  %v2666_v39 = vmul.f32 %v14333_v44, %v2529_v35  ;;  %1015 = vperm.xlu1 %13006, %v11834_v43   ;;  %1010 = vperm.xlu0 %13005, %v11833_v45   ;;  %v14353_v45 = vld [vmem:[%s17773_s3] ss:$0 sm:$0xff]  ;;  %v1394_v35 = vadd.f32 %v1362_v30, %v1132_v26  ;;  %v11804_v30 = vld [vmem:[%s13780_s25 + $0xf1] sm:$0xff] }
 0x14a   : > { %v2699_v42 = vadd.f32 %v2667_v38, %v2438_v32  ;;  %v2698_v40 = vadd.f32 %v2666_v39, %v2437_v34  ;;  %v1655_v38 = vadd.f32 %v1623_v10, %v1394_v35 }
 0x14b   : > { %v14339_v48 = vpop.permute.xlu1 %463  ;;  %v14341_v50 = vpop.permute.xlu0 %458 }
 0x14c   : > { %v2738_v61 = vmul.f32 %v14346_v5, %v2699_v42  ;;  %v2737_v43 = vmul.f32 %v14346_v5, %v2698_v40  ;;  %2051 = vperm.xlu1 %13006, %v11770_v41   ;;  %2046 = vperm.xlu0 %13005, %v11769_v9  }
 0x14e   : > { %v2777_v62 = vadd.f32 %v14353_v45, %v2738_v61  ;;  %v2776_v16 = vadd.f32 %v14353_v45, %v2737_v43 }
 0x14f   : > { %v14357_v19 = vpop.permute.xlu1 %724  ;;  %v14359_v58 = vpop.permute.xlu0 %719 }
 0x150   : > { %v2809_v60 = vmax.f32 %v2777_v62, 0.0  ;;  %v2808_v22 = vmax.f32 %v2776_v16, 0.0  ;;  %1277 = vperm.xlu1 %13006, %v11770_v41   ;;  %1272 = vperm.xlu0 %13005, %v11769_v9  }
 0x152   : > { %2915 = vst.msk [vmem:[#allocation2 + $0x90] sm:$0xff] %vm2834_vm0, %v2809_v60  ;;  %2914 = vst.msk [vmem:[#allocation2 + $0x88] sm:$0xff] %vm2834_vm0, %v2808_v22 }
 0x153   : > { %v1760_v54 = vpop.permute.xlu1 %1759  ;;  %v1755_v55 = vpop.permute.xlu0 %1754 }
 0x154   : > { %2312 = vperm.xlu1 %13006, %v11803_v1   ;;  %2307 = vperm.xlu0 %13005, %v11802_v53   ;;  %v1885_v17 = vmul.f32 %v14308_v4, %v1760_v54  ;;  %v1884_v32 = vmul.f32 %v14308_v4, %v1755_v55  ;;  %v11772_v54 = vld [vmem:[%s13780_s25 + $0xf8] sm:$0xff] }
 0x156   : > { %v1916_v40 = vadd.f32 %v1884_v32, %v1655_v38  ;;  %v841_v32 = vmul.f32 %v14259_v52, %v14359_v58  ;;  %v580_v38 = vmul.f32 %v14268_v57, %v14341_v50 }
 0x157   : > { %v14365_v63 = vpop.permute.xlu1 %985  ;;  %v14367_v46 = vpop.permute.xlu0 %980 }
 0x158   : > { %1538 = vperm.xlu1 %13006, %v11803_v1   ;;  %1533 = vperm.xlu0 %13005, %v11802_v53  }
 0x15b   : > { %v2022_v2 = vpop.permute.xlu1 %2021  ;;  %v2017_v49 = vpop.permute.xlu0 %2016 }
 0x15c   : > { %2573 = vperm.xlu1 %13006, %v11836_v56   ;;  %2568 = vperm.xlu0 %13005, %v11835_v33   ;;  %v2147_v34 = vmul.f32 %v14315_v7, %v2022_v2  ;;  %v2146_v14 = vmul.f32 %v14315_v7, %v2017_v49  ;;  %v11771_v2 = vld [vmem:[%s13780_s25 + $0xf0] sm:$0xff] }
 0x15e   : > { %v2178_v43 = vadd.f32 %v2146_v14, %v1916_v40  ;;  %v1102_v14 = vmul.f32 %v14277_v28, %v14367_v46  ;;  %v873_v40 = vadd.f32 %v841_v32, %v580_v38 }
 0x15f   : > { %v14383_v20 = vpop.permute.xlu1 %1247  ;;  %v14387_v37 = vpop.permute.xlu0 %1242 }
 0x160   : > { %503 = vperm.xlu1 %13006, %v11770_v41   ;;  %498 = vperm.xlu0 %13005, %v11769_v9   ;;  %v1917_v41 = vadd.f32 %v1885_v17, %v1656_v59  ;;  %v581_v59 = vmul.f32 %v14268_v57, %v14339_v48  ;;  %v1364_v48 = vmul.f32 %v14290_v23, %v14387_v37 }
 0x162   : > { %v2179_v61 = vadd.f32 %v2147_v34, %v1917_v41  ;;  %v1103_v34 = vmul.f32 %v14277_v28, %v14365_v63 }
 0x163   : > { %v2283_v27 = vpop.permute.xlu1 %2282  ;;  %v2278_v24 = vpop.permute.xlu0 %2277 }
 0x164   : > { %764 = vperm.xlu1 %13006, %v11803_v1   ;;  %759 = vperm.xlu0 %13005, %v11802_v53   ;;  %v2408_v15 = vmul.f32 %v14326_v21, %v2283_v27  ;;  %v2407_v9 = vmul.f32 %v14326_v21, %v2278_v24  ;;  %v11838_v27 = vld [vmem:[%s13780_s25 + $0xfa] sm:$0xff]  ;;  %v842_v24 = vmul.f32 %v14259_v52, %v14357_v19 }
 0x166   : > { %v2440_v16 = vadd.f32 %v2408_v15, %v2179_v61  ;;  %v2439_v1 = vadd.f32 %v2407_v9, %v2178_v43  ;;  %v874_v19 = vadd.f32 %v842_v24, %v581_v59  ;;  %v1365_v15 = vmul.f32 %v14290_v23, %v14383_v20 }
 0x167   : > { %v14399_v39 = vpop.permute.xlu1 %1508  ;;  %v14402_v42 = vpop.permute.xlu0 %1503  ;;  %v1134_v9 = vadd.f32 %v1102_v14, %v873_v40  ;;  %v11807_v40 = vld [vmem:[%s13780_s25 + $0x111] sm:$0xff] }
 0x168   : > { %1799 = vperm.xlu1 %13006, %v11836_v56   ;;  %1794 = vperm.xlu0 %13005, %v11835_v33   ;;  %v1135_v63 = vadd.f32 %v1103_v34, %v874_v19  ;;  %v1626_v50 = vmul.f32 %v14299_v29, %v14399_v39  ;;  %v1625_v46 = vmul.f32 %v14299_v29, %v14402_v42 }
 0x16a   : > { %v1397_v43 = vadd.f32 %v1365_v15, %v1135_v63 }
 0x16b   : > { %v2544_v62 = vpop.permute.xlu1 %2543  ;;  %v2539_v22 = vpop.permute.xlu0 %2538 }
 0x16c   : > { %v2669_v60 = vmul.f32 %v14333_v44, %v2544_v62  ;;  %1025 = vperm.xlu1 %13006, %v11836_v56   ;;  %v2668_v53 = vmul.f32 %v14333_v44, %v2539_v22  ;;  %1020 = vperm.xlu0 %13005, %v11835_v33   ;;  %v1658_v37 = vadd.f32 %v1626_v50, %v1397_v43  ;;  %v11839_v43 = vld [vmem:[%s13780_s25 + $0x10a] sm:$0xff] }
 0x16e   : > { %v2701_v55 = vadd.f32 %v2669_v60, %v2440_v16  ;;  %v2700_v3 = vadd.f32 %v2668_v53, %v2439_v1  ;;  %v1396_v16 = vadd.f32 %v1364_v48, %v1134_v9  ;;  %v11806_v48 = vld [vmem:[%s13780_s25 + $0x109] sm:$0xff] }
 0x16f   : > { %v14409_v49 = vpop.permute.xlu1 %473  ;;  %v14412_v6 = vpop.permute.xlu0 %468 }
 0x170   : > { %v2740_v8 = vmul.f32 %v14346_v5, %v2701_v55  ;;  %2061 = vperm.xlu1 %13006, %v11772_v54   ;;  %v2739_v31 = vmul.f32 %v14346_v5, %v2700_v3  ;;  %2056 = vperm.xlu0 %13005, %v11771_v2   ;;  %v1657_v1 = vadd.f32 %v1625_v46, %v1396_v16 }
 0x172   : > { %v2779_v56 = vadd.f32 %v14353_v45, %v2740_v8  ;;  %v2778_v33 = vadd.f32 %v14353_v45, %v2739_v31 }
 0x173   : > { %v14417_v11 = vpop.permute.xlu1 %734  ;;  %v14419_v36 = vpop.permute.xlu0 %729 }
 0x174   : > { %v2811_v12 = vmax.f32 %v2779_v56, 0.0  ;;  %1287 = vperm.xlu1 %13006, %v11772_v54   ;;  %v2810_v13 = vmax.f32 %v2778_v33, 0.0  ;;  %1282 = vperm.xlu0 %13005, %v11771_v2  }
 0x176   : > { %2917 = vst.msk [vmem:[#allocation2 + $0xb0] sm:$0xff] %vm2834_vm0, %v2811_v12  ;;  %2916 = vst.msk [vmem:[#allocation2 + $0xa8] sm:$0xff] %vm2834_vm0, %v2810_v13 }
 0x177   : > { %v1770_v51 = vpop.permute.xlu1 %1769  ;;  %v1765_v47 = vpop.permute.xlu0 %1764 }
 0x178   : > { %2322 = vperm.xlu1 %13006, %v11805_v25   ;;  %2317 = vperm.xlu0 %13005, %v11804_v30   ;;  %v1887_v20 = vmul.f32 %v14308_v4, %v1770_v51  ;;  %v1886_v60 = vmul.f32 %v14308_v4, %v1765_v47  ;;  %v11774_v51 = vld [vmem:[%s13780_s25 + $0x110] sm:$0xff] }
 0x17b   : > { %v14425_v26 = vpop.permute.xlu1 %995  ;;  %v14427_v10 = vpop.permute.xlu0 %990 }
 0x17c   : > { %1548 = vperm.xlu1 %13006, %v11805_v25   ;;  %1543 = vperm.xlu0 %13005, %v11804_v30  }
 0x17f   : > { %v2032_v17 = vpop.permute.xlu1 %2031  ;;  %v2027_v35 = vpop.permute.xlu0 %2026 }
 0x180   : > { %2583 = vperm.xlu1 %13006, %v11838_v27   ;;  %2578 = vperm.xlu0 %13005, %v11837_v18   ;;  %v2149_v22 = vmul.f32 %v14315_v7, %v2032_v17  ;;  %v2148_v39 = vmul.f32 %v14315_v7, %v2027_v35  ;;  %v11773_v17 = vld [vmem:[%s13780_s25 + $0x108] sm:$0xff] }
 0x183   : > { %v14443_v41 = vpop.permute.xlu1 %1257  ;;  %v14447_v58 = vpop.permute.xlu0 %1252 }
 0x184   : > { %513 = vperm.xlu1 %13006, %v11772_v54   ;;  %508 = vperm.xlu0 %13005, %v11771_v2   ;;  %v1919_v54 = vadd.f32 %v1887_v20, %v1658_v37  ;;  %v1918_v2 = vadd.f32 %v1886_v60, %v1657_v1  ;;  %v843_v60 = vmul.f32 %v14259_v52, %v14419_v36 }
 0x185   : > { %v583_v37 = vmul.f32 %v14268_v57, %v14409_v49  ;;  %v582_v1 = vmul.f32 %v14268_v57, %v14412_v6  ;;  %v1366_v49 = vmul.f32 %v14290_v23, %v14447_v58 }
 0x186   : > { %v2181_v8 = vadd.f32 %v2149_v22, %v1919_v54  ;;  %v2180_v31 = vadd.f32 %v2148_v39, %v1918_v2  ;;  %v1105_v22 = vmul.f32 %v14277_v28, %v14425_v26  ;;  %v1104_v39 = vmul.f32 %v14277_v28, %v14427_v10 }
 0x187   : > { %v2293_v61 = vpop.permute.xlu1 %2292  ;;  %v2288_v62 = vpop.permute.xlu0 %2287  ;;  %v875_v2 = vadd.f32 %v843_v60, %v582_v1 }
 0x188   : > { %774 = vperm.xlu1 %13006, %v11805_v25   ;;  %769 = vperm.xlu0 %13005, %v11804_v30   ;;  %v2410_v42 = vmul.f32 %v14326_v21, %v2293_v61  ;;  %v2409_v3 = vmul.f32 %v14326_v21, %v2288_v62  ;;  %v11840_v61 = vld [vmem:[%s13780_s25 + $0x112] sm:$0xff]  ;;  %v844_v62 = vmul.f32 %v14259_v52, %v14417_v11 }
 0x18a   : > { %v2442_v33 = vadd.f32 %v2410_v42, %v2181_v8  ;;  %v2441_v25 = vadd.f32 %v2409_v3, %v2180_v31  ;;  %v876_v11 = vadd.f32 %v844_v62, %v583_v37  ;;  %v1367_v42 = vmul.f32 %v14290_v23, %v14443_v41 }
 0x18b   : > { %v14459_v53 = vpop.permute.xlu1 %1518  ;;  %v14462_v55 = vpop.permute.xlu0 %1513  ;;  %v1136_v3 = vadd.f32 %v1104_v39, %v875_v2 }
 0x18c   : > { %1809 = vperm.xlu1 %13006, %v11838_v27   ;;  %1804 = vperm.xlu0 %13005, %v11837_v18   ;;  %v1137_v26 = vadd.f32 %v1105_v22, %v876_v11  ;;  %v1628_v6 = vmul.f32 %v14299_v29, %v14459_v53  ;;  %v1627_v10 = vmul.f32 %v14299_v29, %v14462_v55 }
 0x18e   : > { %v1399_v31 = vadd.f32 %v1367_v42, %v1137_v26  ;;  %v13007_v42 = vld [vmem:[%s17774_s4 + $0x78] sm:$0xff]  }
 0x18f   : > { %v2554_v56 = vpop.permute.xlu1 %2553  ;;  %v2549_v13 = vpop.permute.xlu0 %2548  ;;  %v13008_v26 = vld [vmem:[%s17774_s4 + $0x38] sm:$0xff]   ;;  %12312 = vmatprep.subr.bf16.mxu0 %v13007_v42 }
 0x190   : > { %v2671_v12 = vmul.f32 %v14333_v44, %v2554_v56  ;;  %1035 = vperm.xlu1 %13006, %v11838_v27   ;;  %v2670_v30 = vmul.f32 %v14333_v44, %v2549_v13  ;;  %1030 = vperm.xlu0 %13005, %v11837_v18   ;;  %v1660_v58 = vadd.f32 %v1628_v6, %v1399_v31  ;;  %v11808_v6 = vld [vmem:[%s13780_s25 + $0x121] sm:$0xff]  ;;  %v13010_v31 = vld [vmem:[%s17774_s4 + $0x30] sm:$0xff]  }
 0x191   : > { %12313 = vmatpush3.bf16.msra.mxu0 %v13008_v26 }
 0x192   : > { %v2703_v47 = vadd.f32 %v2671_v12, %v2442_v33  ;;  %v2702_v24 = vadd.f32 %v2670_v30, %v2441_v25  ;;  %v1398_v33 = vadd.f32 %v1366_v49, %v1136_v3  ;;  %v11809_v49 = vld [vmem:[%s13780_s25 + $0x129] sm:$0xff] }
 0x193   : > { %v14469_v35 = vpop.permute.xlu1 %483  ;;  %v14472_v59 = vpop.permute.xlu0 %478 }
 0x194   : > { %v2742_v32 = vmul.f32 %v14346_v5, %v2703_v47  ;;  %2071 = vperm.xlu1 %13006, %v11774_v51   ;;  %v2741_v34 = vmul.f32 %v14346_v5, %v2702_v24  ;;  %2066 = vperm.xlu0 %13005, %v11773_v17   ;;  %v1659_v25 = vadd.f32 %v1627_v10, %v1398_v33  ;;  %v13011_v33 = vld [vmem:[%s17774_s4 + $0x68] sm:$0xff]  }
 0x196   : > { %v2781_v27 = vadd.f32 %v14353_v45, %v2742_v32  ;;  %v2780_v18 = vadd.f32 %v14353_v45, %v2741_v34 }
 0x197   : > { %v14477_v38 = vpop.permute.xlu1 %744  ;;  %v14479_v19 = vpop.permute.xlu0 %739 }
 0x198   : > { %v2813_v14 = vmax.f32 %v2781_v27, 0.0  ;;  %1297 = vperm.xlu1 %13006, %v11774_v51   ;;  %v2812_v15 = vmax.f32 %v2780_v18, 0.0  ;;  %1292 = vperm.xlu0 %13005, %v11773_v17  }
 0x19a   : > { %2919 = vst.msk [vmem:[#allocation2 + $0xd0] sm:$0xff] %vm2834_vm0, %v2813_v14  ;;  %2918 = vst.msk [vmem:[#allocation2 + $0xc8] sm:$0xff] %vm2834_vm0, %v2812_v15 }
 0x19b   : > { %v1780_v63 = vpop.permute.xlu1 %1779  ;;  %v1775_v50 = vpop.permute.xlu0 %1774 }
 0x19c   : > { %2332 = vperm.xlu1 %13006, %v11807_v40   ;;  %2327 = vperm.xlu0 %13005, %v11806_v48   ;;  %v1889_v41 = vmul.f32 %v14308_v4, %v1780_v63  ;;  %v1888_v12 = vmul.f32 %v14308_v4, %v1775_v50  ;;  %v11776_v63 = vld [vmem:[%s13780_s25 + $0x128] sm:$0xff] }
 0x19f   : > { %v14485_v9 = vpop.permute.xlu1 %1005  ;;  %v14487_v46 = vpop.permute.xlu0 %1000 }
 0x1a0   : > { %1558 = vperm.xlu1 %13006, %v11807_v40   ;;  %1553 = vperm.xlu0 %13005, %v11806_v48  }
 0x1a3   : > { %v2042_v20 = vpop.permute.xlu1 %2041  ;;  %v2037_v16 = vpop.permute.xlu0 %2036 }
 0x1a4   : > { %2593 = vperm.xlu1 %13006, %v11840_v61   ;;  %2588 = vperm.xlu0 %13005, %v11839_v43   ;;  %v2151_v13 = vmul.f32 %v14315_v7, %v2042_v20  ;;  %v2150_v53 = vmul.f32 %v14315_v7, %v2037_v16  ;;  %v14529_v20 = vld [vmem:[%s13780_s25 + $0x120] sm:$0xff] }
 0x1a7   : > { %v14503_v54 = vpop.permute.xlu1 %1267  ;;  %v14507_v36 = vpop.permute.xlu0 %1262 }
 0x1a8   : > { %523 = vperm.xlu1 %13006, %v11774_v51   ;;  %518 = vperm.xlu0 %13005, %v11773_v17   ;;  %v1921_v51 = vadd.f32 %v1889_v41, %v1660_v58  ;;  %v1920_v17 = vadd.f32 %v1888_v12, %v1659_v25  ;;  %v14569_v12 = vld [vmem:[%s13780_s25 + $0x12a] sm:$0xff] }
 0x1a9   : > { %v13012_v58 = vld [vmem:[%s17774_s4 + $0x28] sm:$0xff]  }
 0x1aa   : > { %v2183_v32 = vadd.f32 %v2151_v13, %v1921_v51  ;;  %v2182_v34 = vadd.f32 %v2150_v53, %v1920_v17  ;;  %v14575_v13 = vld [vmem:[%s13780_s25 + $0x122] sm:$0xff]  ;;  %v846_v53 = vmul.f32 %v14259_v52, %v14477_v38  ;;  %v845_v17 = vmul.f32 %v14259_v52, %v14479_v19 }
 0x1ab   : > { %v2303_v8 = vpop.permute.xlu1 %2302  ;;  %v2298_v56 = vpop.permute.xlu0 %2297  ;;  %v1107_v38 = vmul.f32 %v14277_v28, %v14485_v9 }
 0x1ac   : > { %784 = vperm.xlu1 %13006, %v11807_v40   ;;  %779 = vperm.xlu0 %13005, %v11806_v48   ;;  %v2412_v55 = vmul.f32 %v14326_v21, %v2303_v8  ;;  %v2411_v24 = vmul.f32 %v14326_v21, %v2298_v56  ;;  %v13009_v8 = vld [vmem:[%s17774_s4 + $0x70] sm:$0xff]  }
 0x1ad   : > { %12314 = vmatprep.subr.bf16.mxu0 %v13009_v8  ;;  %v13019_v8 = vld [vmem:[%s17774_s4 + $0x48] sm:$0xff]  }
 0x1ae   : > { %v2444_v18 = vadd.f32 %v2412_v55, %v2183_v32  ;;  %v2443_v40 = vadd.f32 %v2411_v24, %v2182_v34  ;;  %12315 = vmatpush3.bf16.msra.mxu0 %v13010_v31  ;;  %v13013_v55 = vld [vmem:[%s17774_s4 + $0x60] sm:$0xff]   ;;  %v585_v32 = vmul.f32 %v14268_v57, %v14469_v35  ;;  %v584_v34 = vmul.f32 %v14268_v57, %v14472_v59  ;;  %v13015_v35 = vld [vmem:[%s17774_s4 + $0x58] sm:$0xff]  }
 0x1af   : > { %v14519_v30 = vpop.permute.xlu1 %1528  ;;  %v14522_v47 = vpop.permute.xlu0 %1523  ;;  %12316 = vmatprep.subr.bf16.mxu0 %v13011_v33  ;;  %v13014_v24 = vld [vmem:[%s17774_s4 + $0x20] sm:$0xff]   ;;  %v1368_v59 = vmul.f32 %v14290_v23, %v14507_v36 }
 0x1b0   : > { %1819 = vperm.xlu1 %13006, %v11840_v61   ;;  %1814 = vperm.xlu0 %13005, %v11839_v43   ;;  %v877_v9 = vadd.f32 %v845_v17, %v584_v34  ;;  %v13021_v34 = vld [vmem:[%s17774_s4 + $0x40] sm:$0xff]  }
 0x1b2   : > { %12317 = vmatpush3.bf16.msra.mxu0 %v13012_v58  ;;  %v13020_v58 = vld [vmem:[%s17774_s4 + $0x8] sm:$0xff]  }
 0x1b3   : > { %v2564_v27 = vpop.permute.xlu1 %2563  ;;  %v2559_v15 = vpop.permute.xlu0 %2558  ;;  %12318 = vmatprep.subr.bf16.mxu0 %v13013_v55 }
 0x1b4   : > { %v2673_v14 = vmul.f32 %v14333_v44, %v2564_v27  ;;  %1045 = vperm.xlu1 %13006, %v11840_v61   ;;  %v2672_v48 = vmul.f32 %v14333_v44, %v2559_v15  ;;  %1040 = vperm.xlu0 %13005, %v11839_v43   ;;  %v1106_v27 = vmul.f32 %v14277_v28, %v14487_v46  ;;  %v13016_v46 = vld [vmem:[%s17774_s4 + $0x18] sm:$0xff]  }
 0x1b6   : > { %v2705_v50 = vadd.f32 %v2673_v14, %v2444_v18  ;;  %v2704_v62 = vadd.f32 %v2672_v48, %v2443_v40  ;;  %12319 = vmatpush3.bf16.msra.mxu0 %v13014_v24  ;;  %v878_v18 = vadd.f32 %v846_v53, %v585_v32  ;;  %v1369_v14 = vmul.f32 %v14290_v23, %v14503_v54 }
 0x1b7   : > { %v14531_v16 = vpop.permute.xlu1 %493  ;;  %v14534_v37 = vpop.permute.xlu0 %488  ;;  %v1630_v54 = vmul.f32 %v14299_v29, %v14519_v30  ;;  %12320 = vmatprep.subr.bf16.mxu0 %v13015_v35  ;;  %v1138_v48 = vadd.f32 %v1106_v27, %v877_v9  ;;  %v13018_v30 = vld [vmem:[%s17774_s4 + $0x10] sm:$0xff]   ;;  %v13022_v9 = vld [vmem:[%s17774_s4] sm:$0xff]  }
 0x1b8   : > { %v2744_v60 = vmul.f32 %v14346_v5, %v2705_v50  ;;  %2081 = vperm.xlu1 %13006, %v11776_v63   ;;  %v2743_v61 = vmul.f32 %v14346_v5, %v2704_v62  ;;  %2076 = vperm.xlu0 %13005, %v14529_v20   ;;  %v1139_v40 = vadd.f32 %v1107_v38, %v878_v18  ;;  %v14643_v38 = vld [vmem:[%s13780_s25 + $0x138] sm:$0xff]  ;;  %v2989_v35 = vld [vmem:[#allocation2 + $0x10] sm:$0xff] }
 0x1ba   : > { %v2783_v43 = vadd.f32 %v14353_v45, %v2744_v60  ;;  %v2782_v22 = vadd.f32 %v14353_v45, %v2743_v61  ;;  %12321 = vmatpush3.bf16.msra.mxu0 %v13016_v46  ;;  %v1401_v62 = vadd.f32 %v1369_v14, %v1139_v40  ;;  %v1400_v61 = vadd.f32 %v1368_v59, %v1138_v48  ;;  %v2988_v14 = vld [vmem:[#allocation2 + $0x8] sm:$0xff] }
 0x1bb   : > { %v14540_v1 = vpop.permute.xlu1 %754  ;;  %v14542_v11 = vpop.permute.xlu0 %749  ;;  %v3020_v48 = vpack.c.bf16 %v2989_v35, %v2988_v14 }
 0x1bc   : > { %v2815_v39 = vmax.f32 %v2783_v43, 0.0  ;;  %1307 = vperm.xlu1 %13006, %v11776_v63   ;;  %v2814_v2 = vmax.f32 %v2782_v22, 0.0  ;;  %1302 = vperm.xlu0 %13005, %v14529_v20  }
 0x1be   : > { %2921 = vst.msk [vmem:[#allocation2 + $0xf0] sm:$0xff] %vm2834_vm0, %v2815_v39  ;;  %2920 = vst.msk [vmem:[#allocation2 + $0xe8] sm:$0xff] %vm2834_vm0, %v2814_v2 }
 0x1bf   : > { %v1790_v3 = vpop.permute.xlu1 %1789  ;;  %v1785_v10 = vpop.permute.xlu0 %1784 }
 0x1c0   : > { %2342 = vperm.xlu1 %13006, %v11809_v49   ;;  %2337 = vperm.xlu0 %13005, %v11808_v6   ;;  %v1891_v36 = vmul.f32 %v14308_v4, %v1790_v3  ;;  %v1890_v43 = vmul.f32 %v14308_v4, %v1785_v10  ;;  %v3085_v10 = vld [vmem:[#allocation2 + $0x2f] sm:$0xff] }
 0x1c3   : > { %v14561_v41 = vpop.permute.xlu1 %1015  ;;  %v14563_v56 = vpop.permute.xlu0 %1010 }
 0x1c4   : > { %1568 = vperm.xlu1 %13006, %v11809_v49   ;;  %1563 = vperm.xlu0 %13005, %v11808_v6  }
 0x1c7   : > { %v2052_v25 = vpop.permute.xlu1 %2051  ;;  %v2047_v51 = vpop.permute.xlu0 %2046 }
 0x1c8   : > { %2603 = vperm.xlu1 %13006, %v14569_v12   ;;  %2598 = vperm.xlu0 %13005, %v14575_v13   ;;  %v2153_v22 = vmul.f32 %v14315_v7, %v2052_v25  ;;  %v2152_v42 = vmul.f32 %v14315_v7, %v2047_v51 }
 0x1cb   : > { %v14597_v19 = vpop.permute.xlu1 %1277  ;;  %v14601_v15 = vpop.permute.xlu0 %1272 }
 0x1cc   : > { %533 = vperm.xlu1 %13006, %v11776_v63   ;;  %528 = vperm.xlu0 %13005, %v14529_v20   ;;  %v1629_v63 = vmul.f32 %v14299_v29, %v14522_v47  ;;  %v13017_v20 = vld [vmem:[%s17774_s4 + $0x50] sm:$0xff]   ;;  %v1662_v47 = vadd.f32 %v1630_v54, %v1401_v62  ;;  %v11778_v62 = vld [vmem:[%s13780_s25 + $0x140] sm:$0xff] }
 0x1cd   : > { %12322 = vmatprep.subr.bf16.mxu0 %v13017_v20 }
 0x1ce   : > { %v1661_v39 = vadd.f32 %v1629_v63, %v1400_v61  ;;  %12323 = vmatpush3.bf16.msra.mxu0 %v13018_v30 }
 0x1cf   : > { %v2313_v50 = vpop.permute.xlu1 %2312  ;;  %v2308_v60 = vpop.permute.xlu0 %2307  ;;  %12324 = vmatprep.subr.bf16.mxu0 %v13019_v8  ;;  %v14683_v8 = vld [vmem:[%s13780_s25 + $0x142] sm:$0xff] }
 0x1d0   : > { %794 = vperm.xlu1 %13006, %v11809_v49   ;;  %789 = vperm.xlu0 %13005, %v11808_v6   ;;  %v1923_v49 = vadd.f32 %v1891_v36, %v1662_v47  ;;  %v2414_v26 = vmul.f32 %v14326_v21, %v2313_v50  ;;  %v3084_v6 = vld [vmem:[#allocation2 + $0x27] sm:$0xff]  ;;  %v1922_v31 = vadd.f32 %v1890_v43, %v1661_v39 }
 0x1d1   : > { %v2413_v33 = vmul.f32 %v14326_v21, %v2308_v60  ;;  %v3116_v55 = vpack.c.bf16 %v3085_v10, %v3084_v6  ;;  %v11811_v47 = vld [vmem:[%s13780_s25 + $0x141] sm:$0xff]  ;;  %v847_v10 = vmul.f32 %v14259_v52, %v14542_v11 }
 0x1d2   : > { %v2185_v25 = vadd.f32 %v2153_v22, %v1923_v49  ;;  %v2184_v53 = vadd.f32 %v2152_v42, %v1922_v31  ;;  %12325 = vmatpush3.bf16.msra.mxu0 %v13020_v58  ;;  %v11810_v22 = vld [vmem:[%s13780_s25 + $0x139] sm:$0xff]  ;;  %v587_v31 = vmul.f32 %v14268_v57, %v14531_v16 }
 0x1d3   : > { %v14626_v2 = vpop.permute.xlu1 %1538  ;;  %v14629_v3 = vpop.permute.xlu0 %1533  ;;  %12326 = vmatprep.subr.bf16.mxu0 %v13021_v34  ;;  %v11843_v58 = vld [vmem:[%s13780_s25 + $0x13a] sm:$0xff] }
 0x1d4   : > { %1829 = vperm.xlu1 %13006, %v14569_v12   ;;  %1824 = vperm.xlu0 %13005, %v14575_v13   ;;  %v2446_v17 = vadd.f32 %v2414_v26, %v2185_v25  ;;  %v2445_v27 = vadd.f32 %v2413_v33, %v2184_v53  ;;  %v848_v26 = vmul.f32 %v14259_v52, %v14540_v1 }
 0x1d5   : > { %v1109_v33 = vmul.f32 %v14277_v28, %v14561_v41  ;;  %v586_v25 = vmul.f32 %v14268_v57, %v14534_v37  ;;  %v1108_v1 = vmul.f32 %v14277_v28, %v14563_v56  ;;  %v1371_v52 = vmul.f32 %v14290_v23, %v14597_v19 }
 0x1d6   : > { %12327 = vmatpush3.bf16.msra.mxu0 %v13022_v9  ;;  %v1370_v41 = vmul.f32 %v14290_v23, %v14601_v15  ;;  %v1632_v57 = vmul.f32 %v14299_v29, %v14626_v2  ;;  %v1631_v37 = vmul.f32 %v14299_v29, %v14629_v3 }
 0x1d7   : > { %v2574_v51 = vpop.permute.xlu1 %2573  ;;  %v2569_v32 = vpop.permute.xlu0 %2568  ;;  %v879_v16 = vadd.f32 %v847_v10, %v586_v25  ;;  %v2991_v10 = vld [vmem:[#allocation2 + $0x30] sm:$0xff]  ;;  %v11780_v25 = vld [vmem:[%s13780_s25 + $0x158] sm:$0xff] }
 0x1d8   : > { %v2675_v24 = vmul.f32 %v14333_v44, %v2574_v51  ;;  %1050 = vperm.xlu1 %13006, %v14575_v13   ;;  %v2674_v18 = vmul.f32 %v14333_v44, %v2569_v32  ;;  %3437 = vrot.lane.b32.xlu0 %v3116_v55, %s13649_s11  ;;  %v880_v51 = vadd.f32 %v848_v26, %v587_v31 }
 0x1d9   : > { %v1140_v28 = vadd.f32 %v1108_v1, %v879_v16  ;;  %v11813_v16 = vld [vmem:[%s13780_s25 + $0x159] sm:$0xff] }
 0x1da   : > { %v2707_v13 = vadd.f32 %v2675_v24, %v2446_v17  ;;  %v2706_v59 = vadd.f32 %v2674_v18, %v2445_v27  ;;  %v1141_v55 = vadd.f32 %v1109_v33, %v880_v51 }
 0x1db   : > { %v14653_v46 = vpop.permute.xlu1 %503  ;;  %v14656_v54 = vpop.permute.xlu0 %498  ;;  %v1402_v32 = vadd.f32 %v1370_v41, %v1140_v28 }
 0x1dc   : > { %v2746_v40 = vmul.f32 %v14346_v5, %v2707_v13  ;;  %2086 = vperm.xlu1 %13006, %v14643_v38   ;;  %v2745_v63 = vmul.f32 %v14346_v5, %v2706_v59  ;;  %1055 = vperm.xlu0 %13005, %v14569_v12   ;;  %v1403_v17 = vadd.f32 %v1371_v52, %v1141_v55  ;;  %v14755_v55 = vld [vmem:[%s17771_s1 + $0x1] ss:$0 sm:$0xff] }
 0x1dd   : > { %v1663_v27 = vadd.f32 %v1631_v37, %v1402_v32 }
 0x1de   : > { %v2785_v50 = vadd.f32 %v14353_v45, %v2746_v40  ;;  %v2784_v36 = vadd.f32 %v14353_v45, %v2745_v63  ;;  %v1664_v23 = vadd.f32 %v1632_v57, %v1403_v17  ;;  %v3087_v63 = vld [vmem:[#allocation2 + $0x4f] sm:$0xff] }
 0x1df   : > { %v14664_v60 = vpop.permute.xlu1 %764  ;;  %v14666_v61 = vpop.permute.xlu0 %759 }
 0x1e0   : > { %v2817_v20 = vmax.f32 %v2785_v50, 0.0  ;;  %3389 = vrot.lane.b32.xlu1 %v3020_v48, %s13649_s11  ;;  %v2816_v43 = vmax.f32 %v2784_v36, 0.0  ;;  %2091 = vperm.xlu0 %13005, %v11778_v62   ;;  %v850_v57 = vmul.f32 %v14755_v55, %v14664_v60  ;;  %v849_v37 = vmul.f32 %v14755_v55, %v14666_v61  ;;  %v14772_v60 = vld [vmem:[%s17771_s1 + $0x2] ss:$0 sm:$0xff] }
 0x1e2   : > { %2923 = vst.msk [vmem:[#allocation2 + $0x110] sm:$0xff] %vm2834_vm0, %v2817_v20  ;;  %2922 = vst.msk [vmem:[#allocation2 + $0x108] sm:$0xff] %vm2834_vm0, %v2816_v43 }
 0x1e3   : > { %v1800_v12 = vpop.permute.xlu1 %1799  ;;  %v1795_v30 = vpop.permute.xlu0 %1794 }
 0x1e4   : > { %1317 = vperm.xlu1 %13006, %v11778_v62   ;;  %1312 = vperm.xlu0 %13005, %v14643_v38   ;;  %v1893_v19 = vmul.f32 %v14308_v4, %v1800_v12  ;;  %v1892_v34 = vmul.f32 %v14308_v4, %v1795_v30 }
 0x1e6   : > { %v1925_v29 = vadd.f32 %v1893_v19, %v1664_v23  ;;  %v1924_v35 = vadd.f32 %v1892_v34, %v1663_v27 }
 0x1e7   : > { %v14674_v39 = vpop.permute.xlu1 %1025  ;;  %v14676_v42 = vpop.permute.xlu0 %1020 }
 0x1e8   : > { %2352 = vperm.xlu1 %13006, %v11811_v47   ;;  %2347 = vperm.xlu0 %13005, %v11810_v22   ;;  %v1111_v19 = vmul.f32 %v14772_v60, %v14674_v39 }
 0x1eb   : > { %v2062_v49 = vpop.permute.xlu1 %2061  ;;  %v2057_v6 = vpop.permute.xlu0 %2056 }
 0x1ec   : > { %1578 = vperm.xlu1 %13006, %v11811_v47   ;;  %1573 = vperm.xlu0 %13005, %v11810_v22   ;;  %v2155_v15 = vmul.f32 %v14315_v7, %v2062_v49  ;;  %v2154_v2 = vmul.f32 %v14315_v7, %v2057_v6  ;;  %v3086_v7 = vld [vmem:[#allocation2 + $0x47] sm:$0xff] }
 0x1ed   : > { %v3117_v43 = vpack.c.bf16 %v3087_v63, %v3086_v7  ;;  %v2990_v6 = vld [vmem:[#allocation2 + $0x28] sm:$0xff] }
 0x1ee   : > { %v2187_v4 = vadd.f32 %v2155_v15, %v1925_v29  ;;  %v11845_v29 = vld [vmem:[%s13780_s25 + $0x152] sm:$0xff] }
 0x1ef   : > { %v14694_v53 = vpop.permute.xlu1 %1287  ;;  %v14698_v11 = vpop.permute.xlu0 %1282 }
 0x1f0   : > { %2613 = vperm.xlu1 %13006, %v14683_v8   ;;  %2608 = vperm.xlu0 %13005, %v11843_v58  }
 0x1f3   : > { %v2323_v56 = vpop.permute.xlu1 %2322  ;;  %v2318_v24 = vpop.permute.xlu0 %2317 }
 0x1f4   : > { %543 = vperm.xlu1 %13006, %v11778_v62   ;;  %538 = vperm.xlu0 %13005, %v14643_v38   ;;  %v2416_v3 = vmul.f32 %v14326_v21, %v2323_v56  ;;  %v2415_v9 = vmul.f32 %v14326_v21, %v2318_v24  ;;  %v2186_v38 = vadd.f32 %v2154_v2, %v1924_v35  ;;  %v14765_v56 = vld [vmem:[%s17771_s1] ss:$0 sm:$0xff]  ;;  %v14800_v2 = vld [vmem:[%s17771_s1 + $0x4] ss:$0 sm:$0xff] }
 0x1f5   : > { %v589_v17 = vmul.f32 %v14765_v56, %v14653_v46  ;;  %v588_v61 = vmul.f32 %v14765_v56, %v14656_v54  ;;  %v1110_v24 = vmul.f32 %v14772_v60, %v14676_v42  ;;  %v14785_v46 = vld [vmem:[%s17771_s1 + $0x3] ss:$0 sm:$0xff]  ;;  %v14795_v42 = vld [vmem:[%s13780_s25 + $0x15a] sm:$0xff] }
 0x1f6   : > { %v2448_v59 = vadd.f32 %v2416_v3, %v2187_v4  ;;  %v2447_v50 = vadd.f32 %v2415_v9, %v2186_v38  ;;  %v1373_v23 = vmul.f32 %v14785_v46, %v14694_v53  ;;  %v1372_v54 = vmul.f32 %v14785_v46, %v14698_v11  ;;  %v14810_v4 = vld [vmem:[%s17771_s1 + $0x5] ss:$0 sm:$0xff] }
 0x1f7   : > { %v14712_v18 = vpop.permute.xlu1 %1548  ;;  %v14715_v14 = vpop.permute.xlu0 %1543  ;;  %v882_v34 = vadd.f32 %v850_v57, %v589_v17  ;;  %v881_v39 = vadd.f32 %v849_v37, %v588_v61  ;;  %v14847_v57 = vld [vmem:[%s17772_s2] ss:$0 sm:$0xff]  ;;  %v3089_v17 = vld [vmem:[#allocation2 + $0x6f] sm:$0xff] }
 0x1f8   : > { %804 = vperm.xlu1 %13006, %v11811_v47   ;;  %799 = vperm.xlu0 %13005, %v11810_v22   ;;  %v14729_v22 = vld [vmem:[%s13780_s25 + $0x150] sm:$0xff]  ;;  %v1634_v53 = vmul.f32 %v14800_v2, %v14712_v18  ;;  %v1633_v35 = vmul.f32 %v14800_v2, %v14715_v14  ;;  %v14818_v14 = vld [vmem:[%s17771_s1 + $0x6] ss:$0 sm:$0xff] }
 0x1f9   : > { %v1143_v27 = vadd.f32 %v1111_v19, %v882_v34  ;;  %v1142_v3 = vadd.f32 %v1110_v24, %v881_v39  ;;  %v14857_v19 = vld [vmem:[%s17773_s3] ss:$0 sm:$0xff] }
 0x1fb   : > { %v2584_v13 = vpop.permute.xlu1 %2583  ;;  %v2579_v48 = vpop.permute.xlu0 %2578  ;;  %v1405_v11 = vadd.f32 %v1373_v23, %v1143_v27 }
 0x1fc   : > { %v2677_v40 = vmul.f32 %v14333_v44, %v2584_v13  ;;  %1839 = vperm.xlu1 %13006, %v14683_v8   ;;  %v2676_v62 = vmul.f32 %v14333_v44, %v2579_v48  ;;  %1834 = vperm.xlu0 %13005, %v11843_v58  }
 0x1fe   : > { %v2709_v36 = vadd.f32 %v2677_v40, %v2448_v59  ;;  %v2708_v20 = vadd.f32 %v2676_v62, %v2447_v50  ;;  %v1404_v59 = vadd.f32 %v1372_v54, %v1142_v3  ;;  %v1666_v40 = vadd.f32 %v1634_v53, %v1405_v11  ;;  %v14867_v53 = vld [vmem:[%s13780_s25 + $0x168] sm:$0xff] }
 0x1ff   : > { %v14721_v21 = vpop.permute.xlu1 %513  ;;  %v14724_v30 = vpop.permute.xlu0 %508 }
 0x200   : > { %v2748_v12 = vmul.f32 %v14346_v5, %v2709_v36  ;;  %1060 = vperm.xlu1 %13006, %v11843_v58   ;;  %v2747_v47 = vmul.f32 %v14346_v5, %v2708_v20  ;;  %3439 = vrot.lane.b32.xlu0 %v3117_v43, %s13649_s11  ;;  %v3021_v58 = vpack.c.bf16 %v2991_v10, %v2990_v6  ;;  %v14827_v36 = vld [vmem:[%s17771_s1 + $0x7] ss:$0 sm:$0xff] }
 0x201   : > { %v1665_v7 = vadd.f32 %v1633_v35, %v1404_v59  ;;  %v2992_v35 = vld [vmem:[#allocation2 + $0x48] sm:$0xff] }
 0x202   : > { %v2787_v44 = vadd.f32 %v14353_v45, %v2748_v12  ;;  %v2786_v49 = vadd.f32 %v14353_v45, %v2747_v47 }
 0x203   : > { %v14733_v26 = vpop.permute.xlu1 %774  ;;  %v14735_v33 = vpop.permute.xlu0 %769 }
 0x204   : > { %v2819_v31 = vmax.f32 %v2787_v44, 0.0  ;;  %2096 = vperm.xlu1 %13006, %v14729_v22   ;;  %v2818_v5 = vmax.f32 %v2786_v49, 0.0  ;;  %1065 = vperm.xlu0 %13005, %v14683_v8   ;;  %v14750_v8 = vld [vmem:[%s13780_s25 + $0x151] sm:$0xff] }
 0x206   : > { %2925 = vst.msk [vmem:[#allocation2 + $0x130] sm:$0xff] %vm2834_vm0, %v2819_v31  ;;  %2924 = vst.msk [vmem:[#allocation2 + $0x128] sm:$0xff] %vm2834_vm0, %v2818_v5  ;;  %v14837_v31 = vld [vmem:[%s17771_s1 + $0x8] ss:$0 sm:$0xff] }
 0x207   : > { %v1810_v45 = vpop.permute.xlu1 %1809  ;;  %v1805_v1 = vpop.permute.xlu0 %1804 }
 0x208   : > { %3391 = vrot.lane.b32.xlu1 %v3021_v58, %s13649_s11  ;;  %2101 = vperm.xlu0 %13005, %v11780_v25   ;;  %v1895_v38 = vmul.f32 %v14810_v4, %v1810_v45  ;;  %v1894_v18 = vmul.f32 %v14810_v4, %v1805_v1 }
 0x20a   : > { %v1927_v62 = vadd.f32 %v1895_v38, %v1666_v40  ;;  %v1926_v12 = vadd.f32 %v1894_v18, %v1665_v7  ;;  %v11782_v38 = vld [vmem:[%s13780_s25 + $0x170] sm:$0xff]  ;;  %v852_v40 = vmul.f32 %v14755_v55, %v14733_v26 }
 0x20b   : > { %v14743_v51 = vpop.permute.xlu1 %1035  ;;  %v14745_v52 = vpop.permute.xlu0 %1030  ;;  %v11815_v7 = vld [vmem:[%s13780_s25 + $0x171] sm:$0xff] }
 0x20c   : > { %1327 = vperm.xlu1 %13006, %v11780_v25   ;;  %1322 = vperm.xlu0 %13005, %v14729_v22   ;;  %v1112_v26 = vmul.f32 %v14772_v60, %v14745_v52 }
 0x20f   : > { %v2072_v41 = vpop.permute.xlu1 %2071  ;;  %v2067_v28 = vpop.permute.xlu0 %2066 }
 0x210   : > { %2362 = vperm.xlu1 %13006, %v11813_v16   ;;  %2357 = vperm.xlu0 %13005, %v14750_v8   ;;  %v2157_v48 = vmul.f32 %v14818_v14, %v2072_v41  ;;  %v2156_v63 = vmul.f32 %v14818_v14, %v2067_v28 }
 0x212   : > { %v2189_v44 = vadd.f32 %v2157_v48, %v1927_v62  ;;  %v2188_v49 = vadd.f32 %v2156_v63, %v1926_v12  ;;  %v591_v63 = vmul.f32 %v14765_v56, %v14721_v21  ;;  %v1113_v62 = vmul.f32 %v14772_v60, %v14743_v51 }
 0x213   : > { %v14780_v32 = vpop.permute.xlu1 %1297  ;;  %v14789_v15 = vpop.permute.xlu0 %1292  ;;  %v590_v12 = vmul.f32 %v14765_v56, %v14724_v30 }
 0x214   : > { %1588 = vperm.xlu1 %13006, %v11813_v16   ;;  %1583 = vperm.xlu0 %13005, %v14750_v8   ;;  %v1374_v51 = vmul.f32 %v14785_v46, %v14789_v15  ;;  %v11848_v15 = vld [vmem:[%s13780_s25 + $0x172] sm:$0xff] }
 0x217   : > { %v2333_v9 = vpop.permute.xlu1 %2332  ;;  %v2328_v13 = vpop.permute.xlu0 %2327 }
 0x218   : > { %2623 = vperm.xlu1 %13006, %v14795_v42   ;;  %2618 = vperm.xlu0 %13005, %v11845_v29   ;;  %v2418_v20 = vmul.f32 %v14827_v36, %v2333_v9  ;;  %v2417_v47 = vmul.f32 %v14827_v36, %v2328_v13  ;;  %v2993_v9 = vld [vmem:[#allocation2 + $0x50] sm:$0xff] }
 0x21a   : > { %v2450_v10 = vadd.f32 %v2418_v20, %v2189_v44  ;;  %v2449_v45 = vadd.f32 %v2417_v47, %v2188_v49  ;;  %v11814_v20 = vld [vmem:[%s13780_s25 + $0x169] sm:$0xff]  ;;  %v884_v44 = vadd.f32 %v852_v40, %v591_v63 }
 0x21b   : > { %v14822_v50 = vpop.permute.xlu1 %1558  ;;  %v14830_v43 = vpop.permute.xlu0 %1553 }
 0x21c   : > { %553 = vperm.xlu1 %13006, %v11780_v25   ;;  %548 = vperm.xlu0 %13005, %v14729_v22   ;;  %v1145_v30 = vadd.f32 %v1113_v62, %v884_v44  ;;  %v1636_v52 = vmul.f32 %v14800_v2, %v14822_v50 }
 0x21f   : > { %v2594_v6 = vpop.permute.xlu1 %2593  ;;  %v2589_v58 = vpop.permute.xlu0 %2588 }
 0x220   : > { %v2679_v5 = vmul.f32 %v14837_v31, %v2594_v6  ;;  %814 = vperm.xlu1 %13006, %v11813_v16   ;;  %v2678_v25 = vmul.f32 %v14837_v31, %v2589_v58  ;;  %809 = vperm.xlu0 %13005, %v14750_v8   ;;  %v3088_v16 = vld [vmem:[#allocation2 + $0x67] sm:$0xff] }
 0x221   : > { %v3118_v23 = vpack.c.bf16 %v3089_v17, %v3088_v16  ;;  %v11847_v16 = vld [vmem:[%s13780_s25 + $0x16a] sm:$0xff] }
 0x222   : > { %v2711_v1 = vadd.f32 %v2679_v5, %v2450_v10  ;;  %v2710_v22 = vadd.f32 %v2678_v25, %v2449_v45  ;;  %v1635_v10 = vmul.f32 %v14800_v2, %v14830_v43 }
 0x223   : > { %v14842_v41 = vpop.permute.xlu1 %523  ;;  %v14850_v37 = vpop.permute.xlu0 %518 }
 0x224   : > { %v2750_v28 = vmul.f32 %v14847_v57, %v2711_v1  ;;  %1849 = vperm.xlu1 %13006, %v14795_v42   ;;  %v2749_v8 = vmul.f32 %v14847_v57, %v2710_v22  ;;  %1844 = vperm.xlu0 %13005, %v11845_v29  }
 0x226   : > { %v2789_v61 = vadd.f32 %v14857_v19, %v2750_v28  ;;  %v2788_v24 = vadd.f32 %v14857_v19, %v2749_v8 }
 0x227   : > { %v14861_v34 = vpop.permute.xlu1 %784  ;;  %v14863_v54 = vpop.permute.xlu0 %779 }
 0x228   : > { %v2821_v39 = vmax.f32 %v2789_v61, 0.0  ;;  %1070 = vperm.xlu1 %13006, %v11845_v29   ;;  %v2820_v27 = vmax.f32 %v2788_v24, 0.0  ;;  %3441 = vrot.lane.b32.xlu0 %v3118_v23, %s13649_s11  ;;  %v14873_v29 = vpack.c.bf16 %v2993_v9, %v2992_v35 }
 0x22a   : > { %2927 = vst.msk [vmem:[#allocation2 + $0x150] sm:$0xff] %vm2834_vm0, %v2821_v39  ;;  %2926 = vst.msk [vmem:[#allocation2 + $0x148] sm:$0xff] %vm2834_vm0, %v2820_v27 }
 0x22b   : > { %v1820_v3 = vpop.permute.xlu1 %1819  ;;  %v1815_v11 = vpop.permute.xlu0 %1814 }
 0x22c   : > { %2106 = vperm.xlu1 %13006, %v14867_v53   ;;  %1075 = vperm.xlu0 %13005, %v14795_v42   ;;  %v851_v42 = vmul.f32 %v14755_v55, %v14735_v33  ;;  %v1375_v33 = vmul.f32 %v14785_v46, %v14780_v32  ;;  %v1897_v58 = vmul.f32 %v14810_v4, %v1820_v3 }
 0x22d   : > { %v1896_v1 = vmul.f32 %v14810_v4, %v1815_v11 }
 0x22e   : > { %v883_v21 = vadd.f32 %v851_v42, %v590_v12  ;;  %v1407_v32 = vadd.f32 %v1375_v33, %v1145_v30  ;;  %v3090_v30 = vld [vmem:[#allocation2 + $0x87] sm:$0xff] }
 0x22f   : > { %v14876_v13 = vpop.permute.xlu1 %1045  ;;  %v14878_v59 = vpop.permute.xlu0 %1040 }
 0x230   : > { %3393 = vrot.lane.b32.xlu1 %v14873_v29, %s13649_s11  ;;  %2111 = vperm.xlu0 %13005, %v11782_v38   ;;  %v1144_v6 = vadd.f32 %v1112_v26, %v883_v21  ;;  %v1668_v22 = vadd.f32 %v1636_v52, %v1407_v32  ;;  %v3091_v52 = vld [vmem:[#allocation2 + $0x8f] sm:$0xff] }
 0x232   : > { %v1406_v25 = vadd.f32 %v1374_v51, %v1144_v6  ;;  %v1929_v43 = vadd.f32 %v1897_v58, %v1668_v22  ;;  %v11783_v58 = vld [vmem:[%s13780_s25 + $0x180] sm:$0xff]  ;;  %v2995_v22 = vld [vmem:[#allocation2 + $0x70] sm:$0xff] }
 0x233   : > { %v2082_v18 = vpop.permute.xlu1 %2081  ;;  %v2077_v48 = vpop.permute.xlu0 %2076 }
 0x234   : > { %1337 = vperm.xlu1 %13006, %v11782_v38   ;;  %1332 = vperm.xlu0 %13005, %v14867_v53   ;;  %v2159_v28 = vmul.f32 %v14818_v14, %v2082_v18  ;;  %v1667_v50 = vadd.f32 %v1635_v10, %v1406_v25  ;;  %v2158_v17 = vmul.f32 %v14818_v14, %v2077_v48  ;;  %v3037_v10 = vld [vmem:[#allocation2 + $0x11] sm:$0xff] }
 0x236   : > { %v1928_v23 = vadd.f32 %v1896_v1, %v1667_v50  ;;  %v2191_v27 = vadd.f32 %v2159_v28, %v1929_v43  ;;  %v2994_v1 = vld [vmem:[#allocation2 + $0x68] sm:$0xff] }
 0x237   : > { %v14897_v47 = vpop.permute.xlu1 %1307  ;;  %v14901_v49 = vpop.permute.xlu0 %1302  ;;  %v2941_v43 = vld [vmem:[#allocation2 + $0xf] sm:$0xff] }
 0x238   : > { %2372 = vperm.xlu1 %13006, %v11815_v7   ;;  %2367 = vperm.xlu0 %13005, %v11814_v20   ;;  %v2190_v3 = vadd.f32 %v2158_v17, %v1928_v23  ;;  %v2940_v17 = vld [vmem:[#allocation2 + $0x7] sm:$0xff] }
 0x23b   : > { %v2343_v5 = vpop.permute.xlu1 %2342  ;;  %v2338_v45 = vpop.permute.xlu0 %2337 }
 0x23c   : > { %1598 = vperm.xlu1 %13006, %v11815_v7   ;;  %1593 = vperm.xlu0 %13005, %v11814_v20   ;;  %v2420_v61 = vmul.f32 %v14827_v36, %v2343_v5  ;;  %v2419_v39 = vmul.f32 %v14827_v36, %v2338_v45  ;;  %v14938_v5 = vpack.c.bf16 %v3091_v52, %v3090_v30 }
 0x23e   : > { %v2452_v9 = vadd.f32 %v2420_v61, %v2191_v27  ;;  %v2451_v40 = vadd.f32 %v2419_v39, %v2190_v3  ;;  %v14946_v61 = vpack.c.bf16 %v2995_v22, %v2994_v1  ;;  %v2972_v27 = vpack.c.bf16 %v2941_v43, %v2940_v17  ;;  %v11849_v1 = vld [vmem:[%s13780_s25 + $0x182] sm:$0xff] }
 0x23f   : > { %v14915_v8 = vpop.permute.xlu1 %1568  ;;  %v14918_v24 = vpop.permute.xlu0 %1563 }
 0x240   : > { %2633 = vperm.xlu1 %13006, %v11848_v15   ;;  %2628 = vperm.xlu0 %13005, %v11847_v16  }
 0x243   : > { %v2604_v35 = vpop.permute.xlu1 %2603  ;;  %v2599_v18 = vpop.permute.xlu0 %2598 }
 0x244   : > { %v2681_v11 = vmul.f32 %v14837_v31, %v2604_v35  ;;  %563 = vperm.xlu1 %13006, %v11782_v38   ;;  %v2680_v48 = vmul.f32 %v14837_v31, %v2599_v18  ;;  %558 = vperm.xlu0 %13005, %v14867_v53   ;;  %v11817_v18 = vld [vmem:[%s13780_s25 + $0x189] sm:$0xff] }
 0x246   : > { %v2713_v42 = vadd.f32 %v2681_v11, %v2452_v9  ;;  %v2712_v63 = vadd.f32 %v2680_v48, %v2451_v40  ;;  %v853_v11 = vmul.f32 %v14755_v55, %v14863_v54  ;;  %v593_v40 = vmul.f32 %v14765_v56, %v14842_v41 }
 0x247   : > { %v14924_v62 = vpop.permute.xlu1 %533  ;;  %v14927_v26 = vpop.permute.xlu0 %528  ;;  %v1115_v48 = vmul.f32 %v14772_v60, %v14876_v13  ;;  %v1377_v54 = vmul.f32 %v14785_v46, %v14897_v47  ;;  %v1376_v13 = vmul.f32 %v14785_v46, %v14901_v49  ;;  %v11850_v49 = vld [vmem:[%s13780_s25 + $0x18a] sm:$0xff] }
 0x248   : > { %v2752_v12 = vmul.f32 %v14847_v57, %v2713_v42  ;;  %824 = vperm.xlu1 %13006, %v11815_v7   ;;  %v2751_v44 = vmul.f32 %v14847_v57, %v2712_v63  ;;  %819 = vperm.xlu0 %13005, %v11814_v20   ;;  %v3036_v7 = vld [vmem:[#allocation2 + $0x9] sm:$0xff]  ;;  %v11816_v42 = vld [vmem:[%s13780_s25 + $0x181] sm:$0xff]  ;;  %v1114_v63 = vmul.f32 %v14772_v60, %v14878_v59 }
 0x249   : > { %v3068_v45 = vpack.c.bf16 %v3037_v10, %v3036_v7  ;;  %v1638_v59 = vmul.f32 %v14800_v2, %v14915_v8 }
 0x24a   : > { %v2791_v33 = vadd.f32 %v14857_v19, %v2752_v12  ;;  %v2790_v38 = vadd.f32 %v14857_v19, %v2751_v44 }
 0x24b   : > { %v14932_v21 = vpop.permute.xlu1 %794  ;;  %v14934_v53 = vpop.permute.xlu0 %789 }
 0x24c   : > { %v2823_v51 = vmax.f32 %v2791_v33, 0.0  ;;  %1859 = vperm.xlu1 %13006, %v11848_v15   ;;  %v2822_v6 = vmax.f32 %v2790_v38, 0.0  ;;  %1854 = vperm.xlu0 %13005, %v11847_v16  }
 0x24e   : > { %2929 = vst.msk [vmem:[#allocation2 + $0x170] sm:$0xff] %vm2834_vm0, %v2823_v51  ;;  %2928 = vst.msk [vmem:[#allocation2 + $0x168] sm:$0xff] %vm2834_vm0, %v2822_v6  ;;  %v1637_v51 = vmul.f32 %v14800_v2, %v14918_v24 }
 0x24f   : > { %v1830_v20 = vpop.permute.xlu1 %1829  ;;  %v1825_v32 = vpop.permute.xlu0 %1824 }
 0x250   : > { %1080 = vperm.xlu1 %13006, %v11847_v16   ;;  %3443 = vrot.lane.b32.xlu0 %v14938_v5, %s13649_s11  ;;  %v11784_v16 = vld [vmem:[%s13780_s25 + $0x188] sm:$0xff]  ;;  %v1899_v52 = vmul.f32 %v14810_v4, %v1830_v20  ;;  %v1898_v10 = vmul.f32 %v14810_v4, %v1825_v32 }
 0x253   : > { %v14943_v25 = vpop.permute.xlu1 %1050  ;;  %v3438_v28 = vpop.permute.xlu0 %3437 }
 0x254   : > { %2116 = vperm.xlu1 %13006, %v11783_v58   ;;  %1085 = vperm.xlu0 %13005, %v11848_v15   ;;  %v3631_v50 = vsel %vm2834_vm0, %v3068_v45, %v3438_v28  ;;  %v854_v15 = vmul.f32 %v14755_v55, %v14861_v34  ;;  %v592_v34 = vmul.f32 %v14765_v56, %v14850_v37 }
 0x255   : > { %4196 = vmatprep.mubr.bf16.mxu0 %v3631_v50 }
 0x256   : > { %v886_v44 = vadd.f32 %v854_v15, %v593_v40  ;;  %v885_v41 = vadd.f32 %v853_v11, %v592_v34  ;;  %v11785_v40 = vld [vmem:[%s13780_s25 + $0x198] sm:$0xff] }
 0x257   : > { %v2087_v23 = vpop.permute.xlu1 %2086  ;;  %v14949_v39 = vpop.permute.xlu0 %1055 }
 0x258   : > { %3395 = vrot.lane.b32.xlu1 %v14946_v61, %s13649_s11  ;;  %2121 = vperm.xlu0 %13005, %v11784_v16   ;;  %v1147_v37 = vadd.f32 %v1115_v48, %v886_v44  ;;  %v1146_v38 = vadd.f32 %v1114_v63, %v885_v41  ;;  %v2160_v22 = vmul.f32 %v14818_v14, %v2087_v23  ;;  %v2996_v44 = vld [vmem:[#allocation2 + $0x88] sm:$0xff] }
 0x25a   : > { %v1409_v47 = vadd.f32 %v1377_v54, %v1147_v37  ;;  %v1408_v7 = vadd.f32 %v1376_v13, %v1146_v38  ;;  %v2997_v54 = vld [vmem:[#allocation2 + $0x90] sm:$0xff] }
 0x25b   : > { %v3390_v3 = vpop.permute.xlu1 %3389  ;;  %v2092_v35 = vpop.permute.xlu0 %2091  ;;  %v15006_v38 = vpack.c.bf16 %v2997_v54, %v2996_v44  ;;  %v2942_v44 = vld [vmem:[#allocation2 + $0x27] sm:$0xff]  ;;  %v2943_v54 = vld [vmem:[#allocation2 + $0x2f] sm:$0xff] }
 0x25c   : > { %1347 = vperm.xlu1 %13006, %v11784_v16   ;;  %v3567_v9 = vsel %vm2834_vm0, %v2972_v27, %v3390_v3  ;;  %1342 = vperm.xlu0 %13005, %v11783_v58   ;;  %v1670_v58 = vadd.f32 %v1638_v59, %v1409_v47  ;;  %v2161_v45 = vmul.f32 %v14818_v14, %v2092_v35  ;;  %v3092_v35 = vld [vmem:[#allocation2 + $0xa7] sm:$0xff] }
 0x25d   : > { %4197 = vmatmul.mubr.bf16.vlgmr.msra.gmra.mxu0 %v3567_v9  ;;  %v1669_v8 = vadd.f32 %v1637_v51, %v1408_v7  ;;  %v3093_v9 = vld [vmem:[#allocation2 + $0xaf] sm:$0xff]  ;;  %v11786_v51 = vld [vmem:[%s13780_s25 + $0x1a0] sm:$0xff] }
 0x25e   : > { %v1931_v24 = vadd.f32 %v1899_v52, %v1670_v58  ;;  %v14997_v63 = vpack.c.bf16 %v3093_v9, %v3092_v35  ;;  %v11819_v58 = vld [vmem:[%s13780_s25 + $0x1a1] sm:$0xff] }
 0x25f   : > { %v14968_v12 = vpop.permute.xlu1 %1317  ;;  %v14972_v33 = vpop.permute.xlu0 %1312  ;;  %v1930_v17 = vadd.f32 %v1898_v10, %v1669_v8  ;;  %v13028_v35 = vld [vmem:[%s17774_s4 + $0xa8] sm:$0xff]  }
 0x260   : > { %2382 = vperm.xlu1 %13006, %v11817_v18   ;;  %2377 = vperm.xlu0 %13005, %v11816_v42   ;;  %v2193_v43 = vadd.f32 %v2161_v45, %v1931_v24  ;;  %v11818_v45 = vld [vmem:[%s13780_s25 + $0x199] sm:$0xff] }
 0x261   : > { %v2192_v16 = vadd.f32 %v2160_v22, %v1930_v17  ;;  %v13026_v22 = vld [vmem:[%s17774_s4 + $0xb0] sm:$0xff]  }
 0x262   : > { %v3039_v17 = vld [vmem:[#allocation2 + $0x31] sm:$0xff] }
 0x263   : > { %v2353_v30 = vpop.permute.xlu1 %2352  ;;  %v2348_v6 = vpop.permute.xlu0 %2347 }
 0x264   : > { %1608 = vperm.xlu1 %13006, %v11817_v18   ;;  %1603 = vperm.xlu0 %13005, %v11816_v42   ;;  %v2422_v50 = vmul.f32 %v14827_v36, %v2353_v30  ;;  %v2421_v32 = vmul.f32 %v14827_v36, %v2348_v6  ;;  %v13023_v30 = vld [vmem:[%s17774_s4 + $0xf8] sm:$0xff]  }
 0x265   : > { %v13024_v6 = vld [vmem:[%s17774_s4 + $0xb8] sm:$0xff]   ;;  %12424 = vmatprep.subr.bf16.mxu1 %v13023_v30  ;;  %v13030_v30 = vld [vmem:[%s17774_s4 + $0xa0] sm:$0xff]  }
 0x266   : > { %v2454_v3 = vadd.f32 %v2422_v50, %v2193_v43  ;;  %v2453_v11 = vadd.f32 %v2421_v32, %v2192_v16  ;;  %12425 = vmatpush3.bf16.msra.mxu1 %v13024_v6  ;;  %v3038_v50 = vld [vmem:[#allocation2 + $0x29] sm:$0xff]  ;;  %v11851_v43 = vld [vmem:[%s13780_s25 + $0x19a] sm:$0xff] }
 0x267   : > { %v14986_v28 = vpop.permute.xlu1 %1578  ;;  %v14989_v20 = vpop.permute.xlu0 %1573  ;;  %v11852_v32 = vld [vmem:[%s13780_s25 + $0x1a2] sm:$0xff]  ;;  %s366_s25 = scalar_lea.vmem [#allocation7], %s365_s30 }
 0x268   : > { %2643 = vperm.xlu1 %13006, %v11850_v49   ;;  %2638 = vperm.xlu0 %13005, %v11849_v1   ;;  %v13027_v16 = vld [vmem:[%s17774_s4 + $0xe8] sm:$0xff]   ;;  %s11579_s12 = sshll.u32 %s366_s25, 4  ;;  %s11580_s12 = int_to_ptr.vmem [resolvable:$true] %s11579_s12 }
 0x269   : > { %v3096_v6 = vld [vmem:[#allocation2 + $0xe7] sm:$0xff]  ;;  %s13578_s27 = scalar_lea.vmem %s11580_s12, 16 }
 0x26a   : > { %p13579_p6 = scmp.ne.s32.totalorder %s11580_s12, %s13578_s27 }
 0x26b   : > { %v2614_v27 = vpop.permute.xlu1 %2613  ;;  %v2609_v23 = vpop.permute.xlu0 %2608 }
 0x26c   : > { %v2683_v15 = vmul.f32 %v14837_v31, %v2614_v27  ;;  %1869 = vperm.xlu1 %13006, %v11850_v49   ;;  %v2682_v18 = vmul.f32 %v14837_v31, %v2609_v23  ;;  %1864 = vperm.xlu0 %13005, %v11849_v1   ;;  %v13025_v1 = vld [vmem:[%s17774_s4 + $0xf0] sm:$0xff]   ;;  %p13580_p9 = pnand %p13579_p6, %p13745_p5 }
 0x26d   : > { %12426 = vmatprep.subr.bf16.mxu1 %v13025_v1  ;;  %v2999_v23 = vld [vmem:[#allocation2 + $0xb0] sm:$0xff] }
 0x26e   : > { %v2715_v48 = vadd.f32 %v2683_v15, %v2454_v3  ;;  %v2714_v42 = vadd.f32 %v2682_v18, %v2453_v11  ;;  %12427 = vmatpush3.bf16.msra.mxu1 %v13026_v22  ;;  %v15043_v3 = vpack.c.bf16 %v3039_v17, %v3038_v50  ;;  %v2998_v15 = vld [vmem:[#allocation2 + $0xa8] sm:$0xff]  ;;  %v3003_v17 = vld [vmem:[#allocation2 + $0xf0] sm:$0xff]  ;;  %p13581_p10 = pneg %p13580_p9 }
 0x26f   : > { %v14995_v34 = vpop.permute.xlu1 %543  ;;  %v15000_v13 = vpop.permute.xlu0 %538  ;;  %v3094_v11 = vld [vmem:[#allocation2 + $0xc7] sm:$0xff]  ;;  %v3095_v18 = vld [vmem:[#allocation2 + $0xcf] sm:$0xff]  ;;  %12428 = vmatprep.subr.bf16.mxu1 %v13027_v16 }
 0x270   : > { %v2754_v41 = vmul.f32 %v14847_v57, %v2715_v48  ;;  %2126 = vperm.xlu1 %13006, %v11785_v40   ;;  %v2753_v37 = vmul.f32 %v14847_v57, %v2714_v42  ;;  %3445 = vrot.lane.b32.xlu0 %v14997_v63, %s13649_s11  ;;  %v15050_v48 = vpack.c.bf16 %v2999_v23, %v2998_v15  ;;  %v3001_v42 = vld [vmem:[#allocation2 + $0xd0] sm:$0xff]  ;;  %v3002_v50 = vld [vmem:[#allocation2 + $0xe8] sm:$0xff] }
 0x271   : > { %v3098_v23 = vld [vmem:[#allocation2 + $0x107] sm:$0xff] }
 0x272   : > { %v2793_v59 = vadd.f32 %v14857_v19, %v2754_v41  ;;  %v2792_v47 = vadd.f32 %v14857_v19, %v2753_v37  ;;  %12429 = vmatpush3.bf16.msra.mxu1 %v13028_v35  ;;  %v15054_v37 = vpack.c.bf16 %v3095_v18, %v3094_v11  ;;  %v3099_v35 = vld [vmem:[#allocation2 + $0x10f] sm:$0xff]  ;;  %v595_v11 = vmul.f32 %v14765_v56, %v14924_v62 }
 0x273   : > { %v15013_v52 = vpop.permute.xlu1 %804  ;;  %v15018_v10 = vpop.permute.xlu0 %799  ;;  %v15091_v18 = vpack.c.bf16 %v3003_v17, %v3002_v50  ;;  %v3004_v62 = vld [vmem:[#allocation2 + $0x108] sm:$0xff]  ;;  %v1640_v50 = vmul.f32 %v14800_v2, %v14986_v28 }
 0x274   : > { %v2825_v7 = vmax.f32 %v2793_v59, 0.0  ;;  %3397 = vrot.lane.b32.xlu1 %v15006_v38, %s13649_s11  ;;  %v2824_v49 = vmax.f32 %v2792_v47, 0.0  ;;  %2131 = vperm.xlu0 %13005, %v11786_v51   ;;  %v3000_v59 = vld [vmem:[#allocation2 + $0xc8] sm:$0xff]  ;;  %v13029_v51 = vld [vmem:[%s17774_s4 + $0xe0] sm:$0xff]  }
 0x275   : > { %12430 = vmatprep.subr.bf16.mxu1 %v13029_v51 }
 0x276   : > { %2931 = vst.msk [vmem:[#allocation2 + $0x190] sm:$0xff] %vm2834_vm0, %v2825_v7  ;;  %2930 = vst.msk [vmem:[#allocation2 + $0x188] sm:$0xff] %vm2834_vm0, %v2824_v49  ;;  %v3097_v7 = vld [vmem:[#allocation2 + $0xef] sm:$0xff]  ;;  %v15068_v49 = vpack.c.bf16 %v3001_v42, %v3000_v59  ;;  %12431 = vmatpush3.bf16.msra.mxu1 %v13030_v30  ;;  %v1116_v42 = vmul.f32 %v14772_v60, %v14943_v25  ;;  %v1379_v30 = vmul.f32 %v14785_v46, %v14968_v12 }
 0x277   : > { %v15029_v8 = vpop.permute.xlu1 %1839  ;;  %v15034_v24 = vpop.permute.xlu0 %1834  ;;  %v15073_v22 = vpack.c.bf16 %v3097_v7, %v3096_v6  ;;  %v3005_v59 = vld [vmem:[#allocation2 + $0x110] sm:$0xff]  ;;  %v13036_v12 = vld [vmem:[%s17774_s4 + $0xc8] sm:$0xff]  }
 0x278   : > { %2392 = vperm.xlu1 %13006, %v11819_v58   ;;  %2387 = vperm.xlu0 %13005, %v11818_v45   ;;  %v2973_v58 = vpack.c.bf16 %v2943_v54, %v2942_v44  ;;  %v13031_v45 = vld [vmem:[%s17774_s4 + $0xd8] sm:$0xff]   ;;  %v15102_v54 = vpack.c.bf16 %v3099_v35, %v3098_v23  ;;  %v3101_v25 = vld [vmem:[#allocation2 + $0x12f] sm:$0xff]  ;;  %v15125_v17 = vpack.c.bf16 %v3005_v59, %v3004_v62 }
 0x279   : > { %12432 = vmatprep.subr.bf16.mxu1 %v13031_v45  ;;  %v13035_v45 = vld [vmem:[%s17774_s4 + $0x118] sm:$0xff]   ;;  %v3006_v35 = vld [vmem:[#allocation2 + $0x128] sm:$0xff]  ;;  %v1901_v28 = vmul.f32 %v14810_v4, %v15029_v8  ;;  %v13038_v8 = vld [vmem:[%s17774_s4 + $0xc0] sm:$0xff]  }
 0x27a   : > { %12908 = vmatprep.subr.bf16.mxu0 %v13035_v45 }
 0x27b   : > { %v15041_v27 = vpop.permute.xlu1 %1060  ;;  %v3440_v9 = vpop.permute.xlu0 %3439  ;;  %12909 = vmatpush3.bf16.msra.mxu0 %v13035_v45 }
 0x27c   : > { %2653 = vperm.xlu1 %13006, %v11852_v32   ;;  %2648 = vperm.xlu0 %13005, %v11851_v43   ;;  %v3635_v40 = vsel %vm2834_vm0, %v15043_v3, %v3440_v9  ;;  %v13032_v32 = vld [vmem:[%s17774_s4 + $0x98] sm:$0xff]   ;;  %v856_v43 = vmul.f32 %v14755_v55, %v14932_v21  ;;  %v855_v9 = vmul.f32 %v14755_v55, %v14934_v53 }
 0x27d   : > { %4204 = vmatprep.mubr.bf16.mxu0 %v3635_v40  ;;  %v1117_v21 = vmul.f32 %v14772_v60, %v14949_v39  ;;  %12433 = vmatpush3.bf16.msra.mxu1 %v13032_v32  ;;  %v13033_v40 = vld [vmem:[%s17774_s4 + $0xd0] sm:$0xff]   ;;  %v594_v53 = vmul.f32 %v14765_v56, %v14927_v26  ;;  %v3100_v26 = vld [vmem:[#allocation2 + $0x127] sm:$0xff] }
 0x27e   : > { %v13034_v39 = vld [vmem:[%s17774_s4 + $0x90] sm:$0xff]   ;;  %v888_v51 = vadd.f32 %v856_v43, %v595_v11  ;;  %12434 = vmatprep.subr.bf16.mxu1 %v13033_v40  ;;  %v1639_v43 = vmul.f32 %v14800_v2, %v14989_v20  ;;  %v3124_v23 = vpack.c.bf16 %v3101_v25, %v3100_v26  ;;  %v3102_v40 = vld [vmem:[#allocation2 + $0x147] sm:$0xff]  ;;  %v1900_v20 = vmul.f32 %v14810_v4, %v15034_v24 }
 0x27f   : > { %v15052_v41 = vpop.permute.xlu1 %2096  ;;  %v15062_v47 = vpop.permute.xlu0 %1065  ;;  %v887_v7 = vadd.f32 %v855_v9, %v594_v53  ;;  %v3007_v9 = vld [vmem:[#allocation2 + $0x130] sm:$0xff]  ;;  %v13039_v24 = vld [vmem:[%s17774_s4 + $0x80] sm:$0xff]  }
 0x280   : > { %3399 = vrot.lane.b32.xlu1 %v15050_v48, %s13649_s11  ;;  %3447 = vrot.lane.b32.xlu0 %v15054_v37, %s13649_s11  ;;  %v3103_v53 = vld [vmem:[#allocation2 + $0x14f] sm:$0xff] }
 0x281   : > { %12435 = vmatpush3.bf16.msra.mxu1 %v13034_v39  ;;  %v1148_v32 = vadd.f32 %v1116_v42, %v887_v7  ;;  %v15140_v39 = vpack.c.bf16 %v3007_v9, %v3006_v35  ;;  %v3125_v25 = vpack.c.bf16 %v3103_v53, %v3102_v40  ;;  %v3104_v35 = vld [vmem:[#allocation2 + $0x167] sm:$0xff]  ;;  %v3105_v9 = vld [vmem:[#allocation2 + $0x16f] sm:$0xff] }
 0x282   : > { %12436 = vmatprep.subr.bf16.mxu1 %v13036_v12 }
 0x283   : > { %v3392_v1 = vpop.permute.xlu1 %3391  ;;  %v2102_v16 = vpop.permute.xlu0 %2101 }
 0x284   : > { %3401 = vrot.lane.b32.xlu1 %v15068_v49, %s13649_s11  ;;  %v3571_v15 = vsel %vm2834_vm0, %v2973_v58, %v3392_v1  ;;  %3449 = vrot.lane.b32.xlu0 %v15073_v22, %s13649_s11  ;;  %v1378_v58 = vmul.f32 %v14785_v46, %v14972_v33  ;;  %v1149_v1 = vadd.f32 %v1117_v21, %v888_v51  ;;  %v13037_v33 = vld [vmem:[%s17774_s4 + $0x88] sm:$0xff]  }
 0x285   : > { %4205 = vmatmul.mubr.bf16.gmra.mxu0 %v3571_v15  ;;  %v2163_v59 = vmul.f32 %v14818_v14, %v2102_v16  ;;  %12437 = vmatpush3.bf16.msra.mxu1 %v13037_v33  ;;  %v3008_v33 = vld [vmem:[#allocation2 + $0x148] sm:$0xff] }
 0x286   : > { %v1411_v11 = vadd.f32 %v1379_v30, %v1149_v1  ;;  %v1410_v42 = vadd.f32 %v1378_v58, %v1148_v32  ;;  %v2162_v30 = vmul.f32 %v14818_v14, %v15052_v41  ;;  %12438 = vmatprep.subr.bf16.mxu1 %v13038_v8  ;;  %v3009_v32 = vld [vmem:[#allocation2 + $0x150] sm:$0xff] }
 0x287   : > { %v15100_v44 = vpop.permute.xlu1 %1327  ;;  %v15109_v6 = vpop.permute.xlu0 %1322  ;;  %v15165_v40 = vpack.c.bf16 %v3009_v32, %v3008_v33 }
 0x288   : > { %3403 = vrot.lane.b32.xlu1 %v15091_v18, %s13649_s11  ;;  %3451 = vrot.lane.b32.xlu0 %v15102_v54, %s13649_s11  ;;  %v1672_v62 = vadd.f32 %v1640_v50, %v1411_v11  ;;  %v1671_v51 = vadd.f32 %v1639_v43, %v1410_v42 }
 0x289   : > { %12439 = vmatpush3.bf16.msra.mxu1 %v13039_v24 }
 0x28a   : > { %v1933_v7 = vadd.f32 %v1901_v28, %v1672_v62  ;;  %v1932_v45 = vadd.f32 %v1900_v20, %v1671_v51  ;;  %v3126_v20 = vpack.c.bf16 %v3105_v9, %v3104_v35  ;;  %v3182_v62 = vld [vmem:[#allocation2 + $0x49] sm:$0xff] }
 0x28b   : > { %v2363_v15 = vpop.permute.xlu1 %2362  ;;  %v2358_v21 = vpop.permute.xlu0 %2357 }
 0x28c   : > { %3405 = vrot.lane.b32.xlu1 %v15125_v17, %s13649_s11  ;;  %3453 = vrot.lane.b32.xlu0 %v3124_v23, %s13649_s11  ;;  %v2424_v16 = vmul.f32 %v14827_v36, %v2363_v15  ;;  %v2423_v12 = vmul.f32 %v14827_v36, %v2358_v21  ;;  %v2195_v41 = vadd.f32 %v2163_v59, %v1933_v7  ;;  %v3183_v59 = vld [vmem:[#allocation2 + $0x51] sm:$0xff]  ;;  %v3010_v7 = vld [vmem:[#allocation2 + $0x168] sm:$0xff] }
 0x28d   : > { %v2194_v1 = vadd.f32 %v2162_v30, %v1932_v45  ;;  %v3213_v30 = vpack.c.bf16 %v3183_v59, %v3182_v62 }
 0x28e   : > { %v2456_v43 = vadd.f32 %v2424_v16, %v2195_v41  ;;  %v3011_v16 = vld [vmem:[#allocation2 + $0x170] sm:$0xff]  ;;  %v3106_v41 = vld [vmem:[#allocation2 + $0x187] sm:$0xff] }
 0x28f   : > { %v15147_v26 = vpop.permute.xlu1 %1588  ;;  %v15153_v58 = vpop.permute.xlu0 %1583  ;;  %v2455_v11 = vadd.f32 %v2423_v12, %v2194_v1  ;;  %v3107_v1 = vld [vmem:[#allocation2 + $0x18f] sm:$0xff]  ;;  %v15186_v33 = vpack.c.bf16 %v3011_v16, %v3010_v7 }
 0x290   : > { %3407 = vrot.lane.b32.xlu1 %v15140_v39, %s13649_s11  ;;  %3455 = vrot.lane.b32.xlu0 %v3125_v25, %s13649_s11  ;;  %v3187_v7 = vld [vmem:[#allocation2 + $0x91] sm:$0xff] }
 0x291   : > { %v2945_v16 = vld [vmem:[#allocation2 + $0x4f] sm:$0xff] }
 0x293   : > { %v2624_v50 = vpop.permute.xlu1 %2623  ;;  %v2619_v23 = vpop.permute.xlu0 %2618 }
 0x294   : > { %v2685_v15 = vmul.f32 %v14837_v31, %v2624_v50  ;;  %3485 = vrot.lane.b32.xlu1 %v15043_v3, %s13649_s11  ;;  %v2684_v28 = vmul.f32 %v14837_v31, %v2619_v23  ;;  %3533 = vrot.lane.b32.xlu0 %v14873_v29, %s13649_s11  ;;  %v3185_v23 = vld [vmem:[#allocation2 + $0x71] sm:$0xff] }
 0x296   : > { %v2717_v21 = vadd.f32 %v2685_v15, %v2456_v43  ;;  %v2716_v53 = vadd.f32 %v2684_v28, %v2455_v11  ;;  %v3127_v43 = vpack.c.bf16 %v3107_v1, %v3106_v41  ;;  %v3184_v15 = vld [vmem:[#allocation2 + $0x69] sm:$0xff] }
 0x297   : > { %v15167_v42 = vpop.permute.xlu1 %553  ;;  %v15170_v3 = vpop.permute.xlu0 %548  ;;  %v15196_v9 = vpack.c.bf16 %v3185_v23, %v3184_v15  ;;  %v3012_v11 = vld [vmem:[#allocation2 + $0x188] sm:$0xff]  ;;  %v3013_v28 = vld [vmem:[#allocation2 + $0x190] sm:$0xff]  ;;  %v858_v15 = vmul.f32 %v14755_v55, %v15013_v52  ;;  %v1119_v52 = vmul.f32 %v14772_v60, %v15062_v47 }
 0x298   : > { %v2756_v8 = vmul.f32 %v14847_v57, %v2717_v21  ;;  %3409 = vrot.lane.b32.xlu1 %v15165_v40, %s13649_s11  ;;  %v2755_v51 = vmul.f32 %v14847_v57, %v2716_v53  ;;  %3457 = vrot.lane.b32.xlu0 %v3126_v20, %s13649_s11  ;;  %v15205_v20 = vpack.c.bf16 %v3013_v28, %v3012_v11  ;;  %v13040_v41 = vld [vmem:[%s17774_s4 + $0x110] sm:$0xff]  }
 0x299   : > { %12910 = vmatprep.subr.bf16.mxu0 %v13040_v41  ;;  %v857_v28 = vmul.f32 %v14755_v55, %v15018_v10  ;;  %v3188_v10 = vld [vmem:[#allocation2 + $0xa9] sm:$0xff] }
 0x29a   : > { %v2795_v29 = vadd.f32 %v14857_v19, %v2756_v8  ;;  %v2794_v25 = vadd.f32 %v14857_v19, %v2755_v51  ;;  %v2944_v8 = vld [vmem:[#allocation2 + $0x47] sm:$0xff]  ;;  %12911 = vmatpush3.bf16.msra.mxu0 %v13040_v41 }
 0x29b   : > { %v15178_v24 = vpop.permute.xlu1 %814  ;;  %v15180_v12 = vpop.permute.xlu0 %809 }
 0x29c   : > { %v2827_v45 = vmax.f32 %v2795_v29, 0.0  ;;  %3487 = vrot.lane.b32.xlu1 %v3213_v30, %s13649_s11  ;;  %v2826_v50 = vmax.f32 %v2794_v25, 0.0  ;;  %3535 = vrot.lane.b32.xlu0 %v14946_v61, %s13649_s11  ;;  %v3186_v25 = vld [vmem:[#allocation2 + $0x89] sm:$0xff] }
 0x29e   : > { %2933 = vst.msk [vmem:[#allocation2 + $0x1b0] sm:$0xff] %vm2834_vm0, %v2827_v45  ;;  %2932 = vst.msk [vmem:[#allocation2 + $0x1a8] sm:$0xff] %vm2834_vm0, %v2826_v50 }
 0x29f   : > { %v15189_v32 = vpop.permute.xlu1 %1849  ;;  %v15191_v35 = vpop.permute.xlu0 %1844 }
 0x2a0   : > { %3411 = vrot.lane.b32.xlu1 %v15186_v33, %s13649_s11  ;;  %3459 = vrot.lane.b32.xlu0 %v3127_v43, %s13649_s11  ;;  %v1903_v41 = vmul.f32 %v14810_v4, %v15189_v32 }
 0x2a3   : > { %v15198_v61 = vpop.permute.xlu1 %1070  ;;  %v3442_v21 = vpop.permute.xlu0 %3441 }
 0x2a4   : > { %3489 = vrot.lane.b32.xlu1 %v15196_v9, %s13649_s11  ;;  %3537 = vrot.lane.b32.xlu0 %v15006_v38, %s13649_s11  ;;  %v3639_v53 = vsel %vm2834_vm0, %v3213_v30, %v3442_v21  ;;  %v15212_v38 = vpack.c.bf16 %v3187_v7, %v3186_v25  ;;  %v15214_v30 = vpack.c.bf16 %v2945_v16, %v2944_v8 }
 0x2a5   : > { %4212 = vmatprep.mubr.bf16.mxu0 %v3639_v53  ;;  %v3108_v62 = vld [vmem:[#allocation2 + $0x1a7] sm:$0xff]  ;;  %v3109_v59 = vld [vmem:[#allocation2 + $0x1af] sm:$0xff]  ;;  %v597_v21 = vmul.f32 %v14765_v56, %v14995_v34  ;;  %v1381_v34 = vmul.f32 %v14785_v46, %v15100_v44  ;;  %v1641_v7 = vmul.f32 %v14800_v2, %v15153_v58 }
 0x2a6   : > { %v3128_v29 = vpack.c.bf16 %v3109_v59, %v3108_v62  ;;  %v3014_v50 = vld [vmem:[#allocation2 + $0x1a8] sm:$0xff]  ;;  %v3015_v43 = vld [vmem:[#allocation2 + $0x1b0] sm:$0xff]  ;;  %v596_v62 = vmul.f32 %v14765_v56, %v15000_v13  ;;  %v1118_v59 = vmul.f32 %v14772_v60, %v15041_v27  ;;  %v1380_v56 = vmul.f32 %v14785_v46, %v15109_v6 }
 0x2a7   : > { %v2107_v51 = vpop.permute.xlu1 %2106  ;;  %v15207_v45 = vpop.permute.xlu0 %1075  ;;  %v15233_v53 = vpack.c.bf16 %v3015_v43, %v3014_v50  ;;  %v890_v8 = vadd.f32 %v858_v15, %v597_v21  ;;  %v1642_v60 = vmul.f32 %v14800_v2, %v15147_v26  ;;  %v1902_v6 = vmul.f32 %v14810_v4, %v15191_v35 }
 0x2a8   : > { %3413 = vrot.lane.b32.xlu1 %v15205_v20, %s13649_s11  ;;  %3461 = vrot.lane.b32.xlu0 %v3128_v29, %s13649_s11  ;;  %v889_v47 = vadd.f32 %v857_v28, %v596_v62  ;;  %v2164_v15 = vmul.f32 %v14818_v14, %v2107_v51 }
 0x2a9   : > { %v1151_v13 = vadd.f32 %v1119_v52, %v890_v8 }
 0x2aa   : > { %v1150_v25 = vadd.f32 %v1118_v59, %v889_v47 }
 0x2ab   : > { %v3394_v1 = vpop.permute.xlu1 %3393  ;;  %v2112_v23 = vpop.permute.xlu0 %2111  ;;  %v1413_v16 = vadd.f32 %v1381_v34, %v1151_v13 }
 0x2ac   : > { %3491 = vrot.lane.b32.xlu1 %v15212_v38, %s13649_s11  ;;  %v3575_v11 = vsel %vm2834_vm0, %v15214_v30, %v3394_v1  ;;  %3539 = vrot.lane.b32.xlu0 %v15050_v48, %s13649_s11  ;;  %v3189_v48 = vld [vmem:[#allocation2 + $0xb1] sm:$0xff]  ;;  %v1412_v46 = vadd.f32 %v1380_v56, %v1150_v25  ;;  %v2165_v50 = vmul.f32 %v14818_v14, %v2112_v23 }
 0x2ad   : > { %4213 = vmatmul.mubr.bf16.gmra.mxu0 %v3575_v11  ;;  %v15251_v27 = vpack.c.bf16 %v3189_v48, %v3188_v10  ;;  %v1674_v26 = vadd.f32 %v1642_v60, %v1413_v16 }
 0x2ae   : > { %v1673_v43 = vadd.f32 %v1641_v7, %v1412_v46 }
 0x2af   : > { %v15239_v55 = vpop.permute.xlu1 %1337  ;;  %v15243_v29 = vpop.permute.xlu0 %1332  ;;  %v1935_v58 = vadd.f32 %v1903_v41, %v1674_v26 }
 0x2b0   : > { %3415 = vrot.lane.b32.xlu1 %v15233_v53, %s13649_s11  ;;  %v1934_v28 = vadd.f32 %v1902_v6, %v1673_v43 }
 0x2b1   : > { %v2197_v52 = vadd.f32 %v2165_v50, %v1935_v58 }
 0x2b2   : > { %v2196_v62 = vadd.f32 %v2164_v15, %v1934_v28  ;;  %v2947_v28 = vld [vmem:[#allocation2 + $0x6f] sm:$0xff] }
 0x2b3   : > { %v2373_v44 = vpop.permute.xlu1 %2372  ;;  %v2368_v1 = vpop.permute.xlu0 %2367 }
 0x2b4   : > { %3493 = vrot.lane.b32.xlu1 %v15251_v27, %s13649_s11  ;;  %v2426_v11 = vmul.f32 %v14827_v36, %v2373_v44  ;;  %v2425_v21 = vmul.f32 %v14827_v36, %v2368_v1 }
 0x2b6   : > { %v2458_v4 = vadd.f32 %v2426_v11, %v2197_v52  ;;  %v2457_v10 = vadd.f32 %v2425_v21, %v2196_v62  ;;  %v2946_v11 = vld [vmem:[#allocation2 + $0x67] sm:$0xff]  ;;  %v3191_v62 = vld [vmem:[#allocation2 + $0xd1] sm:$0xff] }
 0x2b7   : > { %v15263_v2 = vpop.permute.xlu1 %1598  ;;  %v15266_v32 = vpop.permute.xlu0 %1593  ;;  %v3190_v52 = vld [vmem:[#allocation2 + $0xc9] sm:$0xff] }
 0x2bb   : > { %v2634_v59 = vpop.permute.xlu1 %2633  ;;  %v2629_v23 = vpop.permute.xlu0 %2628 }
 0x2bc   : > { %v2687_v35 = vmul.f32 %v14837_v31, %v2634_v59  ;;  %v2686_v14 = vmul.f32 %v14837_v31, %v2629_v23  ;;  %v15305_v59 = vpack.c.bf16 %v2947_v28, %v2946_v11  ;;  %v13537_v23 = vld [vmem:[%s17771_s1 + $0x1] ss:$0 sm:$0xff] }
 0x2be   : > { %v2719_v51 = vadd.f32 %v2687_v35, %v2458_v4  ;;  %v2718_v48 = vadd.f32 %v2686_v14, %v2457_v10  ;;  %v15307_v35 = vpack.c.bf16 %v3191_v62, %v3190_v52  ;;  %v860_v10 = vmul.f32 %v13537_v23, %v15178_v24  ;;  %v13539_v24 = vld [vmem:[%s17771_s1 + $0x2] ss:$0 sm:$0xff] }
 0x2bf   : > { %v15271_v8 = vpop.permute.xlu1 %563  ;;  %v15274_v47 = vpop.permute.xlu0 %558 }
 0x2c0   : > { %v2758_v34 = vmul.f32 %v14847_v57, %v2719_v51  ;;  %v2757_v36 = vmul.f32 %v14847_v57, %v2718_v48  ;;  %v13041_v57 = vld [vmem:[%s17774_s4 + $0x108] sm:$0xff]   ;;  %v859_v48 = vmul.f32 %v13537_v23, %v15180_v12 }
 0x2c1   : > { %12912 = vmatprep.subr.bf16.mxu0 %v13041_v57 }
 0x2c2   : > { %v2797_v56 = vadd.f32 %v14857_v19, %v2758_v34  ;;  %v2796_v13 = vadd.f32 %v14857_v19, %v2757_v36  ;;  %12913 = vmatpush3.bf16.msra.mxu0 %v13041_v57  ;;  %v13538_v34 = vld [vmem:[%s17771_s1] ss:$0 sm:$0xff] }
 0x2c3   : > { %v15279_v60 = vpop.permute.xlu1 %824  ;;  %v15281_v7 = vpop.permute.xlu0 %819  ;;  %v599_v36 = vmul.f32 %v13538_v34, %v15167_v42  ;;  %v598_v12 = vmul.f32 %v13538_v34, %v15170_v3 }
 0x2c4   : > { %v2829_v25 = vmax.f32 %v2797_v56, 0.0  ;;  %v2828_v31 = vmax.f32 %v2796_v13, 0.0  ;;  %v1121_v56 = vmul.f32 %v13539_v24, %v15207_v45  ;;  %v13541_v45 = vld [vmem:[%s17771_s1 + $0x4] ss:$0 sm:$0xff] }
 0x2c5   : > { %v1644_v3 = vmul.f32 %v13541_v45, %v15263_v2  ;;  %v15350_v2 = vld [vmem:[%s17771_s1 + $0x6] ss:$0 sm:$0xff] }
 0x2c6   : > { %2935 = vst.msk [vmem:[#allocation2 + $0x1d0] sm:$0xff] %vm2834_vm0, %v2829_v25  ;;  %2934 = vst.msk [vmem:[#allocation2 + $0x1c8] sm:$0xff] %vm2834_vm0, %v2828_v31  ;;  %v892_v25 = vadd.f32 %v860_v10, %v599_v36  ;;  %v13540_v31 = vld [vmem:[%s17771_s1 + $0x3] ss:$0 sm:$0xff] }
 0x2c7   : > { %v1860_v44 = vpop.permute.xlu1 %1859  ;;  %v1855_v16 = vpop.permute.xlu0 %1854  ;;  %v1383_v57 = vmul.f32 %v13540_v31, %v15239_v55  ;;  %v15343_v55 = vld [vmem:[%s17771_s1 + $0x5] ss:$0 sm:$0xff] }
 0x2c8   : > { %v1905_v11 = vmul.f32 %v15343_v55, %v1860_v44  ;;  %v1904_v52 = vmul.f32 %v15343_v55, %v1855_v16  ;;  %v15357_v44 = vld [vmem:[%s17771_s1 + $0x7] ss:$0 sm:$0xff] }
 0x2cb   : > { %v15285_v41 = vpop.permute.xlu1 %1080  ;;  %v3444_v1 = vpop.permute.xlu0 %3443 }
 0x2cc   : > { %v3643_v19 = vsel %vm2834_vm0, %v15196_v9, %v3444_v1  ;;  %v13042_v9 = vld [vmem:[%s17774_s4 + $0x100] sm:$0xff]   ;;  %v891_v1 = vadd.f32 %v859_v48, %v598_v12 }
 0x2cd   : > { %v3017_v46 = vld [vmem:[#allocation2 + $0x1d0] sm:$0xff]  ;;  %4220 = vmatprep.mubr.bf16.mxu0 %v3643_v19  ;;  %v3110_v6 = vld [vmem:[#allocation2 + $0x1c7] sm:$0xff]  ;;  %12914 = vmatprep.subr.bf16.mxu0 %v13042_v9  ;;  %v1382_v19 = vmul.f32 %v13540_v31, %v15243_v29 }
 0x2ce   : > { %v3111_v26 = vld [vmem:[#allocation2 + $0x1cf] sm:$0xff]  ;;  %12915 = vmatpush3.bf16.msra.mxu0 %v13042_v9 }
 0x2cf   : > { %v3016_v50 = vld [vmem:[#allocation2 + $0x1c8] sm:$0xff]  ;;  %v2117_v43 = vpop.permute.xlu1 %2116  ;;  %v15292_v15 = vpack.c.bf16 %v3111_v26, %v3110_v6  ;;  %v15296_v21 = vpop.permute.xlu0 %1085  ;;  %v1643_v6 = vmul.f32 %v13541_v45, %v15266_v32 }
 0x2d0   : > { %v15294_v58 = vpack.c.bf16 %v3017_v46, %v3016_v50  ;;  %v1153_v46 = vadd.f32 %v1121_v56, %v892_v25 }
 0x2d1   : > { %3463 = vrot.lane.b32.xlu0 %v15292_v15, %s13649_s11 }
 0x2d2   : > { %3417 = vrot.lane.b32.xlu1 %v15294_v58, %s13649_s11  ;;  %v1415_v50 = vadd.f32 %v1383_v57, %v1153_v46 }
 0x2d3   : > { %v3396_v4 = vpop.permute.xlu1 %3395  ;;  %v2122_v14 = vpop.permute.xlu0 %2121 }
 0x2d4   : > { %v3579_v51 = vsel %vm2834_vm0, %v15305_v59, %v3396_v4  ;;  %v1676_v62 = vadd.f32 %v1644_v3, %v1415_v50  ;;  %v2167_v32 = vmul.f32 %v15350_v2, %v2122_v14  ;;  %v2166_v4 = vmul.f32 %v15350_v2, %v2117_v43  ;;  %v15364_v43 = vld [vmem:[%s17771_s1 + $0x8] ss:$0 sm:$0xff]  ;;  %v15372_v50 = vld [vmem:[%s17772_s2] ss:$0 sm:$0xff] }
 0x2d5   : > { %3541 = vrot.lane.b32.xlu0 %v15068_v49, %s13649_s11  ;;  %4221 = vmatmul.mubr.bf16.gmra.mxu0 %v3579_v51  ;;  %v1120_v49 = vmul.f32 %v13539_v24, %v15198_v61 }
 0x2d6   : > { %3495 = vrot.lane.b32.xlu1 %v15307_v35, %s13649_s11  ;;  %v1937_v51 = vadd.f32 %v1905_v11, %v1676_v62  ;;  %v601_v62 = vmul.f32 %v13538_v34, %v15271_v8 }
 0x2d7   : > { %v1348_v13 = vpop.permute.xlu1 %1347  ;;  %v1343_v42 = vpop.permute.xlu0 %1342  ;;  %v1152_v61 = vadd.f32 %v1120_v49, %v891_v1 }
 0x2d8   : > { %v2199_v12 = vadd.f32 %v2167_v32, %v1937_v51  ;;  %v1123_v32 = vmul.f32 %v13539_v24, %v15296_v21  ;;  %v1122_v51 = vmul.f32 %v13539_v24, %v15285_v41  ;;  %v1384_v21 = vmul.f32 %v13540_v31, %v1343_v42 }
 0x2d9   : > { %v1414_v28 = vadd.f32 %v1382_v19, %v1152_v61 }
 0x2db   : > { %v2383_v26 = vpop.permute.xlu1 %2382  ;;  %v2378_v29 = vpop.permute.xlu0 %2377  ;;  %v1675_v9 = vadd.f32 %v1643_v6, %v1414_v28  ;;  %v861_v28 = vmul.f32 %v13537_v23, %v15281_v7 }
 0x2dc   : > { %v2428_v16 = vmul.f32 %v15357_v44, %v2383_v26  ;;  %v2427_v56 = vmul.f32 %v15357_v44, %v2378_v29  ;;  %v862_v26 = vmul.f32 %v13537_v23, %v15279_v60  ;;  %v15382_v60 = vld [vmem:[%s17773_s3] ss:$0 sm:$0xff] }
 0x2dd   : > { %v1936_v36 = vadd.f32 %v1904_v52, %v1675_v9 }
 0x2de   : > { %v2460_v14 = vadd.f32 %v2428_v16, %v2199_v12  ;;  %v894_v23 = vadd.f32 %v862_v26, %v601_v62 }
 0x2df   : > { %v1609_v10 = vpop.permute.xlu1 %1608  ;;  %v1604_v48 = vpop.permute.xlu0 %1603  ;;  %v2198_v49 = vadd.f32 %v2166_v4, %v1936_v36  ;;  %v600_v4 = vmul.f32 %v13538_v34, %v15274_v47  ;;  %v1385_v36 = vmul.f32 %v13540_v31, %v1348_v13 }
 0x2e0   : > { %v1645_v41 = vmul.f32 %v13541_v45, %v1604_v48 }
 0x2e1   : > { %v2459_v19 = vadd.f32 %v2427_v56, %v2198_v49  ;;  %v893_v12 = vadd.f32 %v861_v28, %v600_v4 }
 0x2e3   : > { %v2644_v25 = vpop.permute.xlu1 %2643  ;;  %v2639_v1 = vpop.permute.xlu0 %2638  ;;  %v1154_v47 = vadd.f32 %v1122_v51, %v893_v12 }
 0x2e4   : > { %v2689_v57 = vmul.f32 %v15364_v43, %v2644_v25  ;;  %v2688_v46 = vmul.f32 %v15364_v43, %v2639_v1 }
 0x2e5   : > { %v1416_v42 = vadd.f32 %v1384_v21, %v1154_v47  ;;  %v3195_v47 = vld [vmem:[#allocation2 + $0x111] sm:$0xff] }
 0x2e6   : > { %v2721_v3 = vadd.f32 %v2689_v57, %v2460_v14  ;;  %v2720_v61 = vadd.f32 %v2688_v46, %v2459_v19  ;;  %v1155_v14 = vadd.f32 %v1123_v32, %v894_v23  ;;  %v1646_v57 = vmul.f32 %v13541_v45, %v1609_v10  ;;  %v3193_v23 = vld [vmem:[#allocation2 + $0xf1] sm:$0xff] }
 0x2e7   : > { %v1870_v6 = vpop.permute.xlu1 %1869  ;;  %v1865_v29 = vpop.permute.xlu0 %1864  ;;  %v1677_v46 = vadd.f32 %v1645_v41, %v1416_v42  ;;  %v3197_v42 = vld [vmem:[#allocation2 + $0x131] sm:$0xff] }
 0x2e8   : > { %v2760_v11 = vmul.f32 %v15372_v50, %v2721_v3  ;;  %v2759_v52 = vmul.f32 %v15372_v50, %v2720_v61  ;;  %v1417_v24 = vadd.f32 %v1385_v36, %v1155_v14  ;;  %v1907_v13 = vmul.f32 %v15343_v55, %v1870_v6 }
 0x2ea   : > { %v2799_v9 = vadd.f32 %v15382_v60, %v2760_v11  ;;  %v2798_v16 = vadd.f32 %v15382_v60, %v2759_v52  ;;  %v1678_v10 = vadd.f32 %v1646_v57, %v1417_v24  ;;  %v3194_v57 = vld [vmem:[#allocation2 + $0x109] sm:$0xff] }
 0x2eb   : > { %v2127_v7 = vpop.permute.xlu1 %2126  ;;  %v3446_v8 = vpop.permute.xlu0 %3445 }
 0x2ec   : > { %v2831_v56 = vmax.f32 %v2799_v9, 0.0  ;;  %v2830_v49 = vmax.f32 %v2798_v16, 0.0  ;;  %v3647_v25 = vsel %vm2834_vm0, %v15212_v38, %v3446_v8  ;;  %v1906_v38 = vmul.f32 %v15343_v55, %v1865_v29 }
 0x2ed   : > { %4228 = vmatprep.mubr.bf16.mxu0 %v3647_v25  ;;  %v2168_v45 = vmul.f32 %v15350_v2, %v2127_v7  ;;  %v1939_v3 = vadd.f32 %v1907_v13, %v1678_v10  ;;  %v3192_v7 = vld [vmem:[#allocation2 + $0xe9] sm:$0xff]  ;;  %v15424_v13 = vpack.c.bf16 %v3195_v47, %v3194_v57 }
 0x2ee   : > { %2937 = vst.msk [vmem:[#allocation2 + $0x1f0] sm:$0xff] %vm2834_vm0, %v2831_v56  ;;  %2936 = vst.msk [vmem:[#allocation2 + $0x1e8] sm:$0xff] %vm2834_vm0, %v2830_v49  ;;  %v1938_v6 = vadd.f32 %v1906_v38, %v1677_v46  ;;  %v15410_v21 = vpack.c.bf16 %v3193_v23, %v3192_v7  ;;  %v3199_v46 = vld [vmem:[#allocation2 + $0x151] sm:$0xff] }
 0x2ef   : > { %v3398_v34 = vpop.permute.xlu1 %3397  ;;  %v2132_v1 = vpop.permute.xlu0 %2131  ;;  %v3135_v57 = vld [vmem:[#allocation2 + $0x50] sm:$0xff] }
 0x2f0   : > { %v3583_v31 = vsel %vm2834_vm0, %v14938_v5, %v3398_v34  ;;  %v2169_v19 = vmul.f32 %v15350_v2, %v2132_v1  ;;  %v2200_v29 = vadd.f32 %v2168_v45, %v1938_v6  ;;  %v3201_v6 = vld [vmem:[#allocation2 + $0x171] sm:$0xff] }
 0x2f1   : > { %4229 = vmatmul.mubr.bf16.gmra.mxu0 %v3583_v31  ;;  %v3196_v31 = vld [vmem:[#allocation2 + $0x129] sm:$0xff] }
 0x2f2   : > { %v2201_v5 = vadd.f32 %v2169_v19, %v1939_v3  ;;  %v15432_v38 = vpack.c.bf16 %v3197_v42, %v3196_v31  ;;  %v3198_v19 = vld [vmem:[#allocation2 + $0x149] sm:$0xff] }
 0x2f3   : > { %v2393_v48 = vpop.permute.xlu1 %2392  ;;  %v2388_v26 = vpop.permute.xlu0 %2387  ;;  %v15440_v3 = vpack.c.bf16 %v3199_v46, %v3198_v19  ;;  %v3136_v19 = vld [vmem:[#allocation2 + $0x68] sm:$0xff]  ;;  %v3137_v46 = vld [vmem:[#allocation2 + $0x70] sm:$0xff] }
 0x2f4   : > { %v2430_v61 = vmul.f32 %v15357_v44, %v2393_v48  ;;  %v2429_v11 = vmul.f32 %v15357_v44, %v2388_v26  ;;  %v3200_v26 = vld [vmem:[#allocation2 + $0x169] sm:$0xff] }
 0x2f5   : > { %v3019_v28 = vld [vmem:[#allocation2 + $0x1f0] sm:$0xff]  ;;  %v3112_v52 = vld [vmem:[#allocation2 + $0x1e7] sm:$0xff] }
 0x2f6   : > { %v3113_v62 = vld [vmem:[#allocation2 + $0x1ef] sm:$0xff]  ;;  %v2462_v2 = vadd.f32 %v2430_v61, %v2201_v5  ;;  %v2461_v36 = vadd.f32 %v2429_v11, %v2200_v29 }
 0x2f7   : > { %v3018_v55 = vld [vmem:[#allocation2 + $0x1e8] sm:$0xff]  ;;  %v2654_v32 = vpop.permute.xlu1 %2653  ;;  %v15400_v9 = vpack.c.bf16 %v3113_v62, %v3112_v52  ;;  %v2649_v16 = vpop.permute.xlu0 %2648  ;;  %v15446_v52 = vpack.c.bf16 %v3201_v6, %v3200_v26  ;;  %v3209_v42 = vld [vmem:[#allocation2 + $0x1f1] sm:$0xff]  ;;  %v3166_v6 = vpack.c.bf16 %v3137_v46, %v3136_v19 }
 0x2f8   : > { %v15402_v4 = vpack.c.bf16 %v3019_v28, %v3018_v55  ;;  %v2691_v51 = vmul.f32 %v15364_v43, %v2654_v32  ;;  %v2690_v44 = vmul.f32 %v15364_v43, %v2649_v16  ;;  %v3132_v62 = vld [vmem:[#allocation2 + $0x28] sm:$0xff]  ;;  %v3133_v55 = vld [vmem:[#allocation2 + $0x30] sm:$0xff] }
 0x2f9   : > { %3465 = vrot.lane.b32.xlu0 %v15400_v9, %s13649_s11  ;;  %v3202_v32 = vld [vmem:[#allocation2 + $0x189] sm:$0xff]  ;;  %v3164_v16 = vpack.c.bf16 %v3133_v55, %v3132_v62 }
 0x2fa   : > { %3419 = vrot.lane.b32.xlu1 %v15402_v4, %s13649_s11  ;;  %v2723_v56 = vadd.f32 %v2691_v51, %v2462_v2  ;;  %v2722_v8 = vadd.f32 %v2690_v44, %v2461_v36  ;;  %v3203_v2 = vld [vmem:[#allocation2 + $0x191] sm:$0xff]  ;;  %v3208_v31 = vld [vmem:[#allocation2 + $0x1e9] sm:$0xff] }
 0x2fb   : > { %v3400_v12 = vpop.permute.xlu1 %3399  ;;  %v3448_v25 = vpop.permute.xlu0 %3447  ;;  %v15458_v36 = vpack.c.bf16 %v3203_v2, %v3202_v32  ;;  %v3234_v26 = vld [vmem:[#allocation2 + $0x8f] sm:$0xff] }
 0x2fc   : > { %v2762_v49 = vmul.f32 %v15372_v50, %v2723_v56  ;;  %v3587_v14 = vsel %vm2834_vm0, %v14997_v63, %v3400_v12  ;;  %v2761_v43 = vmul.f32 %v15372_v50, %v2722_v8  ;;  %v3651_v41 = vsel %vm2834_vm0, %v15251_v27, %v3448_v25  ;;  %v3204_v8 = vld [vmem:[#allocation2 + $0x1a9] sm:$0xff]  ;;  %v3205_v12 = vld [vmem:[#allocation2 + $0x1b1] sm:$0xff] }
 0x2fd   : > { %3543 = vrot.lane.b32.xlu0 %v15091_v18, %s13649_s11  ;;  %4236 = vmatprep.mubr.bf16.mxu0 %v3651_v41  ;;  %v15469_v25 = vpack.c.bf16 %v3205_v12, %v3204_v8  ;;  %v3207_v41 = vld [vmem:[#allocation2 + $0x1d1] sm:$0xff]  ;;  %v3235_v12 = vld [vmem:[#allocation2 + $0xa7] sm:$0xff] }
 0x2fe   : > { %3497 = vrot.lane.b32.xlu1 %v15410_v21, %s13649_s11  ;;  %v2801_v34 = vadd.f32 %v15382_v60, %v2762_v49  ;;  %v2800_v24 = vadd.f32 %v15382_v60, %v2761_v43  ;;  %4237 = vmatmul.mubr.bf16.gmra.mxu0 %v3587_v14  ;;  %v3134_v14 = vld [vmem:[#allocation2 + $0x48] sm:$0xff] }
 0x2ff   : > { %v3402_v63 = vpop.permute.xlu1 %3401  ;;  %v3450_v50 = vpop.permute.xlu0 %3449  ;;  %v3206_v43 = vld [vmem:[#allocation2 + $0x1c9] sm:$0xff] }
 0x300   : > { %v2833_v1 = vmax.f32 %v2801_v34, 0.0  ;;  %v2832_v18 = vmax.f32 %v2800_v24, 0.0  ;;  %v3655_v27 = vsel %vm2834_vm0, %v15307_v35, %v3450_v50  ;;  %v3591_v45 = vsel %vm2834_vm0, %v15054_v37, %v3402_v63 }
 0x301   : > { %4244 = vmatprep.mubr.bf16.mxu0 %v3655_v27  ;;  %v15479_v63 = vpack.c.bf16 %v3207_v41, %v3206_v43 }
 0x302   : > { %3499 = vrot.lane.b32.xlu1 %v15424_v13, %s13649_s11  ;;  %2939 = vst.msk [vmem:[#allocation2 + $0x210] sm:$0xff] %vm2834_vm0, %v2833_v1  ;;  %2938 = vst.msk [vmem:[#allocation2 + $0x208] sm:$0xff] %vm2834_vm0, %v2832_v18  ;;  %v2959_v18 = vld [vmem:[#allocation2 + $0x12f] sm:$0xff] }
 0x303   : > { %v3404_v60 = vpop.permute.xlu1 %3403  ;;  %v3452_v10 = vpop.permute.xlu0 %3451 }
 0x304   : > { %v3659_v35 = vsel %vm2834_vm0, %v15410_v21, %v3452_v10  ;;  %v3595_v51 = vsel %vm2834_vm0, %v15073_v22, %v3404_v60  ;;  %v15488_v60 = vpack.c.bf16 %v3209_v42, %v3208_v31  ;;  %v3233_v10 = vld [vmem:[#allocation2 + $0x87] sm:$0xff]  ;;  %v3308_v42 = vld [vmem:[#allocation2 + $0x230] sm:$0xff] }
 0x305   : > { %v3307_v31 = vld [vmem:[#allocation2 + $0x228] sm:$0xff] }
 0x306   : > { %3501 = vrot.lane.b32.xlu1 %v15432_v38, %s13649_s11  ;;  %4245 = vmatmul.mubr.bf16.gmra.mxu0 %v3591_v45 }
 0x307   : > { %v3406_v48 = vpop.permute.xlu1 %3405  ;;  %4252 = vmatprep.mubr.bf16.mxu0 %v3659_v35  ;;  %v3454_v61 = vpop.permute.xlu0 %3453 }
 0x308   : > { %v3663_v23 = vsel %vm2834_vm0, %v15424_v13, %v3454_v61 }
 0x309   : > { %v3114_v11 = vld [vmem:[#allocation2 + $0x207] sm:$0xff]  ;;  %v3115_v28 = vld [vmem:[#allocation2 + $0x20f] sm:$0xff] }
 0x30a   : > { %3503 = vrot.lane.b32.xlu1 %v15440_v3, %s13649_s11  ;;  %v15448_v37 = vpack.c.bf16 %v3115_v28, %v3114_v11  ;;  %v3210_v35 = vld [vmem:[#allocation2 + $0x209] sm:$0xff]  ;;  %v3211_v61 = vld [vmem:[#allocation2 + $0x211] sm:$0xff] }
 0x30b   : > { %v15444_v5 = vpop.permute.xlu1 %3407  ;;  %v3456_v29 = vpop.permute.xlu0 %3455  ;;  %v15501_v55 = vpack.c.bf16 %v3211_v61, %v3210_v35  ;;  %v2967_v35 = vld [vmem:[#allocation2 + $0x1af] sm:$0xff] }
 0x30c   : > { %3467 = vrot.lane.b32.xlu0 %v15448_v37, %s13649_s11  ;;  %v3667_v24 = vsel %vm2834_vm0, %v15432_v38, %v3456_v29  ;;  %v3263_v29 = vpack.c.bf16 %v3234_v26, %v3233_v10  ;;  %v3324_v10 = vpack.c.bf16 %v3308_v42, %v3307_v31 }
 0x30e   : > { %3505 = vrot.lane.b32.xlu1 %v15446_v52, %s13649_s11  ;;  %4253 = vmatmul.mubr.bf16.gmra.mxu0 %v3595_v51  ;;  %v2960_v51 = vld [vmem:[#allocation2 + $0x147] sm:$0xff] }
 0x30f   : > { %v3486_v7 = vpop.permute.xlu1 %3485  ;;  %4260 = vmatprep.mubr.bf16.mxu0 %v3663_v23  ;;  %v3534_v44 = vpop.permute.xlu0 %3533  ;;  %v3138_v23 = vld [vmem:[#allocation2 + $0x88] sm:$0xff] }
 0x310   : > { %v3695_v56 = vsel %vm2834_vm0, %v3164_v16, %v3486_v7  ;;  %3545 = vrot.lane.b32.xlu0 %v15125_v17, %s13649_s11  ;;  %v3759_v22 = vsel %vm2834_vm0, %v15214_v30, %v3534_v44  ;;  %v3599_v17 = vsel %vm2834_vm0, %v15102_v54, %v3406_v48  ;;  %v3165_v30 = vpack.c.bf16 %v3135_v57, %v3134_v14  ;;  %v2961_v16 = vld [vmem:[#allocation2 + $0x14f] sm:$0xff] }
 0x311   : > { %4357 = vmatprep.mubr.bf16.mxu1 %v3759_v22  ;;  %v3139_v44 = vld [vmem:[#allocation2 + $0x90] sm:$0xff]  ;;  %v15511_v8 = vpack.c.bf16 %v2961_v16, %v2960_v51 }
 0x312   : > { %3507 = vrot.lane.b32.xlu1 %v15458_v36, %s13649_s11  ;;  %4358 = vmatmul.mubr.bf16.vlgmr.msra.gmra.mxu1 %v3695_v56  ;;  %v3236_v22 = vld [vmem:[#allocation2 + $0xaf] sm:$0xff]  ;;  %v3167_v14 = vpack.c.bf16 %v3139_v44, %v3138_v23 }
 0x313   : > { %v15467_v49 = vpop.permute.xlu1 %3409  ;;  %v3458_v47 = vpop.permute.xlu0 %3457  ;;  %v3264_v43 = vpack.c.bf16 %v3236_v22, %v3235_v12 }
 0x314   : > { %3547 = vrot.lane.b32.xlu0 %v15140_v39, %s13649_s11  ;;  %v2958_v39 = vld [vmem:[#allocation2 + $0x127] sm:$0xff]  ;;  %v3671_v62 = vsel %vm2834_vm0, %v15440_v3, %v3458_v47 }
 0x315   : > { %v15490_v48 = vpack.c.bf16 %v2959_v18, %v2958_v39  ;;  %v2964_v39 = vld [vmem:[#allocation2 + $0x187] sm:$0xff]  ;;  %v2965_v18 = vld [vmem:[#allocation2 + $0x18f] sm:$0xff] }
 0x316   : > { %3509 = vrot.lane.b32.xlu1 %v15469_v25, %s13649_s11  ;;  %4261 = vmatmul.mubr.bf16.gmra.mxu0 %v3599_v17  ;;  %v15536_v19 = vpack.c.bf16 %v2965_v18, %v2964_v39  ;;  %v13043_v18 = vld [vmem:[%s17776_s6 + $0x70] ss:$8 sps:$4 sm:$0xff]  }
 0x317   : > { %v3488_v34 = vpop.permute.xlu1 %3487  ;;  %4268 = vmatprep.mubr.bf16.mxu0 %v3667_v24  ;;  %v3536_v1 = vpop.permute.xlu0 %3535  ;;  %v3305_v24 = vld [vmem:[#allocation2 + $0x208] sm:$0xff] }
 0x318   : > { %v3699_v50 = vsel %vm2834_vm0, %v3165_v30, %v3488_v34  ;;  %3549 = vrot.lane.b32.xlu0 %v15165_v40, %s13649_s11  ;;  %v3763_v54 = vsel %vm2834_vm0, %v15305_v59, %v3536_v1  ;;  %v3603_v59 = vsel %vm2834_vm0, %v15490_v48, %v15444_v5  ;;  %v2962_v30 = vld [vmem:[#allocation2 + $0x167] sm:$0xff]  ;;  %v2963_v34 = vld [vmem:[#allocation2 + $0x16f] sm:$0xff] }
 0x319   : > { %4365 = vmatprep.mubr.bf16.mxu1 %v3763_v54  ;;  %v3306_v1 = vld [vmem:[#allocation2 + $0x210] sm:$0xff] }
 0x31a   : > { %3511 = vrot.lane.b32.xlu1 %v15479_v63, %s13649_s11  ;;  %4366 = vmatmul.mubr.bf16.gmra.mxu1 %v3699_v50  ;;  %v15532_v54 = vpack.c.bf16 %v3306_v1, %v3305_v24 }
 0x31b   : > { %v3412_v27 = vpop.permute.xlu1 %3411  ;;  %v3460_v45 = vpop.permute.xlu0 %3459 }
 0x31c   : > { %3551 = vrot.lane.b32.xlu0 %v15186_v33, %s13649_s11  ;;  %v3675_v47 = vsel %vm2834_vm0, %v15446_v52, %v3460_v45  ;;  %v2966_v45 = vld [vmem:[#allocation2 + $0x1a7] sm:$0xff] }
 0x31d   : > { %v12328_v40 = vpop.f32.mrf.mxu0 }
 0x31e   : > { %3513 = vrot.lane.b32.xlu1 %v15488_v60, %s13649_s11  ;;  %4269 = vmatmul.mubr.bf16.gmra.mxu0 %v3603_v59  ;;  %v3237_v59 = vld [vmem:[#allocation2 + $0xc7] sm:$0xff] }
 0x31f   : > { %v3490_v11 = vpop.permute.xlu1 %3489  ;;  %v12329_v28 = vpop.f32.mrf.mxu0  ;;  %4276 = vmatprep.mubr.bf16.mxu0 %v3671_v62  ;;  %v3141_v62 = vld [vmem:[#allocation2 + $0xb0] sm:$0xff] }
 0x320   : > { %v15503_v32 = vadd.f32 %v12329_v28, %v12328_v40  ;;  %v3538_v2 = vpop.permute.xlu0 %3537  ;;  %v3703_v33 = vsel %vm2834_vm0, %v3166_v6, %v3490_v11  ;;  %3553 = vrot.lane.b32.xlu0 %v15205_v20, %s13649_s11  ;;  %v3607_v20 = vsel %vm2834_vm0, %v15511_v8, %v15467_v49  ;;  %v15524_v49 = vpack.c.bf16 %v2963_v34, %v2962_v30  ;;  %v3238_v6 = vld [vmem:[#allocation2 + $0xcf] sm:$0xff] }
 0x321   : > { %v3767_v5 = vsel %vm2834_vm0, %v3263_v29, %v3538_v2  ;;  %v15545_v40 = vpack.c.bf16 %v2967_v35, %v2966_v45  ;;  %v3140_v28 = vld [vmem:[#allocation2 + $0xa8] sm:$0xff] }
 0x322   : > { %3515 = vrot.lane.b32.xlu1 %v15501_v55, %s13649_s11  ;;  %4373 = vmatprep.mubr.bf16.mxu1 %v3767_v5  ;;  %v3611_v50 = vsel %vm2834_vm0, %v15524_v49, %v3412_v27  ;;  %v15541_v27 = vpop.f32.mrf.mxu0  ;;  %v3265_v5 = vpack.c.bf16 %v3238_v6, %v3237_v59  ;;  %v3168_v16 = vpack.c.bf16 %v3141_v62, %v3140_v28  ;;  %v3241_v35 = vld [vmem:[#allocation2 + $0x107] sm:$0xff] }
 0x323   : > { %4374 = vmatmul.mubr.bf16.gmra.mxu1 %v3703_v33  ;;  %v3414_v7 = vpop.permute.xlu1 %3413  ;;  %v3144_v59 = vld [vmem:[#allocation2 + $0xe8] sm:$0xff] }
 0x324   : > { %v3462_v56 = vpop.permute.xlu0 %3461  ;;  %3555 = vrot.lane.b32.xlu0 %v15233_v53, %s13649_s11  ;;  %v15543_v61 = vpop.f32.mrf.mxu0  ;;  %v13046_v28 = vld [vmem:[%s17776_s6 + $0x60] ss:$8 sps:$4 sm:$0xff]   ;;  %v13048_v62 = vld [vmem:[%s17776_s6 + $0x64] ss:$8 sps:$4 sm:$0xff]  }
 0x326   : > { %4277 = vmatmul.mubr.bf16.gmra.mxu0 %v3607_v20 }
 0x327   : > { %v3492_v57 = vpop.permute.xlu1 %3491  ;;  %4284 = vmatprep.mubr.bf16.mxu0 %v3675_v47  ;;  %v3240_v47 = vld [vmem:[#allocation2 + $0xef] sm:$0xff] }
 0x328   : > { %v3540_v41 = vpop.permute.xlu0 %3539  ;;  %v3707_v17 = vsel %vm2834_vm0, %v3167_v14, %v3492_v57  ;;  %3557 = vrot.lane.b32.xlu0 %v15294_v58, %s13649_s11  ;;  %v3679_v58 = vsel %vm2834_vm0, %v15458_v36, %v3462_v56  ;;  %v3239_v57 = vld [vmem:[#allocation2 + $0xe7] sm:$0xff] }
 0x329   : > { %v3771_v53 = vsel %vm2834_vm0, %v3264_v43, %v3540_v41  ;;  %v3142_v41 = vld [vmem:[#allocation2 + $0xc8] sm:$0xff]  ;;  %v3266_v24 = vpack.c.bf16 %v3240_v47, %v3239_v57  ;;  %v13049_v57 = vld [vmem:[%s17776_s6 + $0x50] ss:$8 sps:$4 sm:$0xff]   ;;  %v13051_v47 = vld [vmem:[%s17776_s6 + $0x54] ss:$8 sps:$4 sm:$0xff]  }
 0x32a   : > { %4381 = vmatprep.mubr.bf16.mxu1 %v3771_v53 }
 0x32b   : > { %4382 = vmatmul.mubr.bf16.gmra.mxu1 %v3707_v17  ;;  %v3416_v46 = vpop.permute.xlu1 %3415  ;;  %v3143_v17 = vld [vmem:[#allocation2 + $0xd0] sm:$0xff] }
 0x32c   : > { %3559 = vrot.lane.b32.xlu0 %v15402_v4, %s13649_s11  ;;  %v3615_v4 = vsel %vm2834_vm0, %v15536_v19, %v3414_v7  ;;  %v3619_v2 = vsel %vm2834_vm0, %v15545_v40, %v3416_v46  ;;  %v3326_v46 = vld [vmem:[#allocation2 + $0x51] sm:$0xff] }
 0x32e   : > { %4285 = vmatmul.mubr.bf16.gmra.mxu0 %v3611_v50  ;;  %v3169_v50 = vpack.c.bf16 %v3143_v17, %v3142_v41 }
 0x32f   : > { %4292 = vmatprep.mubr.bf16.mxu0 %v3679_v58  ;;  %v3494_v33 = vpop.permute.xlu1 %3493 }
 0x330   : > { %3561 = vrot.lane.b32.xlu0 %v15532_v54, %s13649_s11  ;;  %v3711_v56 = vsel %vm2834_vm0, %v3168_v16, %v3494_v33 }
 0x334   : > { %3563 = vrot.lane.b32.xlu0 %v3324_v10, %s13649_s11  ;;  %s12309_s11 = sshll.u32 %s13728_s17, 4  ;;  %s13651_s17 = smov [#allocation7]  }
 0x335   : > { %s17735_s21 = scalar_lea.hbm %s17780_s10, %s12309_s11  ;;  %s13582_s28 = sshll.u32 %s13651_s17, 4  ;;  %s13583_s28 = int_to_ptr.vmem [resolvable:$false] %s13582_s28 }
 0x336   : > { %4293 = vmatmul.mubr.bf16.gmra.mxu0 %v3615_v4  ;;  %v3325_v4 = vld [vmem:[#allocation2 + $0x49] sm:$0xff]  ;;  %s13584_s29 = scalar_lea.vmem %s13583_s28, 32  ;;  %p13585_p11 = scmp.lt.s32.totalorder %s11580_s12, %s13583_s28 }
 0x337   : > { %p13586_p12 = scmp.lt.s32.totalorder %s13584_s29, %s13578_s27 }
 0x339   : > { %p13587_p13 = por %p13586_p12, %p13585_p11 }
 0x33b   : > { %p13588_p0 = pnand %p13587_p13, %p13581_p10 }
 0x343   : > { %v3464_v26 = vpop.permute.xlu0 %3463 }
 0x344   : > { %v3683_v11 = vsel %vm2834_vm0, %v15469_v25, %v3464_v26  ;;  %v3418_v22 = vpop.permute.xlu1 %3417  ;;  %v3242_v26 = vld [vmem:[#allocation2 + $0x10f] sm:$0xff] }
 0x345   : > { %4300 = vmatprep.mubr.bf16.mxu0 %v3683_v11  ;;  %v12334_v29 = vpop.f32.mrf.mxu0  ;;  %v3623_v30 = vsel %vm2834_vm0, %v15292_v15, %v3418_v22  ;;  %v13045_v15 = vld [vmem:[%s17776_s6 + $0x74] ss:$8 sps:$4 sm:$0xff]  }
 0x346   : > { %4301 = vmatmul.mubr.bf16.gmra.mxu0 %v3619_v2  ;;  %7503 = vmatprep.subr.bf16.mxu1 %v13045_v15  ;;  %v3145_v11 = vld [vmem:[#allocation2 + $0xf0] sm:$0xff]  ;;  %v3357_v2 = vpack.c.bf16 %v3326_v46, %v3325_v4  ;;  %v13054_v4 = vld [vmem:[%s17776_s6 + $0x44] ss:$8 sps:$4 sm:$0xff]  }
 0x347   : > { %v3542_v51 = vpop.permute.xlu0 %3541  ;;  %v12335_v7 = vpop.f32.mrf.mxu0  ;;  %7504 = vmatpush1.bf16.msra.mxu1 %v13043_v18  ;;  %v3170_v16 = vpack.c.bf16 %v3145_v11, %v3144_v59  ;;  %v3328_v22 = vld [vmem:[#allocation2 + $0x71] sm:$0xff]  ;;  %v3333_v18 = vld [vmem:[#allocation2 + $0xc9] sm:$0xff] }
 0x348   : > { %v3775_v23 = vsel %vm2834_vm0, %v3265_v5, %v3542_v51  ;;  %v15552_v44 = vadd.f32 %v12335_v7, %v12334_v29  ;;  %v3496_v34 = vpop.permute.xlu1 %3495  ;;  %v3267_v5 = vpack.c.bf16 %v3242_v26, %v3241_v35  ;;  %7505 = vmatprep.subr.bf16.mxu1 %v13048_v62  ;;  %v3334_v15 = vld [vmem:[#allocation2 + $0xd1] sm:$0xff]  ;;  %v3148_v35 = vld [vmem:[#allocation2 + $0x128] sm:$0xff] }
 0x349   : > { %4389 = vmatprep.mubr.bf16.mxu1 %v3775_v23  ;;  %v15555_v12 = vpop.f32.mrf.mxu0  ;;  %v3715_v39 = vsel %vm2834_vm0, %v3169_v50, %v3496_v34  ;;  %v3149_v26 = vld [vmem:[#allocation2 + $0x130] sm:$0xff]  ;;  %v3361_v59 = vpack.c.bf16 %v3334_v15, %v3333_v18  ;;  %v13064_v15 = vld [vmem:[%s17776_s6] ss:$8 sps:$4 sm:$0xff]  }
 0x34a   : > { %4390 = vmatmul.mubr.bf16.gmra.mxu1 %v3711_v56  ;;  %v3327_v56 = vld [vmem:[#allocation2 + $0x69] sm:$0xff] }
 0x34b   : > { %v15557_v20 = vpop.f32.mrf.mxu0  ;;  %7506 = vmatpush1.bf16.msra.mxu1 %v13046_v28  ;;  %v3358_v17 = vpack.c.bf16 %v3328_v22, %v3327_v56  ;;  %v3172_v28 = vpack.c.bf16 %v3149_v26, %v3148_v35  ;;  %v13055_v62 = vld [vmem:[%s17776_s6 + $0x30] ss:$8 sps:$4 sm:$0xff]   ;;  %v13063_v22 = vld [vmem:[%s17776_s6 + $0x14] ss:$8 sps:$4 sm:$0xff]   ;;  %v3255_v35 = vld [vmem:[#allocation2 + $0x1e7] sm:$0xff] }
 0x34c   : > { %7507 = vmatprep.subr.bf16.mxu1 %v13051_v47  ;;  %v3151_v56 = vld [vmem:[#allocation2 + $0x150] sm:$0xff] }
 0x34d   : > { %v13061_v47 = vld [vmem:[%s17776_s6 + $0x10] ss:$8 sps:$4 sm:$0xff]  }
 0x34e   : > { %v3256_v26 = vld [vmem:[#allocation2 + $0x1ef] sm:$0xff] }
 0x34f   : > { %7508 = vmatpush1.bf16.msra.mxu1 %v13049_v57 }
 0x350   : > { %7509 = vmatprep.subr.bf16.mxu1 %v13054_v4  ;;  %v3156_v4 = vld [vmem:[#allocation2 + $0x1a8] sm:$0xff] }
 0x36b   : > { %v3466_v14 = vpop.permute.xlu0 %3465 }
 0x36c   : > { %v3687_v43 = vsel %vm2834_vm0, %v15479_v63, %v3466_v14  ;;  %v3420_v10 = vpop.permute.xlu1 %3419  ;;  %v3329_v14 = vld [vmem:[#allocation2 + $0x89] sm:$0xff] }
 0x36d   : > { %4308 = vmatprep.mubr.bf16.mxu0 %v3687_v43  ;;  %v12340_v53 = vpop.f32.mrf.mxu0  ;;  %v3627_v29 = vsel %vm2834_vm0, %v15400_v9, %v3420_v10  ;;  %v3330_v9 = vld [vmem:[#allocation2 + $0x91] sm:$0xff]  ;;  %v13052_v10 = vld [vmem:[%s17776_s6 + $0x40] ss:$8 sps:$4 sm:$0xff]  }
 0x36e   : > { %4309 = vmatmul.mubr.bf16.gmra.mxu0 %v3623_v30  ;;  %v3147_v30 = vld [vmem:[#allocation2 + $0x110] sm:$0xff]  ;;  %v3359_v34 = vpack.c.bf16 %v3330_v9, %v3329_v14  ;;  %7510 = vmatpush1.bf16.msra.mxu1 %v13052_v10 }
 0x36f   : > { %v3544_v1 = vpop.permute.xlu0 %3543  ;;  %v12341_v31 = vpop.f32.mrf.mxu0 }
 0x370   : > { %v3779_v42 = vsel %vm2834_vm0, %v3266_v24, %v3544_v1  ;;  %v15564_v58 = vadd.f32 %v12341_v31, %v12340_v53  ;;  %v3498_v33 = vpop.permute.xlu1 %3497  ;;  %v3146_v53 = vld [vmem:[#allocation2 + $0x108] sm:$0xff] }
 0x371   : > { %4397 = vmatprep.mubr.bf16.mxu1 %v3779_v42  ;;  %v3719_v23 = vsel %vm2834_vm0, %v3170_v16, %v3498_v33  ;;  %v3171_v50 = vpack.c.bf16 %v3147_v30, %v3146_v53  ;;  %v3331_v42 = vld [vmem:[#allocation2 + $0xa9] sm:$0xff]  ;;  %v15605_v46 = vpop.f32.mrf.mxu0 }
 0x372   : > { %4398 = vmatmul.mubr.bf16.gmra.mxu1 %v3715_v39  ;;  %v3332_v39 = vld [vmem:[#allocation2 + $0xb1] sm:$0xff]  ;;  %v13058_v16 = vld [vmem:[%s17776_s6 + $0x20] ss:$8 sps:$4 sm:$0xff]  }
 0x374   : > { %v3500_v24 = vpop.permute.xlu1 %3499 }
 0x375   : > { %v3723_v31 = vsel %vm2834_vm0, %v3171_v50, %v3500_v24  ;;  %v3253_v50 = vld [vmem:[#allocation2 + $0x1c7] sm:$0xff] }
 0x37e   : > { %v3468_v45 = vpop.permute.xlu0 %3467 }
 0x37f   : > { %v3691_v6 = vsel %vm2834_vm0, %v15488_v60, %v3468_v45  ;;  %v3360_v45 = vpack.c.bf16 %v3332_v39, %v3331_v42 }
 0x380   : > { %4316 = vmatprep.mubr.bf16.mxu0 %v3691_v6  ;;  %v3502_v6 = vpop.permute.xlu1 %3501 }
 0x381   : > { %4317 = vmatmul.mubr.bf16.gmra.mxu0 %v3627_v29  ;;  %v15615_v29 = vpop.f32.mrf.mxu0  ;;  %v3727_v33 = vsel %vm2834_vm0, %v3172_v28, %v3502_v6 }
 0x382   : > { %12916 = vmatprep.mubr.msk.bf16.mxu0 %vm2834_vm0, %v3357_v2  ;;  %v3546_v51 = vpop.permute.xlu0 %3545  ;;  %v13060_v2 = vld [vmem:[%s17776_s6 + $0x24] ss:$8 sps:$4 sm:$0xff]  }
 0x383   : > { %v3783_v7 = vsel %vm2834_vm0, %v3267_v5, %v3546_v51 }
 0x384   : > { %4405 = vmatprep.mubr.bf16.mxu1 %v3783_v7  ;;  %v3504_v9 = vpop.permute.xlu1 %3503 }
 0x385   : > { %4406 = vmatmul.mubr.bf16.gmra.mxu1 %v3719_v23  ;;  %v3150_v23 = vld [vmem:[#allocation2 + $0x148] sm:$0xff] }
 0x386   : > { %v3548_v43 = vpop.permute.xlu0 %3547  ;;  %v3173_v57 = vpack.c.bf16 %v3151_v56, %v3150_v23  ;;  %v13073_v23 = vld [vmem:[%s17776_s6 + $0x170] ss:$8 sps:$4 sm:$0xff]  }
 0x387   : > { %v3787_v41 = vsel %vm2834_vm0, %v15490_v48, %v3548_v43 }
 0x388   : > { %4413 = vmatprep.mubr.bf16.mxu1 %v3787_v41  ;;  %v3731_v43 = vsel %vm2834_vm0, %v3173_v57, %v3504_v9  ;;  %v3506_v53 = vpop.permute.xlu1 %3505  ;;  %v3355_v57 = vld [vmem:[#allocation2 + $0x229] sm:$0xff] }
 0x389   : > { %12917 = vmatmul.mubr.msk.bf16.vlgmr.msra.gmra.mxu0 %vm2834_vm0, %v3358_v17  ;;  %v3153_v17 = vld [vmem:[#allocation2 + $0x170] sm:$0xff] }
 0x38a   : > { %12920 = vmatprep.mubr.msk.bf16.mxu0 %vm2834_vm0, %v3359_v34  ;;  %v3550_v1 = vpop.permute.xlu0 %3549 }
 0x38b   : > { %v3791_v48 = vsel %vm2834_vm0, %v15511_v8, %v3550_v1  ;;  %v13057_v8 = vld [vmem:[%s17776_s6 + $0x34] ss:$8 sps:$4 sm:$0xff]  }
 0x38c   : > { %7511 = vmatprep.subr.bf16.mxu1 %v13057_v8  ;;  %v3155_v1 = vld [vmem:[#allocation2 + $0x190] sm:$0xff]  ;;  %v3508_v42 = vpop.permute.xlu1 %3507 }
 0x38d   : > { %4414 = vmatmul.mubr.bf16.gmra.mxu1 %v3723_v31  ;;  %v3254_v31 = vld [vmem:[#allocation2 + $0x1cf] sm:$0xff] }
 0x38e   : > { %4421 = vmatprep.mubr.bf16.mxu1 %v3791_v48  ;;  %v3552_v11 = vpop.permute.xlu0 %3551  ;;  %7512 = vmatpush1.bf16.msra.mxu1 %v13055_v62  ;;  %v3273_v48 = vpack.c.bf16 %v3254_v31, %v3253_v50  ;;  %v3274_v62 = vpack.c.bf16 %v3256_v26, %v3255_v35 }
 0x38f   : > { %v3795_v51 = vsel %vm2834_vm0, %v15524_v49, %v3552_v11  ;;  %7513 = vmatprep.subr.bf16.mxu1 %v13060_v2 }
 0x391   : > { %12921 = vmatmul.mubr.msk.bf16.gmra.mxu0 %vm2834_vm0, %v3360_v45 }
 0x392   : > { %12924 = vmatprep.mubr.msk.bf16.mxu0 %vm2834_vm0, %v3361_v59  ;;  %v3554_v49 = vpop.permute.xlu0 %3553  ;;  %7514 = vmatpush1.bf16.msra.mxu1 %v13058_v16  ;;  %v3510_v59 = vpop.permute.xlu1 %3509 }
 0x393   : > { %7515 = vmatprep.subr.bf16.mxu1 %v13063_v22  ;;  %v3799_v41 = vsel %vm2834_vm0, %v15536_v19, %v3554_v49  ;;  %v3154_v19 = vld [vmem:[#allocation2 + $0x188] sm:$0xff]  ;;  %v13075_v22 = vld [vmem:[%s17776_s6 + $0x174] ss:$8 sps:$4 sm:$0xff]  }
 0x394   : > { %7576 = vmatprep.subr.bf16.mxu0 %v13075_v22  ;;  %v13093_v22 = vld [vmem:[%s17776_s6 + $0x134] ss:$8 sps:$4 sm:$0xff]  }
 0x395   : > { %v12346_v5 = vpop.f32.mrf.mxu0  ;;  %4422 = vmatmul.mubr.bf16.gmra.mxu1 %v3727_v33  ;;  %7577 = vmatpush1.bf16.msra.mxu0 %v13073_v23 }
 0x396   : > { %4429 = vmatprep.mubr.bf16.mxu1 %v3795_v51  ;;  %7516 = vmatpush1.bf16.msra.mxu1 %v13061_v47  ;;  %v3159_v51 = vld [vmem:[#allocation2 + $0x1d0] sm:$0xff]  ;;  %v3512_v56 = vpop.permute.xlu1 %3511 }
 0x397   : > { %v12347_v7 = vpop.f32.mrf.mxu0  ;;  %v3356_v47 = vld [vmem:[#allocation2 + $0x231] sm:$0xff] }
 0x398   : > { %v15629_v14 = vadd.f32 %v12347_v7, %v12346_v5  ;;  %v13067_v5 = vld [vmem:[%s17776_s6 + $0xf0] ss:$8 sps:$4 sm:$0xff]   ;;  %v13072_v7 = vld [vmem:[%s17776_s6 + $0xe4] ss:$8 sps:$4 sm:$0xff]  }
 0x399   : > { %12925 = vmatmul.mubr.msk.bf16.gmra.mxu0 %vm2834_vm0, %v15410_v21  ;;  %v3152_v21 = vld [vmem:[#allocation2 + $0x168] sm:$0xff] }
 0x39a   : > { %12928 = vmatprep.mubr.msk.bf16.mxu0 %vm2834_vm0, %v15424_v13  ;;  %v3556_v13 = vpop.permute.xlu0 %3555  ;;  %v3174_v30 = vpack.c.bf16 %v3153_v17, %v3152_v21  ;;  %v3259_v21 = vld [vmem:[#allocation2 + $0x227] sm:$0xff]  ;;  %v3260_v17 = vld [vmem:[#allocation2 + $0x22f] sm:$0xff]  ;;  %v3514_v50 = vpop.permute.xlu1 %3513 }
 0x39b   : > { %v3803_v24 = vsel %vm2834_vm0, %v15545_v40, %v3556_v13 }
 0x39c   : > { %v3735_v34 = vsel %vm2834_vm0, %v3174_v30, %v3506_v53  ;;  %v3372_v53 = vpack.c.bf16 %v3356_v47, %v3355_v57  ;;  %v3160_v30 = vld [vmem:[#allocation2 + $0x1e8] sm:$0xff] }
 0x39d   : > { %4430 = vmatmul.mubr.bf16.gmra.mxu1 %v3731_v43  ;;  %v13070_v43 = vld [vmem:[%s17776_s6 + $0xe0] ss:$8 sps:$4 sm:$0xff]  }
 0x39e   : > { %4437 = vmatprep.mubr.bf16.mxu1 %v3799_v41  ;;  %v3558_v39 = vpop.permute.xlu0 %3557  ;;  %v3516_v26 = vpop.permute.xlu1 %3515 }
 0x39f   : > { %v3807_v40 = vsel %vm2834_vm0, %v3273_v48, %v3558_v39 }
 0x3a1   : > { %12929 = vmatmul.mubr.msk.bf16.gmra.mxu0 %vm2834_vm0, %v15432_v38  ;;  %v15650_v38 = vpop.f32.mrf.mxu0 }
 0x3a2   : > { %12932 = vmatprep.mubr.msk.bf16.mxu0 %vm2834_vm0, %v15440_v3  ;;  %v3175_v3 = vpack.c.bf16 %v3155_v1, %v3154_v19  ;;  %v3560_v8 = vpop.permute.xlu0 %3559 }
 0x3a3   : > { %v15662_v10 = vpop.f32.mrf.mxu0  ;;  %v3811_v33 = vsel %vm2834_vm0, %v3274_v62, %v3560_v8 }
 0x3a4   : > { %v3739_v18 = vsel %vm2834_vm0, %v3175_v3, %v3508_v42  ;;  %v13076_v42 = vld [vmem:[%s17776_s6 + $0x160] ss:$8 sps:$4 sm:$0xff]  }
 0x3a5   : > { %4438 = vmatmul.mubr.bf16.gmra.mxu1 %v3735_v34  ;;  %v3161_v34 = vld [vmem:[#allocation2 + $0x1f0] sm:$0xff] }
 0x3a6   : > { %4445 = vmatprep.mubr.bf16.mxu1 %v3803_v24  ;;  %v3562_v9 = vpop.permute.xlu0 %3561  ;;  %v3276_v24 = vpack.c.bf16 %v3260_v17, %v3259_v21  ;;  %v3178_v3 = vpack.c.bf16 %v3161_v34, %v3160_v30  ;;  %v13096_v30 = vld [vmem:[%s17776_s6 + $0x124] ss:$8 sps:$4 sm:$0xff]  }
 0x3a9   : > { %12933 = vmatmul.mubr.msk.bf16.gmra.mxu0 %vm2834_vm0, %v15446_v52  ;;  %v13066_v52 = vld [vmem:[%s17776_s6 + $0x4] ss:$8 sps:$4 sm:$0xff]  }
 0x3aa   : > { %12936 = vmatprep.mubr.msk.bf16.mxu0 %vm2834_vm0, %v15458_v36  ;;  %v3157_v36 = vld [vmem:[#allocation2 + $0x1b0] sm:$0xff]  ;;  %7517 = vmatprep.subr.bf16.mxu1 %v13066_v52  ;;  %v3564_v1 = vpop.permute.xlu0 %3563 }
 0x3ab   : > { %7518 = vmatpush1.bf16.msra.mxu1 %v13064_v15  ;;  %v3176_v11 = vpack.c.bf16 %v3157_v36, %v3156_v4  ;;  %v3819_v48 = vsel %vm2834_vm0, %v3276_v24, %v3564_v1  ;;  %v13079_v52 = vld [vmem:[%s17776_s6 + $0xd0] ss:$8 sps:$4 sm:$0xff]   ;;  %v13081_v4 = vld [vmem:[%s17776_s6 + $0xd4] ss:$8 sps:$4 sm:$0xff]   ;;  %v13094_v24 = vld [vmem:[%s17776_s6 + $0x120] ss:$8 sps:$4 sm:$0xff]  }
 0x3ac   : > { %v13082_v36 = vld [vmem:[%s17776_s6 + $0x150] ss:$8 sps:$4 sm:$0xff]   ;;  %v13090_v1 = vld [vmem:[%s17776_s6 + $0xc4] ss:$8 sps:$4 sm:$0xff]  }
 0x3ad   : > { %4446 = vmatmul.mubr.bf16.gmra.mxu1 %v3739_v18  ;;  %v3743_v2 = vsel %vm2834_vm0, %v3176_v11, %v3510_v59  ;;  %v13085_v11 = vld [vmem:[%s17776_s6 + $0x140] ss:$8 sps:$4 sm:$0xff]  }
 0x3ae   : > { %4453 = vmatprep.mubr.bf16.mxu1 %v3807_v40  ;;  %v3751_v40 = vsel %vm2834_vm0, %v3178_v3, %v3514_v50  ;;  %v13088_v50 = vld [vmem:[%s17776_s6 + $0xc0] ss:$8 sps:$4 sm:$0xff]  }
 0x3b1   : > { %v12352_v45 = vpop.f32.mrf.mxu0  ;;  %12937 = vmatmul.mubr.msk.bf16.gmra.mxu0 %vm2834_vm0, %v15469_v25  ;;  %v13069_v25 = vld [vmem:[%s17776_s6 + $0xf4] ss:$8 sps:$4 sm:$0xff]  }
 0x3b2   : > { %12940 = vmatprep.mubr.msk.bf16.mxu0 %vm2834_vm0, %v15479_v63  ;;  %v3158_v63 = vld [vmem:[#allocation2 + $0x1c8] sm:$0xff]  ;;  %7519 = vmatprep.subr.bf16.mxu1 %v13069_v25 }
 0x3b3   : > { %v12353_v6 = vpop.f32.mrf.mxu0  ;;  %7520 = vmatpush2.bf16.msra.mxu1 %v13067_v5  ;;  %v3177_v49 = vpack.c.bf16 %v3159_v51, %v3158_v63 }
 0x3b4   : > { %v15668_v28 = vadd.f32 %v12353_v6, %v12352_v45  ;;  %7521 = vmatprep.subr.bf16.mxu1 %v13072_v7  ;;  %v13084_v45 = vld [vmem:[%s17776_s6 + $0x154] ss:$8 sps:$4 sm:$0xff]   ;;  %v13087_v6 = vld [vmem:[%s17776_s6 + $0x144] ss:$8 sps:$4 sm:$0xff]  }
 0x3b5   : > { %4454 = vmatmul.mubr.bf16.gmra.mxu1 %v3743_v2  ;;  %v15678_v16 = vpop.f32.mrf.mxu0  ;;  %v3755_v2 = vsel %vm2834_vm0, %v15532_v54, %v3516_v26 }
 0x3b6   : > { %4461 = vmatprep.mubr.bf16.mxu1 %v3811_v33 }
 0x3b7   : > { %v15696_v41 = vpop.f32.mrf.mxu0  ;;  %7522 = vmatpush2.bf16.msra.mxu1 %v13070_v43 }
 0x3b8   : > { %7523 = vmatprep.subr.bf16.mxu1 %v13081_v4 }
 0x3b9   : > { %12941 = vmatmul.mubr.msk.bf16.gmra.mxu0 %vm2834_vm0, %v15488_v60  ;;  %v3747_v60 = vsel %vm2834_vm0, %v3177_v49, %v3512_v56 }
 0x3ba   : > { %12944 = vmatprep.mubr.msk.bf16.mxu0 %vm2834_vm0, %v15501_v55  ;;  %v3815_v55 = vsel %vm2834_vm0, %v15448_v37, %v3562_v9  ;;  %v13078_v37 = vld [vmem:[%s17776_s6 + $0x164] ss:$8 sps:$4 sm:$0xff]   ;;  %v13091_v9 = vld [vmem:[%s17776_s6 + $0x130] ss:$8 sps:$4 sm:$0xff]  }
 0x3bb   : > { %7578 = vmatprep.subr.bf16.mxu0 %v13078_v37  ;;  %7524 = vmatpush2.bf16.msra.mxu1 %v13079_v52 }
 0x3bc   : > { %7579 = vmatpush1.bf16.msra.mxu0 %v13076_v42  ;;  %7525 = vmatprep.subr.bf16.mxu1 %v13090_v1  ;;  %v13099_v1 = vld [vmem:[%s17776_s6 + $0xb4] ss:$8 sps:$4 sm:$0xff]  }
 0x3bd   : > { %4462 = vmatmul.mubr.bf16.gmra.mxu1 %v3747_v60  ;;  %7580 = vmatprep.subr.bf16.mxu0 %v13084_v45 }
 0x3be   : > { %v12358_v13 = vpop.f32.mrf.mxu0  ;;  %4469 = vmatprep.mubr.bf16.mxu1 %v3815_v55 }
 0x3bf   : > { %7526 = vmatpush2.bf16.msra.mxu1 %v13088_v50  ;;  %v13097_v50 = vld [vmem:[%s17776_s6 + $0xb0] ss:$8 sps:$4 sm:$0xff]  }
 0x3c0   : > { %v12359_v19 = vpop.f32.mrf.mxu0  ;;  %7581 = vmatpush1.bf16.msra.mxu0 %v13082_v36  ;;  %7527 = vmatprep.subr.bf16.mxu1 %v13099_v1 }
 0x3c1   : > { %v15701_v31 = vadd.f32 %v12359_v19, %v12358_v13  ;;  %12945 = vmatmul.mubr.msk.bf16.gmra.mxu0 %vm2834_vm0, %v3372_v53  ;;  %7582 = vmatprep.subr.bf16.mxu0 %v13087_v6 }
 0x3c2   : > { %v15710_v39 = vpop.f32.mrf.mxu0 }
 0x3c3   : > { %7528 = vmatpush2.bf16.msra.mxu1 %v13097_v50 }
 0x3c4   : > { %v15713_v18 = vpop.f32.mrf.mxu0  ;;  %7583 = vmatpush1.bf16.msra.mxu0 %v13085_v11  ;;  %7529 = vmatprep.subr.bf16.mxu1 %v13108_v0  ;;  %v13650_v0 = vmov 1983009808  }
 0x3c5   : > { %4470 = vmatmul.mubr.bf16.gmra.mxu1 %v3751_v40  ;;  %7584 = vmatprep.subr.bf16.mxu0 %v13093_v22 }
 0x3c6   : > { %v12364_v15 = vpop.f32.mrf.mxu0  ;;  %4477 = vmatprep.mubr.bf16.mxu1 %v3819_v48 }
 0x3c8   : > { %v12365_v35 = vpop.f32.mrf.mxu0  ;;  %7585 = vmatpush1.bf16.msra.mxu0 %v13091_v9 }
 0x3c9   : > { %v15728_v59 = vadd.f32 %v12365_v35, %v12364_v15  ;;  %7586 = vmatprep.subr.bf16.mxu0 %v13096_v30 }
 0x3ca   : > { %v15730_v8 = vpop.f32.mrf.mxu0 }
 0x3cc   : > { %v15738_v62 = vpop.f32.mrf.mxu0  ;;  %7587 = vmatpush1.bf16.msra.mxu0 %v13094_v24 }
 0x3cd   : > { %4478 = vmatmul.mubr.bf16.gmra.mxu1 %v3755_v2 }
 0x3ce   : > { %v12370_v33 = vpop.f32.mrf.mxu0 }
 0x3d0   : > { %v12371_v5 = vpop.f32.mrf.mxu0 }
 0x3d1   : > { %v15742_v25 = vadd.f32 %v12371_v5, %v12370_v33  ;;  %v13102_v33 = vld [vmem:[%s17776_s6 + $0x114] ss:$8 sps:$4 sm:$0xff]   ;;  %v13100_v5 = vld [vmem:[%s17776_s6 + $0x110] ss:$8 sps:$4 sm:$0xff]  }
 0x3d2   : > { %v15744_v63 = vpop.f32.mrf.mxu0  ;;  %v15773_v34 = vpop.f32.mrf.mxu1  ;;  %7588 = vmatprep.subr.bf16.mxu0 %v13102_v33 }
 0x3d3   : > { %7589 = vmatpush1.bf16.msra.mxu0 %v13100_v5 }
 0x3d4   : > { %v15746_v51 = vpop.f32.mrf.mxu0  ;;  %v15786_v37 = vpop.f32.mrf.mxu1 }
 0x3d6   : > { %v12376_v7 = vpop.f32.mrf.mxu0  ;;  %v15792_v15 = vpop.f32.mrf.mxu1 }
 0x3d8   : > { %v12377_v23 = vpop.f32.mrf.mxu0  ;;  %v15796_v36 = vpop.f32.mrf.mxu1 }
 0x3d9   : > { %v15748_v56 = vadd.f32 %v12377_v23, %v12376_v7 }
 0x3da   : > { %v15753_v54 = vpop.f32.mrf.mxu0  ;;  %v15800_v6 = vpop.f32.mrf.mxu1 }
 0x3dc   : > { %v15758_v49 = vpop.f32.mrf.mxu0  ;;  %v15810_v7 = vpop.f32.mrf.mxu1 }
 0x3de   : > { %v12382_v57 = vpop.f32.mrf.mxu0  ;;  %v15812_v23 = vpop.f32.mrf.mxu1 }
 0x3e0   : > { %v12383_v47 = vpop.f32.mrf.mxu0  ;;  %v15814_v9 = vpop.f32.mrf.mxu1 }
 0x3e1   : > { %v15760_v43 = vadd.f32 %v12383_v47, %v12382_v57 }
 0x3e2   : > { %v15762_v60 = vpop.f32.mrf.mxu0 }
 0x3e4   : > { %v15764_v21 = vpop.f32.mrf.mxu0 }
 0x3e6   : > { %v12388_v17 = vpop.f32.mrf.mxu0 }
 0x3e8   : > { %v12389_v55 = vpop.f32.mrf.mxu0 }
 0x3e9   : > { %v15766_v53 = vadd.f32 %v12389_v55, %v12388_v17  ;;  %v15818_v55 = vpop.f32.mrf.mxu1 }
 0x3ea   : > { %v15768_v13 = vpop.f32.mrf.mxu0 }
 0x3ec   : > { %v15778_v19 = vpop.f32.mrf.mxu0 }
 0x3ee   : > { %v12394_v42 = vpop.f32.mrf.mxu0 }
 0x3f0   : > { %v12395_v3 = vpop.f32.mrf.mxu0 }
 0x3f1   : > { %v15788_v48 = vadd.f32 %v12395_v3, %v12394_v42  ;;  %v15828_v42 = vpop.f32.mrf.mxu1  ;;  %v13105_v3 = vld [vmem:[%s17776_s6 + $0x104] ss:$8 sps:$4 sm:$0xff]  }
 0x3f2   : > { %v15790_v40 = vpop.f32.mrf.mxu0  ;;  %7590 = vmatprep.subr.bf16.mxu0 %v13105_v3 }
 0x3f4   : > { %v15794_v52 = vpop.f32.mrf.mxu0 }
 0x3f6   : > { %v12400_v4 = vpop.f32.mrf.mxu0 }
 0x3f8   : > { %v12401_v45 = vpop.f32.mrf.mxu0 }
 0x3f9   : > { %v15798_v35 = vadd.f32 %v12401_v45, %v12400_v4  ;;  %v13103_v4 = vld [vmem:[%s17776_s6 + $0x100] ss:$8 sps:$4 sm:$0xff]   ;;  %v15836_v45 = vpop.f32.mrf.mxu1 }
 0x3fa   : > { %v12403_v26 = vpop.f32.mrf.mxu0  ;;  %7591 = vmatpush1.bf16.msra.mxu0 %v13103_v4 }
 0x3fb   : > { %17819 = vst [vmem:[#allocation10_spill] sm:$0xff] %v15798_v35 }
 0x3fc   : > { %v12404_v11 = vpop.f32.mrf.mxu0 }
 0x3fd   : > { %v15802_v2 = vadd.f32 %v12404_v11, %v12403_v26  ;;  %v15838_v26 = vpop.f32.mrf.mxu1 }
 0x3ff   : > { %17820 = vst [vmem:[#allocation11_spill] sm:$0xff] %v15802_v2  ;;  %v15840_v11 = vpop.f32.mrf.mxu1 }
 0x401   : > { %v15842_v33 = vpop.f32.mrf.mxu1 }
 0x403   : > { %v15844_v5 = vpop.f32.mrf.mxu1 }
 0x406   : > { %v12406_v22 = vpop.f32.mrf.mxu0 }
 0x408   : > { %v12407_v57 = vpop.f32.mrf.mxu0 }
 0x409   : > { %v15816_v47 = vadd.f32 %v12407_v57, %v12406_v22  ;;  %v13111_v22 = vld [vmem:[%s17776_s6 + $0x1f4] ss:$8 sps:$4 sm:$0xff]   ;;  %v13109_v57 = vld [vmem:[%s17776_s6 + $0x1f0] ss:$8 sps:$4 sm:$0xff]  }
 0x40a   : > { %v12409_v17 = vpop.f32.mrf.mxu0  ;;  %7592 = vmatprep.subr.bf16.mxu0 %v13111_v22  ;;  %v13106_v22 = vld [vmem:[%s17776_s6 + $0xa0] ss:$8 sps:$4 sm:$0xff]  }
 0x40b   : > { %17821 = vst [vmem:[#allocation12_spill] sm:$0xff] %v15816_v47  ;;  %7593 = vmatpush2.bf16.msra.mxu0 %v13109_v57  ;;  %7530 = vmatpush2.bf16.msra.mxu1 %v13106_v22  ;;  %v4715_v22 = vlaneseq }
 0x40c   : > { %v12410_v30 = vpop.f32.mrf.mxu0 }
 0x40d   : > { %v15820_v24 = vadd.f32 %v12410_v30, %v12409_v17  ;;  %v15852_v17 = vpop.f32.mrf.mxu1 }
 0x40f   : > { %17822 = vst [vmem:[#allocation13_spill] sm:$0xff] %v15820_v24  ;;  %v15854_v30 = vpop.f32.mrf.mxu1 }
 0x411   : > { %v15856_v1 = vpop.f32.mrf.mxu1 }
 0x412   : > { %17823 = vst [vmem:[#allocation14_spill] sm:$0xff] %v15856_v1  ;;  %v4713_v1 = vunpack.c.l.s4 %v13650_v0 }
 0x413   : > { %v15863_v24 = vpop.f32.mrf.mxu1 }
 0x414   : > { %17825 = vst [vmem:[#allocation16_spill] sm:$0xff] %v15863_v24  ;;  %v12339_v24 = vadd.f32 %v15557_v20, %v15555_v12  ;;  %v12363_v12 = vadd.f32 %v15713_v18, %v15710_v39  ;;  %v13112_v20 = vld [vmem:[%s17776_s6 + $0x1e0] ss:$8 sps:$4 sm:$0xff]   ;;  %v4714_v39 = vunpack.c.0.s8 %v4713_v1  ;;  %v15909_v18 = vshrl.u32 %v4715_v22, 7 }
 0x415   : > { %v15870_v35 = vpop.f32.mrf.mxu1 }
 0x416   : > { %17827 = vst [vmem:[#allocation18_spill] sm:$0xff] %v15909_v18 }
 0x42e   : > { %v12412_v50 = vpop.f32.mrf.mxu0 }
 0x430   : > { %v12413_v3 = vpop.f32.mrf.mxu0 }
 0x431   : > { %v15858_v4 = vadd.f32 %v12413_v3, %v12412_v50  ;;  %v12333_v3 = vadd.f32 %v15543_v61, %v15541_v27  ;;  %v13114_v27 = vld [vmem:[%s17776_s6 + $0x1e4] ss:$8 sps:$4 sm:$0xff]   ;;  %v12357_v61 = vadd.f32 %v15696_v41, %v15678_v16 }
 0x432   : > { %v12415_v47 = vpop.f32.mrf.mxu0  ;;  %v15872_v50 = vpop.f32.mrf.mxu1  ;;  %7594 = vmatprep.subr.bf16.mxu0 %v13114_v27 }
 0x433   : > { %17824 = vst [vmem:[#allocation15_spill] sm:$0xff] %v15858_v4  ;;  %v15879_v4 = vld [vmem:[%s17775_s5] ss:$0 sm:$0xff]  ;;  %7595 = vmatpush2.bf16.msra.mxu0 %v13112_v20 }
 0x434   : > { %v12416_v57 = vpop.f32.mrf.mxu0  ;;  %v4210_v16 = vadd.f32 %v12339_v24, %v15879_v4  ;;  %v4215_v41 = vadd.f32 %v15564_v58, %v15879_v4  ;;  %v15919_v24 = vadd.f32 %v15668_v28, %v15879_v4  ;;  %v15922_v58 = vadd.f32 %v12357_v61, %v15879_v4 }
 0x435   : > { %v15868_v2 = vadd.f32 %v12416_v57, %v12415_v47  ;;  %v12345_v47 = vadd.f32 %v15615_v29, %v15605_v46  ;;  %v12351_v57 = vadd.f32 %v15662_v10, %v15650_v38  ;;  %v4199_v46 = vadd.f32 %v15503_v32, %v15879_v4 }
 0x436   : > { %v4202_v29 = vadd.f32 %v12333_v3, %v15879_v4  ;;  %v4207_v38 = vadd.f32 %v15552_v44, %v15879_v4  ;;  %v12369_v10 = vadd.f32 %v15738_v62, %v15730_v8  ;;  %v4223_v3 = vadd.f32 %v15629_v14, %v15879_v4 }
 0x437   : > { %17826 = vst [vmem:[#allocation17_spill] sm:$0xff] %v15868_v2  ;;  %v15887_v2 = vpop.f32.mrf.mxu1  ;;  %v4218_v32 = vadd.f32 %v12345_v47, %v15879_v4  ;;  %v4226_v44 = vadd.f32 %v12351_v57, %v15879_v4  ;;  %v12375_v8 = vadd.f32 %v15746_v51, %v15744_v63  ;;  %v15926_v1 = vadd.f32 %v15701_v31, %v15879_v4 }
 0x438   : > { %v15929_v0 = vadd.f32 %v12363_v12, %v15879_v4  ;;  %v15933_v14 = vadd.f32 %v15728_v59, %v15879_v4  ;;  %v15936_v63 = vadd.f32 %v12369_v10, %v15879_v4  ;;  %v12442_v28 = vadd.f32 %v15786_v37, %v15773_v34 }
 0x439   : > { %v12473_v62 = vpop.f32.mrf.mxu1  ;;  %v12445_v51 = vadd.f32 %v15796_v36, %v15792_v15  ;;  %v15944_v31 = vadd.f32 %v15742_v25, %v15879_v4  ;;  %v12381_v47 = vadd.f32 %v15758_v49, %v15753_v54  ;;  %v12448_v59 = vadd.f32 %v15810_v7, %v15800_v6 }
 0x43a   : > { %v15951_v57 = vsub.s32 %v4714_v39, %v15909_v18  ;;  %v15954_v27 = vadd.f32 %v12375_v8, %v15879_v4  ;;  %v12451_v34 = vadd.f32 %v15814_v9, %v15812_v23  ;;  %v12387_v37 = vadd.f32 %v15764_v21, %v15762_v60 }
 0x43b   : > { %v12454_v25 = vadd.f32 %v15828_v42, %v15818_v55  ;;  %v12474_v15 = vpop.f32.mrf.mxu1  ;;  %v12457_v49 = vadd.f32 %v15838_v26, %v15836_v45  ;;  %v12393_v36 = vadd.f32 %v15778_v19, %v15768_v13  ;;  %v12460_v6 = vadd.f32 %v15842_v33, %v15840_v11 }
 0x43c   : > { %v15972_v23 = vadd.f32 %v15748_v56, %v15879_v4  ;;  %v12463_v60 = vadd.f32 %v15852_v17, %v15844_v5  ;;  %v4360_v55 = vadd.f32 %v12442_v28, %v4199_v46  ;;  %v15976_v42 = vadd.f32 %v12445_v51, %v4202_v29  ;;  %v17829_v29 = vld [vmem:[#allocation16_spill] sm:$0xff] }
 0x43d   : > { %v15979_v13 = vadd.f32 %v12381_v47, %v15879_v4  ;;  %v15983_v19 = vadd.f32 %v15760_v43, %v15879_v4  ;;  %v12399_v56 = vadd.f32 %v15794_v52, %v15790_v40  ;;  %v4368_v45 = vadd.f32 %v12448_v59, %v4207_v38 }
 0x43e   : > { %v15988_v26 = vadd.f32 %v12387_v37, %v15879_v4  ;;  %v15992_v11 = vadd.f32 %v15766_v53, %v15879_v4  ;;  %v4371_v17 = vadd.f32 %v12451_v34, %v4210_v16  ;;  %v15994_v61 = vadd.f32 %v12454_v25, %v4215_v41  ;;  %v17828_v53 = vld [vmem:[#allocation14_spill] sm:$0xff]  ;;  %v17833_v34 = vld [vmem:[#allocation13_spill] sm:$0xff] }
 0x43f   : > { %v15997_v12 = vadd.f32 %v12393_v36, %v15879_v4  ;;  %v16001_v20 = vadd.f32 %v12460_v6, %v4223_v3  ;;  %v16003_v40 = vadd.f32 %v12457_v49, %v4218_v32  ;;  %v16007_v52 = vadd.f32 %v15788_v48, %v15879_v4  ;;  %v17830_v32 = vld [vmem:[#allocation10_spill] sm:$0xff]  ;;  %v17831_v48 = vld [vmem:[#allocation11_spill] sm:$0xff] }
 0x440   : > { %v12466_v46 = vadd.f32 %v17828_v53, %v15854_v30  ;;  %v12469_v38 = vadd.f32 %v15870_v35, %v17829_v29  ;;  %v16013_v41 = vadd.f32 %v12463_v60, %v4226_v44  ;;  %v16016_v39 = vadd.f32 %v12399_v56, %v15879_v4  ;;  %v17832_v30 = vld [vmem:[#allocation12_spill] sm:$0xff]  ;;  %v17834_v36 = vld [vmem:[#allocation15_spill] sm:$0xff]  ;;  %v17835_v60 = vld [vmem:[#allocation17_spill] sm:$0xff] }
 0x441   : > { %v12418_v22 = vpop.f32.mrf.mxu0  ;;  %v16020_v3 = vadd.f32 %v17830_v32, %v15879_v4  ;;  %v16024_v8 = vadd.f32 %v17831_v48, %v15879_v4  ;;  %v16028_v51 = vadd.f32 %v17832_v30, %v15879_v4  ;;  %v12472_v35 = vadd.f32 %v15887_v2, %v15872_v50 }
 0x442   : > { %v12475_v44 = vadd.f32 %v12474_v15, %v12473_v62  ;;  %v16034_v37 = vadd.f32 %v17833_v34, %v15879_v4  ;;  %v16038_v6 = vadd.f32 %v17834_v36, %v15879_v4  ;;  %v16045_v62 = vadd.f32 %v12466_v46, %v15919_v24 }
 0x443   : > { %v12419_v54 = vpop.f32.mrf.mxu0  ;;  %v16048_v15 = vadd.f32 %v12469_v38, %v15922_v58  ;;  %v16058_v24 = vadd.f32 %v12472_v35, %v15926_v1 }
 0x444   : > { %v15968_v7 = vadd.f32 %v12419_v54, %v12418_v22  ;;  %v16061_v58 = vadd.f32 %v12475_v44, %v15929_v0 }
 0x445   : > { %v12421_v21 = vpop.f32.mrf.mxu0  ;;  %v12476_v9 = vpop.f32.mrf.mxu1 }
 0x447   : > { %v12422_v33 = vpop.f32.mrf.mxu0  ;;  %v12477_v5 = vpop.f32.mrf.mxu1 }
 0x448   : > { %v15999_v43 = vadd.f32 %v12422_v33, %v12421_v21  ;;  %v12478_v22 = vadd.f32 %v12477_v5, %v12476_v9  ;;  %v16042_v21 = vadd.f32 %v17835_v60, %v15879_v4  ;;  %v13120_v9 = vld [vmem:[%s17776_s6 + $0x1d4] ss:$8 sps:$4 sm:$0xff]   ;;  %v13118_v4 = vld [vmem:[%s17776_s6 + $0x1d0] ss:$8 sps:$4 sm:$0xff]  }
 0x449   : > { %v12479_v10 = vpop.f32.mrf.mxu1  ;;  %v12918_v16 = vpop.f32.mrf.mxu0  ;;  %7596 = vmatprep.subr.bf16.mxu0 %v13120_v9 }
 0x44a   : > { %v4529_v28 = vadd.f32 %v12918_v16, %v4368_v45  ;;  %v16064_v53 = vadd.f32 %v12478_v22, %v15933_v14  ;;  %7597 = vmatpush2.bf16.msra.mxu0 %v13118_v4 }
 0x44b   : > { %v12480_v47 = vpop.f32.mrf.mxu1  ;;  %v4520_v59 = vpop.f32.mrf.mxu0 }
 0x44c   : > { %v4649_v25 = vmax.f32 %v4529_v28, 0.0  ;;  %v12481_v54 = vadd.f32 %v12480_v47, %v12479_v10  ;;  %v4521_v49 = vadd.f32 %v4520_v59, %v4360_v55 }
 0x44d   : > { %v12482_v2 = vpop.f32.mrf.mxu1  ;;  %v12919_v50 = vpop.f32.mrf.mxu0 }
 0x44e   : > { %v4745_v55 = vcombine.high %v4649_v25, %v4649_v25  ;;  %v4752_v56 = vrot.slane %v4649_v25, %v15951_v57  ;;  %v4647_v45 = vmax.f32 %v4521_v49, 0.0  ;;  %v4532_v33 = vadd.f32 %v12919_v50, %v4371_v17  ;;  %v13115_v50 = vld [vmem:[%s17776_s6 + $0x90] ss:$8 sps:$4 sm:$0xff]  }
 0x44f   : > { %v12483_v5 = vpop.f32.mrf.mxu1  ;;  %v16067_v46 = vadd.f32 %v12481_v54, %v15936_v63  ;;  %v13117_v54 = vld [vmem:[%s17776_s6 + $0x94] ss:$8 sps:$4 sm:$0xff]  }
 0x450   : > { %v4759_v17 = vrot.slane %v4745_v55, %v15951_v57  ;;  %v4760_v29 = vcombine.high %v4752_v56, %v4752_v56  ;;  %v5440_v38 = vsel %vm5383_vm1, %v4752_v56, -inf  ;;  %v4711_v10 = vcombine.high %v4647_v45, %v4647_v45  ;;  %7531 = vmatprep.subr.bf16.mxu1 %v13117_v54 }
 0x451   : > { %v5441_v16 = vrot.slane %v5440_v38, 4  ;;  %v4718_v1 = vrot.slane %v4647_v45, %v15951_v57  ;;  %v16072_v32 = vmax.f32 %v4532_v33, 0.0  ;;  %v16074_v0 = vadd.f32 %v12483_v5, %v12482_v2  ;;  %7532 = vmatpush2.bf16.msra.mxu1 %v13115_v50 }
 0x452   : > { %v4761_v14 = vcombine.high %v4759_v17, %v4759_v17  ;;  %v5447_v48 = vsel %vm5383_vm1, %v4760_v29, -inf  ;;  %v5454_v63 = vsel %vm5383_vm1, %v4759_v17, -inf  ;;  %v4725_v28 = vrot.slane %v4711_v10, %v15951_v57 }
 0x453   : > { %v5442_v30 = vmax.f32 %v5440_v38, %v5441_v16  ;;  %v5448_v35 = vrot.slane %v5447_v48, 4  ;;  %v5455_v44 = vrot.slane %v5454_v63, 4  ;;  %v4726_v22 = vcombine.high %v4718_v1, %v4718_v1 }
 0x454   : > { %v5461_v47 = vsel %vm5383_vm1, %v4761_v14, -inf  ;;  %v4727_v59 = vcombine.high %v4725_v28, %v4725_v28  ;;  %v5384_v34 = vsel %vm5383_vm1, %v4718_v1, -inf  ;;  %v5398_v25 = vsel %vm5383_vm1, %v4725_v28, -inf }
 0x455   : > { %v5443_v49 = vrot.slane %v5442_v30, 2  ;;  %v5449_v36 = vmax.f32 %v5447_v48, %v5448_v35  ;;  %v5456_v60 = vmax.f32 %v5454_v63, %v5455_v44  ;;  %v5462_v2 = vrot.slane %v5461_v47, 4 }
 0x456   : > { %v5385_v9 = vrot.slane %v5384_v34, 4  ;;  %v5391_v55 = vsel %vm5383_vm1, %v4726_v22, -inf  ;;  %v5399_v56 = vrot.slane %v5398_v25, 4  ;;  %v5405_v45 = vsel %vm5383_vm1, %v4727_v59, -inf }
 0x457   : > { %v5444_v33 = vmax.f32 %v5442_v30, %v5443_v49  ;;  %v5450_v4 = vrot.slane %v5449_v36, 2  ;;  %v5457_v5 = vrot.slane %v5456_v60, 2  ;;  %v5463_v17 = vmax.f32 %v5461_v47, %v5462_v2 }
 0x458   : > { %v5386_v29 = vmax.f32 %v5384_v34, %v5385_v9  ;;  %v5392_v38 = vrot.slane %v5391_v55, 4  ;;  %v5400_v10 = vmax.f32 %v5398_v25, %v5399_v56  ;;  %v5406_v16 = vrot.slane %v5405_v45, 4  ;;  %v4523_v25 = vpop.f32.mrf.mxu0 }
 0x459   : > { %v5445_v1 = vrot.slane %v5444_v33, 1  ;;  %v5451_v14 = vmax.f32 %v5449_v36, %v5450_v4  ;;  %v5458_v48 = vmax.f32 %v5456_v60, %v5457_v5  ;;  %v5464_v63 = vrot.slane %v5463_v17, 2 }
 0x45a   : > { %v5387_v28 = vrot.slane %v5386_v29, 2  ;;  %v5393_v35 = vmax.f32 %v5391_v55, %v5392_v38  ;;  %v5401_v44 = vrot.slane %v5400_v10, 2  ;;  %v5407_v22 = vmax.f32 %v5405_v45, %v5406_v16  ;;  %v12485_v38 = vpop.f32.mrf.mxu1 }
 0x45b   : > { %v5446_v18 = vmax.f32 %v5444_v33, %v5445_v1  ;;  %v5452_v59 = vrot.slane %v5451_v14, 1  ;;  %v5459_v54 = vrot.slane %v5458_v48, 1  ;;  %v5465_v30 = vmax.f32 %v5463_v17, %v5464_v63 }
 0x45c   : > { %v5388_v49 = vmax.f32 %v5386_v29, %v5387_v28  ;;  %v5394_v47 = vrot.slane %v5393_v35, 2  ;;  %v5402_v2 = vmax.f32 %v5400_v10, %v5401_v44  ;;  %v5408_v34 = vrot.slane %v5407_v22, 2 }
 0x45d   : > { %v5453_v50 = vmax.f32 %v5451_v14, %v5452_v59  ;;  %v5460_v9 = vmax.f32 %v5458_v48, %v5459_v54  ;;  %v5466_v36 = vrot.slane %v5465_v30, 1  ;;  %v4762_v60 = vcombine.high %v16072_v32, %v16072_v32 }
 0x45e   : > { %v5389_v55 = vrot.slane %v5388_v49, 1  ;;  %v5395_v56 = vmax.f32 %v5393_v35, %v5394_v47  ;;  %v5403_v45 = vrot.slane %v5402_v2, 1  ;;  %v5409_v33 = vmax.f32 %v5407_v22, %v5408_v34  ;;  %v12486_v34 = vpop.f32.mrf.mxu1 }
 0x45f   : > { %v5467_v4 = vmax.f32 %v5465_v30, %v5466_v36  ;;  %v4769_v5 = vrot.slane %v16072_v32, %v15951_v57  ;;  %v4776_v17 = vrot.slane %v4762_v60, %v15951_v57  ;;  %v4524_v29 = vadd.f32 %v4523_v25, %v15976_v42  ;;  %v12922_v32 = vpop.f32.mrf.mxu0 }
 0x460   : > { %v5390_v10 = vmax.f32 %v5388_v49, %v5389_v55  ;;  %v5396_v16 = vrot.slane %v5395_v56, 1  ;;  %v5404_v1 = vmax.f32 %v5402_v2, %v5403_v45  ;;  %v5410_v14 = vrot.slane %v5409_v33, 1 }
 0x461   : > { %v4777_v48 = vcombine.high %v4769_v5, %v4769_v5  ;;  %v4778_v63 = vcombine.high %v4776_v17, %v4776_v17  ;;  %v5468_v28 = vsel %vm5383_vm1, %v4769_v5, -inf  ;;  %v5482_v35 = vsel %vm5383_vm1, %v4776_v17, -inf }
 0x462   : > { %v5397_v44 = vmax.f32 %v5395_v56, %v5396_v16  ;;  %v5411_v22 = vmax.f32 %v5409_v33, %v5410_v14  ;;  %v6280_v59 = vmax.f32 %v5390_v10, %v5446_v18  ;;  %v6282_v54 = vmax.f32 %v5404_v1, %v5460_v9 }
 0x463   : > { %v5469_v30 = vrot.slane %v5468_v28, 4  ;;  %v5475_v47 = vsel %vm5383_vm1, %v4777_v48, -inf  ;;  %v5483_v42 = vrot.slane %v5482_v35, 4  ;;  %v5489_v49 = vsel %vm5383_vm1, %v4778_v63, -inf }
 0x464   : > { %v6281_v2 = vmax.f32 %v5397_v44, %v5453_v50  ;;  %v6283_v25 = vmax.f32 %v5411_v22, %v5467_v4  ;;  %v5476_v36 = vrot.slane %v5475_v47, 4  ;;  %v5490_v60 = vrot.slane %v5489_v49, 4  ;;  %v13123_v50 = vld [vmem:[%s17776_s6 + $0x1c4] ss:$8 sps:$4 sm:$0xff]   ;;  %v4536_v22 = vpop.f32.mrf.mxu0 }
 0x465   : > { %v5470_v55 = vmax.f32 %v5468_v28, %v5469_v30  ;;  %v5484_v45 = vmax.f32 %v5482_v35, %v5483_v42  ;;  %v4648_v5 = vmax.f32 %v4524_v29, 0.0  ;;  %v4545_v56 = vadd.f32 %v12922_v32, %v16001_v20  ;;  %7598 = vmatprep.subr.bf16.mxu0 %v13123_v50 }
 0x466   : > { %v6439_v18 = vsel %vm6438_vm2, %v6281_v2, %v6280_v59  ;;  %v5477_v9 = vmax.f32 %v5475_v47, %v5476_v36  ;;  %v5491_v33 = vmax.f32 %v5489_v49, %v5490_v60  ;;  %v16102_v17 = vadd.f32 %v12486_v34, %v12485_v38  ;;  %v13121_v38 = vld [vmem:[%s17776_s6 + $0x1c0] ss:$8 sps:$4 sm:$0xff]  }
 0x467   : > { %v6441_v10 = vsel %vm6440_vm3, %v6282_v54, %v6439_v18  ;;  %v5471_v16 = vrot.slane %v5470_v55, 2  ;;  %v5485_v1 = vrot.slane %v5484_v45, 2  ;;  %v4728_v14 = vcombine.high %v4648_v5, %v4648_v5  ;;  %7599 = vmatpush2.bf16.msra.mxu0 %v13121_v38  ;;  %v12923_v18 = vpop.f32.mrf.mxu0 }
 0x468   : > { %v5478_v4 = vrot.slane %v5477_v9, 2  ;;  %v5492_v48 = vrot.slane %v5491_v33, 2  ;;  %v4735_v29 = vrot.slane %v4648_v5, %v15951_v57  ;;  %v16110_v20 = vsel %vm6442_vm4, %v6283_v25, %v6441_v10 }
 0x469   : > { %v5472_v63 = vmax.f32 %v5470_v55, %v5471_v16  ;;  %v5486_v28 = vmax.f32 %v5484_v45, %v5485_v1  ;;  %v4742_v35 = vrot.slane %v4728_v14, %v15951_v57  ;;  %v4653_v44 = vmax.f32 %v4545_v56, 0.0 }
 0x46a   : > { %v5479_v59 = vmax.f32 %v5477_v9, %v5478_v4  ;;  %v5493_v54 = vmax.f32 %v5491_v33, %v5492_v48  ;;  %v4743_v32 = vcombine.high %v4735_v29, %v4735_v29  ;;  %v5412_v30 = vsel %vm5383_vm1, %v4735_v29, -inf }
 0x46b   : > { %v5473_v47 = vrot.slane %v5472_v63, 1  ;;  %v5487_v42 = vrot.slane %v5486_v28, 1  ;;  %v4744_v49 = vcombine.high %v4742_v35, %v4742_v35  ;;  %v5413_v34 = vrot.slane %v5412_v30, 4 }
 0x46c   : > { %v5480_v2 = vrot.slane %v5479_v59, 1  ;;  %v5494_v25 = vrot.slane %v5493_v54, 1  ;;  %v5419_v36 = vsel %vm5383_vm1, %v4743_v32, -inf  ;;  %v5426_v60 = vsel %vm5383_vm1, %v4742_v35, -inf }
 0x46d   : > { %v5474_v55 = vmax.f32 %v5472_v63, %v5473_v47  ;;  %v16119_v45 = vmax.f32 %v5486_v28, %v5487_v42  ;;  %v5414_v5 = vmax.f32 %v5412_v30, %v5413_v34  ;;  %v5420_v56 = vrot.slane %v5419_v36, 4 }
 0x46e   : > { %v16121_v9 = vmax.f32 %v5479_v59, %v5480_v2  ;;  %v16123_v33 = vmax.f32 %v5493_v54, %v5494_v25  ;;  %v5427_v10 = vrot.slane %v5426_v60, 4  ;;  %v5433_v16 = vsel %vm5383_vm1, %v4744_v49, -inf }
 0x46f   : > { %v5415_v1 = vrot.slane %v5414_v5, 2  ;;  %v5421_v14 = vmax.f32 %v5419_v36, %v5420_v56  ;;  %v5434_v50 = vrot.slane %v5433_v16, 4  ;;  %v4813_v4 = vcombine.high %v4653_v44, %v4653_v44 }
 0x470   : > { %v5428_v48 = vmax.f32 %v5426_v60, %v5427_v10  ;;  %v4820_v29 = vrot.slane %v4653_v44, %v15951_v57  ;;  %v4537_v38 = vadd.f32 %v4536_v22, %v15994_v61  ;;  %v16129_v63 = vadd.f32 %v12923_v18, %v16013_v41 }
 0x471   : > { %v5416_v28 = vmax.f32 %v5414_v5, %v5415_v1  ;;  %v5422_v35 = vrot.slane %v5421_v14, 2  ;;  %v5435_v59 = vmax.f32 %v5433_v16, %v5434_v50  ;;  %v4827_v54 = vrot.slane %v4813_v4, %v15951_v57 }
 0x472   : > { %v5429_v32 = vrot.slane %v5428_v48, 2  ;;  %v4828_v30 = vcombine.high %v4820_v29, %v4820_v29  ;;  %v5552_v47 = vsel %vm5383_vm1, %v4820_v29, -inf  ;;  %v4651_v42 = vmax.f32 %v4537_v38, 0.0  ;;  %v13127_v38 = vld [vmem:[%s17776_s6 + $0x1b0] ss:$8 sps:$4 sm:$0xff]  }
 0x473   : > { %v5417_v49 = vrot.slane %v5416_v28, 1  ;;  %v5423_v34 = vmax.f32 %v5421_v14, %v5422_v35  ;;  %v5436_v44 = vrot.slane %v5435_v59, 2  ;;  %v4829_v2 = vcombine.high %v4827_v54, %v4827_v54  ;;  %v13129_v14 = vld [vmem:[%s17776_s6 + $0x1b4] ss:$8 sps:$4 sm:$0xff]  }
 0x474   : > { %v5430_v61 = vmax.f32 %v5428_v48, %v5429_v32  ;;  %v5553_v22 = vrot.slane %v5552_v47, 4  ;;  %v5559_v41 = vsel %vm5383_vm1, %v4828_v30, -inf  ;;  %v5566_v25 = vsel %vm5383_vm1, %v4827_v54, -inf  ;;  %7600 = vmatprep.subr.bf16.mxu0 %v13129_v14 }
 0x475   : > { %v5418_v36 = vmax.f32 %v5416_v28, %v5417_v49  ;;  %v5424_v60 = vrot.slane %v5423_v34, 1  ;;  %v5437_v5 = vmax.f32 %v5435_v59, %v5436_v44  ;;  %v5560_v56 = vrot.slane %v5559_v41, 4  ;;  %7601 = vmatpush2.bf16.msra.mxu0 %v13127_v38 }
 0x476   : > { %v5431_v18 = vrot.slane %v5430_v61, 1  ;;  %v5554_v10 = vmax.f32 %v5552_v47, %v5553_v22  ;;  %v5567_v16 = vrot.slane %v5566_v25, 4  ;;  %v5573_v1 = vsel %vm5383_vm1, %v4829_v2, -inf  ;;  %v13124_v22 = vld [vmem:[%s17776_s6 + $0x80] ss:$8 sps:$4 sm:$0xff]  }
 0x477   : > { %v5425_v50 = vmax.f32 %v5423_v34, %v5424_v60  ;;  %v5438_v4 = vrot.slane %v5437_v5, 1  ;;  %v6284_v48 = vmax.f32 %v5418_v36, %v5474_v55  ;;  %v5561_v29 = vmax.f32 %v5559_v41, %v5560_v56  ;;  %v13126_v55 = vld [vmem:[%s17776_s6 + $0x84] ss:$8 sps:$4 sm:$0xff]  }
 0x478   : > { %v5432_v28 = vmax.f32 %v5430_v61, %v5431_v18  ;;  %v5555_v35 = vrot.slane %v5554_v10, 2  ;;  %v5568_v59 = vmax.f32 %v5566_v25, %v5567_v16  ;;  %v5574_v54 = vrot.slane %v5573_v1, 4  ;;  %7533 = vmatprep.subr.bf16.mxu1 %v13126_v55 }
 0x479   : > { %v5439_v32 = vmax.f32 %v5437_v5, %v5438_v4  ;;  %v6285_v30 = vmax.f32 %v5425_v50, %v16121_v9  ;;  %v6445_v47 = vsel %vm6444_vm5, %v6284_v48, %v16110_v20  ;;  %v5562_v49 = vrot.slane %v5561_v29, 2  ;;  %7534 = vmatpush2.bf16.msra.mxu1 %v13124_v22 }
 0x47a   : > { %v6286_v34 = vmax.f32 %v5432_v28, %v16119_v45  ;;  %v5556_v44 = vmax.f32 %v5554_v10, %v5555_v35  ;;  %v5569_v2 = vrot.slane %v5568_v59, 2  ;;  %v5575_v61 = vmax.f32 %v5573_v1, %v5574_v54  ;;  %v12488_v45 = vpop.f32.mrf.mxu1 }
 0x47b   : > { %v6287_v9 = vmax.f32 %v5439_v32, %v16123_v33  ;;  %v6447_v41 = vsel %vm6446_vm6, %v6285_v30, %v6445_v47  ;;  %v5563_v20 = vmax.f32 %v5561_v29, %v5562_v49  ;;  %v4779_v25 = vcombine.high %v4651_v42, %v4651_v42 }
 0x47c   : > { %v6449_v36 = vsel %vm6448_vm7, %v6286_v34, %v6447_v41  ;;  %v5557_v60 = vrot.slane %v5556_v44, 1  ;;  %v5570_v5 = vmax.f32 %v5568_v59, %v5569_v2  ;;  %v5576_v56 = vrot.slane %v5575_v61, 2  ;;  %v12489_v32 = vpop.f32.mrf.mxu1 }
 0x47d   : > { %v6451_v18 = vsel %vm6450_vm8, %v6287_v9, %v6449_v36  ;;  %v5564_v10 = vrot.slane %v5563_v20, 1  ;;  %v4786_v16 = vrot.slane %v4651_v42, %v15951_v57  ;;  %v4793_v1 = vrot.slane %v4779_v25, %v15951_v57 }
 0x47e   : > { %6510 = vst [vmem:[#allocation3 + $0x20] sm:$0xff] %v6451_v18  ;;  %v16158_v33 = vmax.f32 %v5556_v44, %v5557_v60  ;;  %v5571_v14 = vrot.slane %v5570_v5, 1  ;;  %v5577_v50 = vmax.f32 %v5575_v61, %v5576_v56  ;;  %v4654_v4 = vmax.f32 %v16129_v63, 0.0  ;;  %v4539_v63 = vpop.f32.mrf.mxu0 }
 0x47f   : > { %v16161_v48 = vmax.f32 %v5563_v20, %v5564_v10  ;;  %v4794_v29 = vcombine.high %v4786_v16, %v4786_v16  ;;  %v4795_v38 = vcombine.high %v4793_v1, %v4793_v1  ;;  %v5496_v28 = vsel %vm5383_vm1, %v4786_v16, -inf }
 0x480   : > { %v16164_v35 = vmax.f32 %v5570_v5, %v5571_v14  ;;  %v5578_v59 = vrot.slane %v5577_v50, 1  ;;  %v5497_v54 = vrot.slane %v5496_v28, 4  ;;  %v5510_v42 = vsel %vm5383_vm1, %v4793_v1, -inf }
 0x481   : > { %v5503_v30 = vsel %vm5383_vm1, %v4794_v29, -inf  ;;  %v5511_v47 = vrot.slane %v5510_v42, 4  ;;  %v5517_v49 = vsel %vm5383_vm1, %v4795_v38, -inf  ;;  %v4830_v55 = vcombine.high %v4654_v4, %v4654_v4 }
 0x482   : > { %v16169_v34 = vmax.f32 %v5577_v50, %v5578_v59  ;;  %v5498_v44 = vmax.f32 %v5496_v28, %v5497_v54  ;;  %v5504_v2 = vrot.slane %v5503_v30, 4  ;;  %v5518_v61 = vrot.slane %v5517_v49, 4 }
 0x483   : > { %v5512_v22 = vmax.f32 %v5510_v42, %v5511_v47  ;;  %v4837_v9 = vrot.slane %v4654_v4, %v15951_v57  ;;  %v4844_v41 = vrot.slane %v4830_v55, %v15951_v57  ;;  %v16173_v20 = vadd.f32 %v12489_v32, %v12488_v45 }
 0x484   : > { %v5499_v25 = vrot.slane %v5498_v44, 2  ;;  %v5505_v36 = vmax.f32 %v5503_v30, %v5504_v2  ;;  %v5519_v60 = vmax.f32 %v5517_v49, %v5518_v61  ;;  %v4540_v5 = vadd.f32 %v4539_v63, %v16003_v40 }
 0x485   : > { %v5513_v56 = vrot.slane %v5512_v22, 2  ;;  %v4845_v18 = vcombine.high %v4837_v9, %v4837_v9  ;;  %v4846_v10 = vcombine.high %v4844_v41, %v4844_v41  ;;  %v5580_v16 = vsel %vm5383_vm1, %v4837_v9, -inf }
 0x486   : > { %v5500_v1 = vmax.f32 %v5498_v44, %v5499_v25  ;;  %v5506_v14 = vrot.slane %v5505_v36, 2  ;;  %v5520_v50 = vrot.slane %v5519_v60, 2  ;;  %v5581_v29 = vrot.slane %v5580_v16, 4 }
 0x487   : > { %v5514_v38 = vmax.f32 %v5512_v22, %v5513_v56  ;;  %v5587_v4 = vsel %vm5383_vm1, %v4845_v18, -inf  ;;  %v5594_v45 = vsel %vm5383_vm1, %v4844_v41, -inf  ;;  %v5601_v28 = vsel %vm5383_vm1, %v4846_v10, -inf }
 0x488   : > { %v5501_v59 = vrot.slane %v5500_v1, 1  ;;  %v5507_v54 = vmax.f32 %v5505_v36, %v5506_v14  ;;  %v5521_v42 = vmax.f32 %v5519_v60, %v5520_v50  ;;  %v5582_v40 = vmax.f32 %v5580_v16, %v5581_v29  ;;  %v12926_v36 = vpop.f32.mrf.mxu0  ;;  %v13132_v60 = vld [vmem:[%s17776_s6 + $0x1a4] ss:$8 sps:$4 sm:$0xff]   ;;  %v13130_v29 = vld [vmem:[%s17776_s6 + $0x1a0] ss:$8 sps:$4 sm:$0xff]  }
 0x489   : > { %v5515_v32 = vrot.slane %v5514_v38, 1  ;;  %v5588_v30 = vrot.slane %v5587_v4, 4  ;;  %v5595_v47 = vrot.slane %v5594_v45, 4  ;;  %v5602_v49 = vrot.slane %v5601_v28, 4  ;;  %7602 = vmatprep.subr.bf16.mxu0 %v13132_v60 }
 0x48a   : > { %v5502_v55 = vmax.f32 %v5500_v1, %v5501_v59  ;;  %v5508_v63 = vrot.slane %v5507_v54, 1  ;;  %v5522_v44 = vrot.slane %v5521_v42, 1  ;;  %v5583_v2 = vrot.slane %v5582_v40, 2  ;;  %7603 = vmatpush2.bf16.msra.mxu0 %v13130_v29 }
 0x48b   : > { %v5516_v61 = vmax.f32 %v5514_v38, %v5515_v32  ;;  %v5589_v22 = vmax.f32 %v5587_v4, %v5588_v30  ;;  %v5596_v9 = vmax.f32 %v5594_v45, %v5595_v47  ;;  %v5603_v25 = vmax.f32 %v5601_v28, %v5602_v49  ;;  %v12491_v28 = vpop.f32.mrf.mxu1 }
 0x48c   : > { %v5509_v56 = vmax.f32 %v5507_v54, %v5508_v63  ;;  %v5523_v41 = vmax.f32 %v5521_v42, %v5522_v44  ;;  %v6288_v18 = vmax.f32 %v5502_v55, %v16158_v33  ;;  %v5584_v10 = vmax.f32 %v5582_v40, %v5583_v2 }
 0x48d   : > { %v6290_v16 = vmax.f32 %v5516_v61, %v16164_v35  ;;  %v5590_v1 = vrot.slane %v5589_v22, 2  ;;  %v5597_v14 = vrot.slane %v5596_v9, 2  ;;  %v5604_v50 = vrot.slane %v5603_v25, 2  ;;  %v12492_v2 = vpop.f32.mrf.mxu1 }
 0x48e   : > { %v6289_v38 = vmax.f32 %v5509_v56, %v16161_v48  ;;  %v6291_v4 = vmax.f32 %v5523_v41, %v16169_v34  ;;  %v5585_v33 = vrot.slane %v5584_v10, 1  ;;  %v4652_v45 = vmax.f32 %v4540_v5, 0.0  ;;  %v4552_v56 = vpop.f32.mrf.mxu0 }
 0x48f   : > { %v5591_v59 = vmax.f32 %v5589_v22, %v5590_v1  ;;  %v5598_v54 = vmax.f32 %v5596_v9, %v5597_v14  ;;  %v5605_v42 = vmax.f32 %v5603_v25, %v5604_v50  ;;  %v4561_v35 = vadd.f32 %v12926_v36, %v16058_v24 }
 0x490   : > { %v6452_v40 = vsel %vm6438_vm2, %v6289_v38, %v6288_v18  ;;  %v16192_v32 = vmax.f32 %v5584_v10, %v5585_v33  ;;  %v4796_v30 = vcombine.high %v4652_v45, %v4652_v45  ;;  %v4803_v47 = vrot.slane %v4652_v45, %v15951_v57  ;;  %v13135_v33 = vld [vmem:[%s17776_s6 + $0x274] ss:$8 sps:$4 sm:$0xff]  }
 0x491   : > { %v6453_v48 = vsel %vm6440_vm3, %v6290_v16, %v6452_v40  ;;  %v5592_v34 = vrot.slane %v5591_v59, 1  ;;  %v5599_v49 = vrot.slane %v5598_v54, 1  ;;  %v5606_v5 = vrot.slane %v5605_v42, 1  ;;  %7649 = vmatprep.subr.bf16.mxu1 %v13135_v33 }
 0x492   : > { %v4810_v55 = vrot.slane %v4796_v30, %v15951_v57  ;;  %v4811_v63 = vcombine.high %v4803_v47, %v4803_v47  ;;  %v5524_v44 = vsel %vm5383_vm1, %v4803_v47, -inf  ;;  %v16199_v24 = vsel %vm6442_vm4, %v6291_v4, %v6453_v48 }
 0x493   : > { %v16201_v61 = vmax.f32 %v5591_v59, %v5592_v34  ;;  %v16203_v22 = vmax.f32 %v5598_v54, %v5599_v49  ;;  %v16205_v9 = vmax.f32 %v5605_v42, %v5606_v5  ;;  %v5525_v25 = vrot.slane %v5524_v44, 4 }
 0x494   : > { %v4812_v41 = vcombine.high %v4810_v55, %v4810_v55  ;;  %v5531_v18 = vsel %vm5383_vm1, %v4811_v63, -inf  ;;  %v5538_v10 = vsel %vm5383_vm1, %v4810_v55, -inf  ;;  %v4657_v36 = vmax.f32 %v4561_v35, 0.0 }
 0x495   : > { %v5526_v60 = vmax.f32 %v5524_v44, %v5525_v25  ;;  %v5532_v16 = vrot.slane %v5531_v18, 4  ;;  %v5539_v1 = vrot.slane %v5538_v10, 4  ;;  %v16209_v14 = vadd.f32 %v12492_v2, %v12491_v28 }
 0x496   : > { %v5545_v50 = vsel %vm5383_vm1, %v4812_v41, -inf  ;;  %v4881_v29 = vcombine.high %v4657_v36, %v4657_v36  ;;  %v4888_v38 = vrot.slane %v4657_v36, %v15951_v57  ;;  %v4553_v4 = vadd.f32 %v4552_v56, %v16045_v62 }
 0x497   : > { %v5527_v45 = vrot.slane %v5526_v60, 2  ;;  %v5533_v59 = vmax.f32 %v5531_v18, %v5532_v16  ;;  %v5540_v54 = vmax.f32 %v5538_v10, %v5539_v1  ;;  %v5546_v42 = vrot.slane %v5545_v50, 4 }
 0x498   : > { %v4895_v35 = vrot.slane %v4881_v29, %v15951_v57  ;;  %v4896_v40 = vcombine.high %v4888_v38, %v4888_v38  ;;  %v5664_v28 = vsel %vm5383_vm1, %v4888_v38, -inf  ;;  %v4655_v30 = vmax.f32 %v4553_v4, 0.0 }
 0x499   : > { %v5528_v47 = vmax.f32 %v5526_v60, %v5527_v45  ;;  %v5534_v48 = vrot.slane %v5533_v59, 2  ;;  %v5541_v34 = vrot.slane %v5540_v54, 2  ;;  %v5547_v49 = vmax.f32 %v5545_v50, %v5546_v42 }
 0x49a   : > { %v4897_v62 = vcombine.high %v4895_v35, %v4895_v35  ;;  %v5665_v5 = vrot.slane %v5664_v28, 4  ;;  %v5671_v55 = vsel %vm5383_vm1, %v4896_v40, -inf  ;;  %v5678_v63 = vsel %vm5383_vm1, %v4895_v35, -inf }
 0x49b   : > { %v5529_v44 = vrot.slane %v5528_v47, 1  ;;  %v5535_v2 = vmax.f32 %v5533_v59, %v5534_v48  ;;  %v5542_v25 = vmax.f32 %v5540_v54, %v5541_v34  ;;  %v5548_v56 = vrot.slane %v5547_v49, 2 }
 0x49c   : > { %v5666_v41 = vmax.f32 %v5664_v28, %v5665_v5  ;;  %v5672_v18 = vrot.slane %v5671_v55, 4  ;;  %v5679_v10 = vrot.slane %v5678_v63, 4  ;;  %v5685_v36 = vsel %vm5383_vm1, %v4897_v62, -inf  ;;  %v12494_v5 = vpop.f32.mrf.mxu1 }
 0x49d   : > { %v5530_v16 = vmax.f32 %v5528_v47, %v5529_v44  ;;  %v5536_v60 = vrot.slane %v5535_v2, 1  ;;  %v5543_v1 = vrot.slane %v5542_v25, 1  ;;  %v5549_v29 = vmax.f32 %v5547_v49, %v5548_v56 }
 0x49e   : > { %v5667_v50 = vrot.slane %v5666_v41, 2  ;;  %v5673_v38 = vmax.f32 %v5671_v55, %v5672_v18  ;;  %v5680_v4 = vmax.f32 %v5678_v63, %v5679_v10  ;;  %v5686_v33 = vrot.slane %v5685_v36, 4  ;;  %v12927_v18 = vpop.f32.mrf.mxu0 }
 0x49f   : > { %v5537_v45 = vmax.f32 %v5535_v2, %v5536_v60  ;;  %v5544_v42 = vmax.f32 %v5542_v25, %v5543_v1  ;;  %v5550_v35 = vrot.slane %v5549_v29, 1  ;;  %v6292_v59 = vmax.f32 %v5530_v16, %v16192_v32 }
 0x4a0   : > { %v5668_v54 = vmax.f32 %v5666_v41, %v5667_v50  ;;  %v5674_v40 = vrot.slane %v5673_v38, 2  ;;  %v5681_v28 = vrot.slane %v5680_v4, 2  ;;  %v5687_v48 = vmax.f32 %v5685_v36, %v5686_v33 }
 0x4a1   : > { %v5551_v34 = vmax.f32 %v5549_v29, %v5550_v35  ;;  %v6293_v62 = vmax.f32 %v5537_v45, %v16201_v61  ;;  %v6294_v47 = vmax.f32 %v5544_v42, %v16203_v22  ;;  %v6455_v49 = vsel %vm6444_vm5, %v6292_v59, %v16199_v24  ;;  %v13138_v61 = vld [vmem:[%s17776_s6 + $0x194] ss:$8 sps:$4 sm:$0xff]   ;;  %v12495_v29 = vpop.f32.mrf.mxu1 }
 0x4a2   : > { %v5669_v55 = vrot.slane %v5668_v54, 1  ;;  %v5675_v63 = vmax.f32 %v5673_v38, %v5674_v40  ;;  %v5682_v44 = vmax.f32 %v5680_v4, %v5681_v28  ;;  %v5688_v2 = vrot.slane %v5687_v48, 2  ;;  %7604 = vmatprep.subr.bf16.mxu0 %v13138_v61 }
 0x4a3   : > { %v6295_v25 = vmax.f32 %v5551_v34, %v16205_v9  ;;  %v6456_v32 = vsel %vm6446_vm6, %v6293_v62, %v6455_v49  ;;  %v4847_v56 = vcombine.high %v4655_v30, %v4655_v30  ;;  %v4854_v41 = vrot.slane %v4655_v30, %v15951_v57  ;;  %v13136_v9 = vld [vmem:[%s17776_s6 + $0x190] ss:$8 sps:$4 sm:$0xff]   ;;  %v4555_v34 = vpop.f32.mrf.mxu0 }
 0x4a4   : > { %v6457_v22 = vsel %vm6448_vm7, %v6294_v47, %v6456_v32  ;;  %v16234_v24 = vmax.f32 %v5668_v54, %v5669_v55  ;;  %v5676_v10 = vrot.slane %v5675_v63, 1  ;;  %v5683_v36 = vrot.slane %v5682_v44, 1  ;;  %7605 = vmatpush2.bf16.msra.mxu0 %v13136_v9 }
 0x4a5   : > { %v6458_v16 = vsel %vm6450_vm8, %v6295_v25, %v6457_v22  ;;  %v5689_v60 = vmax.f32 %v5687_v48, %v5688_v2  ;;  %v4861_v30 = vrot.slane %v4847_v56, %v15951_v57  ;;  %v4862_v1 = vcombine.high %v4854_v41, %v4854_v41 }
 0x4a6   : > { %6511 = vst [vmem:[#allocation3 + $0x38] sm:$0xff] %v6458_v16  ;;  %v16241_v50 = vmax.f32 %v5675_v63, %v5676_v10  ;;  %v16243_v38 = vmax.f32 %v5682_v44, %v5683_v36  ;;  %v5608_v4 = vsel %vm5383_vm1, %v4854_v41, -inf  ;;  %v4564_v33 = vadd.f32 %v12927_v18, %v16061_v58 }
 0x4a7   : > { %v5690_v45 = vrot.slane %v5689_v60, 1  ;;  %v4863_v42 = vcombine.high %v4861_v30, %v4861_v30  ;;  %v5609_v35 = vrot.slane %v5608_v4, 4  ;;  %v5615_v59 = vsel %vm5383_vm1, %v4862_v1, -inf }
 0x4a8   : > { %v5616_v54 = vrot.slane %v5615_v59, 4  ;;  %v5622_v40 = vsel %vm5383_vm1, %v4861_v30, -inf  ;;  %v4658_v28 = vmax.f32 %v4564_v33, 0.0  ;;  %v16249_v48 = vadd.f32 %v12495_v29, %v12494_v5 }
 0x4a9   : > { %v16251_v62 = vmax.f32 %v5689_v60, %v5690_v45  ;;  %v5610_v47 = vmax.f32 %v5608_v4, %v5609_v35  ;;  %v5623_v49 = vrot.slane %v5622_v40, 4  ;;  %v5629_v55 = vsel %vm5383_vm1, %v4863_v42, -inf  ;;  %v13142_v45 = vld [vmem:[%s17776_s6 + $0x180] ss:$8 sps:$4 sm:$0xff]  }
 0x4aa   : > { %v5617_v58 = vmax.f32 %v5615_v59, %v5616_v54  ;;  %v5630_v63 = vrot.slane %v5629_v55, 4  ;;  %v4898_v44 = vcombine.high %v4658_v28, %v4658_v28  ;;  %v4905_v2 = vrot.slane %v4658_v28, %v15951_v57 }
 0x4ab   : > { %v5611_v25 = vrot.slane %v5610_v47, 2  ;;  %v5624_v32 = vmax.f32 %v5622_v40, %v5623_v49  ;;  %v4556_v56 = vadd.f32 %v4555_v34, %v16048_v15  ;;  %v16258_v5 = vadd.f32 %v16074_v0, %v15944_v31  ;;  %v13144_v15 = vld [vmem:[%s17776_s6 + $0x184] ss:$8 sps:$4 sm:$0xff]   ;;  %v12497_v40 = vpop.f32.mrf.mxu1 }
 0x4ac   : > { %v5618_v41 = vrot.slane %v5617_v58, 2  ;;  %v5631_v18 = vmax.f32 %v5629_v55, %v5630_v63  ;;  %v4912_v61 = vrot.slane %v4898_v44, %v15951_v57  ;;  %v4913_v22 = vcombine.high %v4905_v2, %v4905_v2  ;;  %7606 = vmatprep.subr.bf16.mxu0 %v13144_v15 }
 0x4ad   : > { %v5612_v10 = vmax.f32 %v5610_v47, %v5611_v25  ;;  %v5625_v36 = vrot.slane %v5624_v32, 2  ;;  %v5692_v9 = vsel %vm5383_vm1, %v4905_v2, -inf  ;;  %v4656_v16 = vmax.f32 %v4556_v56, 0.0  ;;  %7607 = vmatpush2.bf16.msra.mxu0 %v13142_v45 }
 0x4ae   : > { %v5619_v60 = vmax.f32 %v5617_v58, %v5618_v41  ;;  %v5632_v30 = vrot.slane %v5631_v18, 2  ;;  %v4914_v1 = vcombine.high %v4912_v61, %v4912_v61  ;;  %v5693_v29 = vrot.slane %v5692_v9, 4 }
 0x4af   : > { %v5613_v31 = vrot.slane %v5612_v10, 1  ;;  %v5626_v0 = vmax.f32 %v5624_v32, %v5625_v36  ;;  %v5699_v4 = vsel %vm5383_vm1, %v4913_v22, -inf  ;;  %v5706_v33 = vsel %vm5383_vm1, %v4912_v61, -inf }
 0x4b0   : > { %v5620_v42 = vrot.slane %v5619_v60, 1  ;;  %v5633_v35 = vmax.f32 %v5631_v18, %v5632_v30  ;;  %v5694_v59 = vmax.f32 %v5692_v9, %v5693_v29  ;;  %v5700_v54 = vrot.slane %v5699_v4, 4 }
 0x4b1   : > { %v5614_v28 = vmax.f32 %v5612_v10, %v5613_v31  ;;  %v5627_v34 = vrot.slane %v5626_v0, 1  ;;  %v5707_v47 = vrot.slane %v5706_v33, 4  ;;  %v5713_v49 = vsel %vm5383_vm1, %v4914_v1, -inf  ;;  %v12498_v10 = vpop.f32.mrf.mxu1 }
 0x4b2   : > { %v5621_v55 = vmax.f32 %v5619_v60, %v5620_v42  ;;  %v5634_v58 = vrot.slane %v5633_v35, 1  ;;  %v5695_v63 = vrot.slane %v5694_v59, 2  ;;  %v5701_v44 = vmax.f32 %v5699_v4, %v5700_v54 }
 0x4b3   : > { %v5628_v2 = vmax.f32 %v5626_v0, %v5627_v34  ;;  %v6296_v25 = vmax.f32 %v5614_v28, %v16234_v24  ;;  %v5708_v32 = vmax.f32 %v5706_v33, %v5707_v47  ;;  %v5714_v56 = vrot.slane %v5713_v49, 4  ;;  %v12930_v24 = vpop.f32.mrf.mxu0 }
 0x4b4   : > { %v5635_v41 = vmax.f32 %v5633_v35, %v5634_v58  ;;  %v6297_v18 = vmax.f32 %v5621_v55, %v16241_v50  ;;  %v5696_v61 = vmax.f32 %v5694_v59, %v5695_v63  ;;  %v5702_v22 = vrot.slane %v5701_v44, 2 }
 0x4b5   : > { %v6298_v36 = vmax.f32 %v5628_v2, %v16243_v38  ;;  %v5709_v9 = vrot.slane %v5708_v32, 2  ;;  %v5715_v30 = vmax.f32 %v5713_v49, %v5714_v56  ;;  %v4864_v1 = vcombine.high %v4656_v16, %v4656_v16  ;;  %v4568_v58 = vpop.f32.mrf.mxu0 }
 0x4b6   : > { %v6299_v60 = vmax.f32 %v5635_v41, %v16251_v62  ;;  %v6459_v29 = vsel %vm6438_vm2, %v6297_v18, %v6296_v25  ;;  %v5697_v15 = vrot.slane %v5696_v61, 1  ;;  %v5703_v31 = vmax.f32 %v5701_v44, %v5702_v22  ;;  %v12500_v62 = vpop.f32.mrf.mxu1 }
 0x4b7   : > { %v6460_v0 = vsel %vm6440_vm3, %v6298_v36, %v6459_v29  ;;  %v5710_v4 = vmax.f32 %v5708_v32, %v5709_v9  ;;  %v5716_v33 = vrot.slane %v5715_v30, 2  ;;  %v4871_v50 = vrot.slane %v4656_v16, %v15951_v57 }
 0x4b8   : > { %v16278_v45 = vmax.f32 %v5696_v61, %v5697_v15  ;;  %v5704_v42 = vrot.slane %v5703_v31, 1  ;;  %v4878_v38 = vrot.slane %v4864_v1, %v15951_v57  ;;  %v16282_v35 = vsel %vm6442_vm4, %v6299_v60, %v6460_v0  ;;  %v12501_v61 = vpop.f32.mrf.mxu1 }
 0x4b9   : > { %v5711_v59 = vrot.slane %v5710_v4, 1  ;;  %v5717_v54 = vmax.f32 %v5715_v30, %v5716_v33  ;;  %v4879_v28 = vcombine.high %v4871_v50, %v4871_v50  ;;  %v5636_v34 = vsel %vm5383_vm1, %v4871_v50, -inf }
 0x4ba   : > { %v16285_v47 = vmax.f32 %v5703_v31, %v5704_v42  ;;  %v4880_v49 = vcombine.high %v4878_v38, %v4878_v38  ;;  %v5637_v55 = vrot.slane %v5636_v34, 4  ;;  %v5650_v16 = vsel %vm5383_vm1, %v4878_v38, -inf  ;;  %v12931_v31 = vpop.f32.mrf.mxu0 }
 0x4bb   : > { %v16288_v63 = vmax.f32 %v5710_v4, %v5711_v59  ;;  %v5718_v44 = vrot.slane %v5717_v54, 1  ;;  %v5643_v2 = vsel %vm5383_vm1, %v4879_v28, -inf  ;;  %v5651_v25 = vrot.slane %v5650_v16, 4 }
 0x4bc   : > { %v5638_v32 = vmax.f32 %v5636_v34, %v5637_v55  ;;  %v5644_v56 = vrot.slane %v5643_v2, 4  ;;  %v5657_v41 = vsel %vm5383_vm1, %v4880_v49, -inf  ;;  %v4577_v18 = vadd.f32 %v12930_v24, %v16258_v5 }
 0x4bd   : > { %v16293_v22 = vmax.f32 %v5717_v54, %v5718_v44  ;;  %v5652_v36 = vmax.f32 %v5650_v16, %v5651_v25  ;;  %v5658_v9 = vrot.slane %v5657_v41, 4  ;;  %v16295_v30 = vadd.f32 %v12498_v10, %v12497_v40 }
 0x4be   : > { %v5639_v1 = vrot.slane %v5638_v32, 2  ;;  %v5645_v60 = vmax.f32 %v5643_v2, %v5644_v56  ;;  %v4661_v29 = vmax.f32 %v4577_v18, 0.0  ;;  %v4569_v15 = vadd.f32 %v4568_v58, %v16064_v53 }
 0x4bf   : > { %v5653_v0 = vrot.slane %v5652_v36, 2  ;;  %v5659_v4 = vmax.f32 %v5657_v41, %v5658_v9  ;;  %v4419_v33 = vadd.f32 %v16102_v17, %v15954_v27  ;;  %v16300_v50 = vadd.f32 %v12501_v61, %v12500_v62 }
 0x4c0   : > { %v5640_v5 = vmax.f32 %v5638_v32, %v5639_v1  ;;  %v5646_v24 = vrot.slane %v5645_v60, 2  ;;  %v4949_v42 = vcombine.high %v4661_v29, %v4661_v29  ;;  %v4956_v38 = vrot.slane %v4661_v29, %v15951_v57 }
 0x4c1   : > { %v5654_v40 = vmax.f32 %v5652_v36, %v5653_v0  ;;  %v5660_v10 = vrot.slane %v5659_v4, 2  ;;  %v4659_v59 = vmax.f32 %v4569_v15, 0.0  ;;  %v16303_v54 = vadd.f32 %v12931_v31, %v4419_v33 }
 0x4c2   : > { %v5641_v28 = vrot.slane %v5640_v5, 1  ;;  %v5647_v53 = vmax.f32 %v5645_v60, %v5646_v24  ;;  %v4963_v34 = vrot.slane %v4949_v42, %v15951_v57  ;;  %v4964_v49 = vcombine.high %v4956_v38, %v4956_v38 }
 0x4c3   : > { %v5655_v55 = vrot.slane %v5654_v40, 1  ;;  %v5661_v16 = vmax.f32 %v5659_v4, %v5660_v10  ;;  %v5776_v27 = vsel %vm5383_vm1, %v4956_v38, -inf  ;;  %v4915_v17 = vcombine.high %v4659_v59, %v4659_v59 }
 0x4c4   : > { %v5642_v62 = vmax.f32 %v5640_v5, %v5641_v28  ;;  %v5648_v58 = vrot.slane %v5647_v53, 1  ;;  %v4965_v44 = vcombine.high %v4963_v34, %v4963_v34  ;;  %v5777_v2 = vrot.slane %v5776_v27, 4 }
 0x4c5   : > { %v5656_v25 = vmax.f32 %v5654_v40, %v5655_v55  ;;  %v5662_v32 = vrot.slane %v5661_v16, 1  ;;  %v5783_v56 = vsel %vm5383_vm1, %v4964_v49, -inf  ;;  %v5790_v41 = vsel %vm5383_vm1, %v4963_v34, -inf }
 0x4c6   : > { %v5649_v18 = vmax.f32 %v5647_v53, %v5648_v58  ;;  %v6300_v61 = vmax.f32 %v5642_v62, %v16278_v45  ;;  %v5778_v36 = vmax.f32 %v5776_v27, %v5777_v2  ;;  %v5784_v9 = vrot.slane %v5783_v56, 4 }
 0x4c7   : > { %v5663_v1 = vmax.f32 %v5661_v16, %v5662_v32  ;;  %v6302_v60 = vmax.f32 %v5656_v25, %v16288_v63  ;;  %v5791_v29 = vrot.slane %v5790_v41, 4  ;;  %v5797_v15 = vsel %vm5383_vm1, %v4965_v44, -inf }
 0x4c8   : > { %v6301_v31 = vmax.f32 %v5649_v18, %v16285_v47  ;;  %v6462_v0 = vsel %vm6444_vm5, %v6300_v61, %v16282_v35  ;;  %v5779_v4 = vrot.slane %v5778_v36, 2  ;;  %v5785_v33 = vmax.f32 %v5783_v56, %v5784_v9  ;;  %v4571_v18 = vpop.f32.mrf.mxu0 }
 0x4c9   : > { %v6303_v5 = vmax.f32 %v5663_v1, %v16293_v22  ;;  %v5792_v24 = vmax.f32 %v5790_v41, %v5791_v29  ;;  %v5798_v42 = vrot.slane %v5797_v15, 4  ;;  %v4922_v45 = vrot.slane %v4659_v59, %v15951_v57 }
 0x4ca   : > { %v6463_v38 = vsel %vm6446_vm6, %v6301_v31, %v6462_v0  ;;  %v5780_v40 = vmax.f32 %v5778_v36, %v5779_v4  ;;  %v5786_v63 = vrot.slane %v5785_v33, 2  ;;  %v4929_v10 = vrot.slane %v4915_v17, %v15951_v57 }
 0x4cb   : > { %v6464_v28 = vsel %vm6448_vm7, %v6302_v60, %v6463_v38  ;;  %v5793_v47 = vrot.slane %v5792_v24, 2  ;;  %v5799_v53 = vmax.f32 %v5797_v15, %v5798_v42  ;;  %v4930_v34 = vcombine.high %v4922_v45, %v4922_v45 }
 0x4cc   : > { %v6465_v35 = vsel %vm6450_vm8, %v6303_v5, %v6464_v28  ;;  %v5781_v49 = vrot.slane %v5780_v40, 1  ;;  %v5787_v55 = vmax.f32 %v5785_v33, %v5786_v63  ;;  %v4931_v22 = vcombine.high %v4929_v10, %v4929_v10 }
 0x4cd   : > { %6512 = vst [vmem:[#allocation3 + $0x50] sm:$0xff] %v6465_v35  ;;  %v5794_v16 = vmax.f32 %v5792_v24, %v5793_v47  ;;  %v5800_v27 = vrot.slane %v5799_v53, 2  ;;  %v5720_v59 = vsel %vm5383_vm1, %v4922_v45, -inf  ;;  %v5727_v62 = vsel %vm5383_vm1, %v4930_v34, -inf }
 0x4ce   : > { %v5782_v58 = vmax.f32 %v5780_v40, %v5781_v49  ;;  %v5788_v44 = vrot.slane %v5787_v55, 1  ;;  %v5721_v17 = vrot.slane %v5720_v59, 4  ;;  %v5728_v2 = vrot.slane %v5727_v62, 4 }
 0x4cf   : > { %v5795_v25 = vrot.slane %v5794_v16, 1  ;;  %v5801_v32 = vmax.f32 %v5799_v53, %v5800_v27  ;;  %v5734_v56 = vsel %vm5383_vm1, %v4929_v10, -inf  ;;  %v5741_v41 = vsel %vm5383_vm1, %v4931_v22, -inf }
 0x4d0   : > { %v5789_v61 = vmax.f32 %v5787_v55, %v5788_v44  ;;  %v5722_v36 = vmax.f32 %v5720_v59, %v5721_v17  ;;  %v5729_v9 = vmax.f32 %v5727_v62, %v5728_v2  ;;  %v5735_v1 = vrot.slane %v5734_v56, 4 }
 0x4d1   : > { %v5796_v60 = vmax.f32 %v5794_v16, %v5795_v25  ;;  %v5802_v29 = vrot.slane %v5801_v32, 1  ;;  %v5742_v15 = vrot.slane %v5741_v41, 4  ;;  %v4662_v31 = vmax.f32 %v16303_v54, 0.0  ;;  %v12503_v25 = vpop.f32.mrf.mxu1 }
 0x4d2   : > { %v5723_v0 = vrot.slane %v5722_v36, 2  ;;  %v5730_v4 = vrot.slane %v5729_v9, 2  ;;  %v5736_v33 = vmax.f32 %v5734_v56, %v5735_v1  ;;  %v4572_v5 = vadd.f32 %v4571_v18, %v16067_v46 }
 0x4d3   : > { %v5803_v24 = vmax.f32 %v5801_v32, %v5802_v29  ;;  %v5743_v42 = vmax.f32 %v5741_v41, %v5742_v15  ;;  %v4966_v45 = vcombine.high %v4662_v31, %v4662_v31  ;;  %v4973_v38 = vrot.slane %v4662_v31, %v15951_v57 }
 0x4d4   : > { %v5724_v40 = vmax.f32 %v5722_v36, %v5723_v0  ;;  %v5731_v63 = vmax.f32 %v5729_v9, %v5730_v4  ;;  %v5737_v10 = vrot.slane %v5736_v33, 2  ;;  %v4660_v28 = vmax.f32 %v4572_v5, 0.0 }
 0x4d5   : > { %v5744_v47 = vrot.slane %v5743_v42, 2  ;;  %v4980_v53 = vrot.slane %v4966_v45, %v15951_v57  ;;  %v4981_v34 = vcombine.high %v4973_v38, %v4973_v38  ;;  %v5804_v54 = vsel %vm5383_vm1, %v4973_v38, -inf  ;;  %v12504_v38 = vpop.f32.mrf.mxu1 }
 0x4d6   : > { %v5725_v35 = vrot.slane %v5724_v40, 1  ;;  %v5732_v49 = vrot.slane %v5731_v63, 1  ;;  %v5738_v55 = vmax.f32 %v5736_v33, %v5737_v10  ;;  %v5805_v22 = vrot.slane %v5804_v54, 4 }
 0x4d7   : > { %v5745_v46 = vmax.f32 %v5743_v42, %v5744_v47  ;;  %v4982_v16 = vcombine.high %v4980_v53, %v4980_v53  ;;  %v5811_v27 = vsel %vm5383_vm1, %v4981_v34, -inf  ;;  %v5818_v59 = vsel %vm5383_vm1, %v4980_v53, -inf }
 0x4d8   : > { %v5726_v62 = vmax.f32 %v5724_v40, %v5725_v35  ;;  %v5733_v44 = vmax.f32 %v5731_v63, %v5732_v49  ;;  %v5739_v17 = vrot.slane %v5738_v55, 1  ;;  %v5806_v2 = vmax.f32 %v5804_v54, %v5805_v22  ;;  %v13156_v40 = vld [vmem:[%s17776_s6 + $0x374] ss:$8 sps:$4 sm:$0xff]   ;;  %v12934_v54 = vpop.f32.mrf.mxu0 }
 0x4d9   : > { %v5746_v32 = vrot.slane %v5745_v46, 1  ;;  %v5812_v56 = vrot.slane %v5811_v27, 4  ;;  %v5819_v41 = vrot.slane %v5818_v59, 4  ;;  %v5825_v18 = vsel %vm5383_vm1, %v4982_v16, -inf  ;;  %7722 = vmatprep.subr.bf16.mxu0 %v13156_v40 }
 0x4da   : > { %v5740_v36 = vmax.f32 %v5738_v55, %v5739_v17  ;;  %v6304_v9 = vmax.f32 %v5726_v62, %v5782_v58  ;;  %v6305_v1 = vmax.f32 %v5733_v44, %v5789_v61  ;;  %v5807_v29 = vrot.slane %v5806_v2, 2 }
 0x4db   : > { %v5747_v15 = vmax.f32 %v5745_v46, %v5746_v32  ;;  %v5813_v31 = vmax.f32 %v5811_v27, %v5812_v56  ;;  %v5820_v0 = vmax.f32 %v5818_v59, %v5819_v41  ;;  %v5826_v4 = vrot.slane %v5825_v18, 4  ;;  %v12506_v59 = vpop.f32.mrf.mxu1 }
 0x4dc   : > { %v6306_v33 = vmax.f32 %v5740_v36, %v5796_v60  ;;  %v6466_v5 = vsel %vm6438_vm2, %v6305_v1, %v6304_v9  ;;  %v5808_v42 = vmax.f32 %v5806_v2, %v5807_v29  ;;  %v4932_v45 = vcombine.high %v4660_v28, %v4660_v28 }
 0x4dd   : > { %v6307_v63 = vmax.f32 %v5747_v15, %v5803_v24  ;;  %v5814_v10 = vrot.slane %v5813_v31, 2  ;;  %v5821_v47 = vrot.slane %v5820_v0, 2  ;;  %v5827_v58 = vmax.f32 %v5825_v18, %v5826_v4  ;;  %v4584_v18 = vpop.f32.mrf.mxu0 }
 0x4de   : > { %v6467_v61 = vsel %vm6440_vm3, %v6306_v33, %v6466_v5  ;;  %v5809_v53 = vrot.slane %v5808_v42, 1  ;;  %v4939_v34 = vrot.slane %v4660_v28, %v15951_v57  ;;  %v4946_v60 = vrot.slane %v4932_v45, %v15951_v57  ;;  %v12507_v33 = vpop.f32.mrf.mxu1 }
 0x4df   : > { %v5815_v35 = vmax.f32 %v5813_v31, %v5814_v10  ;;  %v5822_v49 = vmax.f32 %v5820_v0, %v5821_v47  ;;  %v5828_v55 = vrot.slane %v5827_v58, 2  ;;  %v16341_v22 = vsel %vm6442_vm4, %v6307_v63, %v6467_v61  ;;  %v12935_v47 = vpop.f32.mrf.mxu0 }
 0x4e0   : > { %v16343_v46 = vmax.f32 %v5808_v42, %v5809_v53  ;;  %v4947_v24 = vcombine.high %v4939_v34, %v4939_v34  ;;  %v4948_v16 = vcombine.high %v4946_v60, %v4946_v60  ;;  %v5748_v27 = vsel %vm5383_vm1, %v4939_v34, -inf }
 0x4e1   : > { %v5816_v62 = vrot.slane %v5815_v35, 1  ;;  %v5823_v44 = vrot.slane %v5822_v49, 1  ;;  %v5829_v28 = vmax.f32 %v5827_v58, %v5828_v55  ;;  %v5749_v17 = vrot.slane %v5748_v27, 4 }
 0x4e2   : > { %v5755_v2 = vsel %vm5383_vm1, %v4947_v24, -inf  ;;  %v5762_v32 = vsel %vm5383_vm1, %v4946_v60, -inf  ;;  %v5769_v56 = vsel %vm5383_vm1, %v4948_v16, -inf  ;;  %v4432_v41 = vadd.f32 %v16249_v48, %v15983_v19 }
 0x4e3   : > { %v16351_v36 = vmax.f32 %v5815_v35, %v5816_v62  ;;  %v16353_v9 = vmax.f32 %v5822_v49, %v5823_v44  ;;  %v5830_v1 = vrot.slane %v5829_v28, 1  ;;  %v5750_v29 = vmax.f32 %v5748_v27, %v5749_v17 }
 0x4e4   : > { %v5756_v15 = vrot.slane %v5755_v2, 4  ;;  %v5763_v31 = vrot.slane %v5762_v32, 4  ;;  %v5770_v0 = vrot.slane %v5769_v56, 4  ;;  %v4593_v4 = vadd.f32 %v12934_v54, %v4432_v41 }
 0x4e5   : > { %v16355_v5 = vmax.f32 %v5829_v28, %v5830_v1  ;;  %v5751_v42 = vrot.slane %v5750_v29, 2  ;;  %v16357_v45 = vadd.f32 %v12504_v38, %v12503_v25  ;;  %v4424_v19 = vadd.f32 %v16173_v20, %v15972_v23 }
 0x4e6   : > { %v5757_v48 = vmax.f32 %v5755_v2, %v5756_v15  ;;  %v5764_v40 = vmax.f32 %v5762_v32, %v5763_v31  ;;  %v5771_v63 = vmax.f32 %v5769_v56, %v5770_v0  ;;  %v4665_v10 = vmax.f32 %v4593_v4, 0.0 }
 0x4e7   : > { %v5752_v58 = vmax.f32 %v5750_v29, %v5751_v42  ;;  %v4585_v61 = vadd.f32 %v4584_v18, %v4424_v19  ;;  %v4435_v53 = vadd.f32 %v16295_v30, %v15988_v26  ;;  %v16363_v34 = vadd.f32 %v12507_v33, %v12506_v59 }
 0x4e8   : > { %v5758_v60 = vrot.slane %v5757_v48, 2  ;;  %v5765_v54 = vrot.slane %v5764_v40, 2  ;;  %v5772_v35 = vrot.slane %v5771_v63, 2  ;;  %v5017_v25 = vcombine.high %v4665_v10, %v4665_v10 }
 0x4e9   : > { %v5753_v38 = vrot.slane %v5752_v58, 1  ;;  %v5024_v49 = vrot.slane %v4665_v10, %v15951_v57  ;;  %v4663_v23 = vmax.f32 %v4585_v61, 0.0  ;;  %v4596_v20 = vadd.f32 %v12935_v47, %v4435_v53 }
 0x4ea   : > { %v5759_v55 = vmax.f32 %v5757_v48, %v5758_v60  ;;  %v5766_v24 = vmax.f32 %v5764_v40, %v5765_v54  ;;  %v5773_v16 = vmax.f32 %v5771_v63, %v5772_v35  ;;  %v5031_v27 = vrot.slane %v5017_v25, %v15951_v57 }
 0x4eb   : > { %v5754_v62 = vmax.f32 %v5752_v58, %v5753_v38  ;;  %v5032_v44 = vcombine.high %v5024_v49, %v5024_v49  ;;  %v5888_v26 = vsel %vm5383_vm1, %v5024_v49, -inf  ;;  %v4983_v30 = vcombine.high %v4663_v23, %v4663_v23 }
 0x4ec   : > { %v5760_v59 = vrot.slane %v5759_v55, 1  ;;  %v5767_v28 = vrot.slane %v5766_v24, 1  ;;  %v5774_v17 = vrot.slane %v5773_v16, 1  ;;  %v5033_v2 = vcombine.high %v5031_v27, %v5031_v27 }
 0x4ed   : > { %v6308_v32 = vmax.f32 %v5754_v62, %v16343_v46  ;;  %v5889_v56 = vrot.slane %v5888_v26, 4  ;;  %v5895_v41 = vsel %vm5383_vm1, %v5032_v44, -inf  ;;  %v5902_v18 = vsel %vm5383_vm1, %v5031_v27, -inf }
 0x4ee   : > { %v5761_v1 = vmax.f32 %v5759_v55, %v5760_v59  ;;  %v5768_v29 = vmax.f32 %v5766_v24, %v5767_v28  ;;  %v5775_v15 = vmax.f32 %v5773_v16, %v5774_v17  ;;  %v5896_v31 = vrot.slane %v5895_v41, 4 }
 0x4ef   : > { %v6469_v0 = vsel %vm6444_vm5, %v6308_v32, %v16341_v22  ;;  %v5890_v4 = vmax.f32 %v5888_v26, %v5889_v56  ;;  %v5903_v33 = vrot.slane %v5902_v18, 4  ;;  %v5909_v42 = vsel %vm5383_vm1, %v5033_v2, -inf }
 0x4f0   : > { %v6309_v19 = vmax.f32 %v5761_v1, %v16351_v36  ;;  %v6310_v46 = vmax.f32 %v5768_v29, %v16353_v9  ;;  %v6311_v48 = vmax.f32 %v5775_v15, %v16355_v5  ;;  %v5897_v40 = vmax.f32 %v5895_v41, %v5896_v31 }
 0x4f1   : > { %v5891_v63 = vrot.slane %v5890_v4, 2  ;;  %v5904_v10 = vmax.f32 %v5902_v18, %v5903_v33  ;;  %v5910_v47 = vrot.slane %v5909_v42, 4  ;;  %v4990_v58 = vrot.slane %v4663_v23, %v15951_v57  ;;  %v4587_v33 = vpop.f32.mrf.mxu0 }
 0x4f2   : > { %v6470_v61 = vsel %vm6446_vm6, %v6309_v19, %v6469_v0  ;;  %v5898_v53 = vrot.slane %v5897_v40, 2  ;;  %v4997_v22 = vrot.slane %v4983_v30, %v15951_v57  ;;  %v4666_v60 = vmax.f32 %v4596_v20, 0.0 }
 0x4f3   : > { %v6471_v54 = vsel %vm6448_vm7, %v6310_v46, %v6470_v61  ;;  %v5892_v35 = vmax.f32 %v5890_v4, %v5891_v63  ;;  %v5905_v36 = vrot.slane %v5904_v10, 2  ;;  %v5911_v25 = vmax.f32 %v5909_v42, %v5910_v47 }
 0x4f4   : > { %v6472_v9 = vsel %vm6450_vm8, %v6311_v48, %v6471_v54  ;;  %v5899_v5 = vmax.f32 %v5897_v40, %v5898_v53  ;;  %v4998_v38 = vcombine.high %v4990_v58, %v4990_v58  ;;  %v4999_v49 = vcombine.high %v4997_v22, %v4997_v22 }
 0x4f5   : > { %6513 = vst [vmem:[#allocation3 + $0x68] sm:$0xff] %v6472_v9  ;;  %v5893_v55 = vrot.slane %v5892_v35, 1  ;;  %v5906_v24 = vmax.f32 %v5904_v10, %v5905_v36  ;;  %v5912_v23 = vrot.slane %v5911_v25, 2  ;;  %v5832_v16 = vsel %vm5383_vm1, %v4990_v58, -inf }
 0x4f6   : > { %v5900_v27 = vrot.slane %v5899_v5, 1  ;;  %v5833_v62 = vrot.slane %v5832_v16, 4  ;;  %v5839_v20 = vsel %vm5383_vm1, %v4998_v38, -inf  ;;  %v5846_v44 = vsel %vm5383_vm1, %v4997_v22, -inf }
 0x4f7   : > { %v5894_v26 = vmax.f32 %v5892_v35, %v5893_v55  ;;  %v5907_v30 = vrot.slane %v5906_v24, 1  ;;  %v5913_v59 = vmax.f32 %v5911_v25, %v5912_v23  ;;  %v5840_v28 = vrot.slane %v5839_v20, 4 }
 0x4f8   : > { %v5901_v17 = vmax.f32 %v5899_v5, %v5900_v27  ;;  %v5834_v2 = vmax.f32 %v5832_v16, %v5833_v62  ;;  %v5847_v32 = vrot.slane %v5846_v44, 4  ;;  %v5853_v56 = vsel %vm5383_vm1, %v4999_v49, -inf }
 0x4f9   : > { %v5908_v41 = vmax.f32 %v5906_v24, %v5907_v30  ;;  %v5914_v18 = vrot.slane %v5913_v59, 1  ;;  %v5841_v1 = vmax.f32 %v5839_v20, %v5840_v28  ;;  %v5854_v29 = vrot.slane %v5853_v56, 4 }
 0x4fa   : > { %v5835_v15 = vrot.slane %v5834_v2, 2  ;;  %v5848_v31 = vmax.f32 %v5846_v44, %v5847_v32  ;;  %v5034_v0 = vcombine.high %v4666_v60, %v4666_v60  ;;  %v5041_v4 = vrot.slane %v4666_v60, %v15951_v57 }
 0x4fb   : > { %v5915_v42 = vmax.f32 %v5913_v59, %v5914_v18  ;;  %v5842_v19 = vrot.slane %v5841_v1, 2  ;;  %v5855_v46 = vmax.f32 %v5853_v56, %v5854_v29  ;;  %v4427_v48 = vadd.f32 %v16209_v14, %v15979_v13 }
 0x4fc   : > { %v5836_v40 = vmax.f32 %v5834_v2, %v5835_v15  ;;  %v5849_v63 = vrot.slane %v5848_v31, 2  ;;  %v5048_v10 = vrot.slane %v5034_v0, %v15951_v57  ;;  %v5049_v47 = vcombine.high %v5041_v4, %v5041_v4 }
 0x4fd   : > { %v5843_v58 = vmax.f32 %v5841_v1, %v5842_v19  ;;  %v5856_v61 = vrot.slane %v5855_v46, 2  ;;  %v5916_v53 = vsel %vm5383_vm1, %v5041_v4, -inf  ;;  %v4588_v22 = vadd.f32 %v4587_v33, %v4427_v48  ;;  %v12509_v48 = vpop.f32.mrf.mxu1 }
 0x4fe   : > { %v5837_v54 = vrot.slane %v5836_v40, 1  ;;  %v5850_v35 = vmax.f32 %v5848_v31, %v5849_v63  ;;  %v5050_v60 = vcombine.high %v5048_v10, %v5048_v10  ;;  %v5917_v36 = vrot.slane %v5916_v53, 4 }
 0x4ff   : > { %v5844_v25 = vrot.slane %v5843_v58, 1  ;;  %v5857_v9 = vmax.f32 %v5855_v46, %v5856_v61  ;;  %v5923_v5 = vsel %vm5383_vm1, %v5049_v47, -inf  ;;  %v5930_v13 = vsel %vm5383_vm1, %v5048_v10, -inf  ;;  %v12938_v61 = vpop.f32.mrf.mxu0 }
 0x500   : > { %v5838_v14 = vmax.f32 %v5836_v40, %v5837_v54  ;;  %v5851_v38 = vrot.slane %v5850_v35, 1  ;;  %v5918_v49 = vmax.f32 %v5916_v53, %v5917_v36  ;;  %v5924_v55 = vrot.slane %v5923_v5, 4 }
 0x501   : > { %v5845_v24 = vmax.f32 %v5843_v58, %v5844_v25  ;;  %v5858_v23 = vrot.slane %v5857_v9, 1  ;;  %v5931_v16 = vrot.slane %v5930_v13, 4  ;;  %v5937_v27 = vsel %vm5383_vm1, %v5050_v60, -inf }
 0x502   : > { %v5852_v62 = vmax.f32 %v5850_v35, %v5851_v38  ;;  %v6312_v20 = vmax.f32 %v5838_v14, %v5894_v26  ;;  %v5919_v44 = vrot.slane %v5918_v49, 2  ;;  %v5925_v30 = vmax.f32 %v5923_v5, %v5924_v55  ;;  %v12510_v5 = vpop.f32.mrf.mxu1 }
 0x503   : > { %v5859_v59 = vmax.f32 %v5857_v9, %v5858_v23  ;;  %v6313_v28 = vmax.f32 %v5845_v24, %v5901_v17  ;;  %v5932_v2 = vmax.f32 %v5930_v13, %v5931_v16  ;;  %v5938_v32 = vrot.slane %v5937_v27, 4  ;;  %v4600_v23 = vpop.f32.mrf.mxu0  ;;  %v6531_v16 = vld [vmem:[#allocation3 + $0x20] sm:$0xff] }
 0x504   : > { %v6314_v56 = vmax.f32 %v5852_v62, %v5908_v41  ;;  %v5920_v18 = vmax.f32 %v5918_v49, %v5919_v44  ;;  %v5926_v1 = vrot.slane %v5925_v30, 2  ;;  %v4664_v29 = vmax.f32 %v4588_v22, 0.0 }
 0x505   : > { %v6315_v15 = vmax.f32 %v5859_v59, %v5915_v42  ;;  %v6473_v31 = vsel %vm6438_vm2, %v6313_v28, %v6312_v20  ;;  %v5933_v0 = vrot.slane %v5932_v2, 2  ;;  %v5939_v4 = vmax.f32 %v5937_v27, %v5938_v32 }
 0x506   : > { %v6474_v33 = vsel %vm6440_vm3, %v6314_v56, %v6473_v31  ;;  %v5921_v19 = vrot.slane %v5920_v18, 1  ;;  %v5927_v46 = vmax.f32 %v5925_v30, %v5926_v1  ;;  %v5000_v26 = vcombine.high %v4664_v29, %v4664_v29 }
 0x507   : > { %v5934_v40 = vmax.f32 %v5932_v2, %v5933_v0  ;;  %v5940_v63 = vrot.slane %v5939_v4, 2  ;;  %v5007_v17 = vrot.slane %v4664_v29, %v15951_v57  ;;  %v16398_v41 = vsel %vm6442_vm4, %v6315_v15, %v6474_v33  ;;  %v12939_v33 = vpop.f32.mrf.mxu0 }
 0x508   : > { %v16400_v10 = vmax.f32 %v5920_v18, %v5921_v19  ;;  %v5928_v42 = vrot.slane %v5927_v46, 1  ;;  %v5014_v47 = vrot.slane %v5000_v26, %v15951_v57  ;;  %v4448_v58 = vadd.f32 %v16363_v34, %v16007_v52  ;;  %v13548_v18 = vld [vmem:[#allocation3] sm:$0xff] }
 0x509   : > { %v5935_v53 = vrot.slane %v5934_v40, 1  ;;  %v5941_v22 = vmax.f32 %v5939_v4, %v5940_v63  ;;  %v5015_v54 = vcombine.high %v5007_v17, %v5007_v17  ;;  %v5860_v35 = vsel %vm5383_vm1, %v5007_v17, -inf }
 0x50a   : > { %v16406_v60 = vmax.f32 %v5927_v46, %v5928_v42  ;;  %v5016_v36 = vcombine.high %v5014_v47, %v5014_v47  ;;  %v5861_v25 = vrot.slane %v5860_v35, 4  ;;  %v5874_v9 = vsel %vm5383_vm1, %v5014_v47, -inf }
 0x50b   : > { %v16409_v13 = vmax.f32 %v5934_v40, %v5935_v53  ;;  %v5942_v14 = vrot.slane %v5941_v22, 1  ;;  %v5867_v38 = vsel %vm5383_vm1, %v5015_v54, -inf  ;;  %v5875_v49 = vrot.slane %v5874_v9, 4 }
 0x50c   : > { %v5862_v52 = vmax.f32 %v5860_v35, %v5861_v25  ;;  %v5868_v34 = vrot.slane %v5867_v38, 4  ;;  %v5881_v55 = vsel %vm5383_vm1, %v5016_v36, -inf  ;;  %v4609_v24 = vadd.f32 %v12938_v61, %v4448_v58 }
 0x50d   : > { %v16413_v27 = vmax.f32 %v5941_v22, %v5942_v14  ;;  %v5876_v62 = vmax.f32 %v5874_v9, %v5875_v49  ;;  %v5882_v20 = vrot.slane %v5881_v55, 4  ;;  %v12511_v44 = vadd.f32 %v12510_v5, %v12509_v48  ;;  %v12512_v49 = vpop.f32.mrf.mxu1 }
 0x50e   : > { %v5863_v30 = vrot.slane %v5862_v52, 2  ;;  %v5869_v59 = vmax.f32 %v5867_v38, %v5868_v34  ;;  %v4669_v28 = vmax.f32 %v4609_v24, 0.0  ;;  %v4440_v2 = vadd.f32 %v16300_v50, %v15992_v11 }
 0x50f   : > { %v5877_v32 = vrot.slane %v5876_v62, 2  ;;  %v5883_v56 = vmax.f32 %v5881_v55, %v5882_v20  ;;  %v6538_v1 = vpack.c.bf16 %v6531_v16, %v13548_v18  ;;  %v4451_v29 = vadd.f32 %v12511_v44, %v16016_v39 }
 0x510   : > { %v5864_v15 = vmax.f32 %v5862_v52, %v5863_v30  ;;  %v5870_v31 = vrot.slane %v5869_v59, 2  ;;  %v5085_v0 = vcombine.high %v4669_v28, %v4669_v28  ;;  %v5092_v4 = vrot.slane %v4669_v28, %v15951_v57 }
 0x511   : > { %v5878_v19 = vmax.f32 %v5876_v62, %v5877_v32  ;;  %v5884_v46 = vrot.slane %v5883_v56, 2  ;;  %v4601_v26 = vadd.f32 %v4600_v23, %v4440_v2  ;;  %7535 = vmatprep.mubr.bf16.mxu1 %v6538_v1  ;;  %v16419_v48 = vadd.f32 %v12939_v33, %v4451_v29 }
 0x512   : > { %v5865_v40 = vrot.slane %v5864_v15, 1  ;;  %v5871_v11 = vmax.f32 %v5869_v59, %v5870_v31  ;;  %v5099_v50 = vrot.slane %v5085_v0, %v15951_v57  ;;  %v5100_v63 = vcombine.high %v5092_v4, %v5092_v4 }
 0x513   : > { %v5879_v17 = vrot.slane %v5878_v19, 1  ;;  %v5885_v42 = vmax.f32 %v5883_v56, %v5884_v46  ;;  %v6000_v39 = vsel %vm5383_vm1, %v5092_v4, -inf  ;;  %v4667_v47 = vmax.f32 %v4601_v26, 0.0  ;;  %v12513_v56 = vpop.f32.mrf.mxu1 }
 0x514   : > { %v5866_v58 = vmax.f32 %v5864_v15, %v5865_v40  ;;  %v5872_v61 = vrot.slane %v5871_v11, 1  ;;  %v5101_v53 = vcombine.high %v5099_v50, %v5099_v50  ;;  %v6001_v22 = vrot.slane %v6000_v39, 4 }
 0x515   : > { %v5880_v54 = vmax.f32 %v5878_v19, %v5879_v17  ;;  %v5886_v35 = vrot.slane %v5885_v42, 1  ;;  %v6007_v36 = vsel %vm5383_vm1, %v5100_v63, -inf  ;;  %v6014_v25 = vsel %vm5383_vm1, %v5099_v50, -inf  ;;  %v12515_v50 = vpop.f32.mrf.mxu1 }
 0x516   : > { %v5873_v9 = vmax.f32 %v5871_v11, %v5872_v61  ;;  %v6316_v5 = vmax.f32 %v5866_v58, %v16400_v10  ;;  %v6002_v14 = vmax.f32 %v6000_v39, %v6001_v22  ;;  %v6008_v38 = vrot.slane %v6007_v36, 4  ;;  %v16442_v58 = vld [vmem:[#allocation3 + $0x1f] sm:$0xff] }
 0x517   : > { %v5887_v52 = vmax.f32 %v5885_v42, %v5886_v35  ;;  %v6318_v34 = vmax.f32 %v5880_v54, %v16409_v13  ;;  %v6015_v55 = vrot.slane %v6014_v25, 4  ;;  %v6021_v24 = vsel %vm5383_vm1, %v5101_v53, -inf }
 0x518   : > { %v6317_v23 = vmax.f32 %v5873_v9, %v16406_v60  ;;  %v6476_v16 = vsel %vm6444_vm5, %v6316_v5, %v16398_v41  ;;  %v6003_v62 = vrot.slane %v6002_v14, 2  ;;  %v6009_v20 = vmax.f32 %v6007_v36, %v6008_v38  ;;  %v13133_v5 = vld [vmem:[%s17776_s6 + $0x270] ss:$8 sps:$4 sm:$0xff]  }
 0x519   : > { %v6319_v44 = vmax.f32 %v5887_v52, %v16413_v27  ;;  %v6016_v30 = vmax.f32 %v6014_v25, %v6015_v55  ;;  %v6022_v10 = vrot.slane %v6021_v24, 4  ;;  %v5051_v59 = vcombine.high %v4667_v47, %v4667_v47  ;;  %v13141_v55 = vld [vmem:[%s17776_s6 + $0x264] ss:$8 sps:$4 sm:$0xff]  }
 0x51a   : > { %v6477_v28 = vsel %vm6446_vm6, %v6317_v23, %v6476_v16  ;;  %v6004_v2 = vmax.f32 %v6002_v14, %v6003_v62  ;;  %v6010_v32 = vrot.slane %v6009_v20, 2  ;;  %v5058_v13 = vrot.slane %v4667_v47, %v15951_v57  ;;  %v6518_v47 = vld [vmem:[#allocation3 + $0x7] sm:$0xff] }
 0x51b   : > { %v6478_v18 = vsel %vm6448_vm7, %v6318_v34, %v6477_v28  ;;  %v6017_v60 = vrot.slane %v6016_v30, 2  ;;  %v6023_v1 = vmax.f32 %v6021_v24, %v6022_v10  ;;  %v5065_v41 = vrot.slane %v5051_v59, %v15951_v57  ;;  %v12516_v24 = vpop.f32.mrf.mxu1 }
 0x51c   : > { %v6479_v29 = vsel %vm6450_vm8, %v6319_v44, %v6478_v18  ;;  %v6005_v15 = vrot.slane %v6004_v2, 1  ;;  %v6011_v27 = vmax.f32 %v6009_v20, %v6010_v32  ;;  %v5066_v31 = vcombine.high %v5058_v13, %v5058_v13 }
 0x51d   : > { %6514 = vst [vmem:[#allocation3 + $0x80] sm:$0xff] %v6479_v29  ;;  %v6018_v0 = vmax.f32 %v6016_v30, %v6017_v60  ;;  %v6024_v4 = vrot.slane %v6023_v1, 2  ;;  %v5067_v33 = vcombine.high %v5065_v41, %v5065_v41  ;;  %v5944_v19 = vsel %vm5383_vm1, %v5058_v13, -inf  ;;  %v13139_v13 = vld [vmem:[%s17776_s6 + $0x260] ss:$8 sps:$4 sm:$0xff]  }
 0x51e   : > { %v16438_v46 = vmax.f32 %v6004_v2, %v6005_v15  ;;  %v6012_v26 = vrot.slane %v6011_v27, 1  ;;  %v5945_v40 = vrot.slane %v5944_v19, 4  ;;  %v5951_v11 = vsel %vm5383_vm1, %v5066_v31, -inf }
 0x51f   : > { %v6019_v63 = vrot.slane %v6018_v0, 1  ;;  %v6025_v17 = vmax.f32 %v6023_v1, %v6024_v4  ;;  %v5952_v42 = vrot.slane %v5951_v11, 4  ;;  %v5958_v39 = vsel %vm5383_vm1, %v5065_v41, -inf  ;;  %v13147_v41 = vld [vmem:[%s17776_s6 + $0x254] ss:$8 sps:$4 sm:$0xff]  }
 0x520   : > { %v16444_v61 = vmax.f32 %v6011_v27, %v6012_v26  ;;  %v5946_v53 = vmax.f32 %v5944_v19, %v5945_v40  ;;  %v5959_v22 = vrot.slane %v5958_v39, 4  ;;  %v5965_v54 = vsel %vm5383_vm1, %v5067_v33, -inf }
 0x521   : > { %v16447_v35 = vmax.f32 %v6018_v0, %v6019_v63  ;;  %v6026_v36 = vrot.slane %v6025_v17, 1  ;;  %v5953_v25 = vmax.f32 %v5951_v11, %v5952_v42  ;;  %v5966_v9 = vrot.slane %v5965_v54, 4  ;;  %v13145_v11 = vld [vmem:[%s17776_s6 + $0x250] ss:$8 sps:$4 sm:$0xff]  }
 0x522   : > { %v5947_v14 = vrot.slane %v5946_v53, 2  ;;  %v5960_v38 = vmax.f32 %v5958_v39, %v5959_v22  ;;  %v4670_v52 = vmax.f32 %v16419_v48, 0.0  ;;  %v6526_v34 = vpack.c.bf16 %v16442_v58, %v6518_v47  ;;  %v4603_v48 = vpop.f32.mrf.mxu0  ;;  %v13150_v39 = vld [vmem:[%s17776_s6 + $0x244] ss:$8 sps:$4 sm:$0xff]  }
 0x523   : > { %v16457_v23 = vmax.f32 %v6025_v17, %v6026_v36  ;;  %v5954_v16 = vrot.slane %v5953_v25, 2  ;;  %v5967_v62 = vmax.f32 %v5965_v54, %v5966_v9  ;;  %v16459_v20 = vadd.f32 %v12513_v56, %v12512_v49 }
 0x524   : > { %v5948_v44 = vmax.f32 %v5946_v53, %v5947_v14  ;;  %v5961_v30 = vrot.slane %v5960_v38, 2  ;;  %v5102_v10 = vcombine.high %v4670_v52, %v4670_v52  ;;  %v5109_v59 = vrot.slane %v4670_v52, %v15951_v57  ;;  %7536 = vmatmul.mubr.bf16.vlgmr.msra.gmra.mxu1 %v6526_v34  ;;  %v13148_v34 = vld [vmem:[%s17776_s6 + $0x240] ss:$8 sps:$4 sm:$0xff]  }
 0x525   : > { %v5955_v28 = vmax.f32 %v5953_v25, %v5954_v16  ;;  %v5968_v2 = vrot.slane %v5967_v62, 2  ;;  %7650 = vmatpush1.bf16.msra.mxu1 %v13133_v5  ;;  %v4443_v32 = vadd.f32 %v16357_v45, %v15997_v12  ;;  %v16467_v18 = vadd.f32 %v12516_v24, %v12515_v50 }
 0x526   : > { %v5949_v49 = vrot.slane %v5948_v44, 1  ;;  %v5962_v56 = vmax.f32 %v5960_v38, %v5961_v30  ;;  %v5116_v60 = vrot.slane %v5102_v10, %v15951_v57  ;;  %v5117_v1 = vcombine.high %v5109_v59, %v5109_v59  ;;  %7651 = vmatprep.subr.bf16.mxu1 %v13141_v55 }
 0x527   : > { %v5956_v29 = vrot.slane %v5955_v28, 1  ;;  %v5969_v15 = vmax.f32 %v5967_v62, %v5968_v2  ;;  %v6028_v12 = vsel %vm5383_vm1, %v5109_v59, -inf  ;;  %v4604_v45 = vadd.f32 %v4603_v48, %v4443_v32  ;;  %v12518_v32 = vpop.f32.mrf.mxu1 }
 0x528   : > { %v5950_v27 = vmax.f32 %v5948_v44, %v5949_v49  ;;  %v5963_v31 = vrot.slane %v5962_v56, 1  ;;  %v5118_v0 = vcombine.high %v5116_v60, %v5116_v60  ;;  %v6029_v4 = vrot.slane %v6028_v12, 4 }
 0x529   : > { %v5957_v33 = vmax.f32 %v5955_v28, %v5956_v29  ;;  %v5970_v19 = vrot.slane %v5969_v15, 1  ;;  %v6035_v26 = vsel %vm5383_vm1, %v5117_v1, -inf  ;;  %v6042_v40 = vsel %vm5383_vm1, %v5116_v60, -inf  ;;  %7652 = vmatpush1.bf16.msra.mxu1 %v13139_v13  ;;  %v13151_v1 = vld [vmem:[%s17776_s6 + $0x230] ss:$8 sps:$4 sm:$0xff]  }
 0x52a   : > { %v5964_v50 = vmax.f32 %v5962_v56, %v5963_v31  ;;  %v6320_v63 = vmax.f32 %v5950_v27, %v16438_v46  ;;  %v6030_v17 = vmax.f32 %v6028_v12, %v6029_v4  ;;  %v6036_v42 = vrot.slane %v6035_v26, 4  ;;  %7653 = vmatprep.subr.bf16.mxu1 %v13147_v41 }
 0x52b   : > { %v5971_v47 = vmax.f32 %v5969_v15, %v5970_v19  ;;  %v6321_v53 = vmax.f32 %v5957_v33, %v16444_v61  ;;  %v6043_v22 = vrot.slane %v6042_v40, 4  ;;  %v6049_v54 = vsel %vm5383_vm1, %v5118_v0, -inf }
 0x52c   : > { %v6322_v36 = vmax.f32 %v5964_v50, %v16447_v35  ;;  %v6031_v25 = vrot.slane %v6030_v17, 2  ;;  %v6037_v9 = vmax.f32 %v6035_v26, %v6036_v42  ;;  %v6050_v5 = vrot.slane %v6049_v54, 4  ;;  %v16492_v35 = vpop.f32.mrf.mxu0  ;;  %v6543_v50 = vld [vmem:[#allocation3 + $0x21] sm:$0xff] }
 0x52d   : > { %v6323_v46 = vmax.f32 %v5971_v47, %v16457_v23  ;;  %v6480_v14 = vsel %vm6438_vm2, %v6321_v53, %v6320_v63  ;;  %v6044_v38 = vmax.f32 %v6042_v40, %v6043_v22  ;;  %v4668_v52 = vmax.f32 %v4604_v45, 0.0  ;;  %7654 = vmatpush1.bf16.msra.mxu1 %v13145_v11  ;;  %v13153_v23 = vld [vmem:[%s17776_s6 + $0x234] ss:$8 sps:$4 sm:$0xff]   ;;  %v6542_v11 = vld [vmem:[#allocation3 + $0x9] sm:$0xff]  ;;  %v12519_v63 = vpop.f32.mrf.mxu1 }
 0x52e   : > { %v6481_v61 = vsel %vm6440_vm3, %v6322_v36, %v6480_v14  ;;  %v6032_v55 = vmax.f32 %v6030_v17, %v6031_v25  ;;  %v6038_v24 = vrot.slane %v6037_v9, 2  ;;  %v6051_v16 = vmax.f32 %v6049_v54, %v6050_v5  ;;  %7655 = vmatprep.subr.bf16.mxu1 %v13150_v39  ;;  %v4616_v45 = vpop.f32.mrf.mxu0  ;;  %v16517_v40 = vld [vmem:[#allocation3 + $0x37] sm:$0xff]  ;;  %v13157_v53 = vld [vmem:[%s17776_s6 + $0x220] ss:$8 sps:$4 sm:$0xff]  }
 0x52f   : > { %v6045_v62 = vrot.slane %v6044_v38, 2  ;;  %v5068_v44 = vcombine.high %v4668_v52, %v4668_v52  ;;  %v5075_v30 = vrot.slane %v4668_v52, %v15951_v57  ;;  %v16499_v10 = vsel %vm6442_vm4, %v6323_v46, %v6481_v61  ;;  %v13154_v52 = vld [vmem:[%s17776_s6 + $0x370] ss:$8 sps:$4 sm:$0xff]  }
 0x530   : > { %v6033_v59 = vrot.slane %v6032_v55, 1  ;;  %v6039_v48 = vmax.f32 %v6037_v9, %v6038_v24  ;;  %v6052_v28 = vrot.slane %v6051_v16, 2  ;;  %v4456_v2 = vadd.f32 %v16459_v20, %v16020_v3  ;;  %v13159_v3 = vld [vmem:[%s17776_s6 + $0x224] ss:$8 sps:$4 sm:$0xff]   ;;  %v13165_v9 = vld [vmem:[%s17776_s6 + $0x214] ss:$8 sps:$4 sm:$0xff]  }
 0x531   : > { %v6046_v13 = vmax.f32 %v6044_v38, %v6045_v62  ;;  %v5082_v49 = vrot.slane %v5068_v44, %v15951_v57  ;;  %v5083_v56 = vcombine.high %v5075_v30, %v5075_v30  ;;  %v5972_v60 = vsel %vm5383_vm1, %v5075_v30, -inf  ;;  %7656 = vmatpush1.bf16.msra.mxu1 %v13148_v34 }
 0x532   : > { %v16508_v41 = vmax.f32 %v6032_v55, %v6033_v59  ;;  %v6040_v29 = vrot.slane %v6039_v48, 1  ;;  %v6053_v15 = vmax.f32 %v6051_v16, %v6052_v28  ;;  %v5973_v12 = vrot.slane %v5972_v60, 4  ;;  %7657 = vmatprep.subr.bf16.mxu1 %v13153_v23  ;;  %v16535_v16 = vpop.f32.mrf.mxu1  ;;  %v13162_v23 = vld [vmem:[%s17776_s6 + $0x364] ss:$8 sps:$4 sm:$0xff]   ;;  %v13163_v59 = vld [vmem:[%s17776_s6 + $0x210] ss:$8 sps:$4 sm:$0xff]  }
 0x533   : > { %v6047_v20 = vrot.slane %v6046_v13, 1  ;;  %v5084_v27 = vcombine.high %v5082_v49, %v5082_v49  ;;  %v5979_v31 = vsel %vm5383_vm1, %v5083_v56, -inf  ;;  %v5986_v0 = vsel %vm5383_vm1, %v5082_v49, -inf }
 0x534   : > { %v16515_v4 = vmax.f32 %v6039_v48, %v6040_v29  ;;  %v6054_v33 = vrot.slane %v6053_v15, 1  ;;  %v5974_v19 = vmax.f32 %v5972_v60, %v5973_v12  ;;  %v5980_v26 = vrot.slane %v5979_v31, 4  ;;  %v13160_v60 = vld [vmem:[%s17776_s6 + $0x360] ss:$8 sps:$4 sm:$0xff]   ;;  %v12522_v12 = vpop.f32.mrf.mxu1 }
 0x535   : > { %v16519_v17 = vmax.f32 %v6046_v13, %v6047_v20  ;;  %v5987_v42 = vrot.slane %v5986_v0, 4  ;;  %v5993_v39 = vsel %vm5383_vm1, %v5084_v27, -inf  ;;  %v4617_v47 = vadd.f32 %v4616_v45, %v4456_v2  ;;  %7658 = vmatpush1.bf16.msra.mxu1 %v13151_v1  ;;  %v13171_v13 = vld [vmem:[%s17776_s6 + $0x204] ss:$8 sps:$4 sm:$0xff]   ;;  %v13168_v45 = vld [vmem:[%s17776_s6 + $0x354] ss:$8 sps:$4 sm:$0xff]  }
 0x536   : > { %v16525_v22 = vmax.f32 %v6053_v15, %v6054_v33  ;;  %v5975_v54 = vrot.slane %v5974_v19, 2  ;;  %v5981_v36 = vmax.f32 %v5979_v31, %v5980_v26  ;;  %v5994_v25 = vrot.slane %v5993_v39, 4  ;;  %7659 = vmatprep.subr.bf16.mxu1 %v13159_v3  ;;  %v13169_v33 = vld [vmem:[%s17776_s6 + $0x200] ss:$8 sps:$4 sm:$0xff]  }
 0x537   : > { %v5988_v5 = vmax.f32 %v5986_v0, %v5987_v42  ;;  %v4671_v46 = vmax.f32 %v4617_v47, 0.0  ;;  %v6562_v14 = vpack.c.bf16 %v16517_v40, %v16442_v58  ;;  %v6550_v38 = vpack.c.bf16 %v6543_v50, %v6542_v11  ;;  %v16562_v0 = vpop.f32.mrf.mxu0 }
 0x538   : > { %v5976_v34 = vmax.f32 %v5974_v19, %v5975_v54  ;;  %v5982_v61 = vrot.slane %v5981_v36, 2  ;;  %v5995_v55 = vmax.f32 %v5993_v39, %v5994_v25  ;;  %v12520_v24 = vadd.f32 %v12519_v63, %v12518_v32  ;;  %v13177_v63 = vld [vmem:[%s17776_s6 + $0x2f4] ss:$8 sps:$4 sm:$0xff]   ;;  %v13166_v54 = vld [vmem:[%s17776_s6 + $0x350] ss:$8 sps:$4 sm:$0xff]  }
 0x539   : > { %v5989_v62 = vrot.slane %v5988_v5, 2  ;;  %v5119_v44 = vcombine.high %v4671_v46, %v4671_v46  ;;  %v5126_v30 = vrot.slane %v4671_v46, %v15951_v57  ;;  %7608 = vmatprep.mubr.bf16.mxu0 %v6562_v14  ;;  %v16543_v58 = vadd.f32 %v16467_v18, %v16024_v8  ;;  %7660 = vmatpush1.bf16.msra.mxu1 %v13157_v53  ;;  %v13174_v46 = vld [vmem:[%s17776_s6 + $0x344] ss:$8 sps:$4 sm:$0xff]  }
 0x53a   : > { %v5977_v48 = vrot.slane %v5976_v34, 1  ;;  %v5983_v28 = vmax.f32 %v5981_v36, %v5982_v61  ;;  %v5996_v2 = vrot.slane %v5995_v55, 2  ;;  %7609 = vmatmul.mubr.bf16.vlgmr.msra.gmra.mxu0 %v6550_v38  ;;  %v4464_v32 = vadd.f32 %v12520_v24, %v16028_v51  ;;  %7661 = vmatprep.subr.bf16.mxu1 %v13165_v9  ;;  %v4619_v61 = vpop.f32.mrf.mxu0 }
 0x53b   : > { %v5990_v49 = vmax.f32 %v5988_v5, %v5989_v62  ;;  %v5133_v8 = vrot.slane %v5119_v44, %v15951_v57  ;;  %v5134_v18 = vcombine.high %v5126_v30, %v5126_v30  ;;  %v6056_v56 = vsel %vm5383_vm1, %v5126_v30, -inf  ;;  %7723 = vmatpush1.bf16.msra.mxu0 %v13154_v52  ;;  %v16578_v5 = vpop.f32.mrf.mxu1 }
 0x53c   : > { %v5978_v1 = vmax.f32 %v5976_v34, %v5977_v48  ;;  %v5984_v29 = vrot.slane %v5983_v28, 1  ;;  %v5997_v15 = vmax.f32 %v5995_v55, %v5996_v2  ;;  %v6057_v51 = vrot.slane %v6056_v56, 4  ;;  %7724 = vmatprep.subr.bf16.mxu0 %v13162_v23 }
 0x53d   : > { %v5991_v3 = vrot.slane %v5990_v49, 1  ;;  %v5135_v20 = vcombine.high %v5133_v8, %v5133_v8  ;;  %v6063_v27 = vsel %vm5383_vm1, %v5134_v18, -inf  ;;  %v6070_v31 = vsel %vm5383_vm1, %v5133_v8, -inf  ;;  %7662 = vmatpush1.bf16.msra.mxu1 %v13163_v59 }
 0x53e   : > { %v5985_v19 = vmax.f32 %v5983_v28, %v5984_v29  ;;  %v5998_v26 = vrot.slane %v5997_v15, 1  ;;  %v6324_v11 = vmax.f32 %v5978_v1, %v16508_v41  ;;  %v6058_v50 = vmax.f32 %v6056_v56, %v6057_v51  ;;  %7663 = vmatprep.subr.bf16.mxu1 %v13171_v13  ;;  %v13180_v13 = vld [vmem:[%s17776_s6 + $0x334] ss:$8 sps:$4 sm:$0xff]  }
 0x53f   : > { %v5992_v42 = vmax.f32 %v5990_v49, %v5991_v3  ;;  %v6064_v39 = vrot.slane %v6063_v27, 4  ;;  %v6071_v47 = vrot.slane %v6070_v31, 4  ;;  %v6077_v53 = vsel %vm5383_vm1, %v5135_v20, -inf  ;;  %7725 = vmatpush1.bf16.msra.mxu0 %v13160_v60  ;;  %v13181_v60 = vld [vmem:[%s17776_s6 + $0x2e0] ss:$8 sps:$4 sm:$0xff]  }
 0x540   : > { %v5999_v36 = vmax.f32 %v5997_v15, %v5998_v26  ;;  %v6325_v25 = vmax.f32 %v5985_v19, %v16515_v4  ;;  %v6483_v41 = vsel %vm6444_vm5, %v6324_v11, %v16499_v10  ;;  %v6059_v9 = vrot.slane %v6058_v50, 2  ;;  %7726 = vmatprep.subr.bf16.mxu0 %v13168_v45  ;;  %v13175_v4 = vld [vmem:[%s17776_s6 + $0x2f0] ss:$8 sps:$4 sm:$0xff]   ;;  %v13189_v51 = vld [vmem:[%s17776_s6 + $0x2d4] ss:$8 sps:$4 sm:$0xff]  }
 0x541   : > { %v6326_v14 = vmax.f32 %v5992_v42, %v16519_v17  ;;  %v6065_v38 = vmax.f32 %v6063_v27, %v6064_v39  ;;  %v6072_v52 = vmax.f32 %v6070_v31, %v6071_v47  ;;  %v6078_v34 = vrot.slane %v6077_v53, 4  ;;  %7664 = vmatpush1.bf16.msra.mxu1 %v13169_v33  ;;  %v13183_v17 = vld [vmem:[%s17776_s6 + $0x2e4] ss:$8 sps:$4 sm:$0xff]   ;;  %v13187_v39 = vld [vmem:[%s17776_s6 + $0x2d0] ss:$8 sps:$4 sm:$0xff]  }
 0x542   : > { %v6327_v10 = vmax.f32 %v5999_v36, %v16525_v22  ;;  %v6484_v55 = vsel %vm6446_vm6, %v6325_v25, %v6483_v41  ;;  %v6060_v24 = vmax.f32 %v6058_v50, %v6059_v9  ;;  %v4625_v23 = vadd.f32 %v16492_v35, %v4464_v32  ;;  %7665 = vmatprep.subr.bf16.mxu1 %v13177_v63  ;;  %v13172_v22 = vld [vmem:[%s17776_s6 + $0x340] ss:$8 sps:$4 sm:$0xff]   ;;  %v16599_v32 = vpop.f32.mrf.mxu1  ;;  %v13186_v11 = vld [vmem:[%s17776_s6 + $0x324] ss:$8 sps:$4 sm:$0xff]  }
 0x543   : > { %v6485_v62 = vsel %vm6448_vm7, %v6326_v14, %v6484_v55  ;;  %v6066_v44 = vrot.slane %v6065_v38, 2  ;;  %v6073_v30 = vrot.slane %v6072_v52, 2  ;;  %v6079_v59 = vmax.f32 %v6077_v53, %v6078_v34  ;;  %7727 = vmatpush1.bf16.msra.mxu0 %v13166_v54  ;;  %v13195_v25 = vld [vmem:[%s17776_s6 + $0x2c4] ss:$8 sps:$4 sm:$0xff]   ;;  %v13192_v55 = vld [vmem:[%s17776_s6 + $0x314] ss:$8 sps:$4 sm:$0xff]  }
 0x544   : > { %v6486_v48 = vsel %vm6450_vm8, %v6327_v10, %v6485_v62  ;;  %v6061_v28 = vrot.slane %v6060_v24, 1  ;;  %v4673_v2 = vmax.f32 %v4625_v23, 0.0  ;;  %v4620_v35 = vadd.f32 %v4619_v61, %v16543_v58  ;;  %7728 = vmatprep.subr.bf16.mxu0 %v13174_v46  ;;  %v16622_v26 = vpop.f32.mrf.mxu1 }
 0x545   : > { %6515 = vst [vmem:[#allocation3 + $0x98] sm:$0xff] %v6486_v48  ;;  %v6067_v49 = vmax.f32 %v6065_v38, %v6066_v44  ;;  %v6074_v8 = vmax.f32 %v6072_v52, %v6073_v30  ;;  %v6080_v18 = vrot.slane %v6079_v59, 2  ;;  %v12523_v56 = vadd.f32 %v12522_v12, %v16535_v16  ;;  %7666 = vmatpush2.bf16.msra.mxu1 %v13175_v4  ;;  %v13178_v12 = vld [vmem:[%s17776_s6 + $0x330] ss:$8 sps:$4 sm:$0xff]   ;;  %v13184_v38 = vld [vmem:[%s17776_s6 + $0x320] ss:$8 sps:$4 sm:$0xff]  }
 0x546   : > { %v16608_v1 = vmax.f32 %v6060_v24, %v6061_v28  ;;  %v5153_v58 = vcombine.high %v4673_v2, %v4673_v2  ;;  %v5160_v29 = vrot.slane %v4673_v2, %v15951_v57  ;;  %v4672_v15 = vmax.f32 %v4620_v35, 0.0  ;;  %7667 = vmatprep.subr.bf16.mxu1 %v13183_v17  ;;  %v16648_v10 = vpop.f32.mrf.mxu1  ;;  %v13193_v44 = vld [vmem:[%s17776_s6 + $0x2c0] ss:$8 sps:$4 sm:$0xff]   ;;  %v13201_v28 = vld [vmem:[%s17776_s6 + $0x2b4] ss:$8 sps:$4 sm:$0xff]  }
 0x547   : > { %v6068_v45 = vrot.slane %v6067_v49, 1  ;;  %v6075_v3 = vrot.slane %v6074_v8, 1  ;;  %v6081_v20 = vmax.f32 %v6079_v59, %v6080_v18  ;;  %v16615_v16 = vadd.f32 %v12523_v56, %v16034_v37  ;;  %7729 = vmatpush1.bf16.msra.mxu0 %v13172_v22 }
 0x548   : > { %v5167_v27 = vrot.slane %v5153_v58, %v15951_v57  ;;  %v5168_v31 = vcombine.high %v5160_v29, %v5160_v29  ;;  %v6112_v33 = vsel %vm5383_vm1, %v5160_v29, -inf  ;;  %v5136_v19 = vcombine.high %v4672_v15, %v4672_v15  ;;  %7730 = vmatprep.subr.bf16.mxu0 %v13180_v13  ;;  %v16665_v29 = vpop.f32.mrf.mxu1 }
 0x549   : > { %v16627_v37 = vmax.f32 %v6067_v49, %v6068_v45  ;;  %v16629_v50 = vmax.f32 %v6074_v8, %v6075_v3  ;;  %v6082_v63 = vrot.slane %v6081_v20, 1  ;;  %v6113_v42 = vrot.slane %v6112_v33, 4  ;;  %7668 = vmatpush2.bf16.msra.mxu1 %v13181_v60  ;;  %v13190_v8 = vld [vmem:[%s17776_s6 + $0x310] ss:$8 sps:$4 sm:$0xff]  }
 0x54a   : > { %v5169_v47 = vcombine.high %v5167_v27, %v5167_v27  ;;  %v6119_v53 = vsel %vm5383_vm1, %v5168_v31, -inf  ;;  %v6126_v54 = vsel %vm5383_vm1, %v5167_v27, -inf  ;;  %v5143_v36 = vrot.slane %v4672_v15, %v15951_v57  ;;  %7669 = vmatprep.subr.bf16.mxu1 %v13189_v51  ;;  %v13198_v15 = vld [vmem:[%s17776_s6 + $0x304] ss:$8 sps:$4 sm:$0xff]  }
 0x54b   : > { %v16640_v41 = vmax.f32 %v6081_v20, %v6082_v63  ;;  %v6114_v9 = vmax.f32 %v6112_v33, %v6113_v42  ;;  %v6120_v46 = vrot.slane %v6119_v53, 4  ;;  %v6127_v14 = vrot.slane %v6126_v54, 4  ;;  %7731 = vmatpush1.bf16.msra.mxu0 %v13178_v12  ;;  %v13199_v12 = vld [vmem:[%s17776_s6 + $0x2b0] ss:$8 sps:$4 sm:$0xff]   ;;  %v13207_v63 = vld [vmem:[%s17776_s6 + $0x2a4] ss:$8 sps:$4 sm:$0xff]  }
 0x54c   : > { %v6133_v52 = vsel %vm5383_vm1, %v5169_v47, -inf  ;;  %v5150_v34 = vrot.slane %v5136_v19, %v15951_v57  ;;  %v5151_v61 = vcombine.high %v5143_v36, %v5143_v36  ;;  %v6084_v4 = vsel %vm5383_vm1, %v5143_v36, -inf  ;;  %7732 = vmatprep.subr.bf16.mxu0 %v13186_v11  ;;  %v16673_v11 = vpop.f32.mrf.mxu0 }
 0x54d   : > { %v6115_v24 = vrot.slane %v6114_v9, 2  ;;  %v6121_v23 = vmax.f32 %v6119_v53, %v6120_v46  ;;  %v6128_v17 = vmax.f32 %v6126_v54, %v6127_v14  ;;  %v6134_v62 = vrot.slane %v6133_v52, 4  ;;  %7670 = vmatpush2.bf16.msra.mxu1 %v13187_v39  ;;  %v13196_v54 = vld [vmem:[%s17776_s6 + $0x300] ss:$8 sps:$4 sm:$0xff]   ;;  %v16681_v14 = vpop.f32.mrf.mxu1 }
 0x54e   : > { %v5152_v30 = vcombine.high %v5150_v34, %v5150_v34  ;;  %v6085_v59 = vrot.slane %v6084_v4, 4  ;;  %v6091_v22 = vsel %vm5383_vm1, %v5151_v61, -inf  ;;  %v6098_v48 = vsel %vm5383_vm1, %v5150_v34, -inf  ;;  %7671 = vmatprep.subr.bf16.mxu1 %v13195_v25 }
 0x54f   : > { %v6116_v2 = vmax.f32 %v6114_v9, %v6115_v24  ;;  %v6122_v35 = vrot.slane %v6121_v23, 2  ;;  %v6129_v13 = vrot.slane %v6128_v17, 2  ;;  %v6135_v49 = vmax.f32 %v6133_v52, %v6134_v62  ;;  %7733 = vmatpush1.bf16.msra.mxu0 %v13184_v38  ;;  %v13204_v38 = vld [vmem:[%s17776_s6 + $0x3f4] ss:$8 sps:$4 sm:$0xff]  }
 0x550   : > { %v6086_v18 = vmax.f32 %v6084_v4, %v6085_v59  ;;  %v6092_v56 = vrot.slane %v6091_v22, 4  ;;  %v6099_v60 = vrot.slane %v6098_v48, 4  ;;  %v6105_v58 = vsel %vm5383_vm1, %v5152_v30, -inf  ;;  %7734 = vmatprep.subr.bf16.mxu0 %v13192_v55  ;;  %v13205_v55 = vld [vmem:[%s17776_s6 + $0x2a0] ss:$8 sps:$4 sm:$0xff]   ;;  %v16694_v30 = vpop.f32.mrf.mxu0 }
 0x551   : > { %v6117_v51 = vrot.slane %v6116_v2, 1  ;;  %v6123_v45 = vmax.f32 %v6121_v23, %v6122_v35  ;;  %v6130_v3 = vmax.f32 %v6128_v17, %v6129_v13  ;;  %v6136_v20 = vrot.slane %v6135_v49, 2  ;;  %7672 = vmatpush2.bf16.msra.mxu1 %v13193_v44  ;;  %v16692_v44 = vld [vmem:[#allocation3 + $0x50] sm:$0xff] }
 0x552   : > { %v6087_v27 = vrot.slane %v6086_v18, 2  ;;  %v6093_v31 = vmax.f32 %v6091_v22, %v6092_v56  ;;  %v6100_v33 = vmax.f32 %v6098_v48, %v6099_v60  ;;  %v6106_v19 = vrot.slane %v6105_v58, 4  ;;  %7673 = vmatprep.subr.bf16.mxu1 %v13201_v28  ;;  %v13213_v59 = vld [vmem:[%s17776_s6 + $0x294] ss:$8 sps:$4 sm:$0xff]   ;;  %v16727_v60 = vld [vmem:[#allocation3 + $0x67] sm:$0xff] }
 0x553   : > { %v6118_v42 = vmax.f32 %v6116_v2, %v6117_v51  ;;  %v6124_v39 = vrot.slane %v6123_v45, 1  ;;  %v6131_v47 = vrot.slane %v6130_v3, 1  ;;  %v6137_v53 = vmax.f32 %v6135_v49, %v6136_v20  ;;  %7735 = vmatpush1.bf16.msra.mxu0 %v13190_v8  ;;  %v13549_v2 = vld [vmem:[%s17775_s5] ss:$0 sm:$0xff]  ;;  %v16740_v20 = vld [vmem:[#allocation3 + $0x51] sm:$0xff] }
 0x554   : > { %v6088_v36 = vmax.f32 %v6086_v18, %v6087_v27  ;;  %v6094_v25 = vrot.slane %v6093_v31, 2  ;;  %v6101_v9 = vrot.slane %v6100_v33, 2  ;;  %v6107_v46 = vmax.f32 %v6105_v58, %v6106_v19  ;;  %7736 = vmatprep.subr.bf16.mxu0 %v13198_v15  ;;  %v12533_v18 = vpop.f32.mrf.mxu1  ;;  %v13210_v58 = vld [vmem:[%s17776_s6 + $0x3e4] ss:$8 sps:$4 sm:$0xff]  }
 0x555   : > { %v6125_v52 = vmax.f32 %v6123_v45, %v6124_v39  ;;  %v6132_v34 = vmax.f32 %v6130_v3, %v6131_v47  ;;  %v6138_v61 = vrot.slane %v6137_v53, 1  ;;  %v6328_v4 = vmax.f32 %v16608_v1, %v6118_v42  ;;  %7674 = vmatpush2.bf16.msra.mxu1 %v13199_v12  ;;  %v16738_v3 = vpop.f32.mrf.mxu0  ;;  %v13211_v12 = vld [vmem:[%s17776_s6 + $0x290] ss:$8 sps:$4 sm:$0xff]  }
 0x556   : > { %v6089_v24 = vrot.slane %v6088_v36, 1  ;;  %v6095_v23 = vmax.f32 %v6093_v31, %v6094_v25  ;;  %v16690_v17 = vmax.f32 %v6100_v33, %v6101_v9  ;;  %v6108_v62 = vrot.slane %v6107_v46, 2  ;;  %7675 = vmatprep.subr.bf16.mxu1 %v13207_v63  ;;  %v13219_v63 = vld [vmem:[%s17776_s6 + $0x284] ss:$8 sps:$4 sm:$0xff]  }
 0x557   : > { %v6139_v1 = vmax.f32 %v6137_v53, %v6138_v61  ;;  %v6329_v22 = vmax.f32 %v16627_v37, %v6125_v52  ;;  %v6330_v48 = vmax.f32 %v16629_v50, %v6132_v34  ;;  %v4628_v28 = vadd.f32 %v16562_v0, %v16615_v16  ;;  %7737 = vmatpush1.bf16.msra.mxu0 %v13196_v54  ;;  %v16714_v37 = vld [vmem:[#allocation3 + $0x38] sm:$0xff]  ;;  %v16716_v50 = vld [vmem:[#allocation3 + $0x4f] sm:$0xff]  ;;  %v4635_v34 = vpop.f32.mrf.mxu0  ;;  %v13217_v61 = vld [vmem:[%s17776_s6 + $0x280] ss:$8 sps:$4 sm:$0xff]  }
 0x558   : > { %v16707_v35 = vadd.f32 %v13549_v2, %v15968_v7  ;;  %v16710_v13 = vadd.f32 %v13549_v2, %v15999_v43  ;;  %v6096_v49 = vrot.slane %v6095_v23, 1  ;;  %v16712_v8 = vmax.f32 %v6107_v46, %v6108_v62  ;;  %v13202_v0 = vld [vmem:[%s17776_s6 + $0x3f0] ss:$8 sps:$4 sm:$0xff]   ;;  %7738 = vmatprep.subr.bf16.mxu0 %v13204_v38  ;;  %v13222_v2 = vld [vmem:[%s17776_s6 + $0x3c4] ss:$8 sps:$4 sm:$0xff]  }
 0x559   : > { %v6331_v16 = vmax.f32 %v16640_v41, %v6139_v1  ;;  %v6487_v7 = vsel %vm6438_vm2, %v6329_v22, %v6328_v4  ;;  %v4674_v56 = vmax.f32 %v4628_v28, 0.0  ;;  %v16725_v43 = vpack.c.bf16 %v16692_v44, %v16714_v37  ;;  %7676 = vmatpush2.bf16.msra.mxu1 %v13205_v55  ;;  %v16762_v54 = vld [vmem:[#allocation3 + $0x39] sm:$0xff] }
 0x55a   : > { %v6488_v15 = vsel %vm6440_vm3, %v6330_v48, %v6487_v7  ;;  %v16733_v51 = vmax.f32 %v6088_v36, %v6089_v24  ;;  %v16735_v45 = vmax.f32 %v6095_v23, %v6096_v49  ;;  %v6103_v41 = vrot.slane %v16690_v17, 1  ;;  %7677 = vmatprep.subr.bf16.mxu1 %v13213_v59  ;;  %v12534_v36 = vpop.f32.mrf.mxu1  ;;  %v13214_v59 = vld [vmem:[%s17776_s6 + $0x3d0] ss:$8 sps:$4 sm:$0xff]  }
 0x55b   : > { %v5170_v27 = vcombine.high %v4674_v56, %v4674_v56  ;;  %v5177_v31 = vrot.slane %v4674_v56, %v15951_v57  ;;  %v16747_v33 = vsel %vm6442_vm4, %v6331_v16, %v6488_v15  ;;  %7545 = vmatprep.mubr.bf16.mxu1 %v16725_v43  ;;  %v6527_v19 = vpack.c.bf16 %v16716_v50, %v16517_v40  ;;  %v13208_v40 = vld [vmem:[%s17776_s6 + $0x3e0] ss:$8 sps:$4 sm:$0xff]  }
 0x55c   : > { %v6110_v42 = vrot.slane %v16712_v8, 1  ;;  %v12526_v39 = vadd.f32 %v16599_v32, %v16578_v5  ;;  %v12529_v47 = vadd.f32 %v16648_v10, %v16622_v26  ;;  %v6563_v53 = vpack.c.bf16 %v16727_v60, %v16716_v50  ;;  %7739 = vmatpush2.bf16.msra.mxu0 %v13202_v0  ;;  %v13216_v32 = vld [vmem:[%s17776_s6 + $0x3d4] ss:$8 sps:$4 sm:$0xff]  }
 0x55d   : > { %v5184_v25 = vrot.slane %v5170_v27, %v15951_v57  ;;  %v5185_v9 = vcombine.high %v5177_v31, %v5177_v31  ;;  %v6140_v46 = vsel %vm5383_vm1, %v5177_v31, -inf  ;;  %7546 = vmatmul.mubr.bf16.gmra.mxu1 %v6527_v19  ;;  %v16771_v5 = vpack.c.bf16 %v16740_v20, %v16762_v54  ;;  %7740 = vmatprep.subr.bf16.mxu0 %v13210_v58 }
 0x55e   : > { %v6141_v26 = vrot.slane %v6140_v46, 4  ;;  %v4472_v10 = vadd.f32 %v12526_v39, %v16038_v6  ;;  %7618 = vmatprep.mubr.bf16.mxu0 %v6563_v53  ;;  %v12532_v38 = vadd.f32 %v16681_v14, %v16665_v29  ;;  %v4475_v52 = vadd.f32 %v12529_v47, %v16042_v21  ;;  %7678 = vmatpush2.bf16.msra.mxu1 %v13211_v12  ;;  %v13225_v29 = vld [vmem:[%s17776_s6 + $0x474] ss:$8 sps:$4 sm:$0xff]   ;;  %v13220_v12 = vld [vmem:[%s17776_s6 + $0x3c0] ss:$8 sps:$4 sm:$0xff]  }
 0x55f   : > { %v5186_v4 = vcombine.high %v5184_v25, %v5184_v25  ;;  %v6147_v55 = vsel %vm5383_vm1, %v5185_v9, -inf  ;;  %v6154_v24 = vsel %vm5383_vm1, %v5184_v25, -inf  ;;  %7619 = vmatmul.mubr.bf16.gmra.mxu0 %v16771_v5  ;;  %v12535_v6 = vadd.f32 %v12534_v36, %v12533_v18  ;;  %7679 = vmatprep.subr.bf16.mxu1 %v13219_v63 }
 0x560   : > { %v6142_v21 = vmax.f32 %v6140_v46, %v6141_v26  ;;  %v6148_v14 = vrot.slane %v6147_v55, 4  ;;  %v6155_v23 = vrot.slane %v6154_v24, 4  ;;  %v4633_v62 = vadd.f32 %v16694_v30, %v4472_v10  ;;  %7741 = vmatpush2.bf16.msra.mxu0 %v13208_v40  ;;  %v13226_v26 = vld [vmem:[%s17776_s6 + $0x3b0] ss:$8 sps:$4 sm:$0xff]  }
 0x561   : > { %v16794_v1 = vmax.f32 %v16690_v17, %v6103_v41  ;;  %v6161_v22 = vsel %vm5383_vm1, %v5186_v4, -inf  ;;  %v4480_v48 = vadd.f32 %v12532_v38, %v16707_v35  ;;  %v4636_v28 = vadd.f32 %v4635_v34, %v4475_v52  ;;  %7742 = vmatprep.subr.bf16.mxu0 %v13216_v32 }
 0x562   : > { %v6143_v49 = vrot.slane %v6142_v21, 2  ;;  %v6149_v30 = vmax.f32 %v6147_v55, %v6148_v14  ;;  %v6156_v18 = vmax.f32 %v6154_v24, %v6155_v23  ;;  %v6162_v0 = vrot.slane %v6161_v22, 4  ;;  %7680 = vmatpush2.bf16.msra.mxu1 %v13217_v61  ;;  %v13234_v61 = vld [vmem:[%s17776_s6 + $0x3a4] ss:$8 sps:$4 sm:$0xff]  }
 0x563   : > { %v16802_v16 = vmax.f32 %v16712_v8, %v6110_v42  ;;  %v4675_v17 = vmax.f32 %v4633_v62, 0.0  ;;  %v4641_v7 = vadd.f32 %v16673_v11, %v4480_v48  ;;  %v16806_v56 = vadd.f32 %v12535_v6, %v16710_v13  ;;  %7795 = vmatprep.subr.bf16.mxu1 %v13225_v29  ;;  %v13228_v11 = vld [vmem:[%s17776_s6 + $0x3b4] ss:$8 sps:$4 sm:$0xff]  }
 0x564   : > { %v6144_v35 = vmax.f32 %v6142_v21, %v6143_v49  ;;  %v6150_v58 = vrot.slane %v6149_v30, 2  ;;  %v6157_v15 = vrot.slane %v6156_v18, 2  ;;  %v6163_v41 = vmax.f32 %v6161_v22, %v6162_v0  ;;  %7743 = vmatpush2.bf16.msra.mxu0 %v13214_v59 }
 0x565   : > { %v5187_v27 = vcombine.high %v4675_v17, %v4675_v17  ;;  %v5194_v8 = vrot.slane %v4675_v17, %v15951_v57  ;;  %v4677_v31 = vmax.f32 %v4641_v7, 0.0  ;;  %v16812_v19 = vmax.f32 %v4636_v28, 0.0  ;;  %7744 = vmatprep.subr.bf16.mxu0 %v13222_v2  ;;  %v13232_v28 = vld [vmem:[%s17776_s6 + $0x3a0] ss:$8 sps:$4 sm:$0xff]  }
 0x566   : > { %v6145_v13 = vrot.slane %v6144_v35, 1  ;;  %v6151_v63 = vmax.f32 %v6149_v30, %v6150_v58  ;;  %v6158_v42 = vmax.f32 %v6156_v18, %v6157_v15  ;;  %v6164_v39 = vrot.slane %v6163_v41, 2  ;;  %v13240_v18 = vld [vmem:[%s17776_s6 + $0x394] ss:$8 sps:$4 sm:$0xff]  }
 0x567   : > { %v5201_v47 = vrot.slane %v5187_v27, %v15951_v57  ;;  %v5202_v53 = vcombine.high %v5194_v8, %v5194_v8  ;;  %v6168_v36 = vsel %vm5383_vm1, %v5194_v8, -inf  ;;  %v5221_v40 = vcombine.high %v4677_v31, %v4677_v31 }
 0x568   : > { %v6146_v25 = vmax.f32 %v6144_v35, %v6145_v13  ;;  %v6152_v9 = vrot.slane %v6151_v63, 1  ;;  %v6159_v46 = vrot.slane %v6158_v42, 1  ;;  %v6165_v32 = vmax.f32 %v6163_v41, %v6164_v39  ;;  %7745 = vmatpush2.bf16.msra.mxu0 %v13220_v12 }
 0x569   : > { %v5203_v10 = vcombine.high %v5201_v47, %v5201_v47  ;;  %v6169_v38 = vrot.slane %v6168_v36, 4  ;;  %v6175_v52 = vsel %vm5383_vm1, %v5202_v53, -inf  ;;  %v6182_v34 = vsel %vm5383_vm1, %v5201_v47, -inf  ;;  %7746 = vmatprep.subr.bf16.mxu0 %v13228_v11 }
 0x56a   : > { %v6153_v4 = vmax.f32 %v6151_v63, %v6152_v9  ;;  %v6160_v55 = vmax.f32 %v6158_v42, %v6159_v46  ;;  %v6166_v24 = vrot.slane %v6165_v32, 1  ;;  %v6332_v6 = vmax.f32 %v16733_v51, %v6146_v25  ;;  %v13246_v63 = vld [vmem:[%s17776_s6 + $0x384] ss:$8 sps:$4 sm:$0xff]  }
 0x56b   : > { %v6170_v29 = vmax.f32 %v6168_v36, %v6169_v38  ;;  %v6176_v21 = vrot.slane %v6175_v52, 4  ;;  %v6183_v14 = vrot.slane %v6182_v34, 4  ;;  %v6189_v23 = vsel %vm5383_vm1, %v5203_v10, -inf  ;;  %v13244_v10 = vld [vmem:[%s17776_s6 + $0x380] ss:$8 sps:$4 sm:$0xff]  }
 0x56c   : > { %v6167_v62 = vmax.f32 %v6165_v32, %v6166_v24  ;;  %v6333_v59 = vmax.f32 %v16735_v45, %v6153_v4  ;;  %v6334_v22 = vmax.f32 %v16794_v1, %v6160_v55  ;;  %v6490_v48 = vsel %vm6444_vm5, %v6332_v6, %v16747_v33  ;;  %7747 = vmatpush2.bf16.msra.mxu0 %v13226_v26 }
 0x56d   : > { %v6171_v2 = vrot.slane %v6170_v29, 2  ;;  %v6177_v51 = vmax.f32 %v6175_v52, %v6176_v21  ;;  %v6184_v49 = vmax.f32 %v6182_v34, %v6183_v14  ;;  %v6190_v30 = vrot.slane %v6189_v23, 4  ;;  %7748 = vmatprep.subr.bf16.mxu0 %v13234_v61 }
 0x56e   : > { %v6335_v45 = vmax.f32 %v16802_v16, %v6167_v62  ;;  %v6491_v1 = vsel %vm6446_vm6, %v6333_v59, %v6490_v48  ;;  %v5228_v33 = vrot.slane %v4677_v31, %v15951_v57  ;;  %v5235_v0 = vrot.slane %v5221_v40, %v15951_v57  ;;  %v13238_v16 = vld [vmem:[%s17776_s6 + $0x390] ss:$8 sps:$4 sm:$0xff]  }
 0x56f   : > { %v6492_v17 = vsel %vm6448_vm7, %v6334_v22, %v6491_v1  ;;  %v6172_v7 = vmax.f32 %v6170_v29, %v6171_v2  ;;  %v6178_v35 = vrot.slane %v6177_v51, 2  ;;  %v6185_v58 = vrot.slane %v6184_v49, 2 }
 0x570   : > { %v16845_v15 = vsel %vm6450_vm8, %v6335_v45, %v6492_v17  ;;  %v6191_v41 = vmax.f32 %v6189_v23, %v6190_v30  ;;  %v5236_v12 = vcombine.high %v5228_v33, %v5228_v33  ;;  %v5237_v27 = vcombine.high %v5235_v0, %v5235_v0  ;;  %7749 = vmatpush2.bf16.msra.mxu0 %v13232_v28 }
 0x571   : > { %6516 = vst [vmem:[#allocation3 + $0xb0] sm:$0xff] %v16845_v15  ;;  %v6173_v8 = vrot.slane %v6172_v7, 1  ;;  %v6179_v31 = vmax.f32 %v6177_v51, %v6178_v35  ;;  %v6186_v11 = vmax.f32 %v6184_v49, %v6185_v58  ;;  %v6224_v13 = vsel %vm5383_vm1, %v5228_v33, -inf  ;;  %7750 = vmatprep.subr.bf16.mxu0 %v13240_v18 }
 0x572   : > { %v6192_v42 = vrot.slane %v6191_v41, 2  ;;  %v6225_v39 = vrot.slane %v6224_v13, 4  ;;  %v6231_v47 = vsel %vm5383_vm1, %v5236_v12, -inf  ;;  %v6238_v53 = vsel %vm5383_vm1, %v5235_v0, -inf }
 0x573   : > { %v6180_v36 = vrot.slane %v6179_v31, 1  ;;  %v6232_v40 = vrot.slane %v6231_v47, 4  ;;  %v5204_v25 = vcombine.high %v16812_v19, %v16812_v19  ;;  %v6239_v32 = vrot.slane %v6238_v53, 4 }
 0x574   : > { %v6193_v9 = vmax.f32 %v6191_v41, %v6192_v42  ;;  %v6226_v46 = vmax.f32 %v6224_v13, %v6225_v39  ;;  %v6245_v26 = vsel %vm5383_vm1, %v5237_v27, -inf  ;;  %7751 = vmatpush2.bf16.msra.mxu0 %v13238_v16  ;;  %v6174_v38 = vmax.f32 %v6172_v7, %v6173_v8 }
 0x575   : > { %v6233_v52 = vmax.f32 %v6231_v47, %v6232_v40  ;;  %v6246_v34 = vrot.slane %v6245_v26, 4  ;;  %v4644_v61 = vadd.f32 %v16738_v3, %v16806_v56  ;;  %7752 = vmatprep.subr.bf16.mxu0 %v13246_v63  ;;  %v6187_v4 = vrot.slane %v6186_v11, 1 }
 0x576   : > { %v6227_v55 = vrot.slane %v6226_v46, 2  ;;  %v6240_v24 = vmax.f32 %v6238_v53, %v6239_v32  ;;  %v5211_v6 = vrot.slane %v16812_v19, %v15951_v57  ;;  %v6181_v29 = vmax.f32 %v6179_v31, %v6180_v36 }
 0x577   : > { %v6234_v21 = vrot.slane %v6233_v52, 2  ;;  %v6247_v14 = vmax.f32 %v6245_v26, %v6246_v34  ;;  %v5218_v23 = vrot.slane %v5204_v25, %v15951_v57  ;;  %v6194_v62 = vrot.slane %v6193_v9, 1  ;;  %v16879_v34 = vld [vmem:[#allocation3 + $0x80] sm:$0xff] }
 0x578   : > { %v6228_v59 = vmax.f32 %v6226_v46, %v6227_v55  ;;  %v6241_v22 = vrot.slane %v6240_v24, 2  ;;  %v5219_v48 = vcombine.high %v5211_v6, %v5211_v6  ;;  %7753 = vmatpush2.bf16.msra.mxu0 %v13244_v10  ;;  %v6196_v56 = vsel %vm5383_vm1, %v5211_v6, -inf }
 0x579   : > { %v6235_v28 = vmax.f32 %v6233_v52, %v6234_v21  ;;  %v6248_v2 = vrot.slane %v6247_v14, 2  ;;  %v5220_v3 = vcombine.high %v5218_v23, %v5218_v23  ;;  %v6197_v30 = vrot.slane %v6196_v56, 4  ;;  %v16882_v21 = vld [vmem:[#allocation3 + $0x68] sm:$0xff] }
 0x57a   : > { %v6229_v51 = vrot.slane %v6228_v59, 1  ;;  %v6242_v49 = vmax.f32 %v6240_v24, %v6241_v22  ;;  %v6203_v19 = vsel %vm5383_vm1, %v5219_v48, -inf  ;;  %v6210_v33 = vsel %vm5383_vm1, %v5218_v23, -inf  ;;  %v6559_v23 = vld [vmem:[#allocation3 + $0x97] sm:$0xff] }
 0x57b   : > { %v6236_v18 = vrot.slane %v6235_v28, 1  ;;  %v6249_v45 = vmax.f32 %v6247_v14, %v6248_v2  ;;  %v6204_v1 = vrot.slane %v6203_v19, 4  ;;  %v6211_v7 = vrot.slane %v6210_v33, 4  ;;  %v6523_v14 = vld [vmem:[#allocation3 + $0x7f] sm:$0xff] }
 0x57c   : > { %v6230_v0 = vmax.f32 %v6228_v59, %v6229_v51  ;;  %v6243_v17 = vrot.slane %v6242_v49, 1  ;;  %v4678_v35 = vmax.f32 %v4644_v61, 0.0  ;;  %v6198_v12 = vmax.f32 %v6196_v56, %v6197_v30 }
 0x57d   : > { %v6237_v58 = vmax.f32 %v6235_v28, %v6236_v18  ;;  %v6250_v41 = vrot.slane %v6249_v45, 1  ;;  %v6217_v27 = vsel %vm5383_vm1, %v5220_v3, -inf  ;;  %v6188_v16 = vmax.f32 %v6186_v11, %v6187_v4  ;;  %v16890_v28 = vld [vmem:[#allocation3 + $0x81] sm:$0xff] }
 0x57e   : > { %v6244_v8 = vmax.f32 %v6242_v49, %v6243_v17  ;;  %v6336_v31 = vmax.f32 %v6174_v38, %v6230_v0  ;;  %v6205_v13 = vmax.f32 %v6203_v19, %v6204_v1  ;;  %v6195_v63 = vmax.f32 %v6193_v9, %v6194_v62 }
 0x57f   : > { %v6251_v42 = vmax.f32 %v6249_v45, %v6250_v41  ;;  %v6337_v39 = vmax.f32 %v6181_v29, %v6237_v58  ;;  %v6212_v47 = vmax.f32 %v6210_v33, %v6211_v7  ;;  %v6218_v36 = vrot.slane %v6217_v27, 4  ;;  %v6546_v45 = vld [vmem:[#allocation3 + $0x69] sm:$0xff]  ;;  %v16900_v7 = vld [vmem:[#allocation3 + $0x98] sm:$0xff] }
 0x580   : > { %v6338_v53 = vmax.f32 %v6188_v16, %v6244_v8  ;;  %v5238_v40 = vcombine.high %v4678_v35, %v4678_v35  ;;  %v6199_v32 = vrot.slane %v6198_v12, 2  ;;  %v6206_v10 = vrot.slane %v6205_v13, 2  ;;  %v6525_v16 = vld [vmem:[#allocation3 + $0xaf] sm:$0xff] }
 0x581   : > { %v6339_v25 = vmax.f32 %v6195_v63, %v6251_v42  ;;  %v6494_v46 = vsel %vm6438_vm2, %v6337_v39, %v6336_v31  ;;  %v5245_v52 = vrot.slane %v4678_v35, %v15951_v57  ;;  %v6213_v11 = vrot.slane %v6212_v47, 2 }
 0x582   : > { %v6495_v26 = vsel %vm6440_vm3, %v6338_v53, %v6494_v46  ;;  %v5252_v38 = vrot.slane %v5238_v40, %v15951_v57  ;;  %v6219_v61 = vmax.f32 %v6217_v27, %v6218_v36  ;;  %v6200_v24 = vmax.f32 %v6198_v12, %v6199_v32 }
 0x583   : > { %v16877_v9 = vsel %vm6442_vm4, %v6339_v25, %v6495_v26  ;;  %v5253_v4 = vcombine.high %v5245_v52, %v5245_v52  ;;  %v6252_v55 = vsel %vm5383_vm1, %v5245_v52, -inf  ;;  %v6207_v62 = vmax.f32 %v6205_v13, %v6206_v10 }
 0x584   : > { %v5254_v6 = vcombine.high %v5252_v38, %v5252_v38  ;;  %v6253_v29 = vrot.slane %v6252_v55, 4  ;;  %v6266_v22 = vsel %vm5383_vm1, %v5252_v38, -inf  ;;  %v16888_v48 = vpack.c.bf16 %v16879_v34, %v16882_v21 }
 0x585   : > { %v6259_v59 = vsel %vm5383_vm1, %v5253_v4, -inf  ;;  %v6214_v2 = vmax.f32 %v6212_v47, %v6213_v11  ;;  %v6267_v51 = vrot.slane %v6266_v22, 4  ;;  %v6220_v49 = vrot.slane %v6219_v61, 2 }
 0x586   : > { %v6254_v3 = vmax.f32 %v6252_v55, %v6253_v29  ;;  %v6260_v56 = vrot.slane %v6259_v59, 4  ;;  %v6273_v30 = vsel %vm5383_vm1, %v5254_v6, -inf  ;;  %7555 = vmatprep.mubr.bf16.mxu1 %v16888_v48  ;;  %v16895_v19 = vpack.c.bf16 %v6523_v14, %v16727_v60  ;;  %v13550_v55 = vld [vmem:[#allocation3 + $0x21] sm:$0xff] }
 0x587   : > { %v6564_v18 = vpack.c.bf16 %v6559_v23, %v6523_v14  ;;  %v6268_v0 = vmax.f32 %v6266_v22, %v6267_v51  ;;  %v16898_v17 = vpack.c.bf16 %v16890_v28, %v6546_v45  ;;  %v6274_v35 = vrot.slane %v6273_v30, 4 }
 0x588   : > { %v6255_v1 = vrot.slane %v6254_v3, 2  ;;  %v6261_v33 = vmax.f32 %v6259_v59, %v6260_v56  ;;  %7556 = vmatmul.mubr.bf16.gmra.mxu1 %v16895_v19  ;;  %v16905_v58 = vpack.c.bf16 %v16845_v15, %v16900_v7  ;;  %v6201_v60 = vrot.slane %v6200_v24, 1  ;;  %v6566_v56 = vld [vmem:[#allocation3 + $0x20] sm:$0xff] }
 0x589   : > { %7628 = vmatprep.mubr.bf16.mxu0 %v6564_v18  ;;  %v6269_v27 = vrot.slane %v6268_v0, 2  ;;  %v6208_v8 = vrot.slane %v6207_v62, 1  ;;  %v6215_v31 = vrot.slane %v6214_v2, 1  ;;  %v6221_v13 = vmax.f32 %v6219_v61, %v6220_v49 }
 0x58a   : > { %v6256_v41 = vmax.f32 %v6254_v3, %v6255_v1  ;;  %v6262_v12 = vrot.slane %v6261_v33, 2  ;;  %7629 = vmatmul.mubr.bf16.gmra.mxu0 %v16898_v17  ;;  %v6275_v63 = vmax.f32 %v6273_v30, %v6274_v35  ;;  %7565 = vmatprep.mubr.bf16.mxu1 %v16905_v58  ;;  %v16909_v36 = vpack.c.bf16 %v6525_v16, %v6559_v23  ;;  %v13229_v1 = vld [vmem:[%s17776_s6 + $0x460] ss:$8 sps:$4 sm:$0xff]  }
 0x58b   : > { %v6270_v47 = vmax.f32 %v6268_v0, %v6269_v27  ;;  %v6202_v40 = vmax.f32 %v6200_v24, %v6201_v60  ;;  %v6209_v26 = vmax.f32 %v6207_v62, %v6208_v8  ;;  %v6216_v10 = vmax.f32 %v6214_v2, %v6215_v31  ;;  %v13243_v60 = vld [vmem:[%s17776_s6 + $0x444] ss:$8 sps:$4 sm:$0xff]   ;;  %v13241_v27 = vld [vmem:[%s17776_s6 + $0x440] ss:$8 sps:$4 sm:$0xff]   ;;  %v6591_v31 = vld [vmem:[#allocation3 + $0x37] sm:$0xff] }
 0x58c   : > { %v6257_v42 = vrot.slane %v6256_v41, 1  ;;  %v6263_v39 = vmax.f32 %v6261_v33, %v6262_v12  ;;  %v6276_v53 = vrot.slane %v6275_v63, 2  ;;  %v6222_v52 = vrot.slane %v6221_v13, 1  ;;  %v6549_v33 = vld [vmem:[#allocation3 + $0xb1] sm:$0xff]  ;;  %v13252_v8 = vld [vmem:[%s17776_s6 + $0x424] ss:$8 sps:$4 sm:$0xff]  }
 0x58d   : > { %v6271_v32 = vrot.slane %v6270_v47, 1  ;;  %v6586_v6 = vpack.c.bf16 %v16762_v54, %v13550_v55  ;;  %v13223_v54 = vld [vmem:[%s17776_s6 + $0x470] ss:$8 sps:$4 sm:$0xff]   ;;  %v6574_v49 = vpack.c.bf16 %v16714_v37, %v6566_v56  ;;  %v6587_v30 = vpack.c.bf16 %v6546_v45, %v16740_v20  ;;  %v13237_v37 = vld [vmem:[%s17776_s6 + $0x454] ss:$8 sps:$4 sm:$0xff]  }
 0x58e   : > { %v6258_v25 = vmax.f32 %v6256_v41, %v6257_v42  ;;  %v6264_v46 = vrot.slane %v6263_v39, 1  ;;  %v6277_v11 = vmax.f32 %v6275_v63, %v6276_v53  ;;  %v6223_v59 = vmax.f32 %v6221_v13, %v6222_v52  ;;  %v13235_v20 = vld [vmem:[%s17776_s6 + $0x450] ss:$8 sps:$4 sm:$0xff]   ;;  %v13250_v63 = vld [vmem:[%s17776_s6 + $0x420] ss:$8 sps:$4 sm:$0xff]  }
 0x58f   : > { %v6272_v4 = vmax.f32 %v6270_v47, %v6271_v32  ;;  %v6548_v45 = vld [vmem:[#allocation3 + $0x99] sm:$0xff]  ;;  %v6575_v0 = vpack.c.bf16 %v16882_v21, %v16692_v44 }
 0x590   : > { %v6265_v38 = vmax.f32 %v6263_v39, %v6264_v46  ;;  %v6340_v61 = vmax.f32 %v6202_v40, %v6258_v25  ;;  %v6278_v29 = vrot.slane %v6277_v11, 1  ;;  %7566 = vmatmul.mubr.bf16.gmra.mxu1 %v16909_v36  ;;  %v6553_v41 = vpack.c.bf16 %v6549_v33, %v6548_v45  ;;  %v13249_v44 = vld [vmem:[%s17776_s6 + $0x434] ss:$8 sps:$4 sm:$0xff]   ;;  %v13256_v42 = vld [vmem:[%s17776_s6 + $0x400] ss:$8 sps:$4 sm:$0xff]  }
 0x591   : > { %v6342_v23 = vmax.f32 %v6216_v10, %v6272_v4  ;;  %7681 = vmatprep.mubr.bf16.mxu1 %v6586_v6  ;;  %v6588_v12 = vpack.c.bf16 %v6548_v45, %v16890_v28  ;;  %v13247_v28 = vld [vmem:[%s17776_s6 + $0x430] ss:$8 sps:$4 sm:$0xff]   ;;  %v17836_v39 = vmov 0   ;;  %v6598_v53 = vld [vmem:[#allocation3 + $0xdf] sm:$0xff]  ;;  %v13260_v25 = vld [vmem:[#allocation4 + $0x38] sm:$0xff]  }
 0x592   : > { %v6341_v14 = vmax.f32 %v6209_v26, %v6265_v38  ;;  %v6497_v24 = vsel %vm6444_vm5, %v6340_v61, %v16877_v9  ;;  %v6279_v62 = vmax.f32 %v6277_v11, %v6278_v29  ;;  %v13231_v9 = vld [vmem:[%s17776_s6 + $0x464] ss:$8 sps:$4 sm:$0xff]   ;;  %v13267_v38 = vld [vmem:[#allocation4 + $0x68] sm:$0xff]  }
 0x593   : > { %v13261_v46 = vld [vmem:[#allocation4 + $0xf8] sm:$0xff]   ;;  %v13263_v32 = vld [vmem:[#allocation4 + $0x70] sm:$0xff]   ;;  %v13268_v4 = vld [vmem:[#allocation4 + $0x28] sm:$0xff]  }
 0x594   : > { %v6498_v22 = vsel %vm6446_vm6, %v6341_v14, %v6497_v24  ;;  %v6343_v2 = vmax.f32 %v6223_v59, %v6279_v62  ;;  %v13264_v26 = vld [vmem:[#allocation4 + $0x30] sm:$0xff]   ;;  %12578 = vmatprep.subr.bf16.mxu0 %v13261_v46  ;;  %v13269_v61 = vld [vmem:[#allocation4 + $0xe8] sm:$0xff]   ;;  %v13271_v14 = vld [vmem:[#allocation4 + $0x60] sm:$0xff]  }
 0x595   : > { %v6499_v3 = vsel %vm6448_vm7, %v6342_v23, %v6498_v22  ;;  %v13266_v52 = vld [vmem:[#allocation4 + $0xb0] sm:$0xff]   ;;  %v13270_v6 = vld [vmem:[#allocation4 + $0xa8] sm:$0xff]   ;;  %v13272_v23 = vld [vmem:[#allocation4 + $0x20] sm:$0xff]  }
 0x596   : > { %v16921_v51 = vsel %vm6450_vm8, %v6343_v2, %v6499_v3  ;;  %v13273_v24 = vld [vmem:[#allocation4 + $0xe0] sm:$0xff]   ;;  %v13275_v2 = vld [vmem:[#allocation4 + $0x58] sm:$0xff]   ;;  %v13286_v46 = vld [vmem:[#allocation4 + $0x88] sm:$0xff]  }
 0x597   : > { %6517 = vst [vmem:[#allocation3 + $0xc8] sm:$0xff] %v16921_v51  ;;  %v6577_v18 = vpack.c.bf16 %v16921_v51, %v16845_v15  ;;  %v13274_v62 = vld [vmem:[#allocation4 + $0xa0] sm:$0xff]   ;;  %v13276_v3 = vld [vmem:[#allocation4 + $0x18] sm:$0xff]  }
 0x598   : > { %7682 = vmatmul.mubr.bf16.vlgmr.msra.gmra.mxu1 %v6574_v49 }
 0x599   : > { %7796 = vmatpush1.bf16.msra.mxu1 %v13223_v54  ;;  %7691 = vmatprep.mubr.bf16.mxu1 %v6587_v30  ;;  %v13277_v54 = vld [vmem:[#allocation4 + $0xd8] sm:$0xff]  }
 0x59a   : > { %7797 = vmatprep.subr.bf16.mxu1 %v13231_v9  ;;  %v13279_v9 = vld [vmem:[#allocation4 + $0x50] sm:$0xff]  }
 0x59d   : > { %7798 = vmatpush1.bf16.msra.mxu1 %v13229_v1 }
 0x59e   : > { %v6561_v15 = vld [vmem:[#allocation3 + $0xc7] sm:$0xff]  ;;  %7799 = vmatprep.subr.bf16.mxu1 %v13237_v37 }
 0x59f   : > { %v6565_v35 = vpack.c.bf16 %v6561_v15, %v6525_v16  ;;  %v6585_v21 = vld [vmem:[#allocation3 + $0xc9] sm:$0xff]  ;;  %v6576_v16 = vpack.c.bf16 %v16900_v7, %v16879_v34  ;;  %v13255_v34 = vld [vmem:[%s17776_s6 + $0x414] ss:$8 sps:$4 sm:$0xff]   ;;  %v6602_v40 = vpack.c.bf16 %v6598_v53, %v6561_v15 }
 0x5a0   : > { %7692 = vmatmul.mubr.bf16.gmra.mxu1 %v6575_v0  ;;  %v6589_v13 = vpack.c.bf16 %v6585_v21, %v6549_v33  ;;  %v13253_v7 = vld [vmem:[%s17776_s6 + $0x410] ss:$8 sps:$4 sm:$0xff]  }
 0x5a1   : > { %7638 = vmatprep.mubr.bf16.mxu0 %v6565_v35  ;;  %7800 = vmatpush1.bf16.msra.mxu1 %v13235_v20  ;;  %v17837_v33 = vld [vmem:[#allocation18_spill] sm:$0xff]  ;;  %v13281_v35 = vld [vmem:[#allocation4 + $0xd0] sm:$0xff]  }
 0x5a2   : > { %7639 = vmatmul.mubr.bf16.gmra.mxu0 %v6553_v41  ;;  %7701 = vmatprep.mubr.bf16.mxu1 %v6588_v12  ;;  %v6775_v15 = vsub.s32 0, %v17837_v33  ;;  %v6779_v12 = vsub.s32 1, %v17837_v33 }
 0x5a3   : > { %7754 = vmatprep.mubr.bf16.mxu0 %v16725_v43  ;;  %7801 = vmatprep.subr.bf16.mxu1 %v13243_v60  ;;  %v6599_v43 = vpack.c.bf16 %v16716_v50, %v6591_v31  ;;  %v13258_v50 = vld [vmem:[%s17776_s6 + $0x404] ss:$8 sps:$4 sm:$0xff]   ;;  %v6771_v60 = vld [vmem:[%s17777_s7] sm:$0x3] }
 0x5a4   : > { %v17027_v31 = vrot.slane %v6771_v60, %v6779_v12 }
 0x5a5   : > { %7802 = vmatpush1.bf16.msra.mxu1 %v13241_v27  ;;  %v13283_v27 = vld [vmem:[#allocation4 + $0x48] sm:$0xff]  }
 0x5a6   : > { %7803 = vmatprep.subr.bf16.mxu1 %v13249_v44 }
 0x5a8   : > { %7702 = vmatmul.mubr.bf16.gmra.mxu1 %v6576_v16 }
 0x5a9   : > { %7804 = vmatpush1.bf16.msra.mxu1 %v13247_v28  ;;  %7711 = vmatprep.mubr.bf16.mxu1 %v6589_v13  ;;  %v17023_v28 = vrot.slane %v6771_v60, %v6775_v15 }
 0x5aa   : > { %7755 = vmatmul.mubr.bf16.vlgmr.msra.gmra.mxu0 %v6599_v43  ;;  %7805 = vmatprep.subr.bf16.mxu1 %v13252_v8 }
 0x5ab   : > { %7764 = vmatprep.mubr.bf16.mxu0 %v16888_v48  ;;  %v13551_v48 = vld [vmem:[#allocation3] sm:$0xff] }
 0x5ac   : > { %v6614_v47 = vpack.c.bf16 %v13551_v48, %v16921_v51  ;;  %v13278_v51 = vld [vmem:[#allocation4 + $0x98] sm:$0xff]  }
 0x5ad   : > { %7806 = vmatpush1.bf16.msra.mxu1 %v13250_v63 }
 0x5ae   : > { %7807 = vmatprep.subr.bf16.mxu1 %v13255_v34 }
 0x5b0   : > { %7712 = vmatmul.mubr.bf16.gmra.mxu1 %v6577_v18  ;;  %v13280_v18 = vld [vmem:[#allocation4 + $0x10] sm:$0xff]  }
 0x5b1   : > { %7808 = vmatpush1.bf16.msra.mxu1 %v13253_v7  ;;  %7827 = vmatprep.mubr.bf16.mxu1 %v17836_v39 }
 0x5b2   : > { %7765 = vmatmul.mubr.bf16.gmra.mxu0 %v16895_v19  ;;  %7809 = vmatprep.subr.bf16.mxu1 %v13258_v50  ;;  %v6622_v19 = vld [vmem:[#allocation3 + $0xe1] sm:$0xff] }
 0x5b3   : > { %7774 = vmatprep.mubr.bf16.mxu0 %v16905_v58  ;;  %v13259_v58 = vld [vmem:[#allocation4 + $0x78] sm:$0xff]  }
 0x5b5   : > { %7810 = vmatpush1.bf16.msra.mxu1 %v13256_v42 }
 0x5b6   : > { %12556 = vmatprep.subr.bf16.mxu1 %v13259_v58  ;;  %v13285_v58 = vld [vmem:[#allocation4 + $0xc8] sm:$0xff]  }
 0x5b8   : > { %7828 = vmatmul.mubr.bf16.vlgmr.msra.gmra.mxu1 %v16771_v5  ;;  %v6626_v5 = vpack.c.bf16 %v6622_v19, %v6585_v21  ;;  %v13284_v21 = vld [vmem:[#allocation4 + $0x8] sm:$0xff]  }
 0x5b9   : > { %7837 = vmatprep.mubr.bf16.mxu1 %v17836_v39  ;;  %12557 = vmatpush3.bf16.msra.mxu1 %v13260_v25 }
 0x5ba   : > { %7775 = vmatmul.mubr.bf16.gmra.mxu0 %v16909_v36  ;;  %v13262_v36 = vld [vmem:[#allocation4 + $0xb8] sm:$0xff]   ;;  %12558 = vmatprep.subr.bf16.mxu1 %v13263_v32  ;;  %v13287_v32 = vld [vmem:[#allocation4 + $0x40] sm:$0xff]  }
 0x5bb   : > { %7784 = vmatprep.mubr.bf16.mxu0 %v6614_v47  ;;  %12579 = vmatpush3.bf16.msra.mxu0 %v13262_v36 }
 0x5bd   : > { %12559 = vmatpush3.bf16.msra.mxu1 %v13264_v26 }
 0x5be   : > { %12560 = vmatprep.subr.bf16.mxu1 %v13267_v38 }
 0x5c0   : > { %7838 = vmatmul.mubr.bf16.gmra.mxu1 %v16898_v17  ;;  %v13265_v17 = vld [vmem:[#allocation4 + $0xf0] sm:$0xff]  }
 0x5c1   : > { %7847 = vmatprep.mubr.bf16.mxu1 %v17836_v39  ;;  %12580 = vmatprep.subr.bf16.mxu0 %v13265_v17  ;;  %v13288_v17 = vld [vmem:[#allocation4] sm:$0xff]  }
 0x5c2   : > { %7785 = vmatmul.mubr.bf16.gmra.mxu0 %v6602_v40  ;;  %12561 = vmatpush3.bf16.msra.mxu1 %v13268_v4  ;;  %v13290_v4 = vld [vmem:[#allocation4 + $0x80] sm:$0xff]  }
 0x5c3   : > { %12581 = vmatpush3.bf16.msra.mxu0 %v13266_v52  ;;  %12562 = vmatprep.subr.bf16.mxu1 %v13271_v14  ;;  %v13289_v52 = vld [vmem:[#allocation4 + $0xc0] sm:$0xff]  }
 0x5c4   : > { %12582 = vmatprep.subr.bf16.mxu0 %v13269_v61 }
 0x5c6   : > { %12563 = vmatpush3.bf16.msra.mxu1 %v13272_v23 }
 0x5c7   : > { %12583 = vmatpush3.bf16.msra.mxu0 %v13270_v6  ;;  %12564 = vmatprep.subr.bf16.mxu1 %v13275_v2 }
 0x5c8   : > { %7848 = vmatmul.mubr.bf16.gmra.mxu1 %v6553_v41  ;;  %12584 = vmatprep.subr.bf16.mxu0 %v13273_v24  ;;  %v13282_v41 = vld [vmem:[#allocation4 + $0x90] sm:$0xff]  }
 0x5c9   : > { %7857 = vmatprep.mubr.bf16.mxu1 %v17836_v39 }
 0x5ca   : > { %12565 = vmatpush3.bf16.msra.mxu1 %v13276_v3 }
 0x5cb   : > { %12585 = vmatpush3.bf16.msra.mxu0 %v13274_v62  ;;  %12566 = vmatprep.subr.bf16.mxu1 %v13279_v9 }
 0x5cc   : > { %12586 = vmatprep.subr.bf16.mxu0 %v13277_v54 }
 0x5ce   : > { %12567 = vmatpush3.bf16.msra.mxu1 %v13280_v18 }
 0x5cf   : > { %12587 = vmatpush3.bf16.msra.mxu0 %v13278_v51  ;;  %12568 = vmatprep.subr.bf16.mxu1 %v13283_v27 }
 0x5d0   : > { %7858 = vmatmul.mubr.bf16.gmra.mxu1 %v6626_v5  ;;  %12588 = vmatprep.subr.bf16.mxu0 %v13281_v35 }
 0x5d2   : > { %12569 = vmatpush3.bf16.msra.mxu1 %v13284_v21 }
 0x5d3   : > { %12589 = vmatpush3.bf16.msra.mxu0 %v13282_v41  ;;  %12570 = vmatprep.subr.bf16.mxu1 %v13287_v32 }
 0x5d4   : > { %12590 = vmatprep.subr.bf16.mxu0 %v13285_v58 }
 0x5d6   : > { %12571 = vmatpush3.bf16.msra.mxu1 %v13288_v17 }
 0x5d7   : > { %12591 = vmatpush3.bf16.msra.mxu0 %v13286_v46 }
 0x5d8   : > { %12592 = vmatprep.subr.bf16.mxu0 %v13289_v52 }
 0x5db   : > { %12593 = vmatpush3.bf16.msra.mxu0 %v13290_v4 }
 0x5e4   : > { %v16988_v10 = vpop.f32.mrf.mxu1 }
 0x5e6   : > { %v16992_v55 = vpop.f32.mrf.mxu1 }
 0x5e7   : > { %v7540_v17 = vadd.f32 %v16992_v55, %v17027_v31 }
 0x5e8   : > { %v16996_v59 = vpop.f32.mrf.mxu1 }
 0x5ea   : > { %v17000_v56 = vpop.f32.mrf.mxu1 }
 0x5fa   : > { %v16990_v11 = vpop.f32.mrf.mxu0 }
 0x5fc   : > { %v16994_v29 = vpop.f32.mrf.mxu0 }
 0x5fd   : > { %v7613_v4 = vadd.f32 %v16994_v29, %v7540_v17 }
 0x5fe   : > { %v16998_v22 = vpop.f32.mrf.mxu0 }
 0x600   : > { %v17002_v49 = vpop.f32.mrf.mxu0 }
 0x61d   : > { %v17004_v30 = vpop.f32.mrf.mxu1 }
 0x61f   : > { %v17006_v1 = vpop.f32.mrf.mxu0  ;;  %v17008_v37 = vpop.f32.mrf.mxu1 }
 0x621   : > { %v17010_v20 = vpop.f32.mrf.mxu0  ;;  %v17012_v45 = vpop.f32.mrf.mxu1 }
 0x623   : > { %v17015_v0 = vpop.f32.mrf.mxu0  ;;  %v17021_v44 = vpop.f32.mrf.mxu1 }
 0x625   : > { %v17025_v16 = vpop.f32.mrf.mxu0 }
 0x648   : > { %v7557_v8 = vpop.f32.mrf.mxu1 }
 0x649   : > { %v7558_v13 = vadd.f32 %v7557_v8, %v17023_v28 }
 0x64a   : > { %v7630_v43 = vpop.f32.mrf.mxu0  ;;  %v7559_v63 = vpop.f32.mrf.mxu1 }
 0x64b   : > { %v7560_v34 = vadd.f32 %v7559_v63, %v17027_v31  ;;  %v7631_v7 = vadd.f32 %v7630_v43, %v7558_v13 }
 0x64c   : > { %v7632_v50 = vpop.f32.mrf.mxu0  ;;  %v7561_v42 = vpop.f32.mrf.mxu1 }
 0x64d   : > { %v7562_v39 = vadd.f32 %v7561_v42, %v17023_v28  ;;  %v7633_v48 = vadd.f32 %v7632_v50, %v7560_v34  ;;  %v13291_v50 = vld [vmem:[#allocation4 + $0x178] sm:$0xff]  }
 0x64e   : > { %v7634_v47 = vpop.f32.mrf.mxu0  ;;  %v7563_v53 = vpop.f32.mrf.mxu1  ;;  %12600 = vmatprep.subr.bf16.mxu1 %v13291_v50 }
 0x64f   : > { %v7564_v40 = vadd.f32 %v7563_v53, %v17027_v31  ;;  %v7635_v19 = vadd.f32 %v7634_v47, %v7562_v39 }
 0x650   : > { %v7636_v5 = vpop.f32.mrf.mxu0  ;;  %v7567_v25 = vpop.f32.mrf.mxu1 }
 0x651   : > { %v7637_v36 = vadd.f32 %v7636_v5, %v7564_v40  ;;  %v7568_v2 = vadd.f32 %v7567_v25, %v17023_v28 }
 0x652   : > { %v7569_v26 = vpop.f32.mrf.mxu1 }
 0x653   : > { %v7570_v51 = vadd.f32 %v7569_v26, %v17027_v31 }
 0x654   : > { %v7571_v38 = vpop.f32.mrf.mxu1 }
 0x655   : > { %v7572_v15 = vadd.f32 %v7571_v38, %v17023_v28 }
 0x656   : > { %v7573_v61 = vpop.f32.mrf.mxu1 }
 0x657   : > { %v7574_v12 = vadd.f32 %v7573_v61, %v17027_v31 }
 0x658   : > { %v7683_v6 = vpop.f32.mrf.mxu1 }
 0x65a   : > { %v7685_v14 = vpop.f32.mrf.mxu1 }
 0x65b   : > { %v7686_v55 = vadd.f32 %v7685_v14, %v7613_v4 }
 0x65c   : > { %v7687_v23 = vpop.f32.mrf.mxu1 }
 0x65e   : > { %v17033_v24 = vpop.f32.mrf.mxu1 }
 0x660   : > { %v17035_v62 = vpop.f32.mrf.mxu1 }
 0x662   : > { %v7640_v3 = vpop.f32.mrf.mxu0  ;;  %v17038_v54 = vpop.f32.mrf.mxu1 }
 0x663   : > { %v7641_v9 = vadd.f32 %v7640_v3, %v7568_v2  ;;  %v7542_v3 = vadd.f32 %v16996_v59, %v17023_v28 }
 0x664   : > { %v7642_v18 = vpop.f32.mrf.mxu0  ;;  %v17041_v33 = vpop.f32.mrf.mxu1 }
 0x665   : > { %v7643_v35 = vadd.f32 %v7642_v18, %v7570_v51  ;;  %v7615_v29 = vadd.f32 %v16998_v22, %v7542_v3 }
 0x666   : > { %v7644_v60 = vpop.f32.mrf.mxu0  ;;  %v17044_v41 = vpop.f32.mrf.mxu1 }
 0x667   : > { %v7645_v27 = vadd.f32 %v7644_v60, %v7572_v15  ;;  %v7544_v15 = vadd.f32 %v17000_v56, %v17027_v31  ;;  %v7688_v59 = vadd.f32 %v7687_v23, %v7615_v29 }
 0x668   : > { %v7646_v21 = vpop.f32.mrf.mxu0  ;;  %v7703_v8 = vpop.f32.mrf.mxu1 }
 0x669   : > { %v7647_v13 = vadd.f32 %v7646_v21, %v7574_v12  ;;  %v17047_v43 = vadd.f32 %v7703_v8, %v7631_v7  ;;  %v7538_v7 = vadd.f32 %v16988_v10, %v17023_v28  ;;  %v13293_v10 = vld [vmem:[#allocation4 + $0x1f8] sm:$0xff]  }
 0x66a   : > { %v7756_v63 = vpop.f32.mrf.mxu0  ;;  %v7705_v34 = vpop.f32.mrf.mxu1  ;;  %12622 = vmatprep.subr.bf16.mxu0 %v13293_v10 }
 0x66b   : > { %v17049_v42 = vadd.f32 %v7705_v34, %v7633_v48 }
 0x66c   : > { %v7758_v39 = vpop.f32.mrf.mxu0  ;;  %v7707_v47 = vpop.f32.mrf.mxu1 }
 0x66d   : > { %v17051_v53 = vadd.f32 %v7707_v47, %v7635_v19  ;;  %v7611_v19 = vadd.f32 %v16990_v11, %v7538_v7  ;;  %v7759_v60 = vadd.f32 %v7758_v39, %v7686_v55  ;;  %v7548_v39 = vadd.f32 %v17004_v30, %v17023_v28 }
 0x66e   : > { %v7760_v40 = vpop.f32.mrf.mxu0  ;;  %v7709_v5 = vpop.f32.mrf.mxu1 }
 0x66f   : > { %v17053_v58 = vadd.f32 %v7709_v5, %v7637_v36  ;;  %v7684_v61 = vadd.f32 %v7683_v6, %v7611_v19  ;;  %v7554_v19 = vadd.f32 %v17021_v44, %v17027_v31 }
 0x670   : > { %v7762_v25 = vpop.f32.mrf.mxu0  ;;  %v7713_v46 = vpop.f32.mrf.mxu1 }
 0x671   : > { %v17057_v32 = vadd.f32 %v7713_v46, %v7641_v9  ;;  %v7757_v18 = vadd.f32 %v7756_v63, %v7684_v61 }
 0x672   : > { %v17059_v26 = vpop.f32.mrf.mxu0  ;;  %v7715_v48 = vpop.f32.mrf.mxu1 }
 0x673   : > { %v17064_v52 = vadd.f32 %v7715_v48, %v7643_v35 }
 0x674   : > { %v17066_v38 = vpop.f32.mrf.mxu0  ;;  %v7717_v36 = vpop.f32.mrf.mxu1 }
 0x675   : > { %v17069_v2 = vadd.f32 %v7717_v36, %v7645_v27  ;;  %v7617_v27 = vadd.f32 %v17002_v49, %v7544_v15  ;;  %v7550_v49 = vadd.f32 %v17008_v37, %v17027_v31 }
 0x676   : > { %v17073_v51 = vpop.f32.mrf.mxu0  ;;  %v7719_v9 = vpop.f32.mrf.mxu1 }
 0x677   : > { %v17075_v11 = vadd.f32 %v7719_v9, %v7647_v13  ;;  %v7690_v14 = vadd.f32 %v17033_v24, %v7617_v27  ;;  %v7761_v13 = vadd.f32 %v7760_v40, %v7688_v59  ;;  %v7552_v24 = vadd.f32 %v17012_v45, %v17023_v28 }
 0x678   : > { %v7772_v6 = vpop.f32.mrf.mxu0  ;;  %v7829_v35 = vpop.f32.mrf.mxu1  ;;  %v7621_v40 = vadd.f32 %v17006_v1, %v7548_v39  ;;  %v7623_v30 = vadd.f32 %v17010_v20, %v7550_v49  ;;  %v7627_v28 = vadd.f32 %v17025_v16, %v7554_v19 }
 0x679   : > { %v7830_v12 = vadd.f32 %v7829_v35, %v7757_v18  ;;  %v7763_v5 = vadd.f32 %v7762_v25, %v7690_v14  ;;  %v7625_v1 = vadd.f32 %v17015_v0, %v7552_v24 }
 0x67a   : > { %v7776_v21 = vpop.f32.mrf.mxu0  ;;  %v7831_v8 = vpop.f32.mrf.mxu1  ;;  %v7694_v18 = vadd.f32 %v17035_v62, %v7621_v40  ;;  %v7696_v44 = vadd.f32 %v17038_v54, %v7623_v30  ;;  %v7700_v62 = vadd.f32 %v17044_v41, %v7627_v28 }
 0x67b   : > { %v7832_v34 = vadd.f32 %v7831_v8, %v7759_v60  ;;  %v7868_v50 = vmax.f32 %v7830_v12, 0.0  ;;  %v7698_v15 = vadd.f32 %v17041_v33, %v7625_v1 }
 0x67c   : > { %v7833_v63 = vpop.f32.mrf.mxu1  ;;  %v7778_v56 = vpop.f32.mrf.mxu0  ;;  %v7767_v54 = vadd.f32 %v17059_v26, %v7694_v18  ;;  %v7769_v59 = vadd.f32 %v17066_v38, %v7696_v44  ;;  %v7773_v14 = vadd.f32 %v7772_v6, %v7700_v62 }
 0x67d   : > { %v7869_v47 = vmax.f32 %v7832_v34, 0.0  ;;  %v7834_v46 = vadd.f32 %v7833_v63, %v7761_v13  ;;  %v7771_v34 = vadd.f32 %v17073_v51, %v7698_v15  ;;  %v17126_v51 = vadd.f32 %v7778_v56, %v17049_v42 }
 0x67e   : > { %v7835_v22 = vpop.f32.mrf.mxu1  ;;  %v7780_v36 = vpop.f32.mrf.mxu0 }
 0x67f   : > { %v7900_v7 = vcombine.low %v7868_v50, %v7869_v47  ;;  %v7901_v48 = vcombine.high %v7868_v50, %v7869_v47  ;;  %v7836_v23 = vadd.f32 %v7835_v22, %v7763_v5  ;;  %v7870_v4 = vmax.f32 %v7834_v46, 0.0 }
 0x680   : > { %v7782_v35 = vpop.f32.mrf.mxu0  ;;  %v7839_v60 = vpop.f32.mrf.mxu1  ;;  %v17122_v46 = vadd.f32 %v7776_v21, %v17047_v43 }
 0x681   : > { %v7908_v17 = vrot.slane %v7900_v7, %v15951_v57  ;;  %v7915_v25 = vrot.slane %v7901_v48, %v15951_v57  ;;  %v7871_v61 = vmax.f32 %v7836_v23, 0.0  ;;  %v17119_v63 = vadd.f32 %v7839_v60, %v7767_v54 }
 0x682   : > { %v7786_v5 = vpop.f32.mrf.mxu0  ;;  %v17129_v48 = vadd.f32 %v7780_v36, %v17051_v53  ;;  %v7841_v49 = vpop.f32.mrf.mxu1  ;;  %v17132_v23 = vadd.f32 %v7782_v35, %v17053_v58 }
 0x683   : > { %v7916_v10 = vcombine.high %v7908_v17, %v7908_v17  ;;  %v7917_v37 = vcombine.high %v7915_v25, %v7915_v25  ;;  %v8050_v3 = vrot.slane %v7908_v17, %v15951_v57  ;;  %v8066_v45 = vrot.slane %v7915_v25, %v15951_v57 }
 0x684   : > { %v7918_v9 = vcombine.low %v7870_v4, %v7871_v61  ;;  %v7919_v55 = vcombine.high %v7870_v4, %v7871_v61  ;;  %v17139_v21 = vadd.f32 %v7786_v5, %v17057_v32  ;;  %v7872_v53 = vmax.f32 %v17119_v63, 0.0  ;;  %v7843_v61 = vpop.f32.mrf.mxu1 }
 0x685   : > { %v17101_v20 = vrot.slane %v7916_v10, %v15951_v57  ;;  %v17104_v31 = vrot.slane %v7917_v37, %v15951_v57  ;;  %v8364_v29 = vsel %vm5383_vm1, %v8050_v3, -inf  ;;  %v8392_v0 = vsel %vm5383_vm1, %v8066_v45, -inf }
 0x686   : > { %v7926_v16 = vrot.slane %v7918_v9, %v15951_v57  ;;  %v8365_v12 = vrot.slane %v8364_v29, 4  ;;  %v7933_v27 = vrot.slane %v7919_v55, %v15951_v57  ;;  %v8393_v8 = vrot.slane %v8392_v0, 4  ;;  %v7845_v62 = vpop.f32.mrf.mxu1 }
 0x687   : > { %v8378_v33 = vsel %vm5383_vm1, %v17101_v20, -inf  ;;  %v8406_v13 = vsel %vm5383_vm1, %v17104_v31, -inf  ;;  %v8051_v41 = vcombine.high %v8050_v3, %v8050_v3  ;;  %v8067_v6 = vcombine.high %v8066_v45, %v8066_v45 }
 0x688   : > { %v8366_v50 = vmax.f32 %v8364_v29, %v8365_v12  ;;  %v8379_v26 = vrot.slane %v8378_v33, 4  ;;  %v7934_v47 = vcombine.high %v7926_v16, %v7926_v16  ;;  %v8394_v38 = vmax.f32 %v8392_v0, %v8393_v8 }
 0x689   : > { %v7935_v22 = vcombine.high %v7933_v27, %v7933_v27  ;;  %v8082_v39 = vrot.slane %v7926_v16, %v15951_v57  ;;  %v8407_v7 = vrot.slane %v8406_v13, 4  ;;  %v8098_v43 = vrot.slane %v7933_v27, %v15951_v57 }
 0x68a   : > { %v17135_v24 = vrot.slane %v7934_v47, %v15951_v57  ;;  %v8367_v40 = vrot.slane %v8366_v50, 2  ;;  %v17142_v42 = vsel %vm5383_vm1, %v8051_v41, -inf  ;;  %v8380_v56 = vmax.f32 %v8378_v33, %v8379_v26 }
 0x68b   : > { %v8395_v58 = vrot.slane %v8394_v38, 2  ;;  %v17148_v25 = vrot.slane %v7935_v22, %v15951_v57  ;;  %v8420_v19 = vsel %vm5383_vm1, %v8082_v39, -inf  ;;  %v17154_v30 = vsel %vm5383_vm1, %v8067_v6, -inf }
 0x68c   : > { %v8408_v36 = vmax.f32 %v8406_v13, %v8407_v7  ;;  %v8421_v4 = vrot.slane %v8420_v19, 4  ;;  %v8083_v37 = vcombine.high %v8082_v39, %v8082_v39  ;;  %v8434_v3 = vsel %vm5383_vm1, %v17135_v24, -inf }
 0x68d   : > { %v8448_v45 = vsel %vm5383_vm1, %v8098_v43, -inf  ;;  %v8368_v1 = vmax.f32 %v8366_v50, %v8367_v40  ;;  %v8381_v28 = vrot.slane %v8380_v56, 2  ;;  %v8435_v55 = vrot.slane %v8434_v3, 4 }
 0x68e   : > { %v8422_v9 = vmax.f32 %v8420_v19, %v8421_v4  ;;  %v8396_v18 = vmax.f32 %v8394_v38, %v8395_v58  ;;  %v8449_v15 = vrot.slane %v8448_v45, 4  ;;  %v8462_v29 = vsel %vm5383_vm1, %v17148_v25, -inf }
 0x68f   : > { %v8409_v0 = vrot.slane %v8408_v36, 2  ;;  %v8099_v35 = vcombine.high %v8098_v43, %v8098_v43  ;;  %v8436_v60 = vmax.f32 %v8434_v3, %v8435_v55  ;;  %v17168_v27 = vsel %vm5383_vm1, %v8083_v37, -inf }
 0x690   : > { %v8423_v16 = vrot.slane %v8422_v9, 2  ;;  %v7842_v33 = vadd.f32 %v7841_v49, %v7769_v59  ;;  %v8369_v8 = vrot.slane %v8368_v1, 1  ;;  %v8382_v13 = vmax.f32 %v8380_v56, %v8381_v28  ;;  %v7788_v56 = vpop.f32.mrf.mxu0 }
 0x691   : > { %v8463_v63 = vrot.slane %v8462_v29, 4  ;;  %v7844_v41 = vadd.f32 %v7843_v61, %v7771_v34  ;;  %v8397_v50 = vrot.slane %v8396_v18, 1  ;;  %v8450_v26 = vmax.f32 %v8448_v45, %v8449_v15 }
 0x692   : > { %v7873_v47 = vmax.f32 %v7842_v33, 0.0  ;;  %v7846_v5 = vadd.f32 %v7845_v62, %v7773_v14  ;;  %v17170_v38 = vmax.f32 %v8408_v36, %v8409_v0  ;;  %v8424_v22 = vmax.f32 %v8422_v9, %v8423_v16 }
 0x693   : > { %v8437_v6 = vrot.slane %v8436_v60, 2  ;;  %v7874_v40 = vmax.f32 %v7844_v41, 0.0  ;;  %v8370_v19 = vmax.f32 %v8368_v1, %v8369_v8  ;;  %v8383_v59 = vrot.slane %v8382_v13, 1 }
 0x694   : > { %17838 = vst [vmem:[#allocation14_spill] sm:$0xff] %v17170_v38  ;;  %v7936_v7 = vcombine.low %v7872_v53, %v7873_v47  ;;  %v7937_v43 = vcombine.high %v7872_v53, %v7873_v47  ;;  %v7875_v58 = vmax.f32 %v7846_v5, 0.0  ;;  %v17174_v49 = vsel %vm5383_vm1, %v8099_v35, -inf  ;;  %v7790_v35 = vpop.f32.mrf.mxu0 }
 0x695   : > { %v8464_v34 = vmax.f32 %v8462_v29, %v8463_v63  ;;  %v8451_v4 = vrot.slane %v8450_v26, 2  ;;  %v17178_v37 = vmax.f32 %v8396_v18, %v8397_v50  ;;  %v8425_v53 = vrot.slane %v8424_v22, 1  ;;  %v7849_v50 = vpop.f32.mrf.mxu1 }
 0x696   : > { %v7944_v14 = vrot.slane %v7936_v7, %v15951_v57  ;;  %v7951_v36 = vrot.slane %v7937_v43, %v15951_v57  ;;  %v7954_v61 = vcombine.low %v7874_v40, %v7875_v58  ;;  %v7955_v45 = vcombine.high %v7874_v40, %v7875_v58  ;;  %v7792_v58 = vpop.f32.mrf.mxu0 }
 0x697   : > { %v8438_v28 = vmax.f32 %v8436_v60, %v8437_v6  ;;  %v17182_v15 = vmax.f32 %v8382_v13, %v8383_v59  ;;  %v8452_v18 = vmax.f32 %v8450_v26, %v8451_v4  ;;  %v8465_v62 = vrot.slane %v8464_v34, 2 }
 0x698   : > { %v7952_v1 = vcombine.high %v7944_v14, %v7944_v14  ;;  %v7953_v9 = vcombine.high %v7951_v36, %v7951_v36  ;;  %v8114_v55 = vrot.slane %v7944_v14, %v15951_v57  ;;  %v8130_v0 = vrot.slane %v7951_v36, %v15951_v57 }
 0x699   : > { %v7962_v16 = vrot.slane %v7954_v61, %v15951_v57  ;;  %v8426_v8 = vmax.f32 %v8424_v22, %v8425_v53  ;;  %v8439_v47 = vrot.slane %v8438_v28, 1  ;;  %v17196_v5 = vadd.f32 %v7788_v56, %v17064_v52 }
 0x69a   : > { %v17188_v33 = vrot.slane %v7952_v1, %v15951_v57  ;;  %v8476_v60 = vsel %vm5383_vm1, %v8114_v55, -inf  ;;  %v17192_v63 = vrot.slane %v7953_v9, %v15951_v57  ;;  %v8504_v41 = vsel %vm5383_vm1, %v8130_v0, -inf  ;;  %v7851_v1 = vpop.f32.mrf.mxu1 }
 0x69b   : > { %v8477_v13 = vrot.slane %v8476_v60, 4  ;;  %v7970_v6 = vcombine.high %v7962_v16, %v7962_v16  ;;  %v8505_v40 = vrot.slane %v8504_v41, 4  ;;  %v7969_v22 = vrot.slane %v7955_v45, %v15951_v57 }
 0x69c   : > { %v8490_v26 = vsel %vm5383_vm1, %v17188_v33, -inf  ;;  %v8453_v59 = vrot.slane %v8452_v18, 1  ;;  %v17201_v4 = vmax.f32 %v8464_v34, %v8465_v62  ;;  %v17204_v14 = vadd.f32 %v7790_v35, %v17069_v2 }
 0x69d   : > { %v8478_v7 = vmax.f32 %v8476_v60, %v8477_v13  ;;  %v8491_v43 = vrot.slane %v8490_v26, 4  ;;  %v8146_v36 = vrot.slane %v7962_v16, %v15951_v57  ;;  %v17207_v52 = vmax.f32 %v8370_v19, %v8426_v8 }
 0x69e   : > { %17839 = vst [vmem:[#allocation16_spill] sm:$0xff] %v17201_v4  ;;  %v8115_v56 = vcombine.high %v8114_v55, %v8114_v55  ;;  %v8131_v61 = vcombine.high %v8130_v0, %v8130_v0  ;;  %v8518_v53 = vsel %vm5383_vm1, %v17192_v63, -inf  ;;  %v8506_v60 = vmax.f32 %v8504_v41, %v8505_v40 }
 0x69f   : > { %v8479_v9 = vrot.slane %v8478_v7, 2  ;;  %v17212_v45 = vadd.f32 %v7792_v58, %v17075_v11  ;;  %v17215_v34 = vrot.slane %v7970_v6, %v15951_v57  ;;  %v17217_v2 = vmax.f32 %v8438_v28, %v8439_v47  ;;  %v7853_v47 = vpop.f32.mrf.mxu1 }
 0x6a0   : > { %v8492_v35 = vmax.f32 %v8490_v26, %v8491_v43  ;;  %v7971_v16 = vcombine.high %v7969_v22, %v7969_v22  ;;  %v7850_v19 = vadd.f32 %v7849_v50, %v17122_v46  ;;  %v8519_v0 = vrot.slane %v8518_v53, 4 }
 0x6a1   : > { %v8162_v62 = vrot.slane %v7969_v22, %v15951_v57  ;;  %v8532_v8 = vsel %vm5383_vm1, %v8146_v36, -inf  ;;  %v17223_v13 = vmax.f32 %v8452_v18, %v8453_v59  ;;  %v17228_v41 = vsel %vm5383_vm1, %v8115_v56, -inf  ;;  %v7855_v11 = vpop.f32.mrf.mxu1 }
 0x6a2   : > { %v17231_v28 = vsel %vm5383_vm1, %v8131_v61, -inf  ;;  %v8480_v46 = vmax.f32 %v8478_v7, %v8479_v9  ;;  %v8507_v50 = vrot.slane %v8506_v60, 2  ;;  %v8533_v26 = vrot.slane %v8532_v8, 4 }
 0x6a3   : > { %v8546_v6 = vsel %vm5383_vm1, %v17215_v34, -inf  ;;  %v8493_v40 = vrot.slane %v8492_v35, 2  ;;  %v17240_v58 = vrot.slane %v7971_v16, %v15951_v57  ;;  %v8520_v59 = vmax.f32 %v8518_v53, %v8519_v0 }
 0x6a4   : > { %v8534_v56 = vmax.f32 %v8532_v8, %v8533_v26  ;;  %v8560_v7 = vsel %vm5383_vm1, %v8162_v62, -inf  ;;  %v8147_v9 = vcombine.high %v8146_v36, %v8146_v36  ;;  %v8547_v55 = vrot.slane %v8546_v6, 4 }
 0x6a5   : > { %v8561_v3 = vrot.slane %v8560_v7, 4  ;;  %v8481_v18 = vrot.slane %v8480_v46, 1  ;;  %v8508_v12 = vmax.f32 %v8506_v60, %v8507_v50  ;;  %v8163_v32 = vcombine.high %v8162_v62, %v8162_v62 }
 0x6a6   : > { %v17247_v16 = vmax.f32 %v8492_v35, %v8493_v40  ;;  %v8574_v0 = vsel %vm5383_vm1, %v17240_v58, -inf  ;;  %v7852_v8 = vadd.f32 %v7851_v1, %v17126_v51  ;;  %v8521_v36 = vrot.slane %v8520_v59, 2 }
 0x6a7   : > { %v8535_v26 = vrot.slane %v8534_v56, 2  ;;  %v7854_v61 = vadd.f32 %v7853_v47, %v17129_v48  ;;  %v7856_v60 = vadd.f32 %v7855_v11, %v17132_v23  ;;  %v8548_v50 = vmax.f32 %v8546_v6, %v8547_v55  ;;  %v7859_v6 = vpop.f32.mrf.mxu1 }
 0x6a8   : > { %v8562_v22 = vmax.f32 %v8560_v7, %v8561_v3  ;;  %v7876_v43 = vmax.f32 %v7850_v19, 0.0  ;;  %v7877_v62 = vmax.f32 %v7852_v8, 0.0  ;;  %v8509_v35 = vrot.slane %v8508_v12, 1 }
 0x6a9   : > { %v8575_v40 = vrot.slane %v8574_v0, 4  ;;  %v7878_v29 = vmax.f32 %v7854_v61, 0.0  ;;  %v7879_v44 = vmax.f32 %v7856_v60, 0.0  ;;  %v17256_v53 = vmax.f32 %v8480_v46, %v8481_v18 }
 0x6aa   : > { %v17259_v54 = vsel %vm5383_vm1, %v8147_v9, -inf  ;;  %v7972_v51 = vcombine.low %v7876_v43, %v7877_v62  ;;  %v7973_v1 = vcombine.high %v7876_v43, %v7877_v62  ;;  %v17261_v17 = vmax.f32 %v8520_v59, %v8521_v36 }
 0x6ab   : > { %v8536_v48 = vmax.f32 %v8534_v56, %v8535_v26  ;;  %v7990_v47 = vcombine.low %v7878_v29, %v7879_v44  ;;  %v7991_v23 = vcombine.high %v7878_v29, %v7879_v44  ;;  %v8549_v55 = vrot.slane %v8548_v50, 2 }
 0x6ac   : > { %17840 = vst [vmem:[#allocation10_spill] sm:$0xff] %v17261_v17  ;;  %v8563_v3 = vrot.slane %v8562_v22, 2  ;;  %v7980_v19 = vrot.slane %v7972_v51, %v15951_v57  ;;  %v7987_v11 = vrot.slane %v7973_v1, %v15951_v57  ;;  %v17266_v18 = vmax.f32 %v8508_v12, %v8509_v35 }
 0x6ad   : > { %v8576_v61 = vmax.f32 %v8574_v0, %v8575_v40  ;;  %v17270_v43 = vsel %vm5383_vm1, %v8163_v32, -inf  ;;  %v7998_v44 = vrot.slane %v7990_v47, %v15951_v57  ;;  %v17277_v36 = vadd.f32 %v7859_v6, %v17139_v21 }
 0x6ae   : > { %v7988_v59 = vcombine.high %v7980_v19, %v7980_v19  ;;  %v7989_v56 = vcombine.high %v7987_v11, %v7987_v11  ;;  %v8178_v9 = vrot.slane %v7980_v19, %v15951_v57  ;;  %v8194_v8 = vrot.slane %v7987_v11, %v15951_v57 }
 0x6af   : > { %v8537_v12 = vrot.slane %v8536_v48, 1  ;;  %v17279_v26 = vmax.f32 %v8548_v50, %v8549_v55  ;;  %v8564_v0 = vmax.f32 %v8562_v22, %v8563_v3  ;;  %v8577_v60 = vrot.slane %v8576_v61, 2 }
 0x6b0   : > { %v17282_v32 = vrot.slane %v7988_v59, %v15951_v57  ;;  %v17285_v62 = vrot.slane %v7989_v56, %v15951_v57  ;;  %v8588_v35 = vsel %vm5383_vm1, %v8178_v9, -inf  ;;  %v8616_v40 = vsel %vm5383_vm1, %v8194_v8, -inf  ;;  %v7861_v56 = vpop.f32.mrf.mxu1 }
 0x6b1   : > { %v8589_v51 = vrot.slane %v8588_v35, 4  ;;  %v8005_v1 = vrot.slane %v7991_v23, %v15951_v57  ;;  %v8006_v50 = vcombine.high %v7998_v44, %v7998_v44  ;;  %v8617_v55 = vrot.slane %v8616_v40, 4 }
 0x6b2   : > { %17841 = vst [vmem:[#allocation11_spill] sm:$0xff] %v17282_v32  ;;  %17842 = vst [vmem:[#allocation12_spill] sm:$0xff] %v17285_v62  ;;  %v8602_v21 = vsel %vm5383_vm1, %v17282_v32, -inf  ;;  %v8210_v3 = vrot.slane %v7998_v44, %v15951_v57  ;;  %v17294_v19 = vmax.f32 %v8536_v48, %v8537_v12  ;;  %v8179_v11 = vcombine.high %v8178_v9, %v8178_v9 }
 0x6b3   : > { %v8603_v47 = vrot.slane %v8602_v21, 4  ;;  %v8195_v6 = vcombine.high %v8194_v8, %v8194_v8  ;;  %v8590_v59 = vmax.f32 %v8588_v35, %v8589_v51  ;;  %v8565_v46 = vrot.slane %v8564_v0, 1 }
 0x6b4   : > { %v17297_v7 = vmax.f32 %v8576_v61, %v8577_v60  ;;  %v8630_v23 = vsel %vm5383_vm1, %v17285_v62, -inf  ;;  %v8007_v22 = vcombine.high %v8005_v1, %v8005_v1  ;;  %v17302_v10 = vrot.slane %v8006_v50, %v15951_v57  ;;  %v7863_v50 = vpop.f32.mrf.mxu1 }
 0x6b5   : > { %v8604_v39 = vmax.f32 %v8602_v21, %v8603_v47  ;;  %v7880_v48 = vmax.f32 %v17277_v36, 0.0  ;;  %v8618_v44 = vmax.f32 %v8616_v40, %v8617_v55  ;;  %v17306_v9 = vrot.slane %v8005_v1, %v15951_v57 }
 0x6b6   : > { %17843 = vst [vmem:[#allocation13_spill] sm:$0xff] %v17297_v7  ;;  %17844 = vst [vmem:[#allocation15_spill] sm:$0xff] %v17302_v10  ;;  %v8644_v8 = vsel %vm5383_vm1, %v8210_v3, -inf  ;;  %v7862_v12 = vadd.f32 %v7861_v56, %v17196_v5  ;;  %v8591_v61 = vrot.slane %v8590_v59, 2  ;;  %v17311_v60 = vsel %vm5383_vm1, %v8179_v11, -inf  ;;  %v7865_v32 = vpop.f32.mrf.mxu1 }
 0x6b7   : > { %v17314_v35 = vsel %vm5383_vm1, %v8195_v6, -inf  ;;  %v8631_v51 = vrot.slane %v8630_v23, 4  ;;  %v17316_v21 = vmax.f32 %v8564_v0, %v8565_v46  ;;  %v8645_v1 = vrot.slane %v8644_v8, 4 }
 0x6b8   : > { %17845 = vst [vmem:[#allocation17_spill] sm:$0xff] %v17314_v35  ;;  %v8605_v47 = vrot.slane %v8604_v39, 2  ;;  %v17324_v55 = vrot.slane %v8007_v22, %v15951_v57  ;;  %v8658_v11 = vsel %vm5383_vm1, %v17302_v10, -inf  ;;  %v8619_v0 = vrot.slane %v8618_v44, 2 }
 0x6b9   : > { %v8211_v56 = vcombine.high %v8210_v3, %v8210_v3  ;;  %v8592_v36 = vmax.f32 %v8590_v59, %v8591_v61  ;;  %v8632_v40 = vmax.f32 %v8630_v23, %v8631_v51  ;;  %v8227_v29 = vcombine.high %v17306_v9, %v17306_v9 }
 0x6ba   : > { %17846 = vst [vmem:[#allocation18_spill] sm:$0xff] %v17324_v55  ;;  %v8672_v5 = vsel %vm5383_vm1, %v17306_v9, -inf  ;;  %v8646_v62 = vmax.f32 %v8644_v8, %v8645_v1  ;;  %v8659_v4 = vrot.slane %v8658_v11, 4  ;;  %v17336_v46 = vmax.f32 %v8604_v39, %v8605_v47 }
 0x6bb   : > { %v8673_v38 = vrot.slane %v8672_v5, 4  ;;  %v8686_v59 = vsel %vm5383_vm1, %v17324_v55, -inf  ;;  %v7881_v23 = vmax.f32 %v7862_v12, 0.0  ;;  %v8620_v61 = vmax.f32 %v8618_v44, %v8619_v0 }
 0x6bc   : > { %17847 = vst [vmem:[#allocation19_spill] sm:$0xff] %v17336_v46  ;;  %v8687_v6 = vrot.slane %v8686_v59, 4  ;;  %v7864_v9 = vadd.f32 %v7863_v50, %v17204_v14  ;;  %v17344_v22 = vsel %vm5383_vm1, %v8211_v56, -inf  ;;  %v7866_v39 = vadd.f32 %v7865_v32, %v17212_v45 }
 0x6bd   : > { %v8674_v51 = vmax.f32 %v8672_v5, %v8673_v38  ;;  %17848 = vst [vmem:[#allocation20_spill] sm:$0xff] %v17344_v22  ;;  %v8008_v8 = vcombine.low %v7880_v48, %v7881_v23  ;;  %v8009_v1 = vcombine.high %v7880_v48, %v7881_v23  ;;  %v8593_v47 = vrot.slane %v8592_v36, 1 }
 0x6be   : > { %v8633_v35 = vrot.slane %v8632_v40, 2  ;;  %v8647_v10 = vrot.slane %v8646_v62, 2  ;;  %v8660_v3 = vmax.f32 %v8658_v11, %v8659_v4  ;;  %v7883_v38 = vmax.f32 %v7866_v39, 0.0 }
 0x6bf   : > { %v8675_v7 = vrot.slane %v8674_v51, 2  ;;  %v8016_v55 = vrot.slane %v8008_v8, %v15951_v57  ;;  %v8023_v44 = vrot.slane %v8009_v1, %v15951_v57  ;;  %v8621_v12 = vrot.slane %v8620_v61, 1 }
 0x6c0   : > { %v8688_v50 = vmax.f32 %v8686_v59, %v8687_v6  ;;  %v7882_v5 = vmax.f32 %v7864_v9, 0.0  ;;  %v8648_v32 = vmax.f32 %v8646_v62, %v8647_v10  ;;  %v8661_v23 = vrot.slane %v8660_v3, 2 }
 0x6c1   : > { %v8024_v0 = vcombine.high %v8016_v55, %v8016_v55  ;;  %v8025_v56 = vcombine.high %v8023_v44, %v8023_v44  ;;  %v8242_v48 = vrot.slane %v8016_v55, %v15951_v57  ;;  %v8258_v45 = vrot.slane %v8023_v44, %v15951_v57 }
 0x6c2   : > { %v8026_v4 = vcombine.low %v7882_v5, %v7883_v38  ;;  %v8027_v11 = vcombine.high %v7882_v5, %v7883_v38  ;;  %v8676_v17 = vmax.f32 %v8674_v51, %v8675_v7  ;;  %v17359_v6 = vmax.f32 %v8592_v36, %v8593_v47 }
 0x6c3   : > { %v17354_v1 = vrot.slane %v8024_v0, %v15951_v57  ;;  %v17357_v39 = vrot.slane %v8025_v56, %v15951_v57  ;;  %v17361_v59 = vmax.f32 %v8632_v40, %v8633_v35  ;;  %v8700_v55 = vsel %vm5383_vm1, %v8242_v48, -inf }
 0x6c4   : > { %17850 = vst [vmem:[#allocation22_spill] sm:$0xff] %v17359_v6  ;;  %v8728_v10 = vsel %vm5383_vm1, %v8258_v45, -inf  ;;  %v17365_v62 = vmax.f32 %v8620_v61, %v8621_v12  ;;  %v17368_v9 = vsel %vm5383_vm1, %v8227_v29, -inf  ;;  %v8689_v7 = vrot.slane %v8688_v50, 2 }
 0x6c5   : > { %17849 = vst [vmem:[#allocation21_spill] sm:$0xff] %v17357_v39  ;;  %v8701_v51 = vrot.slane %v8700_v55, 4  ;;  %v8649_v44 = vrot.slane %v8648_v32, 1  ;;  %v17370_v38 = vmax.f32 %v8660_v3, %v8661_v23  ;;  %v8714_v36 = vsel %vm5383_vm1, %v17354_v1, -inf }
 0x6c6   : > { %17851 = vst [vmem:[#allocation23_spill] sm:$0xff] %v17365_v62  ;;  %v8729_v47 = vrot.slane %v8728_v10, 4  ;;  %v8677_v35 = vrot.slane %v8676_v17, 1  ;;  %v8715_v5 = vrot.slane %v8714_v36, 4  ;;  %v8742_v0 = vsel %vm5383_vm1, %v17357_v39, -inf }
 0x6c7   : > { %v8702_v40 = vmax.f32 %v8700_v55, %v8701_v51  ;;  %v8743_v12 = vrot.slane %v8742_v0, 4  ;;  %v8034_v29 = vrot.slane %v8026_v4, %v15951_v57  ;;  %v8041_v56 = vrot.slane %v8027_v11, %v15951_v57 }
 0x6c8   : > { %v8730_v61 = vmax.f32 %v8728_v10, %v8729_v47  ;;  %v17378_v8 = vmax.f32 %v8688_v50, %v8689_v7  ;;  %v8243_v3 = vcombine.high %v8242_v48, %v8242_v48  ;;  %v8716_v14 = vmax.f32 %v8714_v36, %v8715_v5 }
 0x6c9   : > { %v8703_v23 = vrot.slane %v8702_v40, 2  ;;  %v8259_v46 = vcombine.high %v8258_v45, %v8258_v45  ;;  %v8744_v55 = vmax.f32 %v8742_v0, %v8743_v12  ;;  %v8042_v22 = vcombine.high %v8034_v29, %v8034_v29 }
 0x6ca   : > { %v8731_v6 = vrot.slane %v8730_v61, 2  ;;  %v8274_v10 = vrot.slane %v8034_v29, %v15951_v57  ;;  %v17852_v47 = vrot.slane %v17142_v42, 4  ;;  %v17386_v11 = vmax.f32 %v8648_v32, %v8649_v44 }
 0x6cb   : > { %v8704_v48 = vmax.f32 %v8702_v40, %v8703_v23  ;;  %v8043_v7 = vcombine.high %v8041_v56, %v8041_v56  ;;  %v17389_v36 = vmax.f32 %v8676_v17, %v8677_v35  ;;  %v17393_v5 = vsel %vm5383_vm1, %v8243_v3, -inf }
 0x6cc   : > { %v8373_v4 = vmax.f32 %v17142_v42, %v17852_v47  ;;  %v8717_v0 = vrot.slane %v8716_v14, 2  ;;  %v8732_v12 = vmax.f32 %v8730_v61, %v8731_v6  ;;  %v17396_v29 = vsel %vm5383_vm1, %v8259_v46, -inf }
 0x6cd   : > { %17853 = vst [vmem:[#allocation24_spill] sm:$0xff] %v17396_v29  ;;  %v8745_v62 = vrot.slane %v8744_v55, 2  ;;  %v8290_v42 = vrot.slane %v8041_v56, %v15951_v57  ;;  %v17400_v32 = vrot.slane %v8042_v22, %v15951_v57  ;;  %v8756_v44 = vsel %vm5383_vm1, %v8274_v10, -inf }
 0x6ce   : > { %v8374_v17 = vrot.slane %v8373_v4, 2  ;;  %v17854_v35 = vrot.slane %v17168_v27, 4  ;;  %v8705_v6 = vrot.slane %v8704_v48, 1  ;;  %v17411_v61 = vrot.slane %v8043_v7, %v15951_v57 }
 0x6cf   : > { %v17414_v56 = vmax.f32 %v8716_v14, %v8717_v0  ;;  %v8275_v47 = vcombine.high %v8274_v10, %v8274_v10  ;;  %v8733_v45 = vrot.slane %v8732_v12, 1  ;;  %v17417_v50 = vmax.f32 %v8744_v55, %v8745_v62 }
 0x6d0   : > { %v8429_v40 = vmax.f32 %v17168_v27, %v17854_v35  ;;  %17855 = vst [vmem:[#allocation25_spill] sm:$0xff] %v17411_v61  ;;  %v8291_v27 = vcombine.high %v8290_v42, %v8290_v42  ;;  %v8757_v35 = vrot.slane %v8756_v44, 4  ;;  %v8375_v46 = vmax.f32 %v8373_v4, %v8374_v17 }
 0x6d1   : > { %17856 = vst [vmem:[#allocation26_spill] sm:$0xff] %v17414_v56  ;;  %17857 = vst [vmem:[#allocation27_spill] sm:$0xff] %v17417_v50  ;;  %v17858_v57 = vcombine.high %v17101_v20, %v17101_v20  ;;  %v17425_v14 = vmax.f32 %v8704_v48, %v8705_v6  ;;  %v8770_v62 = vsel %vm5383_vm1, %v17400_v32, -inf  ;;  %v8784_v0 = vsel %vm5383_vm1, %v8290_v42, -inf }
 0x6d2   : > { %v8430_v51 = vrot.slane %v8429_v40, 2  ;;  %v8376_v23 = vrot.slane %v8375_v46, 1  ;;  %v17860_v4 = vcombine.high %v17135_v24, %v17135_v24  ;;  %v8758_v48 = vmax.f32 %v8756_v44, %v8757_v35 }
 0x6d3   : > { %v8385_v7 = vsel %vm5383_vm1, %v17858_v57, -inf  ;;  %17859 = vst [vmem:[#allocation28_spill] sm:$0xff] %v17425_v14  ;;  %v17438_v6 = vsel %vm5383_vm1, %v8275_v47, -inf  ;;  %v8771_v10 = vrot.slane %v8770_v62, 4  ;;  %v8798_v22 = vsel %vm5383_vm1, %v17411_v61, -inf }
 0x6d4   : > { %v8386_v55 = vrot.slane %v8385_v7, 4  ;;  %v8431_v3 = vmax.f32 %v8429_v40, %v8430_v51  ;;  %v8441_v20 = vsel %vm5383_vm1, %v17860_v4, -inf  ;;  %v17442_v50 = vmax.f32 %v8732_v12, %v8733_v45 }
 0x6d5   : > { %v8442_v42 = vrot.slane %v8441_v20, 4  ;;  %v8785_v51 = vrot.slane %v8784_v0, 4  ;;  %v17445_v24 = vsel %vm5383_vm1, %v8291_v27, -inf  ;;  %v8377_v4 = vmax.f32 %v8375_v46, %v8376_v23 }
 0x6d6   : > { %v8387_v57 = vmax.f32 %v8385_v7, %v8386_v55  ;;  %v8432_v39 = vrot.slane %v8431_v3, 1  ;;  %17861 = vst [vmem:[#allocation29_spill] sm:$0xff] %v17442_v50  ;;  %v17862_v47 = vrot.slane %v17154_v30, 4  ;;  %v8759_v7 = vrot.slane %v8758_v48, 2 }
 0x6d7   : > { %v8443_v44 = vmax.f32 %v8441_v20, %v8442_v42  ;;  %v8764_v55 = vrot.slane %v17438_v6, 4  ;;  %v8799_v61 = vrot.slane %v8798_v22, 4  ;;  %v8772_v29 = vmax.f32 %v8770_v62, %v8771_v10 }
 0x6d8   : > { %v8388_v40 = vrot.slane %v8387_v57, 2  ;;  %v8433_v17 = vmax.f32 %v8431_v3, %v8432_v39  ;;  %v8401_v35 = vmax.f32 %v17154_v30, %v17862_v47  ;;  %v17451_v14 = vmax.f32 %v8784_v0, %v8785_v51  ;;  %v13292_v30 = vld [vmem:[#allocation4 + $0x138] sm:$0xff]   ;;  %v13295_v51 = vld [vmem:[#allocation4 + $0x170] sm:$0xff]  }
 0x6d9   : > { %v8444_v12 = vrot.slane %v8443_v44, 2  ;;  %v17863_v39 = vrot.slane %v17174_v49, 4  ;;  %v17461_v62 = vmax.f32 %v8758_v48, %v8759_v7  ;;  %v17463_v0 = vmax.f32 %v8798_v22, %v8799_v61 }
 0x6da   : > { %v8389_v56 = vmax.f32 %v8387_v57, %v8388_v40  ;;  %v8813_v45 = vmax.f32 %v8377_v4, %v8433_v17  ;;  %v8402_v50 = vrot.slane %v8401_v35, 2  ;;  %v17864_v57 = vcombine.high %v17104_v31, %v17104_v31 }
 0x6db   : > { %v8457_v3 = vmax.f32 %v17174_v49, %v17863_v39  ;;  %v8445_v20 = vmax.f32 %v8443_v44, %v8444_v12  ;;  %v8773_v4 = vrot.slane %v8772_v29, 2  ;;  %v17865_v44 = vcombine.high %v17148_v25, %v17148_v25  ;;  %v13296_v25 = vld [vmem:[#allocation4 + $0x130] sm:$0xff]  }
 0x6dc   : > { %v8390_v46 = vrot.slane %v8389_v56, 1  ;;  %v8845_v23 = vpack.c.bf16 %v8813_v45, %v8813_v45  ;;  %v8403_v42 = vmax.f32 %v8401_v35, %v8402_v50  ;;  %v8413_v10 = vsel %vm5383_vm1, %v17864_v57, -inf }
 0x6dd   : > { %v8458_v17 = vrot.slane %v8457_v3, 2  ;;  %v8414_v40 = vrot.slane %v8413_v10, 4  ;;  %v8446_v47 = vrot.slane %v8445_v20, 1  ;;  %v8469_v50 = vsel %vm5383_vm1, %v17865_v44, -inf }
 0x6de   : > { %10957 = vmatprep.mubr.bf16.mxu1 %v8845_v23  ;;  %v8404_v49 = vrot.slane %v8403_v42, 1  ;;  %v17866_v31 = vpack.c.bf16 %v17207_v52, %v17207_v52  ;;  %v8470_v61 = vrot.slane %v8469_v50, 4  ;;  %v17867_v22 = vrot.slane %v17228_v41, 4 }
 0x6df   : > { %v8459_v48 = vmax.f32 %v8457_v3, %v8458_v17  ;;  %v8415_v35 = vmax.f32 %v8413_v10, %v8414_v40  ;;  %v8391_v45 = vmax.f32 %v8389_v56, %v8390_v46  ;;  %v8447_v12 = vmax.f32 %v8445_v20, %v8446_v47  ;;  %v13299_v17 = vld [vmem:[#allocation4 + $0x168] sm:$0xff]  }
 0x6e0   : > { %10958 = vmatmul.mubr.bf16.vlgmr.msra.gmra.mxu1 %v17866_v31  ;;  %v8485_v7 = vmax.f32 %v17228_v41, %v17867_v22  ;;  %v8814_v39 = vmax.f32 %v17182_v15, %v17217_v2  ;;  %v17868_v23 = vrot.slane %v17259_v54, 4  ;;  %v8471_v10 = vmax.f32 %v8469_v50, %v8470_v61  ;;  %v13294_v22 = vld [vmem:[#allocation4 + $0x1b8] sm:$0xff]  }
 0x6e1   : > { %12601 = vmatpush3.bf16.msra.mxu1 %v13292_v30  ;;  %v8460_v52 = vrot.slane %v8459_v48, 1  ;;  %v8416_v3 = vrot.slane %v8415_v35, 2  ;;  %v8787_v44 = vrot.slane %v17451_v14, 2  ;;  %v8815_v41 = vmax.f32 %v8391_v45, %v8447_v12 }
 0x6e2   : > { %v8541_v57 = vmax.f32 %v17259_v54, %v17868_v23  ;;  %12602 = vmatprep.subr.bf16.mxu1 %v13295_v51  ;;  %v8486_v40 = vrot.slane %v8485_v7, 2  ;;  %v8405_v30 = vmax.f32 %v8403_v42, %v8404_v49  ;;  %v8472_v47 = vrot.slane %v8471_v10, 2  ;;  %v13300_v54 = vld [vmem:[#allocation4 + $0x128] sm:$0xff]   ;;  %v13297_v42 = vld [vmem:[#allocation4 + $0x1f0] sm:$0xff]  }
 0x6e3   : > { %v8461_v46 = vmax.f32 %v8459_v48, %v8460_v52  ;;  %v8417_v20 = vmax.f32 %v8415_v35, %v8416_v3  ;;  %v8847_v2 = vpack.c.bf16 %v8815_v41, %v8815_v41  ;;  %v8846_v31 = vpack.c.bf16 %v8814_v39, %v8814_v39  ;;  %v13303_v35 = vld [vmem:[#allocation4 + $0x160] sm:$0xff]  }
 0x6e4   : > { %v8542_v56 = vrot.slane %v8541_v57, 2  ;;  %v8487_v15 = vmax.f32 %v8485_v7, %v8486_v40  ;;  %v17869_v51 = vcombine.high %v17188_v33, %v17188_v33  ;;  %v8473_v45 = vmax.f32 %v8471_v10, %v8472_v47  ;;  %v13298_v10 = vld [vmem:[#allocation4 + $0x1b0] sm:$0xff]  }
 0x6e5   : > { %12603 = vmatpush3.bf16.msra.mxu1 %v13296_v25  ;;  %v8817_v61 = vmax.f32 %v8405_v30, %v8461_v46  ;;  %v8418_v27 = vrot.slane %v8417_v20, 1  ;;  %v17485_v48 = vmax.f32 %v8772_v29, %v8773_v4  ;;  %10997 = vmatprep.mubr.bf16.mxu0 %v8847_v2  ;;  %v17870_v39 = vcombine.high %v17215_v34, %v17215_v34 }
 0x6e6   : > { %v8543_v23 = vmax.f32 %v8541_v57, %v8542_v56  ;;  %v8497_v50 = vsel %vm5383_vm1, %v17869_v51, -inf  ;;  %12604 = vmatprep.subr.bf16.mxu1 %v13299_v17  ;;  %v8488_v49 = vrot.slane %v8487_v15, 1  ;;  %10998 = vmatmul.mubr.bf16.vlgmr.msra.gmra.mxu0 %v8846_v31  ;;  %v8474_v52 = vrot.slane %v8473_v45, 1  ;;  %v13304_v17 = vld [vmem:[#allocation4 + $0x120] sm:$0xff]   ;;  %v13301_v56 = vld [vmem:[#allocation4 + $0x1e8] sm:$0xff]  }
 0x6e7   : > { %v8498_v12 = vrot.slane %v8497_v50, 4  ;;  %v8553_v25 = vsel %vm5383_vm1, %v17870_v39, -inf  ;;  %v8849_v33 = vpack.c.bf16 %v8817_v61, %v8817_v61  ;;  %v8419_v57 = vmax.f32 %v8417_v20, %v8418_v27  ;;  %12623 = vmatpush3.bf16.msra.mxu0 %v13294_v22  ;;  %v13307_v27 = vld [vmem:[#allocation4 + $0x158] sm:$0xff]  }
 0x6e8   : > { %v8544_v7 = vrot.slane %v8543_v23, 1  ;;  %v8489_v3 = vmax.f32 %v8487_v15, %v8488_v49  ;;  %v8554_v40 = vrot.slane %v8553_v25, 4  ;;  %v17493_v41 = vmax.f32 %v17256_v53, %v17294_v19  ;;  %12624 = vmatprep.subr.bf16.mxu0 %v13297_v42 }
 0x6e9   : > { %12605 = vmatpush3.bf16.msra.mxu1 %v13300_v54  ;;  %v8499_v4 = vmax.f32 %v8497_v50, %v8498_v12  ;;  %v8801_v34 = vrot.slane %v17463_v0, 2  ;;  %11037 = vmatprep.mubr.bf16.mxu1 %v8849_v33  ;;  %v8475_v30 = vmax.f32 %v8473_v45, %v8474_v52  ;;  %v17871_v46 = vrot.slane %v17231_v28, 4  ;;  %v13302_v50 = vld [vmem:[#allocation4 + $0x1a8] sm:$0xff]  }
 0x6ea   : > { %v8545_v29 = vmax.f32 %v8543_v23, %v8544_v7  ;;  %v17872_v47 = vrot.slane %v17270_v43, 4  ;;  %12606 = vmatprep.subr.bf16.mxu1 %v13303_v35  ;;  %v8555_v19 = vmax.f32 %v8553_v25, %v8554_v40  ;;  %v17873_v31 = vcombine.high %v17192_v63, %v17192_v63  ;;  %v13306_v40 = vld [vmem:[#allocation4 + $0x1a0] sm:$0xff]  }
 0x6eb   : > { %v8513_v20 = vmax.f32 %v17231_v28, %v17871_v46  ;;  %v8500_v53 = vrot.slane %v8499_v4, 2  ;;  %v17509_v54 = vmax.f32 %v17451_v14, %v8787_v44  ;;  %v8819_v23 = vmax.f32 %v8419_v57, %v8475_v30  ;;  %12625 = vmatpush3.bf16.msra.mxu0 %v13298_v10  ;;  %v13305_v14 = vld [vmem:[#allocation4 + $0x1e0] sm:$0xff]   ;;  %v13311_v44 = vld [vmem:[#allocation4 + $0x150] sm:$0xff]   ;;  %v13309_v46 = vld [vmem:[#allocation4 + $0x1d8] sm:$0xff]  }
 0x6ec   : > { %v8569_v15 = vmax.f32 %v17270_v43, %v17872_v47  ;;  %v17502_v2 = vmax.f32 %v8489_v3, %v8545_v29  ;;  %v8525_v22 = vsel %vm5383_vm1, %v17873_v31, -inf  ;;  %v13308_v43 = vld [vmem:[#allocation4 + $0x118] sm:$0xff]   ;;  %v8556_v45 = vrot.slane %v8555_v19, 2  ;;  %12626 = vmatprep.subr.bf16.mxu0 %v13301_v56  ;;  %v13312_v30 = vld [vmem:[#allocation4 + $0x110] sm:$0xff]  }
 0x6ed   : > { %v8514_v51 = vrot.slane %v8513_v20, 2  ;;  %12607 = vmatpush3.bf16.msra.mxu1 %v13304_v17  ;;  %v8501_v61 = vmax.f32 %v8499_v4, %v8500_v53  ;;  %v17874_v42 = vrot.slane %v17247_v16, 1  ;;  %v17875_v63 = vrot.slane %v17279_v26, 1 }
 0x6ee   : > { %v8570_v28 = vrot.slane %v8569_v15, 2  ;;  %v8851_v7 = vpack.c.bf16 %v8819_v23, %v8819_v23  ;;  %12608 = vmatprep.subr.bf16.mxu1 %v13307_v27  ;;  %v8526_v25 = vrot.slane %v8525_v22, 4  ;;  %v8557_v57 = vmax.f32 %v8555_v19, %v8556_v45  ;;  %v13310_v45 = vld [vmem:[#allocation4 + $0x198] sm:$0xff]  }
 0x6ef   : > { %v8496_v49 = vmax.f32 %v17247_v16, %v17874_v42  ;;  %v8552_v35 = vmax.f32 %v17279_v26, %v17875_v63  ;;  %v8515_v12 = vmax.f32 %v8513_v20, %v8514_v51  ;;  %v8502_v33 = vrot.slane %v8501_v61, 1  ;;  %12627 = vmatpush3.bf16.msra.mxu0 %v13302_v50  ;;  %v13315_v20 = vld [vmem:[#allocation4 + $0x148] sm:$0xff]   ;;  %v17882_v63 = vld [vmem:[#allocation13_spill] sm:$0xff] }
 0x6f0   : > { %v8571_v39 = vmax.f32 %v8569_v15, %v8570_v28  ;;  %v17876_v3 = vcombine.high %v17240_v58, %v17240_v58  ;;  %11077 = vmatprep.mubr.bf16.mxu0 %v8851_v7  ;;  %v8527_v17 = vmax.f32 %v8525_v22, %v8526_v25  ;;  %v17524_v4 = vmax.f32 %v17463_v0, %v8801_v34  ;;  %v17880_v28 = vld [vmem:[#allocation10_spill] sm:$0xff] }
 0x6f1   : > { %v17517_v52 = vmax.f32 %v8496_v49, %v8552_v35  ;;  %v8516_v10 = vrot.slane %v8515_v12, 1  ;;  %12609 = vmatpush3.bf16.msra.mxu1 %v13308_v43  ;;  %v17528_v56 = vmax.f32 %v17178_v37, %v17223_v13  ;;  %v8558_v27 = vrot.slane %v8557_v57, 1  ;;  %12628 = vmatprep.subr.bf16.mxu0 %v13305_v14  ;;  %v17878_v13 = vld [vmem:[#allocation20_spill] sm:$0xff] }
 0x6f2   : > { %v8581_v16 = vsel %vm5383_vm1, %v17876_v3, -inf  ;;  %v8572_v26 = vrot.slane %v8571_v39, 1  ;;  %v17532_v58 = vmax.f32 %v17266_v18, %v17316_v21  ;;  %12610 = vmatprep.subr.bf16.mxu1 %v13311_v44  ;;  %v8528_v34 = vrot.slane %v8527_v17, 2  ;;  %v13313_v14 = vld [vmem:[#allocation4 + $0x1d0] sm:$0xff]   ;;  %v13319_v44 = vld [vmem:[#allocation4 + $0x140] sm:$0xff]  }
 0x6f3   : > { %v8582_v29 = vrot.slane %v8581_v16, 4  ;;  %v8517_v47 = vmax.f32 %v8515_v12, %v8516_v10  ;;  %v8503_v53 = vmax.f32 %v8501_v61, %v8502_v33  ;;  %v8559_v19 = vmax.f32 %v8557_v57, %v8558_v27  ;;  %12629 = vmatpush3.bf16.msra.mxu0 %v13306_v40  ;;  %v13316_v61 = vld [vmem:[#allocation4 + $0x108] sm:$0xff]  }
 0x6f4   : > { %v8573_v0 = vmax.f32 %v8571_v39, %v8572_v26  ;;  %v17877_v31 = vrot.slane %v17311_v60, 4  ;;  %v17879_v22 = vrot.slane %v17878_v13, 4  ;;  %v8529_v21 = vmax.f32 %v8527_v17, %v8528_v34  ;;  %12630 = vmatprep.subr.bf16.mxu0 %v13309_v46  ;;  %v17884_v33 = vld [vmem:[#allocation11_spill] sm:$0xff] }
 0x6f5   : > { %v8583_v15 = vmax.f32 %v8581_v16, %v8582_v29  ;;  %v17881_v50 = vrot.slane %v17880_v28, 1  ;;  %12611 = vmatpush3.bf16.msra.mxu1 %v13312_v30  ;;  %v17545_v42 = vmax.f32 %v8503_v53, %v8559_v19  ;;  %v17883_v35 = vrot.slane %v17882_v63, 1  ;;  %v17886_v16 = vld [vmem:[#allocation14_spill] sm:$0xff]  ;;  %v17888_v30 = vld [vmem:[#allocation16_spill] sm:$0xff] }
 0x6f6   : > { %v8597_v37 = vmax.f32 %v17311_v60, %v17877_v31  ;;  %v8653_v23 = vmax.f32 %v17878_v13, %v17879_v22  ;;  %v17540_v18 = vmax.f32 %v8517_v47, %v8573_v0  ;;  %12612 = vmatprep.subr.bf16.mxu1 %v13315_v20  ;;  %v8848_v12 = vpack.c.bf16 %v17528_v56, %v17528_v56  ;;  %v17890_v47 = vld [vmem:[#allocation15_spill] sm:$0xff]  ;;  %v13320_v53 = vld [vmem:[#allocation4 + $0x100] sm:$0xff]  }
 0x6f7   : > { %v8584_v51 = vrot.slane %v8583_v15, 2  ;;  %v8524_v43 = vmax.f32 %v17880_v28, %v17881_v50  ;;  %v8580_v7 = vmax.f32 %v17882_v63, %v17883_v35  ;;  %v8530_v39 = vrot.slane %v8529_v21, 1  ;;  %12631 = vmatpush3.bf16.msra.mxu0 %v13310_v45  ;;  %v17893_v63 = vld [vmem:[#allocation17_spill] sm:$0xff] }
 0x6f8   : > { %v8598_v49 = vrot.slane %v8597_v37, 2  ;;  %v8654_v60 = vrot.slane %v8653_v23, 2  ;;  %v17885_v57 = vcombine.high %v17884_v33, %v17884_v33  ;;  %v17887_v10 = vrot.slane %v17886_v16, 1  ;;  %12632 = vmatprep.subr.bf16.mxu0 %v13313_v14 }
 0x6f9   : > { %v8585_v25 = vmax.f32 %v8583_v15, %v8584_v51  ;;  %v17559_v40 = vmax.f32 %v8524_v43, %v8580_v7  ;;  %v17889_v27 = vrot.slane %v17888_v30, 1  ;;  %v17891_v0 = vcombine.high %v17890_v47, %v17890_v47  ;;  %v13314_v15 = vld [vmem:[#allocation4 + $0x190] sm:$0xff]   ;;  %12613 = vmatpush3.bf16.msra.mxu1 %v13316_v61  ;;  %v13323_v51 = vld [vmem:[#allocation4 + $0x278] sm:$0xff]   ;;  %v17892_v43 = vld [vmem:[#allocation22_spill] sm:$0xff] }
 0x6fa   : > { %v8609_v3 = vsel %vm5383_vm1, %v17885_v57, -inf  ;;  %v8412_v26 = vmax.f32 %v17886_v16, %v17887_v10  ;;  %v8599_v17 = vmax.f32 %v8597_v37, %v8598_v49  ;;  %v8655_v29 = vmax.f32 %v8653_v23, %v8654_v60  ;;  %v13317_v23 = vld [vmem:[#allocation4 + $0x1c8] sm:$0xff]   ;;  %12614 = vmatprep.subr.bf16.mxu1 %v13319_v44 }
 0x6fb   : > { %v8468_v46 = vmax.f32 %v17888_v30, %v17889_v27  ;;  %v8586_v56 = vrot.slane %v8585_v25, 1  ;;  %v8610_v20 = vrot.slane %v8609_v3, 4  ;;  %v8665_v34 = vsel %vm5383_vm1, %v17891_v0, -inf  ;;  %12633 = vmatpush3.bf16.msra.mxu0 %v13314_v15  ;;  %v13318_v57 = vld [vmem:[#allocation4 + $0x188] sm:$0xff]   ;;  %v13321_v30 = vld [vmem:[#allocation4 + $0x1c0] sm:$0xff]  }
 0x6fc   : > { %v8531_v19 = vmax.f32 %v8529_v21, %v8530_v39  ;;  %v8600_v31 = vrot.slane %v8599_v17, 1  ;;  %v8656_v37 = vrot.slane %v8655_v29, 1  ;;  %v8666_v13 = vrot.slane %v8665_v34, 4  ;;  %12634 = vmatprep.subr.bf16.mxu0 %v13317_v23  ;;  %v17901_v23 = vld [vmem:[#allocation18_spill] sm:$0xff] }
 0x6fd   : > { %v8761_v22 = vrot.slane %v17461_v62, 1  ;;  %v8587_v28 = vmax.f32 %v8585_v25, %v8586_v56  ;;  %v8611_v50 = vmax.f32 %v8609_v3, %v8610_v20  ;;  %v17571_v49 = vmax.f32 %v17892_v43, %v17386_v11  ;;  %v17896_v25 = vld [vmem:[#allocation12_spill] sm:$0xff]  ;;  %12615 = vmatpush3.bf16.msra.mxu1 %v13320_v53  ;;  %v17898_v56 = vld [vmem:[#allocation19_spill] sm:$0xff] }
 0x6fe   : > { %v8601_v45 = vmax.f32 %v8599_v17, %v8600_v31  ;;  %v8657_v60 = vmax.f32 %v8655_v29, %v8656_v37  ;;  %v8667_v61 = vmax.f32 %v8665_v34, %v8666_v13  ;;  %v17894_v21 = vrot.slane %v17893_v63, 4  ;;  %v13324_v3 = vld [vmem:[#allocation4 + $0x238] sm:$0xff]   ;;  %12644 = vmatprep.subr.bf16.mxu1 %v13323_v51 }
 0x6ff   : > { %v17576_v7 = vmax.f32 %v8531_v19, %v8587_v28  ;;  %v8612_v39 = vrot.slane %v8611_v50, 2  ;;  %v17895_v14 = vrot.slane %v17368_v9, 4  ;;  %v17897_v33 = vcombine.high %v17896_v25, %v17896_v25  ;;  %12635 = vmatpush3.bf16.msra.mxu0 %v13318_v57 }
 0x700   : > { %v8625_v35 = vmax.f32 %v17893_v63, %v17894_v21  ;;  %v17585_v16 = vmax.f32 %v8412_v26, %v8468_v46  ;;  %v17587_v10 = vmax.f32 %v8601_v45, %v8657_v60  ;;  %v8668_v17 = vrot.slane %v8667_v61, 2  ;;  %v13327_v46 = vld [vmem:[#allocation4 + $0x270] sm:$0xff]   ;;  %11038 = vmatmul.mubr.bf16.vlgmr.msra.gmra.mxu1 %v8848_v12  ;;  %12636 = vmatprep.subr.bf16.mxu0 %v13321_v30  ;;  %v13325_v63 = vld [vmem:[#allocation4 + $0x2f8] sm:$0xff]   ;;  %v13331_v21 = vld [vmem:[#allocation4 + $0x268] sm:$0xff]  }
 0x701   : > { %v8681_v44 = vmax.f32 %v17368_v9, %v17895_v14  ;;  %v8637_v11 = vsel %vm5383_vm1, %v17897_v33, -inf  ;;  %v8613_v27 = vmax.f32 %v8611_v50, %v8612_v39  ;;  %v17899_v20 = vrot.slane %v17898_v56, 1  ;;  %v13322_v50 = vld [vmem:[#allocation4 + $0x180] sm:$0xff]   ;;  %12645 = vmatpush3.bf16.msra.mxu1 %v13324_v3  ;;  %v17903_v39 = vld [vmem:[#allocation23_spill] sm:$0xff] }
 0x702   : > { %v8626_v29 = vrot.slane %v8625_v35, 2  ;;  %v17900_v0 = vrot.slane %v17370_v38, 1  ;;  %v8853_v26 = vpack.c.bf16 %v17502_v2, %v17502_v2  ;;  %v8669_v15 = vmax.f32 %v8667_v61, %v8668_v17  ;;  %12646 = vmatprep.subr.bf16.mxu1 %v13327_v46  ;;  %v13326_v17 = vld [vmem:[#allocation4 + $0x2b8] sm:$0xff]  }
 0x703   : > { %v8682_v9 = vrot.slane %v8681_v44, 2  ;;  %v8608_v47 = vmax.f32 %v17898_v56, %v17899_v20  ;;  %v8638_v19 = vrot.slane %v8637_v11, 4  ;;  %v8614_v31 = vrot.slane %v8613_v27, 1  ;;  %12637 = vmatpush3.bf16.msra.mxu0 %v13322_v50  ;;  %v13329_v56 = vld [vmem:[#allocation4 + $0x2f0] sm:$0xff]   ;;  %v13332_v20 = vld [vmem:[#allocation4 + $0x228] sm:$0xff]  }
 0x704   : > { %v8664_v34 = vmax.f32 %v17370_v38, %v17900_v0  ;;  %v8627_v53 = vmax.f32 %v8625_v35, %v8626_v29  ;;  %v17902_v51 = vcombine.high %v17901_v23, %v17901_v23  ;;  %v13328_v38 = vld [vmem:[#allocation4 + $0x230] sm:$0xff]   ;;  %v8670_v43 = vrot.slane %v8669_v15, 1  ;;  %11117 = vmatprep.mubr.bf16.mxu1 %v8853_v26  ;;  %12666 = vmatprep.subr.bf16.mxu0 %v13325_v63  ;;  %v13335_v26 = vld [vmem:[#allocation4 + $0x260] sm:$0xff]   ;;  %v13339_v63 = vld [vmem:[#allocation4 + $0x258] sm:$0xff]  }
 0x705   : > { %v8683_v37 = vmax.f32 %v8681_v44, %v8682_v9  ;;  %v8639_v45 = vmax.f32 %v8637_v11, %v8638_v19  ;;  %v8762_v61 = vmax.f32 %v17461_v62, %v8761_v22  ;;  %v8850_v12 = vpack.c.bf16 %v17585_v16, %v17585_v16  ;;  %12647 = vmatpush3.bf16.msra.mxu1 %v13328_v38  ;;  %v13333_v38 = vld [vmem:[#allocation4 + $0x2e8] sm:$0xff]  }
 0x706   : > { %v17597_v13 = vmax.f32 %v8608_v47, %v8664_v34  ;;  %v8693_v28 = vsel %vm5383_vm1, %v17902_v51, -inf  ;;  %v8628_v2 = vrot.slane %v8627_v53, 1  ;;  %v17608_v14 = vmax.f32 %v17903_v39, %v17389_v36  ;;  %12648 = vmatprep.subr.bf16.mxu1 %v13331_v21  ;;  %v17909_v39 = vld [vmem:[#allocation28_spill] sm:$0xff] }
 0x707   : > { %v8694_v60 = vrot.slane %v8693_v28, 4  ;;  %v8684_v35 = vrot.slane %v8683_v37, 1  ;;  %v8615_v44 = vmax.f32 %v8613_v27, %v8614_v31  ;;  %v8671_v25 = vmax.f32 %v8669_v15, %v8670_v43  ;;  %11078 = vmatmul.mubr.bf16.vlgmr.msra.gmra.mxu0 %v8850_v12  ;;  %v13336_v43 = vld [vmem:[#allocation4 + $0x220] sm:$0xff]  }
 0x708   : > { %v8640_v33 = vrot.slane %v8639_v45, 2  ;;  %v8629_v57 = vmax.f32 %v8627_v53, %v8628_v2  ;;  %v17904_v62 = vrot.slane %v17393_v5, 4  ;;  %v8765_v16 = vmax.f32 %v17438_v6, %v8764_v55  ;;  %12667 = vmatpush3.bf16.msra.mxu0 %v13326_v17 }
 0x709   : > { %v8695_v11 = vmax.f32 %v8693_v28, %v8694_v60  ;;  %v8685_v3 = vmax.f32 %v8683_v37, %v8684_v35  ;;  %v17616_v36 = vmax.f32 %v8615_v44, %v8671_v25  ;;  %v17905_v27 = vrot.slane %v17361_v59, 1  ;;  %12668 = vmatprep.subr.bf16.mxu0 %v13329_v56  ;;  %12649 = vmatpush3.bf16.msra.mxu1 %v13332_v20  ;;  %v17910_v25 = vld [vmem:[#allocation24_spill] sm:$0xff]  ;;  %v13337_v56 = vld [vmem:[#allocation4 + $0x2e0] sm:$0xff]  }
 0x70a   : > { %v8709_v22 = vmax.f32 %v17393_v5, %v17904_v62  ;;  %v8641_v29 = vmax.f32 %v8639_v45, %v8640_v33  ;;  %v8766_v0 = vrot.slane %v8765_v16, 2  ;;  %v17906_v6 = vrot.slane %v17378_v8, 1  ;;  %12650 = vmatprep.subr.bf16.mxu1 %v13335_v26  ;;  %v13340_v20 = vld [vmem:[#allocation4 + $0x218] sm:$0xff]   ;;  %v17914_v26 = vld [vmem:[#allocation26_spill] sm:$0xff] }
 0x70b   : > { %v8696_v30 = vrot.slane %v8695_v11, 2  ;;  %v8636_v9 = vmax.f32 %v17361_v59, %v17905_v27  ;;  %v17621_v5 = vmax.f32 %v8629_v57, %v8685_v3  ;;  %v8855_v34 = vpack.c.bf16 %v17545_v42, %v17545_v42  ;;  %v13330_v42 = vld [vmem:[#allocation4 + $0x2b0] sm:$0xff]  }
 0x70c   : > { %v8710_v47 = vrot.slane %v8709_v22, 2  ;;  %v8692_v55 = vmax.f32 %v17378_v8, %v17906_v6  ;;  %v8642_v46 = vrot.slane %v8641_v29, 1  ;;  %v17907_v59 = vcombine.high %v17354_v1, %v17354_v1  ;;  %12669 = vmatpush3.bf16.msra.mxu0 %v13330_v42 }
 0x70d   : > { %v8697_v15 = vmax.f32 %v8695_v11, %v8696_v30  ;;  %v8775_v19 = vrot.slane %v17485_v48, 1  ;;  %v8767_v37 = vmax.f32 %v8765_v16, %v8766_v0  ;;  %v8789_v8 = vrot.slane %v17509_v54, 1  ;;  %11157 = vmatprep.mubr.bf16.mxu0 %v8855_v34  ;;  %v17913_v16 = vld [vmem:[#allocation27_spill] sm:$0xff]  ;;  %12670 = vmatprep.subr.bf16.mxu0 %v13333_v38 }
 0x70e   : > { %v8721_v53 = vsel %vm5383_vm1, %v17907_v59, -inf  ;;  %v8711_v31 = vmax.f32 %v8709_v22, %v8710_v47  ;;  %v17633_v23 = vmax.f32 %v8636_v9, %v8692_v55  ;;  %v17908_v50 = vcombine.high %v17400_v32, %v17400_v32  ;;  %12651 = vmatpush3.bf16.msra.mxu1 %v13336_v43  ;;  %v13341_v43 = vld [vmem:[#allocation4 + $0x2d8] sm:$0xff]  }
 0x70f   : > { %v8698_v51 = vrot.slane %v8697_v15, 1  ;;  %v8722_v28 = vrot.slane %v8721_v53, 4  ;;  %v8643_v2 = vmax.f32 %v8641_v29, %v8642_v46  ;;  %v8768_v60 = vrot.slane %v8767_v37, 1  ;;  %v13334_v29 = vld [vmem:[#allocation4 + $0x2a8] sm:$0xff]   ;;  %12652 = vmatprep.subr.bf16.mxu1 %v13339_v63  ;;  %v17920_v63 = vld [vmem:[#allocation29_spill] sm:$0xff] }
 0x710   : > { %v8777_v1 = vsel %vm5383_vm1, %v17908_v50, -inf  ;;  %v8712_v45 = vrot.slane %v8711_v31, 1  ;;  %v17641_v44 = vmax.f32 %v17909_v39, %v8762_v61  ;;  %v17911_v33 = vrot.slane %v17910_v25, 4  ;;  %12671 = vmatpush3.bf16.msra.mxu0 %v13334_v29 }
 0x711   : > { %v8778_v12 = vrot.slane %v8777_v1, 4  ;;  %v8699_v21 = vmax.f32 %v8697_v15, %v8698_v51  ;;  %v8723_v35 = vmax.f32 %v8721_v53, %v8722_v28  ;;  %v8769_v57 = vmax.f32 %v8767_v37, %v8768_v60  ;;  %v17916_v37 = vld [vmem:[#allocation21_spill] sm:$0xff]  ;;  %12672 = vmatprep.subr.bf16.mxu0 %v13337_v56 }
 0x712   : > { %v8737_v32 = vmax.f32 %v17910_v25, %v17911_v33  ;;  %v8713_v11 = vmax.f32 %v8711_v31, %v8712_v45  ;;  %v17912_v62 = vrot.slane %v17445_v24, 4  ;;  %v8747_v17 = vrot.slane %v17913_v16, 1  ;;  %v13338_v51 = vld [vmem:[#allocation4 + $0x2a0] sm:$0xff]   ;;  %12653 = vmatpush3.bf16.msra.mxu1 %v13340_v20 }
 0x713   : > { %v8779_v3 = vmax.f32 %v8777_v1, %v8778_v12  ;;  %v17650_v30 = vmax.f32 %v8643_v2, %v8699_v21  ;;  %v8724_v27 = vrot.slane %v8723_v35, 2  ;;  %v8790_v9 = vmax.f32 %v17509_v54, %v8789_v8  ;;  %v17918_v45 = vld [vmem:[#allocation25_spill] sm:$0xff] }
 0x714   : > { %v8793_v22 = vmax.f32 %v17445_v24, %v17912_v62  ;;  %v8738_v61 = vrot.slane %v8737_v32, 2  ;;  %v17653_v47 = vmax.f32 %v8713_v11, %v8769_v57  ;;  %v13343_v24 = vld [vmem:[#allocation4 + $0x250] sm:$0xff]   ;;  %v17915_v46 = vrot.slane %v17914_v26, 1  ;;  %12673 = vmatpush3.bf16.msra.mxu0 %v13338_v51 }
 0x715   : > { %v8780_v0 = vrot.slane %v8779_v3, 2  ;;  %v8725_v55 = vmax.f32 %v8723_v35, %v8724_v27  ;;  %v8776_v59 = vmax.f32 %v17485_v48, %v8775_v19  ;;  %v8803_v54 = vrot.slane %v17524_v4, 1  ;;  %v13344_v48 = vld [vmem:[#allocation4 + $0x210] sm:$0xff]   ;;  %12654 = vmatprep.subr.bf16.mxu1 %v13343_v24  ;;  %v13347_v35 = vld [vmem:[#allocation4 + $0x248] sm:$0xff]   ;;  %12674 = vmatprep.subr.bf16.mxu0 %v13341_v43 }
 0x716   : > { %v8794_v6 = vrot.slane %v8793_v22, 2  ;;  %v8739_v34 = vmax.f32 %v8737_v32, %v8738_v61  ;;  %v8720_v15 = vmax.f32 %v17914_v26, %v17915_v46  ;;  %v17917_v8 = vcombine.high %v17916_v37, %v17916_v37  ;;  %12655 = vmatpush3.bf16.msra.mxu1 %v13344_v48  ;;  %v13345_v27 = vld [vmem:[#allocation4 + $0x2d0] sm:$0xff]   ;;  %v13348_v61 = vld [vmem:[#allocation4 + $0x208] sm:$0xff]   ;;  %v13355_v46 = vld [vmem:[#allocation4 + $0x378] sm:$0xff]  }
 0x717   : > { %v8781_v53 = vmax.f32 %v8779_v3, %v8780_v0  ;;  %v8726_v28 = vrot.slane %v8725_v55, 1  ;;  %v17919_v60 = vcombine.high %v17918_v45, %v17918_v45  ;;  %v17671_v21 = vmax.f32 %v17920_v63, %v8790_v9  ;;  %v13342_v3 = vld [vmem:[#allocation4 + $0x298] sm:$0xff]   ;;  %12656 = vmatprep.subr.bf16.mxu1 %v13347_v35  ;;  %v13351_v0 = vld [vmem:[#allocation4 + $0x240] sm:$0xff]   ;;  %v13360_v43 = vld [vmem:[#allocation4 + $0x330] sm:$0xff]  }
 0x718   : > { %v8795_v31 = vmax.f32 %v8793_v22, %v8794_v6  ;;  %v8749_v42 = vsel %vm5383_vm1, %v17917_v8, -inf  ;;  %v8740_v50 = vrot.slane %v8739_v34, 1  ;;  %v17664_v1 = vmax.f32 %v8720_v15, %v8776_v59  ;;  %12675 = vmatpush3.bf16.msra.mxu0 %v13342_v3  ;;  %v13350_v59 = vld [vmem:[#allocation4 + $0x288] sm:$0xff]   ;;  %v13368_v35 = vld [vmem:[#allocation4 + $0x320] sm:$0xff]  }
 0x719   : > { %v8750_v38 = vrot.slane %v8749_v42, 4  ;;  %v8782_v19 = vrot.slane %v8781_v53, 1  ;;  %v8805_v12 = vsel %vm5383_vm1, %v17919_v60, -inf  ;;  %v8727_v39 = vmax.f32 %v8725_v55, %v8726_v28  ;;  %12676 = vmatprep.subr.bf16.mxu0 %v13345_v27  ;;  %v13354_v28 = vld [vmem:[#allocation4 + $0x280] sm:$0xff]   ;;  %v13363_v48 = vld [vmem:[#allocation4 + $0x368] sm:$0xff]  }
 0x71a   : > { %v8796_v2 = vrot.slane %v8795_v31, 1  ;;  %v8741_v32 = vmax.f32 %v8739_v34, %v8740_v50  ;;  %v8806_v57 = vrot.slane %v8805_v12, 4  ;;  %v8748_v22 = vmax.f32 %v17913_v16, %v8747_v17  ;;  %v13346_v34 = vld [vmem:[#allocation4 + $0x290] sm:$0xff]   ;;  %12657 = vmatpush3.bf16.msra.mxu1 %v13348_v61  ;;  %v13352_v16 = vld [vmem:[#allocation4 + $0x200] sm:$0xff]   ;;  %v13364_v45 = vld [vmem:[#allocation4 + $0x328] sm:$0xff]  }
 0x71b   : > { %v8751_v25 = vmax.f32 %v8749_v42, %v8750_v38  ;;  %v8783_v33 = vmax.f32 %v8781_v53, %v8782_v19  ;;  %v8804_v29 = vmax.f32 %v17524_v4, %v8803_v54  ;;  %v13349_v4 = vld [vmem:[#allocation4 + $0x2c8] sm:$0xff]   ;;  %12658 = vmatprep.subr.bf16.mxu1 %v13351_v0  ;;  %v13353_v54 = vld [vmem:[#allocation4 + $0x2c0] sm:$0xff]   ;;  %v13356_v53 = vld [vmem:[#allocation4 + $0x338] sm:$0xff]   ;;  %v8852_v8 = vpack.c.bf16 %v17493_v41, %v17493_v41 }
 0x71c   : > { %v8797_v11 = vmax.f32 %v8795_v31, %v8796_v2  ;;  %v8807_v20 = vmax.f32 %v8805_v12, %v8806_v57  ;;  %12677 = vmatpush3.bf16.msra.mxu0 %v13346_v34  ;;  %v13359_v42 = vld [vmem:[#allocation4 + $0x370] sm:$0xff]   ;;  %v8857_v50 = vpack.c.bf16 %v17540_v18, %v17540_v18  ;;  %v13357_v38 = vld [vmem:[#allocation4 + $0x3f8] sm:$0xff]   ;;  %v8854_v41 = vpack.c.bf16 %v17517_v52, %v17517_v52  ;;  %v13367_v18 = vld [vmem:[#allocation4 + $0x360] sm:$0xff]  }
 0x71d   : > { %v8752_v62 = vrot.slane %v8751_v25, 2  ;;  %v17675_v9 = vmax.f32 %v8727_v39, %v8783_v33  ;;  %v17679_v24 = vmax.f32 %v8748_v22, %v8804_v29  ;;  %12678 = vmatprep.subr.bf16.mxu0 %v13349_v4  ;;  %v13358_v19 = vld [vmem:[#allocation4 + $0x3b8] sm:$0xff]   ;;  %v13361_v2 = vld [vmem:[#allocation4 + $0x3f0] sm:$0xff]   ;;  %v8859_v60 = vpack.c.bf16 %v17576_v7, %v17576_v7  ;;  %v13365_v63 = vld [vmem:[#allocation4 + $0x3e8] sm:$0xff]  }
 0x71e   : > { %v17677_v56 = vmax.f32 %v8741_v32, %v8797_v11  ;;  %v8808_v55 = vrot.slane %v8807_v20, 2  ;;  %12659 = vmatpush3.bf16.msra.mxu1 %v13352_v16  ;;  %v13362_v12 = vld [vmem:[#allocation4 + $0x3b0] sm:$0xff]   ;;  %v13371_v39 = vld [vmem:[#allocation4 + $0x358] sm:$0xff]   ;;  %v13366_v52 = vld [vmem:[#allocation4 + $0x3a8] sm:$0xff]   ;;  %v8856_v16 = vpack.c.bf16 %v17532_v58, %v17532_v58  ;;  %v8858_v58 = vpack.c.bf16 %v17559_v40, %v17559_v40 }
 0x71f   : > { %v8753_v6 = vmax.f32 %v8751_v25, %v8752_v62  ;;  %12688 = vmatprep.subr.bf16.mxu1 %v13355_v46  ;;  %v13369_v25 = vld [vmem:[#allocation4 + $0x3e0] sm:$0xff]   ;;  %v13372_v33 = vld [vmem:[#allocation4 + $0x318] sm:$0xff]   ;;  %v13375_v7 = vld [vmem:[#allocation4 + $0x350] sm:$0xff]   ;;  %v8861_v46 = vpack.c.bf16 %v17587_v10, %v17587_v10 }
 0x720   : > { %v8809_v26 = vmax.f32 %v8807_v20, %v8808_v55  ;;  %12679 = vmatpush3.bf16.msra.mxu0 %v13350_v59  ;;  %v13370_v32 = vld [vmem:[#allocation4 + $0x3a0] sm:$0xff]   ;;  %v13373_v11 = vld [vmem:[#allocation4 + $0x3d8] sm:$0xff]   ;;  %v13376_v57 = vld [vmem:[#allocation4 + $0x310] sm:$0xff]  }
 0x721   : > { %v8754_v17 = vrot.slane %v8753_v6, 1  ;;  %11118 = vmatmul.mubr.bf16.vlgmr.msra.gmra.mxu1 %v8852_v8  ;;  %12680 = vmatprep.subr.bf16.mxu0 %v13353_v54  ;;  %v13379_v3 = vld [vmem:[#allocation4 + $0x348] sm:$0xff]   ;;  %v13374_v62 = vld [vmem:[#allocation4 + $0x398] sm:$0xff]   ;;  %v13377_v22 = vld [vmem:[#allocation4 + $0x3d0] sm:$0xff]   ;;  %v8863_v8 = vpack.c.bf16 %v17616_v36, %v17616_v36 }
 0x722   : > { %v8810_v15 = vrot.slane %v8809_v26, 1  ;;  %12689 = vmatpush3.bf16.msra.mxu1 %v13356_v53  ;;  %11197 = vmatprep.mubr.bf16.mxu1 %v8857_v50  ;;  %v13380_v29 = vld [vmem:[#allocation4 + $0x308] sm:$0xff]   ;;  %v13383_v27 = vld [vmem:[#allocation4 + $0x340] sm:$0xff]   ;;  %v13378_v61 = vld [vmem:[#allocation4 + $0x390] sm:$0xff]  }
 0x723   : > { %v8755_v31 = vmax.f32 %v8753_v6, %v8754_v17  ;;  %12690 = vmatprep.subr.bf16.mxu1 %v13359_v42  ;;  %v13381_v20 = vld [vmem:[#allocation4 + $0x3c8] sm:$0xff]   ;;  %v13384_v0 = vld [vmem:[#allocation4 + $0x300] sm:$0xff]   ;;  %v13387_v6 = vld [vmem:[#allocation4 + $0x478] sm:$0xff]  }
 0x724   : > { %v8811_v37 = vmax.f32 %v8809_v26, %v8810_v15  ;;  %12681 = vmatpush3.bf16.msra.mxu0 %v13354_v28  ;;  %v13382_v55 = vld [vmem:[#allocation4 + $0x388] sm:$0xff]   ;;  %v13385_v34 = vld [vmem:[#allocation4 + $0x3c0] sm:$0xff]   ;;  %v13388_v4 = vld [vmem:[#allocation4 + $0x438] sm:$0xff]  }
 0x725   : > { %12710 = vmatprep.subr.bf16.mxu0 %v13357_v38  ;;  %v13391_v17 = vld [vmem:[#allocation4 + $0x470] sm:$0xff]   ;;  %v13386_v26 = vld [vmem:[#allocation4 + $0x380] sm:$0xff]   ;;  %v13389_v15 = vld [vmem:[#allocation4 + $0x4f8] sm:$0xff]  }
 0x726   : > { %v17683_v51 = vmax.f32 %v8755_v31, %v8811_v37  ;;  %12691 = vmatpush3.bf16.msra.mxu1 %v13360_v43  ;;  %v13392_v59 = vld [vmem:[#allocation4 + $0x430] sm:$0xff]   ;;  %v13395_v54 = vld [vmem:[#allocation4 + $0x468] sm:$0xff]   ;;  %v13390_v53 = vld [vmem:[#allocation4 + $0x4b8] sm:$0xff]  }
 0x727   : > { %12692 = vmatprep.subr.bf16.mxu1 %v13363_v48  ;;  %11158 = vmatmul.mubr.bf16.vlgmr.msra.gmra.mxu0 %v8854_v41  ;;  %v13393_v31 = vld [vmem:[#allocation4 + $0x4f0] sm:$0xff]   ;;  %v13396_v37 = vld [vmem:[#allocation4 + $0x428] sm:$0xff]   ;;  %v13399_v10 = vld [vmem:[#allocation4 + $0x460] sm:$0xff]  }
 0x728   : > { %12711 = vmatpush3.bf16.msra.mxu0 %v13358_v19  ;;  %11237 = vmatprep.mubr.bf16.mxu0 %v8859_v60  ;;  %v13394_v42 = vld [vmem:[#allocation4 + $0x4b0] sm:$0xff]   ;;  %v13397_v28 = vld [vmem:[#allocation4 + $0x4e8] sm:$0xff]   ;;  %v13400_v50 = vld [vmem:[#allocation4 + $0x420] sm:$0xff]  }
 0x729   : > { %12712 = vmatprep.subr.bf16.mxu0 %v13361_v2  ;;  %v13403_v38 = vld [vmem:[#allocation4 + $0x458] sm:$0xff]   ;;  %v13398_v40 = vld [vmem:[#allocation4 + $0x4a8] sm:$0xff]   ;;  %v13401_v43 = vld [vmem:[#allocation4 + $0x4e0] sm:$0xff]  }
 0x72a   : > { %12693 = vmatpush3.bf16.msra.mxu1 %v13364_v45  ;;  %v13404_v48 = vld [vmem:[#allocation4 + $0x418] sm:$0xff]   ;;  %v13407_v36 = vld [vmem:[#allocation4 + $0x450] sm:$0xff]   ;;  %v13402_v19 = vld [vmem:[#allocation4 + $0x4a0] sm:$0xff]  }
 0x72b   : > { %12694 = vmatprep.subr.bf16.mxu1 %v13367_v18  ;;  %v13405_v41 = vld [vmem:[#allocation4 + $0x4d8] sm:$0xff]   ;;  %v13408_v2 = vld [vmem:[#allocation4 + $0x410] sm:$0xff]   ;;  %v13411_v45 = vld [vmem:[#allocation4 + $0x448] sm:$0xff]  }
 0x72c   : > { %12713 = vmatpush3.bf16.msra.mxu0 %v13362_v12  ;;  %v13406_v60 = vld [vmem:[#allocation4 + $0x498] sm:$0xff]   ;;  %v13409_v18 = vld [vmem:[#allocation4 + $0x4d0] sm:$0xff]   ;;  %v13412_v12 = vld [vmem:[#allocation4 + $0x408] sm:$0xff]  }
 0x72d   : > { %12714 = vmatprep.subr.bf16.mxu0 %v13365_v63  ;;  %v13415_v63 = vld [vmem:[#allocation4 + $0x440] sm:$0xff]  }
 0x72e   : > { %12695 = vmatpush3.bf16.msra.mxu1 %v13368_v35  ;;  %v13410_v35 = vld [vmem:[#allocation4 + $0x490] sm:$0xff]  }
 0x72f   : > { %12696 = vmatprep.subr.bf16.mxu1 %v13371_v39  ;;  %v13413_v39 = vld [vmem:[#allocation4 + $0x4c8] sm:$0xff]  }
 0x730   : > { %12715 = vmatpush3.bf16.msra.mxu0 %v13366_v52  ;;  %v13416_v52 = vld [vmem:[#allocation4 + $0x400] sm:$0xff]  }
 0x731   : > { %12716 = vmatprep.subr.bf16.mxu0 %v13369_v25  ;;  %v13419_v25 = vld [vmem:[#allocation4 + $0x578] sm:$0xff]  }
 0x732   : > { %12697 = vmatpush3.bf16.msra.mxu1 %v13372_v33  ;;  %v13414_v33 = vld [vmem:[#allocation4 + $0x488] sm:$0xff]  }
 0x733   : > { %12698 = vmatprep.subr.bf16.mxu1 %v13375_v7  ;;  %v13417_v7 = vld [vmem:[#allocation4 + $0x4c0] sm:$0xff]  }
 0x734   : > { %12717 = vmatpush3.bf16.msra.mxu0 %v13370_v32  ;;  %v13420_v32 = vld [vmem:[#allocation4 + $0x538] sm:$0xff]  }
 0x735   : > { %12718 = vmatprep.subr.bf16.mxu0 %v13373_v11  ;;  %v8860_v11 = vpack.c.bf16 %v17571_v49, %v17571_v49  ;;  %v8862_v49 = vpack.c.bf16 %v17597_v13, %v17597_v13  ;;  %v13430_v13 = vld [vmem:[#allocation4 + $0x5a8] sm:$0xff]  }
 0x736   : > { %12699 = vmatpush3.bf16.msra.mxu1 %v13376_v57  ;;  %v13423_v57 = vld [vmem:[#allocation4 + $0x570] sm:$0xff]  }
 0x737   : > { %12700 = vmatprep.subr.bf16.mxu1 %v13379_v3  ;;  %v13418_v3 = vld [vmem:[#allocation4 + $0x480] sm:$0xff]  }
 0x738   : > { %12719 = vmatpush3.bf16.msra.mxu0 %v13374_v62  ;;  %v8865_v62 = vpack.c.bf16 %v17621_v5, %v17621_v5  ;;  %v13431_v5 = vld [vmem:[#allocation4 + $0x560] sm:$0xff]  }
 0x739   : > { %12720 = vmatprep.subr.bf16.mxu0 %v13377_v22  ;;  %v13421_v22 = vld [vmem:[#allocation4 + $0x5f8] sm:$0xff]  }
 0x73a   : > { %12701 = vmatpush3.bf16.msra.mxu1 %v13380_v29  ;;  %v13424_v29 = vld [vmem:[#allocation4 + $0x530] sm:$0xff]  }
 0x73b   : > { %12702 = vmatprep.subr.bf16.mxu1 %v13383_v27  ;;  %v13427_v27 = vld [vmem:[#allocation4 + $0x568] sm:$0xff]  }
 0x73c   : > { %12721 = vmatpush3.bf16.msra.mxu0 %v13378_v61  ;;  %v13422_v61 = vld [vmem:[#allocation4 + $0x5b8] sm:$0xff]  }
 0x73d   : > { %12722 = vmatprep.subr.bf16.mxu0 %v13381_v20  ;;  %v13425_v20 = vld [vmem:[#allocation4 + $0x5f0] sm:$0xff]  }
 0x73e   : > { %12703 = vmatpush3.bf16.msra.mxu1 %v13384_v0  ;;  %v13428_v0 = vld [vmem:[#allocation4 + $0x528] sm:$0xff]  }
 0x73f   : > { %12732 = vmatprep.subr.bf16.mxu1 %v13387_v6  ;;  %v8867_v6 = vpack.c.bf16 %v17650_v30, %v17650_v30  ;;  %v13439_v30 = vld [vmem:[#allocation4 + $0x550] sm:$0xff]  }
 0x740   : > { %12723 = vmatpush3.bf16.msra.mxu0 %v13382_v55  ;;  %v13426_v55 = vld [vmem:[#allocation4 + $0x5b0] sm:$0xff]  }
 0x741   : > { %11198 = vmatmul.mubr.bf16.vlgmr.msra.gmra.mxu1 %v8856_v16  ;;  %12724 = vmatprep.subr.bf16.mxu0 %v13385_v34  ;;  %v13429_v34 = vld [vmem:[#allocation4 + $0x5e8] sm:$0xff]   ;;  %v13435_v16 = vld [vmem:[#allocation4 + $0x558] sm:$0xff]  }
 0x742   : > { %12733 = vmatpush3.bf16.msra.mxu1 %v13388_v4  ;;  %11277 = vmatprep.mubr.bf16.mxu1 %v8861_v46  ;;  %v13432_v4 = vld [vmem:[#allocation4 + $0x520] sm:$0xff]  }
 0x743   : > { %12734 = vmatprep.subr.bf16.mxu1 %v13391_v17  ;;  %v13433_v17 = vld [vmem:[#allocation4 + $0x5e0] sm:$0xff]  }
 0x744   : > { %12725 = vmatpush3.bf16.msra.mxu0 %v13386_v26  ;;  %v13436_v26 = vld [vmem:[#allocation4 + $0x518] sm:$0xff]   ;;  %v13434_v46 = vld [vmem:[#allocation4 + $0x5a0] sm:$0xff]  }
 0x745   : > { %12754 = vmatprep.subr.bf16.mxu0 %v13389_v15  ;;  %v13437_v15 = vld [vmem:[#allocation4 + $0x5d8] sm:$0xff]  }
 0x746   : > { %12735 = vmatpush3.bf16.msra.mxu1 %v13392_v59  ;;  %v13440_v59 = vld [vmem:[#allocation4 + $0x510] sm:$0xff]  }
 0x747   : > { %12736 = vmatprep.subr.bf16.mxu1 %v13395_v54  ;;  %11238 = vmatmul.mubr.bf16.vlgmr.msra.gmra.mxu0 %v8858_v58  ;;  %v13443_v54 = vld [vmem:[#allocation4 + $0x548] sm:$0xff]   ;;  %v13441_v58 = vld [vmem:[#allocation4 + $0x5d0] sm:$0xff]  }
 0x748   : > { %12755 = vmatpush3.bf16.msra.mxu0 %v13390_v53  ;;  %11317 = vmatprep.mubr.bf16.mxu0 %v8863_v8  ;;  %v13438_v53 = vld [vmem:[#allocation4 + $0x598] sm:$0xff]   ;;  %v13442_v8 = vld [vmem:[#allocation4 + $0x590] sm:$0xff]  }
 0x749   : > { %12756 = vmatprep.subr.bf16.mxu0 %v13393_v31  ;;  %v13444_v31 = vld [vmem:[#allocation4 + $0x508] sm:$0xff]  }
 0x74a   : > { %12737 = vmatpush3.bf16.msra.mxu1 %v13396_v37  ;;  %v13447_v37 = vld [vmem:[#allocation4 + $0x540] sm:$0xff]  }
 0x74b   : > { %12738 = vmatprep.subr.bf16.mxu1 %v13399_v10  ;;  %v13445_v10 = vld [vmem:[#allocation4 + $0x5c8] sm:$0xff]  }
 0x74c   : > { %12757 = vmatpush3.bf16.msra.mxu0 %v13394_v42  ;;  %v13448_v42 = vld [vmem:[#allocation4 + $0x500] sm:$0xff]  }
 0x74d   : > { %12758 = vmatprep.subr.bf16.mxu0 %v13397_v28  ;;  %v13451_v28 = vld [vmem:[#allocation4 + $0x678] sm:$0xff]  }
 0x74e   : > { %12739 = vmatpush3.bf16.msra.mxu1 %v13400_v50  ;;  %v13446_v50 = vld [vmem:[#allocation4 + $0x588] sm:$0xff]  }
 0x74f   : > { %12740 = vmatprep.subr.bf16.mxu1 %v13403_v38  ;;  %v13449_v38 = vld [vmem:[#allocation4 + $0x5c0] sm:$0xff]  }
 0x750   : > { %12759 = vmatpush3.bf16.msra.mxu0 %v13398_v40  ;;  %v13452_v40 = vld [vmem:[#allocation4 + $0x638] sm:$0xff]  }
 0x751   : > { %12760 = vmatprep.subr.bf16.mxu0 %v13401_v43  ;;  %v8864_v43 = vpack.c.bf16 %v17608_v14, %v17608_v14  ;;  %v8866_v14 = vpack.c.bf16 %v17633_v23, %v17633_v23  ;;  %v13462_v23 = vld [vmem:[#allocation4 + $0x6a8] sm:$0xff]  }
 0x752   : > { %12741 = vmatpush3.bf16.msra.mxu1 %v13404_v48  ;;  %v13455_v48 = vld [vmem:[#allocation4 + $0x670] sm:$0xff]  }
 0x753   : > { %12742 = vmatprep.subr.bf16.mxu1 %v13407_v36  ;;  %v13450_v36 = vld [vmem:[#allocation4 + $0x580] sm:$0xff]  }
 0x754   : > { %12761 = vmatpush3.bf16.msra.mxu0 %v13402_v19  ;;  %v8869_v19 = vpack.c.bf16 %v17653_v47, %v17653_v47  ;;  %v13463_v47 = vld [vmem:[#allocation4 + $0x660] sm:$0xff]  }
 0x755   : > { %12762 = vmatprep.subr.bf16.mxu0 %v13405_v41  ;;  %v13453_v41 = vld [vmem:[#allocation4 + $0x6f8] sm:$0xff]  }
 0x756   : > { %12743 = vmatpush3.bf16.msra.mxu1 %v13408_v2  ;;  %v13456_v2 = vld [vmem:[#allocation4 + $0x630] sm:$0xff]  }
 0x757   : > { %12744 = vmatprep.subr.bf16.mxu1 %v13411_v45  ;;  %v13459_v45 = vld [vmem:[#allocation4 + $0x668] sm:$0xff]  }
 0x758   : > { %12763 = vmatpush3.bf16.msra.mxu0 %v13406_v60  ;;  %v13454_v60 = vld [vmem:[#allocation4 + $0x6b8] sm:$0xff]  }
 0x759   : > { %12764 = vmatprep.subr.bf16.mxu0 %v13409_v18  ;;  %v13457_v18 = vld [vmem:[#allocation4 + $0x6f0] sm:$0xff]  }
 0x75a   : > { %12745 = vmatpush3.bf16.msra.mxu1 %v13412_v12  ;;  %v13460_v12 = vld [vmem:[#allocation4 + $0x628] sm:$0xff]  }
 0x75b   : > { %12746 = vmatprep.subr.bf16.mxu1 %v13415_v63  ;;  %v8871_v63 = vpack.c.bf16 %v17675_v9, %v17675_v9  ;;  %v13471_v9 = vld [vmem:[#allocation4 + $0x650] sm:$0xff]  }
 0x75c   : > { %12765 = vmatpush3.bf16.msra.mxu0 %v13410_v35  ;;  %v13458_v35 = vld [vmem:[#allocation4 + $0x6b0] sm:$0xff]  }
 0x75d   : > { %12766 = vmatprep.subr.bf16.mxu0 %v13413_v39  ;;  %v13461_v39 = vld [vmem:[#allocation4 + $0x6e8] sm:$0xff]  }
 0x75e   : > { %12747 = vmatpush3.bf16.msra.mxu1 %v13416_v52  ;;  %v13464_v52 = vld [vmem:[#allocation4 + $0x620] sm:$0xff]  }
 0x75f   : > { %12776 = vmatprep.subr.bf16.mxu1 %v13419_v25  ;;  %v13467_v25 = vld [vmem:[#allocation4 + $0x658] sm:$0xff]  }
 0x760   : > { %12767 = vmatpush3.bf16.msra.mxu0 %v13414_v33  ;;  %v13465_v33 = vld [vmem:[#allocation4 + $0x6e0] sm:$0xff]  }
 0x761   : > { %11278 = vmatmul.mubr.bf16.vlgmr.msra.gmra.mxu1 %v8860_v11  ;;  %12768 = vmatprep.subr.bf16.mxu0 %v13417_v7  ;;  %v13468_v7 = vld [vmem:[#allocation4 + $0x618] sm:$0xff]  }
 0x762   : > { %12777 = vmatpush3.bf16.msra.mxu1 %v13420_v32  ;;  %11357 = vmatprep.mubr.bf16.mxu1 %v8865_v62  ;;  %v13466_v32 = vld [vmem:[#allocation4 + $0x6a0] sm:$0xff]   ;;  %v13469_v11 = vld [vmem:[#allocation4 + $0x6d8] sm:$0xff]  }
 0x763   : > { %12778 = vmatprep.subr.bf16.mxu1 %v13423_v57  ;;  %v13472_v57 = vld [vmem:[#allocation4 + $0x610] sm:$0xff]   ;;  %v13470_v62 = vld [vmem:[#allocation4 + $0x698] sm:$0xff]  }
 0x764   : > { %12769 = vmatpush3.bf16.msra.mxu0 %v13418_v3  ;;  %v13475_v3 = vld [vmem:[#allocation4 + $0x648] sm:$0xff]  }
 0x765   : > { %12798 = vmatprep.subr.bf16.mxu0 %v13421_v22  ;;  %v13473_v22 = vld [vmem:[#allocation4 + $0x6d0] sm:$0xff]  }
 0x766   : > { %12779 = vmatpush3.bf16.msra.mxu1 %v13424_v29  ;;  %v13476_v29 = vld [vmem:[#allocation4 + $0x608] sm:$0xff]  }
 0x767   : > { %12780 = vmatprep.subr.bf16.mxu1 %v13427_v27  ;;  %11318 = vmatmul.mubr.bf16.vlgmr.msra.gmra.mxu0 %v8862_v49  ;;  %v13479_v27 = vld [vmem:[#allocation4 + $0x640] sm:$0xff]   ;;  %v13477_v49 = vld [vmem:[#allocation4 + $0x6c8] sm:$0xff]  }
 0x768   : > { %12799 = vmatpush3.bf16.msra.mxu0 %v13422_v61  ;;  %11397 = vmatprep.mubr.bf16.mxu0 %v8867_v6  ;;  %v13474_v61 = vld [vmem:[#allocation4 + $0x690] sm:$0xff]   ;;  %v13478_v6 = vld [vmem:[#allocation4 + $0x688] sm:$0xff]  }
 0x769   : > { %12800 = vmatprep.subr.bf16.mxu0 %v13425_v20  ;;  %v13480_v20 = vld [vmem:[#allocation4 + $0x600] sm:$0xff]  }
 0x76a   : > { %12781 = vmatpush3.bf16.msra.mxu1 %v13428_v0  ;;  %v13483_v0 = vld [vmem:[#allocation4 + $0x778] sm:$0xff]  }
 0x76b   : > { %12782 = vmatprep.subr.bf16.mxu1 %v13431_v5  ;;  %v13481_v5 = vld [vmem:[#allocation4 + $0x6c0] sm:$0xff]  }
 0x76c   : > { %12801 = vmatpush3.bf16.msra.mxu0 %v13426_v55  ;;  %v13484_v55 = vld [vmem:[#allocation4 + $0x738] sm:$0xff]  }
 0x76d   : > { %12802 = vmatprep.subr.bf16.mxu0 %v13429_v34  ;;  %v8868_v34 = vpack.c.bf16 %v17641_v44, %v17641_v44  ;;  %v13486_v44 = vld [vmem:[#allocation4 + $0x7b8] sm:$0xff]  }
 0x76e   : > { %12783 = vmatpush3.bf16.msra.mxu1 %v13432_v4  ;;  %v13487_v4 = vld [vmem:[#allocation4 + $0x770] sm:$0xff]  }
 0x76f   : > { %12784 = vmatprep.subr.bf16.mxu1 %v13435_v16 }
 0x770   : > { %12803 = vmatpush3.bf16.msra.mxu0 %v13430_v13  ;;  %v13482_v13 = vld [vmem:[#allocation4 + $0x680] sm:$0xff]  }
 0x771   : > { %12804 = vmatprep.subr.bf16.mxu0 %v13433_v17  ;;  %v8873_v17 = vpack.c.bf16 %v17677_v56, %v17677_v56  ;;  %v9388_v56 = vld [vmem:[%s17779_s9] sm:$0x1] }
 0x772   : > { %12785 = vmatpush3.bf16.msra.mxu1 %v13436_v26  ;;  %v13485_v26 = vld [vmem:[#allocation4 + $0x7f8] sm:$0xff]  }
 0x773   : > { %12786 = vmatprep.subr.bf16.mxu1 %v13439_v30 }
 0x774   : > { %12805 = vmatpush3.bf16.msra.mxu0 %v13434_v46  ;;  %v13488_v46 = vld [vmem:[#allocation4 + $0x730] sm:$0xff]  }
 0x775   : > { %12806 = vmatprep.subr.bf16.mxu0 %v13437_v15 }
 0x776   : > { %12787 = vmatpush3.bf16.msra.mxu1 %v13440_v59  ;;  %v13491_v59 = vld [vmem:[#allocation4 + $0x768] sm:$0xff]  }
 0x777   : > { %12788 = vmatprep.subr.bf16.mxu1 %v13443_v54 }
 0x778   : > { %12807 = vmatpush3.bf16.msra.mxu0 %v13438_v53  ;;  %v8870_v53 = vpack.c.bf16 %v17664_v1, %v17664_v1  ;;  %v13490_v1 = vld [vmem:[#allocation4 + $0x7b0] sm:$0xff]  }
 0x779   : > { %12808 = vmatprep.subr.bf16.mxu0 %v13441_v58  ;;  %v13489_v58 = vld [vmem:[#allocation4 + $0x7f0] sm:$0xff]  }
 0x77a   : > { %12789 = vmatpush3.bf16.msra.mxu1 %v13444_v31 }
 0x77b   : > { %12790 = vmatprep.subr.bf16.mxu1 %v13447_v37  ;;  %v13492_v37 = vld [vmem:[#allocation4 + $0x728] sm:$0xff]  }
 0x77c   : > { %12809 = vmatpush3.bf16.msra.mxu0 %v13442_v8  ;;  %v8875_v8 = vpack.c.bf16 %v17683_v51, %v17683_v51  ;;  %v13494_v51 = vld [vmem:[#allocation4 + $0x7a8] sm:$0xff]  }
 0x77d   : > { %12810 = vmatprep.subr.bf16.mxu0 %v13445_v10  ;;  %v13495_v10 = vld [vmem:[#allocation4 + $0x760] sm:$0xff]  }
 0x77e   : > { %12791 = vmatpush3.bf16.msra.mxu1 %v13448_v42 }
 0x77f   : > { %12820 = vmatprep.subr.bf16.mxu1 %v13451_v28 }
 0x780   : > { %12811 = vmatpush3.bf16.msra.mxu0 %v13446_v50 }
 0x781   : > { %11358 = vmatmul.mubr.bf16.vlgmr.msra.gmra.mxu1 %v8864_v43  ;;  %12812 = vmatprep.subr.bf16.mxu0 %v13449_v38  ;;  %v13493_v38 = vld [vmem:[#allocation4 + $0x7e8] sm:$0xff]  }
 0x782   : > { %12821 = vmatpush3.bf16.msra.mxu1 %v13452_v40  ;;  %11437 = vmatprep.mubr.bf16.mxu1 %v8869_v19  ;;  %v13496_v40 = vld [vmem:[#allocation4 + $0x720] sm:$0xff]  }
 0x783   : > { %12822 = vmatprep.subr.bf16.mxu1 %v13455_v48  ;;  %v13499_v48 = vld [vmem:[#allocation4 + $0x758] sm:$0xff]  }
 0x784   : > { %12813 = vmatpush3.bf16.msra.mxu0 %v13450_v36 }
 0x785   : > { %12842 = vmatprep.subr.bf16.mxu0 %v13453_v41 }
 0x786   : > { %12823 = vmatpush3.bf16.msra.mxu1 %v13456_v2  ;;  %v13497_v2 = vld [vmem:[#allocation4 + $0x7e0] sm:$0xff]  }
 0x787   : > { %12824 = vmatprep.subr.bf16.mxu1 %v13459_v45  ;;  %11398 = vmatmul.mubr.bf16.vlgmr.msra.gmra.mxu0 %v8866_v14  ;;  %v13500_v45 = vld [vmem:[#allocation4 + $0x718] sm:$0xff]   ;;  %v13498_v14 = vld [vmem:[#allocation4 + $0x7a0] sm:$0xff]  }
 0x788   : > { %12843 = vmatpush3.bf16.msra.mxu0 %v13454_v60  ;;  %11477 = vmatprep.mubr.bf16.mxu0 %v8871_v63  ;;  %v13503_v60 = vld [vmem:[#allocation4 + $0x750] sm:$0xff]   ;;  %v13507_v63 = vld [vmem:[#allocation4 + $0x748] sm:$0xff]  }
 0x789   : > { %12844 = vmatprep.subr.bf16.mxu0 %v13457_v18  ;;  %v13501_v18 = vld [vmem:[#allocation4 + $0x7d8] sm:$0xff]  }
 0x78a   : > { %12825 = vmatpush3.bf16.msra.mxu1 %v13460_v12  ;;  %v13504_v12 = vld [vmem:[#allocation4 + $0x710] sm:$0xff]  }
 0x78b   : > { %12826 = vmatprep.subr.bf16.mxu1 %v13463_v47  ;;  %v13502_v47 = vld [vmem:[#allocation4 + $0x798] sm:$0xff]  }
 0x78c   : > { %12845 = vmatpush3.bf16.msra.mxu0 %v13458_v35  ;;  %v13505_v35 = vld [vmem:[#allocation4 + $0x7d0] sm:$0xff]  }
 0x78d   : > { %12846 = vmatprep.subr.bf16.mxu0 %v13461_v39  ;;  %v13508_v39 = vld [vmem:[#allocation4 + $0x708] sm:$0xff]  }
 0x78e   : > { %12827 = vmatpush3.bf16.msra.mxu1 %v13464_v52  ;;  %v13511_v52 = vld [vmem:[#allocation4 + $0x740] sm:$0xff]  }
 0x78f   : > { %12828 = vmatprep.subr.bf16.mxu1 %v13467_v25  ;;  %v13506_v25 = vld [vmem:[#allocation4 + $0x790] sm:$0xff]  }
 0x790   : > { %12847 = vmatpush3.bf16.msra.mxu0 %v13462_v23  ;;  %v13509_v23 = vld [vmem:[#allocation4 + $0x7c8] sm:$0xff]  }
 0x791   : > { %12848 = vmatprep.subr.bf16.mxu0 %v13465_v33  ;;  %v13512_v33 = vld [vmem:[#allocation4 + $0x700] sm:$0xff]  }
 0x792   : > { %12829 = vmatpush3.bf16.msra.mxu1 %v13468_v7  ;;  %v13510_v7 = vld [vmem:[#allocation4 + $0x788] sm:$0xff]  }
 0x793   : > { %12830 = vmatprep.subr.bf16.mxu1 %v13471_v9  ;;  %v13513_v9 = vld [vmem:[#allocation4 + $0x7c0] sm:$0xff]  }
 0x794   : > { %12849 = vmatpush3.bf16.msra.mxu0 %v13466_v32  ;;  %v8872_v32 = vpack.c.bf16 %v17671_v21, %v17671_v21 }
 0x795   : > { %12850 = vmatprep.subr.bf16.mxu0 %v13469_v11 }
 0x796   : > { %12831 = vmatpush3.bf16.msra.mxu1 %v13472_v57  ;;  %v13514_v57 = vld [vmem:[#allocation4 + $0x780] sm:$0xff]  }
 0x797   : > { %12832 = vmatprep.subr.bf16.mxu1 %v13475_v3 }
 0x798   : > { %12851 = vmatpush3.bf16.msra.mxu0 %v13470_v62 }
 0x799   : > { %12852 = vmatprep.subr.bf16.mxu0 %v13473_v22 }
 0x79a   : > { %12833 = vmatpush3.bf16.msra.mxu1 %v13476_v29 }
 0x79b   : > { %12834 = vmatprep.subr.bf16.mxu1 %v13479_v27  ;;  %v8874_v27 = vpack.c.bf16 %v17679_v24, %v17679_v24 }
 0x79c   : > { %12853 = vmatpush3.bf16.msra.mxu0 %v13474_v61 }
 0x79d   : > { %12854 = vmatprep.subr.bf16.mxu0 %v13477_v49 }
 0x79e   : > { %12835 = vmatpush3.bf16.msra.mxu1 %v13480_v20 }
 0x79f   : > { %12864 = vmatprep.subr.bf16.mxu1 %v13483_v0 }
 0x7a0   : > { %v12572_v16 = vpop.f32.mrf.mxu1  ;;  %12855 = vmatpush3.bf16.msra.mxu0 %v13478_v6 }
 0x7a1   : > { %11438 = vmatmul.mubr.bf16.vlgmr.msra.gmra.mxu1 %v8868_v34  ;;  %12856 = vmatprep.subr.bf16.mxu0 %v13481_v5 }
 0x7a2   : > { %12865 = vmatpush3.bf16.msra.mxu1 %v13484_v55  ;;  %v12573_v30 = vpop.f32.mrf.mxu1  ;;  %11517 = vmatprep.mubr.bf16.mxu1 %v8873_v17 }
 0x7a3   : > { %v12574_v15 = vadd.f32 %v12573_v30, %v12572_v16  ;;  %12866 = vmatprep.subr.bf16.mxu1 %v13487_v4 }
 0x7a4   : > { %v12575_v54 = vpop.f32.mrf.mxu1  ;;  %12857 = vmatpush3.bf16.msra.mxu0 %v13482_v13 }
 0x7a5   : > { %12886 = vmatprep.subr.bf16.mxu0 %v13485_v26  ;;  %v10960_v28 = vadd.f32 %v12574_v15, %v9388_v56 }
 0x7a6   : > { %12867 = vmatpush3.bf16.msra.mxu1 %v13488_v46  ;;  %v12576_v31 = vpop.f32.mrf.mxu1  ;;  %v12594_v42 = vpop.f32.mrf.mxu0 }
 0x7a7   : > { %12868 = vmatprep.subr.bf16.mxu1 %v13491_v59  ;;  %11478 = vmatmul.mubr.bf16.vlgmr.msra.gmra.mxu0 %v8870_v53 }
 0x7a8   : > { %12887 = vmatpush3.bf16.msra.mxu0 %v13486_v44  ;;  %11557 = vmatprep.mubr.bf16.mxu0 %v8875_v8  ;;  %v12595_v50 = vpop.f32.mrf.mxu0 }
 0x7a9   : > { %12888 = vmatprep.subr.bf16.mxu0 %v13489_v58  ;;  %v12596_v43 = vadd.f32 %v12595_v50, %v12594_v42 }
 0x7aa   : > { %12869 = vmatpush3.bf16.msra.mxu1 %v13492_v37  ;;  %v12597_v36 = vpop.f32.mrf.mxu0 }
 0x7ab   : > { %12870 = vmatprep.subr.bf16.mxu1 %v13495_v10  ;;  %v11000_v19 = vadd.f32 %v12596_v43, %v10960_v28 }
 0x7ac   : > { %12889 = vmatpush3.bf16.msra.mxu0 %v13490_v1  ;;  %v12598_v41 = vpop.f32.mrf.mxu0 }
 0x7ad   : > { %12890 = vmatprep.subr.bf16.mxu0 %v13493_v38 }
 0x7ae   : > { %12871 = vmatpush3.bf16.msra.mxu1 %v13496_v40 }
 0x7af   : > { %12872 = vmatprep.subr.bf16.mxu1 %v13499_v48 }
 0x7b0   : > { %12891 = vmatpush3.bf16.msra.mxu0 %v13494_v51 }
 0x7b1   : > { %12892 = vmatprep.subr.bf16.mxu0 %v13497_v2 }
 0x7b2   : > { %12873 = vmatpush3.bf16.msra.mxu1 %v13500_v45 }
 0x7b3   : > { %12874 = vmatprep.subr.bf16.mxu1 %v13503_v60 }
 0x7b4   : > { %12893 = vmatpush3.bf16.msra.mxu0 %v13498_v14 }
 0x7b5   : > { %12894 = vmatprep.subr.bf16.mxu0 %v13501_v18 }
 0x7b6   : > { %12875 = vmatpush3.bf16.msra.mxu1 %v13504_v12 }
 0x7b7   : > { %12876 = vmatprep.subr.bf16.mxu1 %v13507_v63 }
 0x7b8   : > { %12895 = vmatpush3.bf16.msra.mxu0 %v13502_v47 }
 0x7b9   : > { %12896 = vmatprep.subr.bf16.mxu0 %v13505_v35 }
 0x7ba   : > { %12877 = vmatpush3.bf16.msra.mxu1 %v13508_v39 }
 0x7bb   : > { %12878 = vmatprep.subr.bf16.mxu1 %v13511_v52 }
 0x7bc   : > { %12897 = vmatpush3.bf16.msra.mxu0 %v13506_v25 }
 0x7bd   : > { %12898 = vmatprep.subr.bf16.mxu0 %v13509_v23 }
 0x7be   : > { %12879 = vmatpush3.bf16.msra.mxu1 %v13512_v33 }
 0x7c0   : > { %v12616_v11 = vpop.f32.mrf.mxu1  ;;  %12899 = vmatpush3.bf16.msra.mxu0 %v13510_v7 }
 0x7c1   : > { %11518 = vmatmul.mubr.bf16.vlgmr.msra.gmra.mxu1 %v8872_v32  ;;  %12900 = vmatprep.subr.bf16.mxu0 %v13513_v9 }
 0x7c2   : > { %v12617_v3 = vpop.f32.mrf.mxu1 }
 0x7c3   : > { %v12618_v62 = vadd.f32 %v12617_v3, %v12616_v11 }
 0x7c4   : > { %v12619_v22 = vpop.f32.mrf.mxu1  ;;  %12901 = vmatpush3.bf16.msra.mxu0 %v13514_v57 }
 0x7c5   : > { %v11040_v29 = vadd.f32 %v12618_v62, %v11000_v19 }
 0x7c6   : > { %v12620_v61 = vpop.f32.mrf.mxu1 }
 0x7c7   : > { %v12638_v49 = vpop.f32.mrf.mxu0  ;;  %11558 = vmatmul.mubr.bf16.vlgmr.msra.gmra.mxu0 %v8874_v27 }
 0x7c9   : > { %v12639_v20 = vpop.f32.mrf.mxu0 }
 0x7ca   : > { %v12640_v0 = vadd.f32 %v12639_v20, %v12638_v49 }
 0x7cb   : > { %v12641_v6 = vpop.f32.mrf.mxu0 }
 0x7cc   : > { %v11080_v21 = vadd.f32 %v12640_v0, %v11040_v29 }
 0x7cd   : > { %v12642_v5 = vpop.f32.mrf.mxu0 }
 0x7e1   : > { %v12660_v55 = vpop.f32.mrf.mxu1 }
 0x7e3   : > { %v12661_v34 = vpop.f32.mrf.mxu1 }
 0x7e4   : > { %v12662_v4 = vadd.f32 %v12661_v34, %v12660_v55 }
 0x7e5   : > { %v12663_v16 = vpop.f32.mrf.mxu1 }
 0x7e6   : > { %v11120_v13 = vadd.f32 %v12662_v4, %v11080_v21 }
 0x7e7   : > { %v12664_v17 = vpop.f32.mrf.mxu1  ;;  %v12682_v26 = vpop.f32.mrf.mxu0 }
 0x7e9   : > { %v12683_v30 = vpop.f32.mrf.mxu0 }
 0x7ea   : > { %v12684_v46 = vadd.f32 %v12683_v30, %v12682_v26 }
 0x7eb   : > { %v12685_v15 = vpop.f32.mrf.mxu0 }
 0x7ec   : > { %v11160_v59 = vadd.f32 %v12684_v46, %v11120_v13 }
 0x7ed   : > { %v12686_v24 = vpop.f32.mrf.mxu0 }
 0x801   : > { %v12704_v54 = vpop.f32.mrf.mxu1 }
 0x803   : > { %v12705_v44 = vpop.f32.mrf.mxu1 }
 0x804   : > { %v12706_v53 = vadd.f32 %v12705_v44, %v12704_v54 }
 0x805   : > { %v12707_v56 = vpop.f32.mrf.mxu1 }
 0x806   : > { %v11200_v58 = vadd.f32 %v12706_v53, %v11160_v59 }
 0x807   : > { %v12708_v31 = vpop.f32.mrf.mxu1  ;;  %v12726_v37 = vpop.f32.mrf.mxu0 }
 0x809   : > { %v12727_v8 = vpop.f32.mrf.mxu0 }
 0x80a   : > { %v12728_v10 = vadd.f32 %v12727_v8, %v12726_v37 }
 0x80b   : > { %v12729_v42 = vpop.f32.mrf.mxu0 }
 0x80c   : > { %v11240_v28 = vadd.f32 %v12728_v10, %v11200_v58 }
 0x80d   : > { %v12730_v1 = vpop.f32.mrf.mxu0 }
 0x821   : > { %v12748_v50 = vpop.f32.mrf.mxu1 }
 0x823   : > { %v12749_v38 = vpop.f32.mrf.mxu1 }
 0x824   : > { %v12750_v40 = vadd.f32 %v12749_v38, %v12748_v50 }
 0x825   : > { %v12751_v43 = vpop.f32.mrf.mxu1 }
 0x826   : > { %v11280_v48 = vadd.f32 %v12750_v40, %v11240_v28 }
 0x827   : > { %v12752_v36 = vpop.f32.mrf.mxu1  ;;  %v12770_v19 = vpop.f32.mrf.mxu0 }
 0x829   : > { %v12771_v51 = vpop.f32.mrf.mxu0 }
 0x82a   : > { %v12772_v41 = vadd.f32 %v12771_v51, %v12770_v19 }
 0x82b   : > { %v12773_v2 = vpop.f32.mrf.mxu0 }
 0x82c   : > { %v11320_v45 = vadd.f32 %v12772_v41, %v11280_v48 }
 0x82d   : > { %v12774_v60 = vpop.f32.mrf.mxu0 }
 0x841   : > { %v12792_v14 = vpop.f32.mrf.mxu1 }
 0x843   : > { %v12793_v18 = vpop.f32.mrf.mxu1 }
 0x844   : > { %v12794_v3 = vadd.f32 %v12793_v18, %v12792_v14 }
 0x845   : > { %v12795_v12 = vpop.f32.mrf.mxu1 }
 0x846   : > { %v11360_v62 = vadd.f32 %v12794_v3, %v11320_v45 }
 0x847   : > { %v12796_v63 = vpop.f32.mrf.mxu1  ;;  %v12814_v47 = vpop.f32.mrf.mxu0 }
 0x849   : > { %v12815_v35 = vpop.f32.mrf.mxu0 }
 0x84a   : > { %v12816_v22 = vadd.f32 %v12815_v35, %v12814_v47 }
 0x84b   : > { %v12817_v39 = vpop.f32.mrf.mxu0 }
 0x84c   : > { %v11400_v27 = vadd.f32 %v12816_v22, %v11360_v62 }
 0x84d   : > { %v12818_v52 = vpop.f32.mrf.mxu0 }
 0x861   : > { %v12836_v25 = vpop.f32.mrf.mxu1 }
 0x863   : > { %v12837_v23 = vpop.f32.mrf.mxu1 }
 0x864   : > { %v12838_v29 = vadd.f32 %v12837_v23, %v12836_v25 }
 0x865   : > { %v12839_v33 = vpop.f32.mrf.mxu1 }
 0x866   : > { %v11440_v49 = vadd.f32 %v12838_v29, %v11400_v27 }
 0x867   : > { %v12840_v7 = vpop.f32.mrf.mxu1  ;;  %v12858_v9 = vpop.f32.mrf.mxu0 }
 0x869   : > { %v12859_v32 = vpop.f32.mrf.mxu0 }
 0x86a   : > { %v12860_v20 = vadd.f32 %v12859_v32, %v12858_v9 }
 0x86b   : > { %v12861_v11 = vpop.f32.mrf.mxu0 }
 0x86c   : > { %v11480_v5 = vadd.f32 %v12860_v20, %v11440_v49 }
 0x86d   : > { %v12862_v57 = vpop.f32.mrf.mxu0 }
 0x881   : > { %v12880_v61 = vpop.f32.mrf.mxu1 }
 0x883   : > { %v12881_v0 = vpop.f32.mrf.mxu1 }
 0x884   : > { %v12882_v6 = vadd.f32 %v12881_v0, %v12880_v61 }
 0x885   : > { %v12883_v21 = vpop.f32.mrf.mxu1 }
 0x886   : > { %v11520_v4 = vadd.f32 %v12882_v6, %v11480_v5 }
 0x887   : > { %v12884_v55 = vpop.f32.mrf.mxu1  ;;  %v12902_v34 = vpop.f32.mrf.mxu0 }
 0x889   : > { %v12903_v16 = vpop.f32.mrf.mxu0 }
 0x88a   : > { %v12904_v13 = vadd.f32 %v12903_v16, %v12902_v34 }
 0x88b   : > { %v12905_v17 = vpop.f32.mrf.mxu0 }
 0x88c   : > { %v11560_v26 = vadd.f32 %v12904_v13, %v11520_v4 }
 0x88d   : > { %v12906_v30 = vpop.f32.mrf.mxu0 }
 0x88e   : > { %11565 = vst [vmem:[%s366_s25] sm:$0x1] %v11560_v26 }
 0x88f   : > { %13591 = shalt.err (!%p13588_p0)
}
 0x890   : > { %s13592_s11 = scalar_lea.hbm %s17735_s21, 16  ;;  %s13596_s18 = scalar_lea.hbm %s17780_s10, 32 }
 0x891   : > { %p13593_p1 = scmp.ne.s32.totalorder %s17735_s21, %s13592_s11  ;;  %p13597_p4 = scmp.lt.s32.totalorder %s17735_s21, %s17780_s10 }
 0x892   : > { %p13598_p7 = scmp.lt.s32.totalorder %s13596_s18, %s13592_s11 }
 0x893   : > { %p13594_p2 = pnand %p13593_p1, %p13745_p5 }
 0x894   : > { %p13599_p8 = por %p13598_p7, %p13597_p4 }
 0x895   : > { %p13595_p3 = pneg %p13594_p2 }
 0x897   : > { %p13600_p6 = pnand %p13599_p8, %p13595_p3 }
 0x899   : > { %13603 = shalt.err (!%p13600_p6)
}
 0x89a   : > { %12953 = dma.vmem_to_hbm [thread:$0]  (%p13745_p5), %s11580_s12, 16, %s17735_s21, %s11567_s26  }
 0x89b PF: > { %p12965_p9 = scmp.ge.s32.totalorder %s13642_s16, 2  ;;  %s11591_s27 = sand.u32 1, %s13630_s13  }
 0x89c   : > { %p17921_p10 = scmp.ne.s32.totalorder %s17817_s24, 0  ;;  %s11592_s28 = scalar_lea.sflag [#allocation6], %s11591_s27 }
 0x89e   : > { %p12960_p11 = pnand %p12965_p9, %p17921_p10 }
 0x8a0   : > { %p12961_p12 = pneg %p12960_p11 }
 0x8a2   : > { %13625 = dma.done.wait (%p12961_p12), %s11592_s28, 16  }
 0x8a3   : > { %13627 = vsyncadd (%p12961_p12), %s11592_s28, 4294967280  ;;  %p21_p13 = scmp.ge.s32.totalorder %s13732_s19, 4   ;;  %s17922_s13 = smov %s13634_s14 }
 0x8a4   : > { %s17923_s14 = smov %s13638_s15  ;;  %s17924_s15 = smov %s13743_s22 }
 0x8a5   : > { %s17925_s16 = smov %s13732_s19  ;;  %23 = sbr.rel (!%p21_p13) target bundleno = 4 (0x4), region = 106 }
 0x8aa   :  { %11596 = vsyncpa [#allocation5], 1 }
 0x8ab   :  { %11598 = vsyncpa [#allocation5 + $0x1], 1 }
 0x8ac   :  { %11599 = vsyncpa [#allocation6], 1 }
 0x8ad   :  { %11601 = vsyncpa [#allocation6 + $0x1], 1 }

</bundles_post_ra>
